<compile_context>
chip_gen: v7x
topology: tpu7x:2x2x1
jax: 0.10.0
libtpu: 0.0.40
codegen_flags: <defaults>
</compile_context>

<pallas_src>
import functools

import jax
import jax.numpy as jnp
from jax.experimental import pallas as pl
from jax.experimental.pallas import tpu as pltpu


def _attention_kernel(enc_ref, att2_ref, we_ref, be_ref, wf_ref, awe_ref, alpha_ref,
                      *, num_valid_pixels):
    """One grid step handles TB batch elements.

    Ref shapes (VMEM tiles):
      enc_ref   : (TB, Pp, E) bf16/f32 -- Pp = pixel axis padded to a multiple of 128
      att2_ref  : (TB, A)  f32 -- pre-projected decoder hidden state
      we_ref    : (E, A)   matmul dtype     be_ref : (1, A) f32
      wf_ref    : (1, A)   f32 -- full_att weight as a lane row (b_full dropped: softmax-invariant)
      awe_ref   : (TB, E)  f32
      alpha_ref : (TB, Pp) f32
    """
    tb, pp, e = enc_ref.shape
    a = we_ref.shape[1]

    enc = enc_ref[...]                                   # (TB, Pp, E)
    # Pp is a multiple of 128 (>= the (16,128)/(8,128) tile), so merging the two leading dims
    # is layout-preserving -- no relayout copy of the encoder tile.
    enc2d = enc.reshape(tb * pp, e)

    # att1 = encoder_att(encoder_out): one (TB*Pp, E) @ (E, A) bf16 MXU matmul per step,
    # accumulated in f32.
    att1 = jnp.dot(enc2d, we_ref[...], preferred_element_type=jnp.float32)
    att1 = att1.reshape(tb, pp, a)

    # att = relu(att1 + b_enc + att2.unsqueeze(1))   (f32 VPU math)
    att = jnp.maximum(att1 + be_ref[...] + att2_ref[...][:, None, :], jnp.float32(0.0))

    # scores = full_att(att).squeeze(2): VPU multiply + lane reduction over A.
    # (b_full omitted on purpose -- a constant logit shift cancels in the softmax.)
    score = jnp.sum(att * wf_ref[...], axis=-1)                         # (TB, Pp) f32

    # Mask the padded pixel columns so they receive zero attention mass.
    if num_valid_pixels < pp:
        col = jax.lax.broadcasted_iota(jnp.int32, (tb, pp), 1)
        score = jnp.where(col < num_valid_pixels, score, -jnp.inf)

    # softmax over the pixel axis (Pp on lanes -> alpha already in row layout)
    m = jnp.max(score, axis=-1, keepdims=True)                          # (TB, 1)
    ex = jnp.exp(score - m)                                             # (TB, Pp)
    denom = jnp.sum(ex, axis=-1, keepdims=True)                         # (TB, 1)
    alpha = ex * pl.reciprocal(denom, approx=True)                      # (TB, Pp)

    # attention_weighted_encoding: VPU multiply + cross-sublane (XLU) reduction over Pp.
    # (An M=1 MXU matmul per batch element would waste 255/256 MXU rows.)
    awe = jnp.sum(alpha[:, :, None] * enc.astype(jnp.float32), axis=1)  # (TB, E)

    awe_ref[...] = awe.astype(awe_ref.dtype)
    alpha_ref[...] = alpha.astype(alpha_ref.dtype)


def _vmem_capacity_bytes():
    try:
        cap = int(getattr(pltpu.get_tpu_info(), "vmem_capacity_bytes", 0))
        if cap > 0:
            return cap
    except Exception:
        pass
    return 64 * 1024 * 1024   # conservative default (v7x per-TensorCore VMEM)


def _vmem_footprint(tb, pp, e, a, enc_itemsize, weight_buffers=2):
    """Rough peak-VMEM estimate for one grid step (bytes)."""
    enc_in   = 2 * tb * pp * e * enc_itemsize            # double-buffered encoder tile
    att2_in  = 2 * tb * a * 4                            # double-buffered decoder projection tile
    weights  = weight_buffers * (e * a * enc_itemsize + 2 * a * 4)
    att_f32  = tb * pp * a * 4                           # relu/att intermediate
    prod_f32 = tb * pp * e * 4                           # alpha * enc product before the reduce
    outs     = 2 * (tb * e * 4 + tb * pp * 4)            # double-buffered outputs
    return enc_in + att2_in + weights + att_f32 + prod_f32 + outs


def _pick_batch_tile(b, pp, e, a, enc_itemsize, budget):
    """Largest sublane-aligned batch tile whose footprint fits the VMEM budget."""
    cands = [t for t in range(min(b, 512), 0, -1)
             if b % t == 0 and (t % 8 == 0 or t == b)]
    if not cands:
        cands = [b]
    # Keep at least 2 grid steps when the batch allows it so both v7x TensorCores get work
    # under dimension_semantics=("parallel",); costs ~nothing on 1-TC chips.
    multi = [t for t in cands if t <= b // 2]
    if b >= 16 and multi:
        cands = multi
    for t in cands:
        if _vmem_footprint(t, pp, e, a, enc_itemsize) <= budget:
            return t
    return cands[-1]


def attention_forward(encoder_out, decoder_hidden, params, *, batch_tile=None,
                      matmul_dtype=jnp.bfloat16):
    """encoder_out: (B, P, E); decoder_hidden: (B, D).
    Returns (attention_weighted_encoding (B, E) f32, alpha (B, P) f32)."""
    B, P, E = encoder_out.shape
    A = params["W_enc"].shape[1]

    # ---- wrapper-side layout prep -------------------------------------------------------
    Pp = ((P + 127) // 128) * 128                      # lane-dense, layout-preserving merge
    enc = encoder_out.astype(matmul_dtype)
    if Pp != P:
        enc = jnp.pad(enc, ((0, 0), (0, Pp - P), (0, 0)))

    we = params["W_enc"].astype(matmul_dtype)                  # (E, A) MXU operand
    be = params["b_enc"].reshape(1, A).astype(jnp.float32)     # (1, A)
    wf = params["W_full"].reshape(1, A).astype(jnp.float32)    # (1, A) lane row
    # b_full is intentionally not passed to the kernel (softmax-invariant constant).

    # Hoisted decoder projection: a tiny (B, D) @ (D, A) matmul -- plain XLA, no extra
    # kernel launch or HBM round-trip through a second pallas_call.
    att2 = (decoder_hidden.astype(jnp.float32) @ params["W_dec"].astype(jnp.float32)
            + params["b_dec"].astype(jnp.float32))             # (B, A) f32

    # ---- VMEM-budget-driven batch tile --------------------------------------------------
    itemsize = jnp.dtype(matmul_dtype).itemsize
    vmem_cap = _vmem_capacity_bytes()
    TB = batch_tile or _pick_batch_tile(B, Pp, E, A, itemsize, budget=int(0.65 * vmem_cap))
    assert B % TB == 0, f"batch {B} must be divisible by batch tile {TB}"
    footprint = _vmem_footprint(TB, Pp, E, A, itemsize)
    vmem_limit = int(min(0.92 * vmem_cap, max(32 * 1024 * 1024, 1.5 * footprint)))

    def build(single_buffer_consts):
        const_kw = dict(pipeline_mode=pl.Buffered(1)) if single_buffer_consts else {}
        grid_spec = pltpu.PrefetchScalarGridSpec(
            num_scalar_prefetch=0,
            grid=(B // TB,),
            in_specs=[
                pl.BlockSpec((TB, Pp, E), lambda b: (b, 0, 0)),        # encoder_out (matmul dtype)
                pl.BlockSpec((TB, A),     lambda b: (b, 0)),           # pre-projected att2 (f32)
                pl.BlockSpec((E, A),      lambda b: (0, 0), **const_kw),  # W_enc (reused each step)
                pl.BlockSpec((1, A),      lambda b: (0, 0), **const_kw),  # b_enc
                pl.BlockSpec((1, A),      lambda b: (0, 0), **const_kw),  # W_full row
            ],
            out_specs=[
                pl.BlockSpec((TB, E),  lambda b: (b, 0)),              # attention_weighted_encoding
                pl.BlockSpec((TB, Pp), lambda b: (b, 0)),              # alpha (padded pixel axis)
            ],
        )
        return pl.pallas_call(
            functools.partial(_attention_kernel, num_valid_pixels=P),
            out_shape=(jax.ShapeDtypeStruct((B, E), jnp.float32),
                       jax.ShapeDtypeStruct((B, Pp), jnp.float32)),
            grid_spec=grid_spec,
            compiler_params=pltpu.CompilerParams(
                dimension_semantics=("parallel",),
                vmem_limit_bytes=vmem_limit),
        )

    try:
        # Constant operands single-buffered (recovers a full W_enc copy of VMEM).
        awe, alpha_pad = build(single_buffer_consts=True)(enc, att2, we, be, wf)
    except Exception:
        # Fallback for jax versions whose TPU pipeline rejects Buffered(1).
        awe, alpha_pad = build(single_buffer_consts=False)(enc, att2, we, be, wf)

    return awe, alpha_pad[:, :P]


def _reference_forward(encoder_out, decoder_hidden, params, matmul_dtype=None):
    """Pure-JAX reference matching the PyTorch forward semantics (b_full included).
    If matmul_dtype is given, the encoder matmul operands are cast the same way the kernel
    casts them (f32 accumulation), for a numerically matched comparison."""
    enc = encoder_out
    we = params["W_enc"]
    if matmul_dtype is not None:
        enc = enc.astype(matmul_dtype)
        we = we.astype(matmul_dtype)
    att1 = jnp.dot(enc, we, preferred_element_type=jnp.float32) + params["b_enc"]   # (B, P, A)
    att2 = decoder_hidden @ params["W_dec"] + params["b_dec"]                       # (B, A)
    att = jax.nn.relu(att1 + att2[:, None, :])                                      # (B, P, A)
    scores = jnp.sum(att * params["W_full"], axis=-1) + params["b_full"]            # (B, P)
    alpha = jax.nn.softmax(scores, axis=1)                                          # (B, P)
    awe = jnp.einsum("bp,bpe->be", alpha, enc.astype(jnp.float32))                  # (B, E)
    return awe, alpha


def _init_params(key, encoder_dim, decoder_dim, attention_dim):
    """Deterministic, PyTorch-Linear-style uniform init (synthetic weights)."""
    k = jax.random.split(key, 6)

    def u(kk, shape, fan_in):
        bound = 1.0 / jnp.sqrt(fan_in)
        return jax.random.uniform(kk, shape, jnp.float32, -bound, bound)

    return {
        "W_enc":  u(k[0], (encoder_dim, attention_dim), encoder_dim),
        "b_enc":  u(k[1], (attention_dim,), encoder_dim),
        "W_dec":  u(k[2], (decoder_dim, attention_dim), decoder_dim),
        "b_dec":  u(k[3], (attention_dim,), decoder_dim),
        "W_full": u(k[4], (attention_dim,), attention_dim),
        "b_full": u(k[5], (1,), attention_dim),
    }


if __name__ == "__main__":
    B, P = 16, 16            # batch, num_pixels (pixel axis padded to 128 inside the wrapper)
    E, D, A = 32, 24, 40     # encoder_dim, decoder_dim, attention_dim

    key = jax.random.PRNGKey(0)
    k_enc, k_hid, k_par = jax.random.split(key, 3)

    encoder_out = jax.random.normal(k_enc, (B, P, E), jnp.float32)
    decoder_hidden = jax.random.normal(k_hid, (B, D), jnp.float32)
    params = _init_params(k_par, E, D, A)

    awe, alpha = attention_forward(encoder_out, decoder_hidden, params)
    awe = jax.block_until_ready(awe)
    alpha = jax.block_until_ready(alpha)
    assert awe.shape == (B, E) and alpha.shape == (B, P)

    # Reference with the same bf16 matmul operands (tight tolerance) ...
    awe_m, alpha_m = _reference_forward(encoder_out, decoder_hidden, params,
                                        matmul_dtype=jnp.bfloat16)
    assert jnp.allclose(alpha, alpha_m, atol=5e-3, rtol=5e-3), (
        float(jnp.max(jnp.abs(alpha - alpha_m))))
    assert jnp.allclose(awe, awe_m, atol=5e-3, rtol=5e-3), (
        float(jnp.max(jnp.abs(awe - awe_m))))

    # ... and the exact f32 module semantics (looser tolerance for the bf16 MXU operands).
    awe_f, alpha_f = _reference_forward(encoder_out, decoder_hidden, params)
    assert jnp.allclose(alpha, alpha_f, atol=3e-2, rtol=3e-2), (
        float(jnp.max(jnp.abs(alpha - alpha_f))))
    assert jnp.allclose(awe, awe_f, atol=3e-2, rtol=3e-2), (
        float(jnp.max(jnp.abs(awe - awe_f))))
    assert jnp.allclose(jnp.sum(alpha, axis=1), 1.0, atol=1e-2)

    print("KERNEL_OK")
</pallas_src>

<mosaic_0001>
module attributes {stable_mosaic.version = 11 : i64} {
  func.func @_attention_kernel(%arg0: i32, %arg1: memref<8x128x32xbf16, #tpu.memory_space<vmem>>, %arg2: memref<8x40xf32, #tpu.memory_space<vmem>>, %arg3: memref<32x40xbf16, #tpu.memory_space<vmem>>, %arg4: memref<1x40xf32, #tpu.memory_space<vmem>>, %arg5: memref<1x40xf32, #tpu.memory_space<vmem>>, %arg6: memref<8x32xf32, #tpu.memory_space<vmem>>, %arg7: memref<8x128xf32, #tpu.memory_space<vmem>>) attributes {dimension_semantics = [#tpu.dimension_semantics<parallel>], iteration_bounds = array<i64: 2>, scalar_prefetch = 0 : i64, scratch_operands = 0 : i64, tpu.core_type = #tpu.core_type<tc>, window_params = [{transform_indices = @transform_0, window_bounds = array<i64: 8, 128, 32>}, {transform_indices = @transform_1, window_bounds = array<i64: 8, 40>}, {pipeline_mode = #tpu.pipeline_mode<synchronous>, transform_indices = @transform_2, window_bounds = array<i64: 32, 40>}, {pipeline_mode = #tpu.pipeline_mode<synchronous>, transform_indices = @transform_3, window_bounds = array<i64: 1, 40>}, {pipeline_mode = #tpu.pipeline_mode<synchronous>, transform_indices = @transform_4, window_bounds = array<i64: 1, 40>}, {transform_indices = @transform_5, window_bounds = array<i64: 8, 32>}, {transform_indices = @transform_6, window_bounds = array<i64: 8, 128>}]} {
    %c0 = arith.constant 0 : index
    %c0_0 = arith.constant 0 : index
    %c0_1 = arith.constant 0 : index
    %0 = vector.load %arg1[%c0, %c0_0, %c0_1] : memref<8x128x32xbf16, #tpu.memory_space<vmem>>, vector<8x128x32xbf16>
    %1 = vector.shape_cast %0 : vector<8x128x32xbf16> to vector<1024x32xbf16>
    %c0_2 = arith.constant 0 : index
    %c0_3 = arith.constant 0 : index
    %2 = vector.load %arg3[%c0_2, %c0_3] : memref<32x40xbf16, #tpu.memory_space<vmem>>, vector<32x40xbf16>
    %cst = arith.constant dense<0.000000e+00> : vector<1024x40xf32>
    %3 = tpu.matmul %1, %2, %cst {dimension_numbers = #tpu.dot_dimension_numbers<[1], [0], [0], [1], [0, 0, 1, 1], [], []>} : vector<1024x32xbf16>, vector<32x40xbf16>, vector<1024x40xf32> -> vector<1024x40xf32>
    %4 = vector.shape_cast %3 : vector<1024x40xf32> to vector<8x128x40xf32>
    %c0_4 = arith.constant 0 : index
    %c0_5 = arith.constant 0 : index
    %5 = vector.load %arg4[%c0_4, %c0_5] : memref<1x40xf32, #tpu.memory_space<vmem>>, vector<1x40xf32>
    %6 = vector.shape_cast %5 : vector<1x40xf32> to vector<1x1x40xf32>
    %7 = vector.broadcast %6 : vector<1x1x40xf32> to vector<8x128x40xf32>
    %8 = arith.addf %4, %7 : vector<8x128x40xf32>
    %c0_6 = arith.constant 0 : index
    %c0_7 = arith.constant 0 : index
    %9 = vector.load %arg2[%c0_6, %c0_7] : memref<8x40xf32, #tpu.memory_space<vmem>>, vector<8x40xf32>
    %10 = vector.shape_cast %9 : vector<8x40xf32> to vector<8x1x40xf32>
    %11 = vector.broadcast %10 : vector<8x1x40xf32> to vector<8x128x40xf32>
    %12 = arith.addf %8, %11 : vector<8x128x40xf32>
    %cst_8 = arith.constant 0.000000e+00 : f32
    %13 = vector.broadcast %cst_8 : f32 to vector<8x128x40xf32>
    %14 = arith.maximumf %12, %13 : vector<8x128x40xf32>
    %c0_9 = arith.constant 0 : index
    %c0_10 = arith.constant 0 : index
    %15 = vector.load %arg5[%c0_9, %c0_10] : memref<1x40xf32, #tpu.memory_space<vmem>>, vector<1x40xf32>
    %16 = vector.shape_cast %15 : vector<1x40xf32> to vector<1x1x40xf32>
    %17 = vector.broadcast %16 : vector<1x1x40xf32> to vector<8x128x40xf32>
    %18 = arith.mulf %14, %17 : vector<8x128x40xf32>
    %cst_11 = arith.constant dense<0.000000e+00> : vector<8x128xf32>
    %19 = vector.multi_reduction <add>, %18, %cst_11 [2] : vector<8x128x40xf32> to vector<8x128xf32>
    %20 = tpu.iota {dimensions = array<i32: 1>} : vector<8x128xi32>
    %c16_i32 = arith.constant 16 : i32
    %21 = vector.broadcast %c16_i32 : i32 to vector<8x128xi32>
    %22 = arith.cmpi slt, %20, %21 : vector<8x128xi32>
    %cst_12 = arith.constant 0xFF800000 : f32
    %23 = vector.broadcast %cst_12 : f32 to vector<8x128xf32>
    %24 = arith.select %22, %19, %23 : vector<8x128xi1>, vector<8x128xf32>
    %cst_13 = arith.constant dense<0xFF800000> : vector<8xf32>
    %25 = vector.multi_reduction <maximumf>, %24, %cst_13 [1] : vector<8x128xf32> to vector<8xf32>
    %26 = vector.shape_cast %25 : vector<8xf32> to vector<8x1xf32>
    %27 = vector.broadcast %26 : vector<8x1xf32> to vector<8x128xf32>
    %28 = arith.subf %24, %27 : vector<8x128xf32>
    %29 = math.exp %28 : vector<8x128xf32>
    %cst_14 = arith.constant dense<0.000000e+00> : vector<8xf32>
    %30 = vector.multi_reduction <add>, %29, %cst_14 [1] : vector<8x128xf32> to vector<8xf32>
    %31 = vector.shape_cast %30 : vector<8xf32> to vector<8x1xf32>
    %32 = tpu.reciprocal %31 {approx = true} : vector<8x1xf32> -> vector<8x1xf32>
    %33 = vector.broadcast %32 : vector<8x1xf32> to vector<8x128xf32>
    %34 = arith.mulf %29, %33 : vector<8x128xf32>
    %35 = vector.shape_cast %34 : vector<8x128xf32> to vector<8x128x1xf32>
    %36 = arith.extf %0 : vector<8x128x32xbf16> to vector<8x128x32xf32>
    %37 = vector.broadcast %35 : vector<8x128x1xf32> to vector<8x128x32xf32>
    %38 = arith.mulf %37, %36 : vector<8x128x32xf32>
    %cst_15 = arith.constant dense<0.000000e+00> : vector<8x32xf32>
    %39 = vector.multi_reduction <add>, %38, %cst_15 [1] : vector<8x128x32xf32> to vector<8x32xf32>
    %c0_16 = arith.constant 0 : index
    %c0_17 = arith.constant 0 : index
    %40 = vector.load %arg6[%c0_16, %c0_17] : memref<8x32xf32, #tpu.memory_space<vmem>>, vector<8x32xf32>
    tpu.vector_store %arg6[%c0_16, %c0_17], %39 {strides = array<i32>} : memref<8x32xf32, #tpu.memory_space<vmem>>, vector<8x32xf32>,
    %c0_18 = arith.constant 0 : index
    %c0_19 = arith.constant 0 : index
    %41 = vector.load %arg7[%c0_18, %c0_19] : memref<8x128xf32, #tpu.memory_space<vmem>>, vector<8x128xf32>
    tpu.vector_store %arg7[%c0_18, %c0_19], %34 {strides = array<i32>} : memref<8x128xf32, #tpu.memory_space<vmem>>, vector<8x128xf32>,
    return
  }
  func.func @transform_0(%arg0: i32) -> (i32, i32, i32) {
    %c0_i32 = arith.constant 0 : i32
    %c0_i32_0 = arith.constant 0 : i32
    %c0_i32_1 = arith.constant 0 : i32
    return %arg0, %c0_i32, %c0_i32_0 : i32, i32, i32
  }
  func.func @transform_1(%arg0: i32) -> (i32, i32) {
    %c0_i32 = arith.constant 0 : i32
    %c0_i32_0 = arith.constant 0 : i32
    return %arg0, %c0_i32 : i32, i32
  }
  func.func @transform_2(%arg0: i32) -> (i32, i32) {
    %c0_i32 = arith.constant 0 : i32
    %c0_i32_0 = arith.constant 0 : i32
    %c0_i32_1 = arith.constant 0 : i32
    return %c0_i32, %c0_i32_0 : i32, i32
  }
  func.func @transform_3(%arg0: i32) -> (i32, i32) {
    %c0_i32 = arith.constant 0 : i32
    %c0_i32_0 = arith.constant 0 : i32
    %c0_i32_1 = arith.constant 0 : i32
    return %c0_i32, %c0_i32_0 : i32, i32
  }
  func.func @transform_4(%arg0: i32) -> (i32, i32) {
    %c0_i32 = arith.constant 0 : i32
    %c0_i32_0 = arith.constant 0 : i32
    %c0_i32_1 = arith.constant 0 : i32
    return %c0_i32, %c0_i32_0 : i32, i32
  }
  func.func @transform_5(%arg0: i32) -> (i32, i32) {
    %c0_i32 = arith.constant 0 : i32
    %c0_i32_0 = arith.constant 0 : i32
    return %arg0, %c0_i32 : i32, i32
  }
  func.func @transform_6(%arg0: i32) -> (i32, i32) {
    %c0_i32 = arith.constant 0 : i32
    %c0_i32_0 = arith.constant 0 : i32
    return %arg0, %c0_i32 : i32, i32
  }
}

module attributes {stable_mosaic.version = 11 : i64} {
  func.func @_attention_kernel(%arg0: i32, %arg1: memref<8x128x32xbf16, #tpu.memory_space<vmem>>, %arg2: memref<8x40xf32, #tpu.memory_space<vmem>>, %arg3: memref<32x40xbf16, #tpu.memory_space<vmem>>, %arg4: memref<1x40xf32, #tpu.memory_space<vmem>>, %arg5: memref<1x40xf32, #tpu.memory_space<vmem>>, %arg6: memref<8x32xf32, #tpu.memory_space<vmem>>, %arg7: memref<8x128xf32, #tpu.memory_space<vmem>>) attributes {dimension_semantics = [#tpu.dimension_semantics<parallel>], iteration_bounds = array<i64: 2>, scalar_prefetch = 0 : i64, scratch_operands = 0 : i64, tpu.core_type = #tpu.core_type<tc>, window_params = [{transform_indices = @transform_0, window_bounds = array<i64: 8, 128, 32>}, {transform_indices = @transform_1, window_bounds = array<i64: 8, 40>}, {pipeline_mode = #tpu.pipeline_mode<synchronous>, transform_indices = @transform_2, window_bounds = array<i64: 32, 40>}, {pipeline_mode = #tpu.pipeline_mode<synchronous>, transform_indices = @transform_3, window_bounds = array<i64: 1, 40>}, {pipeline_mode = #tpu.pipeline_mode<synchronous>, transform_indices = @transform_4, window_bounds = array<i64: 1, 40>}, {transform_indices = @transform_5, window_bounds = array<i64: 8, 32>}, {transform_indices = @transform_6, window_bounds = array<i64: 8, 128>}]} {
    %c0 = arith.constant 0 : index
    %c0_0 = arith.constant 0 : index
    %c0_1 = arith.constant 0 : index
    %0 = vector.load %arg1[%c0, %c0_0, %c0_1] : memref<8x128x32xbf16, #tpu.memory_space<vmem>>, vector<8x128x32xbf16>
    %1 = vector.shape_cast %0 : vector<8x128x32xbf16> to vector<1024x32xbf16>
    %c0_2 = arith.constant 0 : index
    %c0_3 = arith.constant 0 : index
    %2 = vector.load %arg3[%c0_2, %c0_3] : memref<32x40xbf16, #tpu.memory_space<vmem>>, vector<32x40xbf16>
    %cst = arith.constant dense<0.000000e+00> : vector<1024x40xf32>
    %3 = tpu.matmul %1, %2, %cst {dimension_numbers = #tpu.dot_dimension_numbers<[1], [0], [0], [1], [0, 0, 1, 1], [], []>} : vector<1024x32xbf16>, vector<32x40xbf16>, vector<1024x40xf32> -> vector<1024x40xf32>
    %4 = vector.shape_cast %3 : vector<1024x40xf32> to vector<8x128x40xf32>
    %c0_4 = arith.constant 0 : index
    %c0_5 = arith.constant 0 : index
    %5 = vector.load %arg4[%c0_4, %c0_5] : memref<1x40xf32, #tpu.memory_space<vmem>>, vector<1x40xf32>
    %6 = vector.shape_cast %5 : vector<1x40xf32> to vector<1x1x40xf32>
    %7 = vector.broadcast %6 : vector<1x1x40xf32> to vector<8x128x40xf32>
    %8 = arith.addf %4, %7 : vector<8x128x40xf32>
    %c0_6 = arith.constant 0 : index
    %c0_7 = arith.constant 0 : index
    %9 = vector.load %arg2[%c0_6, %c0_7] : memref<8x40xf32, #tpu.memory_space<vmem>>, vector<8x40xf32>
    %10 = vector.shape_cast %9 : vector<8x40xf32> to vector<8x1x40xf32>
    %11 = vector.broadcast %10 : vector<8x1x40xf32> to vector<8x128x40xf32>
    %12 = arith.addf %8, %11 : vector<8x128x40xf32>
    %cst_8 = arith.constant 0.000000e+00 : f32
    %13 = vector.broadcast %cst_8 : f32 to vector<8x128x40xf32>
    %14 = arith.maximumf %12, %13 : vector<8x128x40xf32>
    %c0_9 = arith.constant 0 : index
    %c0_10 = arith.constant 0 : index
    %15 = vector.load %arg5[%c0_9, %c0_10] : memref<1x40xf32, #tpu.memory_space<vmem>>, vector<1x40xf32>
    %16 = vector.shape_cast %15 : vector<1x40xf32> to vector<1x1x40xf32>
    %17 = vector.broadcast %16 : vector<1x1x40xf32> to vector<8x128x40xf32>
    %18 = arith.mulf %14, %17 : vector<8x128x40xf32>
    %cst_11 = arith.constant dense<0.000000e+00> : vector<8x128xf32>
    %19 = vector.multi_reduction <add>, %18, %cst_11 [2] : vector<8x128x40xf32> to vector<8x128xf32>
    %20 = tpu.iota {dimensions = array<i32: 1>} : vector<8x128xi32>
    %c16_i32 = arith.constant 16 : i32
    %21 = vector.broadcast %c16_i32 : i32 to vector<8x128xi32>
    %22 = arith.cmpi slt, %20, %21 : vector<8x128xi32>
    %cst_12 = arith.constant 0xFF800000 : f32
    %23 = vector.broadcast %cst_12 : f32 to vector<8x128xf32>
    %24 = arith.select %22, %19, %23 : vector<8x128xi1>, vector<8x128xf32>
    %cst_13 = arith.constant dense<0xFF800000> : vector<8xf32>
    %25 = vector.multi_reduction <maximumf>, %24, %cst_13 [1] : vector<8x128xf32> to vector<8xf32>
    %26 = vector.shape_cast %25 : vector<8xf32> to vector<8x1xf32>
    %27 = vector.broadcast %26 : vector<8x1xf32> to vector<8x128xf32>
    %28 = arith.subf %24, %27 : vector<8x128xf32>
    %29 = math.exp %28 : vector<8x128xf32>
    %cst_14 = arith.constant dense<0.000000e+00> : vector<8xf32>
    %30 = vector.multi_reduction <add>, %29, %cst_14 [1] : vector<8x128xf32> to vector<8xf32>
    %31 = vector.shape_cast %30 : vector<8xf32> to vector<8x1xf32>
    %32 = tpu.reciprocal %31 {approx = true} : vector<8x1xf32> -> vector<8x1xf32>
    %33 = vector.broadcast %32 : vector<8x1xf32> to vector<8x128xf32>
    %34 = arith.mulf %29, %33 : vector<8x128xf32>
    %35 = vector.shape_cast %34 : vector<8x128xf32> to vector<8x128x1xf32>
    %36 = arith.extf %0 : vector<8x128x32xbf16> to vector<8x128x32xf32>
    %37 = vector.broadcast %35 : vector<8x128x1xf32> to vector<8x128x32xf32>
    %38 = arith.mulf %37, %36 : vector<8x128x32xf32>
    %cst_15 = arith.constant dense<0.000000e+00> : vector<8x32xf32>
    %39 = vector.multi_reduction <add>, %38, %cst_15 [1] : vector<8x128x32xf32> to vector<8x32xf32>
    %c0_16 = arith.constant 0 : index
    %c0_17 = arith.constant 0 : index
    %40 = vector.load %arg6[%c0_16, %c0_17] : memref<8x32xf32, #tpu.memory_space<vmem>>, vector<8x32xf32>
    tpu.vector_store %arg6[%c0_16, %c0_17], %39 {strides = array<i32>} : memref<8x32xf32, #tpu.memory_space<vmem>>, vector<8x32xf32>,
    %c0_18 = arith.constant 0 : index
    %c0_19 = arith.constant 0 : index
    %41 = vector.load %arg7[%c0_18, %c0_19] : memref<8x128xf32, #tpu.memory_space<vmem>>, vector<8x128xf32>
    tpu.vector_store %arg7[%c0_18, %c0_19], %34 {strides = array<i32>} : memref<8x128xf32, #tpu.memory_space<vmem>>, vector<8x128xf32>,
    return
  }
  func.func @transform_0(%arg0: i32) -> (i32, i32, i32) {
    %c0_i32 = arith.constant 0 : i32
    %c0_i32_0 = arith.constant 0 : i32
    %c0_i32_1 = arith.constant 0 : i32
    return %arg0, %c0_i32, %c0_i32_0 : i32, i32, i32
  }
  func.func @transform_1(%arg0: i32) -> (i32, i32) {
    %c0_i32 = arith.constant 0 : i32
    %c0_i32_0 = arith.constant 0 : i32
    return %arg0, %c0_i32 : i32, i32
  }
  func.func @transform_2(%arg0: i32) -> (i32, i32) {
    %c0_i32 = arith.constant 0 : i32
    %c0_i32_0 = arith.constant 0 : i32
    %c0_i32_1 = arith.constant 0 : i32
    return %c0_i32, %c0_i32_0 : i32, i32
  }
  func.func @transform_3(%arg0: i32) -> (i32, i32) {
    %c0_i32 = arith.constant 0 : i32
    %c0_i32_0 = arith.constant 0 : i32
    %c0_i32_1 = arith.constant 0 : i32
    return %c0_i32, %c0_i32_0 : i32, i32
  }
  func.func @transform_4(%arg0: i32) -> (i32, i32) {
    %c0_i32 = arith.constant 0 : i32
    %c0_i32_0 = arith.constant 0 : i32
    %c0_i32_1 = arith.constant 0 : i32
    return %c0_i32, %c0_i32_0 : i32, i32
  }
  func.func @transform_5(%arg0: i32) -> (i32, i32) {
    %c0_i32 = arith.constant 0 : i32
    %c0_i32_0 = arith.constant 0 : i32
    return %arg0, %c0_i32 : i32, i32
  }
  func.func @transform_6(%arg0: i32) -> (i32, i32) {
    %c0_i32 = arith.constant 0 : i32
    %c0_i32_0 = arith.constant 0 : i32
    return %arg0, %c0_i32 : i32, i32
  }
}

</mosaic_0001>

<bundles_post_ra>
// kernel: tpu_custom_call.1
= control target key start
LH: loop header
LB: loop body
LE: loop exit
PB: predicated region body
PF: predicated region fallthrough
CT: control target
= control target key end

     0   :  { %12 = vsyncpa [#allocation3], 0  ;;  %s7678_s0 = inlined_call_operand.vmem [shape: bf16[16,128,32], index: 0, kind: input, shape index: {}]   ;;  %s7679_s1 = inlined_call_operand.vmem [shape: f32[16,40], index: 1, kind: input, shape index: {}]   ;;  %s7680_s2 = inlined_call_operand.vmem [shape: bf16[32,40], index: 2, kind: input, shape index: {}]   ;;  %s7681_s3 = inlined_call_operand.vmem [shape: f32[1,40], index: 3, kind: input, shape index: {}]   ;;  %s7682_s4 = inlined_call_operand.vmem [shape: f32[1,40], index: 4, kind: input, shape index: {}]   ;;  %s7683_s5 = inlined_call_operand.hbm [shape: f32[16,32], index: 5, kind: output, shape index: {0}]   ;;  %s7684_s6 = inlined_call_operand.hbm [shape: f32[16,128], index: 6, kind: output, shape index: {1}]  }
   0x1   :  { %14 = vsyncpa [#allocation3 + $0x1], 0 }
   0x2   :  { %15 = vsyncpa [#allocation5], 0 }
   0x3   :  { %17 = vsyncpa [#allocation5 + $0x1], 0  ;;  %s5279_s21 = smov 0   ;;  %s5281_s22 = smov 0  }
   0x4   :  { %s5283_s23 = smov 0   ;;  %s5285_s24 = smov 0  }
   0x5 LB: > { %s5300_s25 = sadd.s32 4294967295, %s5239_s24   ;;  %s4547_s26 = sadd.s32 4294967294, %s5239_s24   ;;  %s5239_s24 = sphi %s5285_s24, %s7943_s24   ;;  %s5235_s23 = sphi %s5283_s23, %s7942_s23   ;;  %s5231_s22 = sphi %s5281_s22, %s7941_s22   ;;  %s5227_s21 = sphi %s5279_s21, %s7940_s21  }
   0x6   : > { %s5304_s27 = sadd.s32 1, %s5239_s24   ;;  %s145_s28 = sadd.s32 1, %s5235_s23 }
   0x7   : > { %s142_s29 = ssub.s32 %s5239_s24, %s5304_s27  ;;  %p155_p0 = scmp.ne.s32.totalorder %s5235_s23, %s5231_s22 }
   0x8   : > { %p143_p1 = scmp.eq.s32.totalorder %s142_s29, 0  ;;  %p156_p2 = scmp.eq.s32.totalorder %s5300_s25, 1 }
   0x9   : > { %p161_p3 = scmp.ne.s32.totalorder %s5231_s22, %s5227_s21  ;;  %p162_p4 = scmp.eq.s32.totalorder %s4547_s26, 1 }
   0xa   : > { %s5315_s30 = scalar_select %p143_p1, %s5235_s23, %s145_s28  }
   0xb   : > { %p5317_p5 = por %p156_p2, %p155_p0  ;;  %p5321_p6 = por %p162_p4, %p161_p3 }
   0xc   : > { %p4550_p7 = scmp.ge.s32.totalorder %s5239_s24, 1  ;;  %p232_p8 = scmp.lt.s32.totalorder %s5239_s24, 3 }
   0xe   : > { %p233_p9 = pnand %p4550_p7, %p232_p8 }
  0x10   : > { %236 = sbr.rel (%p233_p9) target bundleno = 1380 (0x564), region = 40 }
  0x17   : > { %v4943_v0 = vld [vmem:[%s7680_s2] sm:$0xff]   ;;  %s4553_s11 = sshll.u32 %s5300_s25, 3  ;;  %v4944_v1 = vld [vmem:[%s7680_s2 + $0x8] sm:$0xff]   ;;  %vm7690_vm0 = vcmask 261120   ;;  %p279_p11 = scmp.lt.s32.totalorder %s5300_s25, 1  ;;  %vm2103_vm1 = vcmask 326656  }
  0x18   : > { %p273_p10 = scmp.lt.s32.totalorder %s4553_s11, 15  ;;  %4762 = vmatprep.subr.bf16.mxu0 %v4943_v0  ;;  %4894 = vmatprep.subr.bf16.mxu1 %v4943_v0  ;;  %vm2628_vm2 = vcmask 130112   ;;  %vm2635_vm3 = vcmask 195712   ;;  %vm2642_vm4 = vcmask 261312   ;;  %vm2649_vm5 = vcmask 326912  }
  0x19   : > { %4763 = vmatpush3.bf16.msra.mxu0 %v4943_v0  ;;  %4896 = vmatpush3.bf16.msra.mxu1 %v4943_v0  ;;  %s280_s18 = scalar_select %p279_p11, %s5300_s25, 1  ;;  %vm2656_vm6 = vcmask 392512   ;;  %vm2663_vm7 = vcmask 458112   ;;  %vm2670_vm8 = vcmask 523712   ;;  %vm2677_vm9 = vcmask 589312  }
  0x1a   : > { %s7945_s11 = smov (!%p273_p10, %s4553_s11), 15  ;;  %4764 = vmatprep.subr.bf16.mxu0 %v4944_v1  ;;  %4895 = vmatprep.subr.bf16.mxu1 %v4944_v1  ;;  %vm2684_vm10 = vcmask 654912   ;;  %vm2691_vm11 = vcmask 720512   ;;  %vm2698_vm12 = vcmask 786112   ;;  %vm2705_vm13 = vcmask 851712  }
  0x1b   : > { %s4695_s14 = sshll.u32 %s7945_s11, 6  ;;  %s4556_s19 = sshll.u32 %s280_s18, 3  ;;  %vm2712_vm14 = vcmask 917312   ;;  %vm2719_vm15 = vcmask 982912  }
  0x1c   : > { %s5337_s17 = scalar_lea.vmem %s7678_s0, %s4695_s14  ;;  %s282_s28 = scalar_lea.vmem %s7679_s1, %s4556_s19 }
  0x1d   : > { %4765 = vmatpush3.bf16.msra.mxu0 %v4944_v1  ;;  %4897 = vmatpush3.bf16.msra.mxu1 %v4944_v1  ;;  %v284_v2 = vld [vmem:[%s5337_s17] sm:$0xff]   ;;  %v286_v4 = vld [vmem:[%s5337_s17 + $0x8] sm:$0xff]   ;;  %v288_v6 = vld [vmem:[%s5337_s17 + $0x10] sm:$0xff]   ;;  %s7033_s19 = sand.u32 1, %s5231_s22   ;;  %s5242_s14 = smov [#allocation4]  }
  0x1e   : > { %v348_v3 = vld [vmem:[%s5337_s17 + $0x100] sm:$0xff]   ;;  %v350_v5 = vld [vmem:[%s5337_s17 + $0x108] sm:$0xff]   ;;  %v352_v7 = vld [vmem:[%s5337_s17 + $0x110] sm:$0xff]   ;;  %4766 = vmatprep.mubr.msk.bf16.mxu0 %vm7690_vm0, %v284_v2  ;;  %v5241_v2 = vmov 1966171168   ;;  %s4551_s20 = sshll.u32 %s7033_s19, 3 }
  0x1f   : > { %4830 = vmatprep.mubr.msk.bf16.mxu1 %vm7690_vm0, %v348_v3  ;;  %v290_v8 = vld [vmem:[%s5337_s17 + $0x18] sm:$0xff]   ;;  %v292_v10 = vld [vmem:[%s5337_s17 + $0x20] sm:$0xff]   ;;  %v294_v12 = vld [vmem:[%s5337_s17 + $0x28] sm:$0xff]   ;;  %v1625_v3 = vunpack.c.l.s4 %v5241_v2  ;;  %s7042_s26 = scalar_lea.vmem [#allocation4], %s4551_s20  ;;  %s4418_s12 = scalar_lea.sflag [#allocation5], %s7033_s19 }
  0x20   : > { %4767 = vmatmul.mubr.msk.bf16.vlgmr.msra.gmra.mrb[0].mxu0 %vm7690_vm0, %v286_v4  ;;  %4831 = vmatmul.mubr.msk.bf16.vlgmr.msra.gmra.mrb[0].mxu1 %vm7690_vm0, %v350_v5  ;;  %v354_v9 = vld [vmem:[%s5337_s17 + $0x118] sm:$0xff]   ;;  %v356_v11 = vld [vmem:[%s5337_s17 + $0x120] sm:$0xff]   ;;  %v358_v13 = vld [vmem:[%s5337_s17 + $0x128] sm:$0xff]   ;;  %v7685_v4 = vlaneseq  ;;  %s4444_s11 = sshll.u32 %s7042_s26, 4  ;;  %s5149_s15 = sshll.u32 %s5242_s14, 4  ;;  %s7275_s11 = int_to_ptr.vmem [resolvable:$true] %s4444_s11  ;;  %s5150_s15 = int_to_ptr.vmem [resolvable:$false] %s5149_s15 }
  0x21   : > { %4770 = vmatprep.mubr.msk.bf16.mxu0 %vm7690_vm0, %v288_v6  ;;  %4834 = vmatprep.mubr.msk.bf16.mxu1 %vm7690_vm0, %v352_v7  ;;  %v296_v14 = vld [vmem:[%s5337_s17 + $0x30] sm:$0xff]   ;;  %v298_v16 = vld [vmem:[%s5337_s17 + $0x38] sm:$0xff]   ;;  %v300_v18 = vld [vmem:[%s5337_s17 + $0x40] sm:$0xff]   ;;  %v1626_v5 = vunpack.c.0.s8 %v1625_v3  ;;  %s5145_s13 = scalar_lea.vmem %s7275_s11, 128  ;;  %s5151_s16 = scalar_lea.vmem %s5150_s15, 256 }
  0x22   : > { %v360_v15 = vld [vmem:[%s5337_s17 + $0x130] sm:$0xff]   ;;  %v362_v17 = vld [vmem:[%s5337_s17 + $0x138] sm:$0xff]   ;;  %v364_v19 = vld [vmem:[%s5337_s17 + $0x140] sm:$0xff]   ;;  %v5473_v6 = vshrl.u32 %v7685_v4, 7  ;;  %p5146_p12 = scmp.ne.s32.totalorder %s7275_s11, %s5145_s13  ;;  %p5152_p1 = scmp.lt.s32.totalorder %s7275_s11, %s5150_s15 }
  0x23   : > { %v302_v20 = vld [vmem:[%s5337_s17 + $0x48] sm:$0xff]   ;;  %v368_v22 = vld [vmem:[%s5337_s17 + $0x150] sm:$0xff]   ;;  %v370_v24 = vld [vmem:[%s5337_s17 + $0x158] sm:$0xff]   ;;  %p5153_p2 = scmp.lt.s32.totalorder %s5151_s16, %s5145_s13 }
  0x24   : > { %v366_v21 = vld [vmem:[%s5337_s17 + $0x148] sm:$0xff]   ;;  %v304_v23 = vld [vmem:[%s5337_s17 + $0x50] sm:$0xff]   ;;  %v306_v25 = vld [vmem:[%s5337_s17 + $0x58] sm:$0xff]   ;;  %7702 = vst [vmem:[#allocation8_spill] sm:$0xff] %v5473_v6  ;;  %p5147_p13 = pnand %p5146_p12, %p5317_p5 }
  0x25   : > { %v372_v26 = vld [vmem:[%s5337_s17 + $0x160] sm:$0xff]   ;;  %v374_v28 = vld [vmem:[%s5337_s17 + $0x168] sm:$0xff]   ;;  %v376_v30 = vld [vmem:[%s5337_s17 + $0x170] sm:$0xff]   ;;  %p5154_p3 = por %p5153_p2, %p5152_p1 }
  0x26   : > { %v308_v27 = vld [vmem:[%s5337_s17 + $0x60] sm:$0xff]   ;;  %v310_v29 = vld [vmem:[%s5337_s17 + $0x68] sm:$0xff]   ;;  %v312_v31 = vld [vmem:[%s5337_s17 + $0x70] sm:$0xff]   ;;  %p5148_p0 = pneg %p5147_p13 }
  0x27   : > { %v378_v32 = vld [vmem:[%s5337_s17 + $0x178] sm:$0xff]   ;;  %v380_v34 = vld [vmem:[%s5337_s17 + $0x180] sm:$0xff]   ;;  %v382_v36 = vld [vmem:[%s5337_s17 + $0x188] sm:$0xff]  }
  0x28   : > { %4771 = vmatmul.mubr.msk.bf16.gmra.mrb[4].mxu0 %vm7690_vm0, %v290_v8  ;;  %4835 = vmatmul.mubr.msk.bf16.gmra.mrb[4].mxu1 %vm7690_vm0, %v354_v9  ;;  %v314_v33 = vld [vmem:[%s5337_s17 + $0x78] sm:$0xff]   ;;  %v316_v35 = vld [vmem:[%s5337_s17 + $0x80] sm:$0xff]   ;;  %v318_v37 = vld [vmem:[%s5337_s17 + $0x88] sm:$0xff]   ;;  %v5476_v8 = vsub.s32 %v1626_v5, %v5473_v6  ;;  %p5155_p4 = pnand %p5154_p3, %p5148_p0 }
  0x29   : > { %4774 = vmatprep.mubr.msk.bf16.mxu0 %vm7690_vm0, %v292_v10  ;;  %4838 = vmatprep.mubr.msk.bf16.mxu1 %vm7690_vm0, %v356_v11  ;;  %v384_v38 = vld [vmem:[%s5337_s17 + $0x190] sm:$0xff]   ;;  %v386_v40 = vld [vmem:[%s5337_s17 + $0x198] sm:$0xff]   ;;  %v324_v42 = vld [vmem:[%s5337_s17 + $0xa0] sm:$0xff]  }
  0x2a   : > { %v320_v39 = vld [vmem:[%s5337_s17 + $0x90] sm:$0xff]   ;;  %v322_v41 = vld [vmem:[%s5337_s17 + $0x98] sm:$0xff]   ;;  %v388_v43 = vld [vmem:[%s5337_s17 + $0x1a0] sm:$0xff]  }
  0x2b   : > { %v326_v44 = vld [vmem:[%s5337_s17 + $0xa8] sm:$0xff]   ;;  %v392_v46 = vld [vmem:[%s5337_s17 + $0x1b0] sm:$0xff]   ;;  %v394_v48 = vld [vmem:[%s5337_s17 + $0x1b8] sm:$0xff]  }
  0x2c   : > { %v390_v45 = vld [vmem:[%s5337_s17 + $0x1a8] sm:$0xff]   ;;  %v328_v47 = vld [vmem:[%s5337_s17 + $0xb0] sm:$0xff]   ;;  %v330_v49 = vld [vmem:[%s5337_s17 + $0xb8] sm:$0xff]  }
  0x2d   : > { %v396_v50 = vld [vmem:[%s5337_s17 + $0x1c0] sm:$0xff]   ;;  %v398_v52 = vld [vmem:[%s5337_s17 + $0x1c8] sm:$0xff]   ;;  %v400_v54 = vld [vmem:[%s5337_s17 + $0x1d0] sm:$0xff]  }
  0x2e   : > { %v332_v51 = vld [vmem:[%s5337_s17 + $0xc0] sm:$0xff]   ;;  %v334_v53 = vld [vmem:[%s5337_s17 + $0xc8] sm:$0xff]   ;;  %v336_v55 = vld [vmem:[%s5337_s17 + $0xd0] sm:$0xff]  }
  0x2f   : > { %v402_v56 = vld [vmem:[%s5337_s17 + $0x1d8] sm:$0xff]   ;;  %v404_v58 = vld [vmem:[%s5337_s17 + $0x1e0] sm:$0xff]   ;;  %v406_v60 = vld [vmem:[%s5337_s17 + $0x1e8] sm:$0xff]  }
  0x30   : > { %4775 = vmatmul.mubr.msk.bf16.gmra.mrb[8].mxu0 %vm7690_vm0, %v294_v12  ;;  %4839 = vmatmul.mubr.msk.bf16.gmra.mrb[8].mxu1 %vm7690_vm0, %v358_v13  ;;  %v338_v57 = vld [vmem:[%s5337_s17 + $0xd8] sm:$0xff]   ;;  %v340_v59 = vld [vmem:[%s5337_s17 + $0xe0] sm:$0xff]   ;;  %v342_v61 = vld [vmem:[%s5337_s17 + $0xe8] sm:$0xff]   ;;  %v5489_v13 = vsub.s32 0, %v5473_v6 }
  0x31   : > { %4778 = vmatprep.mubr.msk.bf16.mxu0 %vm7690_vm0, %v296_v14  ;;  %4842 = vmatprep.mubr.msk.bf16.mxu1 %vm7690_vm0, %v360_v15  ;;  %v408_v62 = vld [vmem:[%s5337_s17 + $0x1f0] sm:$0xff]   ;;  %v410_v0 = vld [vmem:[%s5337_s17 + $0x1f8] sm:$0xff]   ;;  %v1621_v7 = vld [vmem:[%s282_s28] sm:$0xff]  ;;  %s4691_s28 = sshll.u32 %s5300_s25, 7 }
  0x32   : > { %v344_v63 = vld [vmem:[%s5337_s17 + $0xf0] sm:$0xff]   ;;  %v346_v1 = vld [vmem:[%s5337_s17 + $0xf8] sm:$0xff]   ;;  %v1623_v9 = vcombine.high %v1621_v7, %v1621_v7  ;;  %v5479_v10 = vrot.slane %v1621_v7, %v5476_v8  ;;  %7703 = vst [vmem:[#allocation9_spill] sm:$0xff] %v5489_v13  ;;  %v5498_v15 = vld [vmem:[%s7681_s3] ss:$0 sm:$0xff]  ;;  %s7270_s10 = scalar_lea.hbm %s7684_s6, %s4691_s28 }
  0x34   : > { %v5482_v11 = vrot.slane %v1623_v9, %v5476_v8  ;;  %v5486_v12 = vrot.slane %v5479_v10, %v5476_v8 }
  0x36   : > { %v5493_v14 = vrot.slane %v5482_v11, %v5476_v8 }
  0x38   : > { %4779 = vmatmul.mubr.msk.bf16.gmra.mrb[12].mxu0 %vm7690_vm0, %v298_v16  ;;  %4843 = vmatmul.mubr.msk.bf16.gmra.mrb[12].mxu1 %vm7690_vm0, %v362_v17  ;;  %v5502_v16 = vrot.slane %v5486_v12, %v5489_v13  ;;  %v5506_v17 = vrot.slane %v5493_v14, %v5489_v13 }
  0x39   : > { %4782 = vmatprep.mubr.msk.bf16.mxu0 %vm7690_vm0, %v300_v18  ;;  %4846 = vmatprep.mubr.msk.bf16.mxu1 %vm7690_vm0, %v364_v19 }
  0x40   : > { %4783 = vmatmul.mubr.msk.bf16.gmra.mrb[16].mxu0 %vm7690_vm0, %v302_v20  ;;  %4847 = vmatmul.mubr.msk.bf16.gmra.mrb[16].mxu1 %vm7690_vm0, %v366_v21 }
  0x41   : > { %4850 = vmatprep.mubr.msk.bf16.mxu1 %vm7690_vm0, %v368_v22  ;;  %4786 = vmatprep.mubr.msk.bf16.mxu0 %vm7690_vm0, %v304_v23 }
  0x48   : > { %4851 = vmatmul.mubr.msk.bf16.gmra.mrb[20].mxu1 %vm7690_vm0, %v370_v24  ;;  %4787 = vmatmul.mubr.msk.bf16.gmra.mrb[20].mxu0 %vm7690_vm0, %v306_v25 }
  0x49   : > { %4854 = vmatprep.mubr.msk.bf16.mxu1 %vm7690_vm0, %v372_v26  ;;  %4790 = vmatprep.mubr.msk.bf16.mxu0 %vm7690_vm0, %v308_v27 }
  0x50   : > { %4855 = vmatmul.mubr.msk.bf16.gmra.mrb[24].mxu1 %vm7690_vm0, %v374_v28  ;;  %4791 = vmatmul.mubr.msk.bf16.gmra.mrb[24].mxu0 %vm7690_vm0, %v310_v29 }
  0x51   : > { %4858 = vmatprep.mubr.msk.bf16.mxu1 %vm7690_vm0, %v376_v30  ;;  %4794 = vmatprep.mubr.msk.bf16.mxu0 %vm7690_vm0, %v312_v31 }
  0x58   : > { %4859 = vmatmul.mubr.msk.bf16.gmra.mrb[28].mxu1 %vm7690_vm0, %v378_v32  ;;  %4795 = vmatmul.mubr.msk.bf16.gmra.mrb[28].mxu0 %vm7690_vm0, %v314_v33 }
  0x59   : > { %4862 = vmatprep.mubr.msk.bf16.mxu1 %vm7690_vm0, %v380_v34  ;;  %4798 = vmatprep.mubr.msk.bf16.mxu0 %vm7690_vm0, %v316_v35 }
  0x60   : > { %4863 = vmatmul.mubr.msk.bf16.gmra.mrb[32].mxu1 %vm7690_vm0, %v382_v36  ;;  %4799 = vmatmul.mubr.msk.bf16.gmra.mrb[32].mxu0 %vm7690_vm0, %v318_v37  ;;  %v5522_v37 = vld [vmem:[%s7682_s4] ss:$0 sm:$0xff] }
  0x61   : > { %4866 = vmatprep.mubr.msk.bf16.mxu1 %vm7690_vm0, %v384_v38  ;;  %4802 = vmatprep.mubr.msk.bf16.mxu0 %vm7690_vm0, %v320_v39 }
  0x68   : > { %4867 = vmatmul.mubr.msk.bf16.gmra.mrb[36].mxu1 %vm7690_vm0, %v386_v40  ;;  %4803 = vmatmul.mubr.msk.bf16.gmra.mrb[36].mxu0 %vm7690_vm0, %v322_v41 }
  0x69   : > { %4806 = vmatprep.mubr.msk.bf16.mxu0 %vm7690_vm0, %v324_v42  ;;  %4870 = vmatprep.mubr.msk.bf16.mxu1 %vm7690_vm0, %v388_v43 }
  0x70   : > { %4807 = vmatmul.mubr.msk.bf16.gmra.mrb[40].mxu0 %vm7690_vm0, %v326_v44  ;;  %4871 = vmatmul.mubr.msk.bf16.gmra.mrb[40].mxu1 %vm7690_vm0, %v390_v45 }
  0x71   : > { %4874 = vmatprep.mubr.msk.bf16.mxu1 %vm7690_vm0, %v392_v46  ;;  %4810 = vmatprep.mubr.msk.bf16.mxu0 %vm7690_vm0, %v328_v47 }
  0x78   : > { %4875 = vmatmul.mubr.msk.bf16.gmra.mrb[44].mxu1 %vm7690_vm0, %v394_v48  ;;  %4811 = vmatmul.mubr.msk.bf16.gmra.mrb[44].mxu0 %vm7690_vm0, %v330_v49 }
  0x79   : > { %4878 = vmatprep.mubr.msk.bf16.mxu1 %vm7690_vm0, %v396_v50  ;;  %4814 = vmatprep.mubr.msk.bf16.mxu0 %vm7690_vm0, %v332_v51 }
  0x80   : > { %4879 = vmatmul.mubr.msk.bf16.gmra.mrb[48].mxu1 %vm7690_vm0, %v398_v52  ;;  %4815 = vmatmul.mubr.msk.bf16.gmra.mrb[48].mxu0 %vm7690_vm0, %v334_v53 }
  0x81   : > { %4882 = vmatprep.mubr.msk.bf16.mxu1 %vm7690_vm0, %v400_v54  ;;  %4818 = vmatprep.mubr.msk.bf16.mxu0 %vm7690_vm0, %v336_v55 }
  0x88   : > { %4883 = vmatmul.mubr.msk.bf16.gmra.mrb[52].mxu1 %vm7690_vm0, %v402_v56  ;;  %4819 = vmatmul.mubr.msk.bf16.gmra.mrb[52].mxu0 %vm7690_vm0, %v338_v57 }
  0x89   : > { %4886 = vmatprep.mubr.msk.bf16.mxu1 %vm7690_vm0, %v404_v58  ;;  %4822 = vmatprep.mubr.msk.bf16.mxu0 %vm7690_vm0, %v340_v59 }
  0x90   : > { %4887 = vmatmul.mubr.msk.bf16.gmra.mrb[56].mxu1 %vm7690_vm0, %v406_v60  ;;  %4823 = vmatmul.mubr.msk.bf16.gmra.mrb[56].mxu0 %vm7690_vm0, %v342_v61 }
  0x91   : > { %4890 = vmatprep.mubr.msk.bf16.mxu1 %vm7690_vm0, %v408_v62  ;;  %4826 = vmatprep.mubr.msk.bf16.mxu0 %vm7690_vm0, %v344_v63 }
  0x98   : > { %4891 = vmatmul.mubr.msk.bf16.gmra.mrb[60].mxu1 %vm7690_vm0, %v410_v0  ;;  %4827 = vmatmul.mubr.msk.bf16.gmra.mrb[60].mxu0 %vm7690_vm0, %v346_v1  ;;  %vm2726_vm0 = vcmask 1048512  }
  0xf3   : > { %v4768_v18 = vpop.f32.mrb[0].mxu0  ;;  %v4832_v19 = vpop.f32.mrb[0].mxu1 }
  0xf4   : > { %v1495_v20 = vadd.f32 %v4768_v18, %v5498_v15  ;;  %v1559_v21 = vadd.f32 %v4832_v19, %v5498_v15  ;;  %v975_v22 = vpop.f32.mrb[1].mxu0  ;;  %v1231_v23 = vpop.f32.mrb[1].mxu1 }
  0xf5   : > { %v1493_v24 = vadd.f32 %v5498_v15, %v975_v22  ;;  %v1557_v25 = vadd.f32 %v5498_v15, %v1231_v23  ;;  %v4769_v26 = vpop.f32.mrb[2].mxu0  ;;  %v4833_v27 = vpop.f32.mrb[2].mxu1 }
  0xf6   : > { %v1714_v28 = vadd.f32 %v5502_v16, %v1495_v20  ;;  %v1778_v29 = vadd.f32 %v5506_v17, %v1559_v21  ;;  %v1496_v30 = vadd.f32 %v4769_v26, %v5498_v15  ;;  %v978_v31 = vpop.f32.mrb[3].mxu0  ;;  %v1234_v32 = vpop.f32.mrb[3].mxu1  ;;  %v1560_v35 = vadd.f32 %v4833_v27, %v5498_v15 }
  0xf7   : > { %v1712_v33 = vadd.f32 %v5502_v16, %v1493_v24  ;;  %v1776_v34 = vadd.f32 %v5506_v17, %v1557_v25  ;;  %v1494_v36 = vadd.f32 %v5498_v15, %v978_v31  ;;  %v1558_v42 = vadd.f32 %v5498_v15, %v1234_v32 }
  0xf8   : > { %v1842_v38 = vmax.f32 %v1714_v28, 0.0  ;;  %v1906_v39 = vmax.f32 %v1778_v29, 0.0  ;;  %v1715_v40 = vadd.f32 %v5502_v16, %v1496_v30  ;;  %v1779_v47 = vadd.f32 %v5506_v17, %v1560_v35 }
  0xf9   : > { %v1840_v41 = vmax.f32 %v1712_v33, 0.0  ;;  %v1904_v46 = vmax.f32 %v1776_v34, 0.0  ;;  %v1713_v48 = vadd.f32 %v5502_v16, %v1494_v36  ;;  %v1777_v58 = vadd.f32 %v5506_v17, %v1558_v42 }
  0xfa   : > { %v1843_v43 = vmax.f32 %v1715_v40, 0.0  ;;  %v2041_v44 = vmul.f32 %v5522_v37, %v1906_v39  ;;  %v1977_v45 = vmul.f32 %v5522_v37, %v1842_v38  ;;  %v1907_v0 = vmax.f32 %v1779_v47, 0.0 }
  0xfb   : > { %v4772_v49 = vpop.f32.mrb[4].mxu0  ;;  %v1975_v50 = vmul.f32 %v5522_v37, %v1840_v41  ;;  %v4836_v51 = vpop.f32.mrb[4].mxu1  ;;  %v1841_v1 = vmax.f32 %v1713_v48, 0.0  ;;  %v2039_v2 = vmul.f32 %v5522_v37, %v1904_v46  ;;  %v1905_v18 = vmax.f32 %v1777_v58, 0.0 }
  0xfc   : > { %v2302_v52 = vsel %vm2103_vm1, %v2041_v44, 0.0  ;;  %v2110_v53 = vsel %vm2103_vm1, %v1977_v45, 0.0  ;;  %v1499_v54 = vadd.f32 %v4772_v49, %v5498_v15  ;;  %v991_v55 = vpop.f32.mrb[5].mxu0  ;;  %v1978_v56 = vmul.f32 %v5522_v37, %v1843_v43  ;;  %v1247_v57 = vpop.f32.mrb[5].mxu1 }
  0xfd   : > { %2303 = vadd.xlane.f32.xlu0 %v2302_v52  ;;  %2111 = vadd.xlane.f32.xlu1 %v2110_v53  ;;  %v4773_v59 = vpop.f32.mrb[6].mxu0  ;;  %v4837_v60 = vpop.f32.mrb[6].mxu1  ;;  %v2104_v5 = vsel %vm2103_vm1, %v1975_v50, 0.0  ;;  %v1563_v9 = vadd.f32 %v4836_v51, %v5498_v15  ;;  %v1497_v21 = vadd.f32 %v5498_v15, %v991_v55  ;;  %v2042_v23 = vmul.f32 %v5522_v37, %v1907_v0 }
  0xfe   : > { %v1500_v61 = vadd.f32 %v4773_v59, %v5498_v15  ;;  %v994_v62 = vpop.f32.mrb[7].mxu0  ;;  %v1250_v63 = vpop.f32.mrb[7].mxu1  ;;  %v1718_v3 = vadd.f32 %v5502_v16, %v1499_v54  ;;  %v2113_v7 = vsel %vm2103_vm1, %v1978_v56, 0.0  ;;  %v1564_v20 = vadd.f32 %v4837_v60, %v5498_v15 }
  0xff   : > { %v1498_v22 = vadd.f32 %v5498_v15, %v994_v62  ;;  %v1782_v27 = vadd.f32 %v5506_v17, %v1563_v9  ;;  %v2296_v28 = vsel %vm2103_vm1, %v2039_v2, 0.0  ;;  %v1976_v29 = vmul.f32 %v5522_v37, %v1841_v1 }
 0x100   : > { %v1719_v19 = vadd.f32 %v5502_v16, %v1500_v61  ;;  %v1846_v26 = vmax.f32 %v1718_v3, 0.0  ;;  %v1783_v33 = vadd.f32 %v5506_v17, %v1564_v20  ;;  %v2305_v34 = vsel %vm2103_vm1, %v2042_v23, 0.0 }
 0x101   : > { %2105 = vadd.xlane.f32.xlu0 %v2104_v5  ;;  %2114 = vadd.xlane.f32.xlu1 %v2113_v7  ;;  %v2040_v35 = vmul.f32 %v5522_v37, %v1905_v18  ;;  %v1716_v41 = vadd.f32 %v5502_v16, %v1497_v21  ;;  %v1561_v42 = vadd.f32 %v5498_v15, %v1247_v57  ;;  %v1910_v43 = vmax.f32 %v1782_v27, 0.0 }
 0x102   : > { %v1847_v32 = vmax.f32 %v1719_v19, 0.0  ;;  %v1562_v44 = vadd.f32 %v5498_v15, %v1250_v63  ;;  %v2107_v45 = vsel %vm2103_vm1, %v1976_v29, 0.0  ;;  %v1981_v46 = vmul.f32 %v5522_v37, %v1846_v26 }
 0x103   : > { %v4776_v24 = vpop.f32.mrb[8].mxu0  ;;  %v4840_v25 = vpop.f32.mrb[8].mxu1  ;;  %v1717_v47 = vadd.f32 %v5502_v16, %v1498_v22  ;;  %v1911_v48 = vmax.f32 %v1783_v33, 0.0  ;;  %v2299_v49 = vsel %vm2103_vm1, %v2040_v35, 0.0  ;;  %v1780_v51 = vadd.f32 %v5506_v17, %v1561_v42 }
 0x104   : > { %v1007_v30 = vpop.f32.mrb[9].mxu0  ;;  %v5550_v31 = vpop.f32.mrb[9].mxu1  ;;  %v1982_v50 = vmul.f32 %v5522_v37, %v1847_v32  ;;  %v1503_v52 = vadd.f32 %v4776_v24, %v5498_v15  ;;  %v1844_v55 = vmax.f32 %v1716_v41, 0.0  ;;  %v2122_v56 = vsel %vm2103_vm1, %v1981_v46, 0.0 }
 0x105   : > { %2297 = vadd.xlane.f32.xlu0 %v2296_v28  ;;  %v4777_v36 = vpop.f32.mrb[10].mxu0  ;;  %v5555_v38 = vpop.f32.mrb[10].mxu1  ;;  %2306 = vadd.xlane.f32.xlu1 %v2305_v34  ;;  %v2045_v58 = vmul.f32 %v5522_v37, %v1910_v43  ;;  %v1845_v61 = vmax.f32 %v1717_v47, 0.0  ;;  %v1781_v62 = vadd.f32 %v5506_v17, %v1562_v44  ;;  %v2046_v0 = vmul.f32 %v5522_v37, %v1911_v48 }
 0x106   : > { %v1010_v39 = vpop.f32.mrb[11].mxu0  ;;  %v1266_v40 = vpop.f32.mrb[11].mxu1  ;;  %v1504_v57 = vadd.f32 %v4777_v36, %v5498_v15  ;;  %v2125_v63 = vsel %vm2103_vm1, %v1982_v50, 0.0  ;;  %v1567_v3 = vadd.f32 %v4840_v25, %v5498_v15  ;;  %v1722_v9 = vadd.f32 %v5502_v16, %v1503_v52 }
 0x107   : > { %v1502_v18 = vadd.f32 %v5498_v15, %v1010_v39  ;;  %v1908_v19 = vmax.f32 %v1780_v51, 0.0  ;;  %v2314_v21 = vsel %vm2103_vm1, %v2045_v58, 0.0  ;;  %v1979_v22 = vmul.f32 %v5522_v37, %v1844_v55 }
 0x108   : > { %v1723_v20 = vadd.f32 %v5502_v16, %v1504_v57  ;;  %v1909_v23 = vmax.f32 %v1781_v62, 0.0  ;;  %v2317_v24 = vsel %vm2103_vm1, %v2046_v0, 0.0  ;;  %v1980_v26 = vmul.f32 %v5522_v37, %v1845_v61 }
 0x109   : > { %2108 = vadd.xlane.f32.xlu0 %v2107_v45  ;;  %2300 = vadd.xlane.f32.xlu1 %v2299_v49  ;;  %v1501_v27 = vadd.f32 %v5498_v15, %v1007_v30  ;;  %v1786_v28 = vadd.f32 %v5506_v17, %v1567_v3  ;;  %v1850_v29 = vmax.f32 %v1722_v9, 0.0  ;;  %v1721_v32 = vadd.f32 %v5502_v16, %v1502_v18 }
 0x10a   : > { %v1851_v39 = vmax.f32 %v1723_v20, 0.0  ;;  %v2116_v41 = vsel %vm2103_vm1, %v1979_v22, 0.0  ;;  %v2043_v30 = vmul.f32 %v5522_v37, %v1908_v19  ;;  %v2119_v45 = vsel %vm2103_vm1, %v1980_v26, 0.0 }
 0x10b   : > { %v5567_v53 = vpop.f32.mrb[12].mxu0  ;;  %v5569_v54 = vpop.f32.mrb[12].mxu1  ;;  %v1566_v46 = vadd.f32 %v5498_v15, %v1266_v40  ;;  %v2044_v47 = vmul.f32 %v5522_v37, %v1909_v23  ;;  %v1914_v51 = vmax.f32 %v1786_v28, 0.0  ;;  %v1720_v57 = vadd.f32 %v5502_v16, %v1501_v27 }
 0x10c   : > { %v5574_v59 = vpop.f32.mrb[13].mxu0  ;;  %v1279_v60 = vpop.f32.mrb[13].mxu1  ;;  %v1638_v40 = vcombine.high %v5479_v10, %v5479_v10  ;;  %v1849_v58 = vmax.f32 %v1721_v32, 0.0  ;;  %v2308_v61 = vsel %vm2103_vm1, %v2043_v30, 0.0  ;;  %v1985_v62 = vmul.f32 %v5522_v37, %v1850_v29 }
 0x10d   : > { %2123 = vadd.xlane.f32.xlu0 %v2122_v56  ;;  %v4781_v1 = vpop.f32.mrb[14].mxu0  ;;  %v4845_v2 = vpop.f32.mrb[14].mxu1  ;;  %2126 = vadd.xlane.f32.xlu1 %v2125_v63  ;;  %v1569_v25 = vadd.f32 %v5498_v15, %v1279_v60  ;;  %v1565_v60 = vadd.f32 %v5498_v15, %v5550_v31  ;;  %v1785_v63 = vadd.f32 %v5506_v17, %v1566_v46  ;;  %v2311_v0 = vsel %vm2103_vm1, %v2044_v47, 0.0 }
 0x10e   : > { %v1026_v5 = vpop.f32.mrb[15].mxu0  ;;  %v1282_v7 = vpop.f32.mrb[15].mxu1  ;;  %v1572_v34 = vadd.f32 %v4845_v2, %v5498_v15  ;;  %v1508_v2 = vadd.f32 %v4781_v1, %v5498_v15  ;;  %v1986_v3 = vmul.f32 %v5522_v37, %v1851_v39  ;;  %v2049_v10 = vmul.f32 %v5522_v37, %v1914_v51 }
 0x10f   : > { %v5592_v33 = vadd.f32 %v5506_v17, %v1569_v25  ;;  %v1570_v42 = vadd.f32 %v5498_v15, %v1282_v7  ;;  %v1568_v7 = vadd.f32 %v5555_v38, %v5498_v15  ;;  %v5636_v31 = vrot.slane %v1638_v40, %v5476_v8 }
 0x110   : > { %v5610_v48 = vadd.f32 %v5506_v17, %v1572_v34  ;;  %v1639_v9 = vcombine.high %v5482_v11, %v5482_v11  ;;  %v1848_v20 = vmax.f32 %v1720_v57, 0.0  ;;  %v1784_v1 = vadd.f32 %v5506_v17, %v1565_v60 }
 0x111   : > { %2315 = vadd.xlane.f32.xlu0 %v2314_v21  ;;  %2318 = vadd.xlane.f32.xlu1 %v2317_v24  ;;  %v5615_v52 = vadd.f32 %v5506_v17, %v1570_v42  ;;  %7704 = vst [vmem:[#allocation10_spill] sm:$0xff] %v5636_v31  ;;  %v2134_v21 = vsel %vm2103_vm1, %v1985_v62, 0.0  ;;  %v1506_v22 = vadd.f32 %v5498_v15, %v1026_v5  ;;  %v1913_v24 = vmax.f32 %v1785_v63, 0.0 }
 0x112   : > { %v1727_v26 = vadd.f32 %v5502_v16, %v1508_v2  ;;  %v2137_v11 = vsel %vm2103_vm1, %v1986_v3, 0.0  ;;  %v1984_v25 = vmul.f32 %v5522_v37, %v1849_v58  ;;  %v2326_v29 = vsel %vm2103_vm1, %v2049_v10, 0.0 }
 0x113   : > { %v5595_v35 = vpop.f32.mrb[16].mxu0  ;;  %v5597_v36 = vpop.f32.mrb[16].mxu1  ;;  %v1787_v34 = vadd.f32 %v5506_v17, %v1568_v7  ;;  %v1507_v39 = vadd.f32 %v5567_v53, %v5498_v15  ;;  %v1912_v30 = vmax.f32 %v1784_v1, 0.0  ;;  %v1725_v42 = vadd.f32 %v5502_v16, %v1506_v22 }
 0x114   : > { %v5602_v43 = vpop.f32.mrb[17].mxu0  ;;  %v5604_v44 = vpop.f32.mrb[17].mxu1  ;;  %v1983_v46 = vmul.f32 %v5522_v37, %v1848_v20  ;;  %v1855_v47 = vmax.f32 %v1727_v26, 0.0  ;;  %v2131_v51 = vsel %vm2103_vm1, %v1984_v25, 0.0  ;;  %v2048_v53 = vmul.f32 %v5522_v37, %v1913_v24 }
 0x115   : > { %2117 = vadd.xlane.f32.xlu0 %v2116_v41  ;;  %v4785_v49 = vpop.f32.mrb[18].mxu0  ;;  %v5612_v50 = vpop.f32.mrb[18].mxu1  ;;  %2120 = vadd.xlane.f32.xlu1 %v2119_v45  ;;  %v5667_v41 = vrot.slane %v1639_v9, %v5476_v8  ;;  %v5672_v45 = vrot.slane %v5636_v31, %v5489_v13  ;;  %v1915_v8 = vmax.f32 %v1787_v34, 0.0  ;;  %v1726_v40 = vadd.f32 %v5502_v16, %v1507_v39 }
 0x116   : > { %v5617_v55 = vpop.f32.mrb[19].mxu0  ;;  %v5619_v56 = vpop.f32.mrb[19].mxu1  ;;  %v1512_v57 = vadd.f32 %v4785_v49, %v5498_v15  ;;  %v1853_v62 = vmax.f32 %v1725_v42, 0.0  ;;  %v1571_v63 = vadd.f32 %v5569_v54, %v5498_v15  ;;  %v2128_v49 = vsel %vm2103_vm1, %v1983_v46, 0.0 }
 0x117   : > { %7705 = vst [vmem:[#allocation11_spill] sm:$0xff] %v5667_v41  ;;  %v5681_v58 = vrot.slane %v5667_v41, %v5489_v13  ;;  %v2323_v7 = vsel %vm2103_vm1, %v2048_v53, 0.0  ;;  %v1576_v9 = vadd.f32 %v5612_v50, %v5498_v15  ;;  %v1990_v20 = vmul.f32 %v5522_v37, %v1855_v47 }
 0x118   : > { %v1731_v10 = vadd.f32 %v5672_v45, %v1512_v57  ;;  %v1854_v24 = vmax.f32 %v1726_v40, 0.0  ;;  %v1505_v26 = vadd.f32 %v5498_v15, %v5574_v59  ;;  %v1510_v50 = vadd.f32 %v5498_v15, %v5617_v55 }
 0x119   : > { %2309 = vadd.xlane.f32.xlu0 %v2308_v61  ;;  %2312 = vadd.xlane.f32.xlu1 %v2311_v0  ;;  %v2047_v0 = vmul.f32 %v5522_v37, %v1912_v30  ;;  %v1795_v39 = vadd.f32 %v5681_v58, %v1576_v9  ;;  %v2149_v30 = vsel %vm2103_vm1, %v1990_v20, 0.0  ;;  %v1988_v42 = vmul.f32 %v5522_v37, %v1853_v62 }
 0x11a   : > { %v1859_v34 = vmax.f32 %v1731_v10, 0.0  ;;  %v1724_v59 = vadd.f32 %v5502_v16, %v1505_v26  ;;  %v1729_v47 = vadd.f32 %v5672_v45, %v1510_v50  ;;  %v1989_v57 = vmul.f32 %v5522_v37, %v1854_v24 }
 0x11b   : > { %v5640_v18 = vpop.f32.mrb[20].mxu1  ;;  %v5642_v19 = vpop.f32.mrb[20].mxu0  ;;  %v2320_v25 = vsel %vm2103_vm1, %v2047_v0, 0.0  ;;  %v1923_v40 = vmax.f32 %v1795_v39, 0.0  ;;  %v1574_v62 = vadd.f32 %v5498_v15, %v5619_v56  ;;  %v2143_v16 = vsel %vm2103_vm1, %v1988_v42, 0.0 }
 0x11c   : > { %v5647_v23 = vpop.f32.mrb[21].mxu1  ;;  %v5649_v38 = vpop.f32.mrb[21].mxu0  ;;  %v1579_v9 = vadd.f32 %v5640_v18, %v5498_v15  ;;  %v1852_v20 = vmax.f32 %v1724_v59, 0.0  ;;  %v2146_v24 = vsel %vm2103_vm1, %v1989_v57, 0.0  ;;  %v1857_v56 = vmax.f32 %v1729_v47, 0.0 }
 0x11d   : > { %2135 = vadd.xlane.f32.xlu0 %v2134_v21  ;;  %v5654_v27 = vpop.f32.mrb[22].mxu1  ;;  %v5656_v28 = vpop.f32.mrb[22].mxu0  ;;  %2138 = vadd.xlane.f32.xlu1 %v2137_v11  ;;  %v1790_v11 = vadd.f32 %v5506_v17, %v1571_v63  ;;  %v1994_v63 = vmul.f32 %v5522_v37, %v1859_v34  ;;  %v1511_v18 = vadd.f32 %v5595_v35, %v5498_v15  ;;  %v1916_v42 = vmax.f32 %v5592_v33, 0.0 }
 0x11e   : > { %v5659_v5 = vpop.f32.mrb[23].mxu1  ;;  %v5661_v32 = vpop.f32.mrb[23].mxu0  ;;  %v1798_v34 = vadd.f32 %v5681_v58, %v1579_v9  ;;  %v1992_v57 = vmul.f32 %v5522_v37, %v1857_v56  ;;  %v1919_v9 = vmax.f32 %v5610_v48, 0.0 }
 0x11f   : > { %v1918_v55 = vmax.f32 %v1790_v11, 0.0  ;;  %v1793_v11 = vadd.f32 %v5681_v58, %v1574_v62  ;;  %v2161_v50 = vsel %vm2103_vm1, %v1994_v63, 0.0 }
 0x121   : > { %2327 = vadd.xlane.f32.xlu0 %v2326_v29  ;;  %2132 = vadd.xlane.f32.xlu1 %v2131_v51  ;;  %v2050_v29 = vmul.f32 %v5522_v37, %v1915_v8  ;;  %v2053_v26 = vmul.f32 %v5522_v37, %v1918_v55  ;;  %v1987_v55 = vmul.f32 %v5522_v37, %v1852_v20 }
 0x122   : > { %v1730_v20 = vadd.f32 %v5672_v45, %v1511_v18  ;;  %v1575_v18 = vadd.f32 %v5597_v36, %v5498_v15 }
 0x123   : > { %v5683_v60 = vpop.f32.mrb[24].mxu1  ;;  %v5685_v61 = vpop.f32.mrb[24].mxu0  ;;  %v2329_v51 = vsel %vm2103_vm1, %v2050_v29, 0.0  ;;  %v1577_v29 = vadd.f32 %v5498_v15, %v5647_v23  ;;  %v2338_v59 = vsel %vm2103_vm1, %v2053_v26, 0.0  ;;  %v1921_v23 = vmax.f32 %v1793_v11, 0.0 }
 0x124   : > { %v5691_v2 = vpop.f32.mrb[25].mxu1  ;;  %v5693_v3 = vpop.f32.mrb[25].mxu0  ;;  %v1917_v26 = vmax.f32 %v5615_v52, 0.0  ;;  %v2140_v56 = vsel %vm2103_vm1, %v1987_v55, 0.0  ;;  %v2051_v11 = vmul.f32 %v5522_v37, %v1916_v42 }
 0x125   : > { %2129 = vadd.xlane.f32.xlu0 %v2128_v49  ;;  %v5700_v1 = vpop.f32.mrb[26].mxu1  ;;  %v5702_v54 = vpop.f32.mrb[26].mxu0  ;;  %2324 = vadd.xlane.f32.xlu1 %v2323_v7  ;;  %v1796_v33 = vadd.f32 %v5681_v58, %v1577_v29  ;;  %v1516_v29 = vadd.f32 %v5656_v28, %v5498_v15 }
 0x126   : > { %v5704_v21 = vpop.f32.mrb[27].mxu1  ;;  %v5706_v22 = vpop.f32.mrb[27].mxu0  ;;  %v2052_v4 = vmul.f32 %v5522_v37, %v1917_v26 }
 0x127   : > { %v1924_v52 = vmax.f32 %v1796_v33, 0.0 }
 0x129   : > { %2321 = vadd.xlane.f32.xlu0 %v2320_v25  ;;  %2150 = vadd.xlane.f32.xlu1 %v2149_v30  ;;  %v2058_v25 = vmul.f32 %v5522_v37, %v1923_v40 }
 0x12b   : > { %v5719_v46 = vpop.f32.mrb[28].mxu1  ;;  %v5721_v17 = vpop.f32.mrb[28].mxu0  ;;  %v2353_v35 = vsel %vm2103_vm1, %v2058_v25, 0.0  ;;  %v2155_v25 = vsel %vm2103_vm1, %v1992_v57, 0.0  ;;  %v1514_v57 = vadd.f32 %v5498_v15, %v5661_v32 }
 0x12c   : > { %v5726_v53 = vpop.f32.mrb[29].mxu1  ;;  %v1087_v8 = vpop.f32.mrb[29].mxu0 }
 0x12d   : > { %2330 = vadd.xlane.f32.xlu0 %v2329_v51  ;;  %v4861_v49 = vpop.f32.mrb[30].mxu1  ;;  %v4797_v0 = vpop.f32.mrb[30].mxu0  ;;  %2144 = vadd.xlane.f32.xlu1 %v2143_v16  ;;  %v1521_v28 = vadd.f32 %v5498_v15, %v1087_v8  ;;  %v1735_v8 = vadd.f32 %v5672_v45, %v1516_v29 }
 0x12e   : > { %v1346_v10 = vpop.f32.mrb[31].mxu1  ;;  %v5732_v7 = vpop.f32.mrb[31].mxu0 }
 0x12f   : > { %v1586_v48 = vadd.f32 %v5498_v15, %v1346_v10  ;;  %v1524_v10 = vadd.f32 %v4797_v0, %v5498_v15  ;;  %v1863_v31 = vmax.f32 %v1735_v8, 0.0  ;;  %v2335_v8 = vsel %vm2103_vm1, %v2052_v4, 0.0 }
 0x131   : > { %2147 = vadd.xlane.f32.xlu0 %v2146_v24  ;;  %2162 = vadd.xlane.f32.xlu1 %v2161_v50  ;;  %v1926_v24 = vmax.f32 %v1798_v34, 0.0  ;;  %v1588_v50 = vadd.f32 %v4861_v49, %v5498_v15  ;;  %v1523_v49 = vadd.f32 %v5721_v17, %v5498_v15  ;;  %v5788_v55 = vadd.f32 %v5681_v58, %v1586_v48 }
 0x132   : > { %v2054_v17 = vmul.f32 %v5522_v37, %v1919_v9  ;;  %v1998_v41 = vmul.f32 %v5522_v37, %v1863_v31 }
 0x133   : > { %v5746_v39 = vpop.f32.mrb[32].mxu1  ;;  %v5748_v30 = vpop.f32.mrb[32].mxu0  ;;  %v5782_v34 = vadd.f32 %v5681_v58, %v1588_v50  ;;  %v2061_v42 = vmul.f32 %v5522_v37, %v1926_v24  ;;  %v5801_v33 = vadd.f32 %v5672_v45, %v1523_v49  ;;  %v5810_v50 = vadd.f32 %v5672_v45, %v1521_v28 }
 0x134   : > { %v5753_v47 = vpop.f32.mrb[33].mxu1  ;;  %v5755_v51 = vpop.f32.mrb[33].mxu0  ;;  %v1858_v49 = vmax.f32 %v1730_v20, 0.0  ;;  %v1733_v20 = vadd.f32 %v5672_v45, %v1514_v57 }
 0x135   : > { %2339 = vadd.xlane.f32.xlu0 %v2338_v59  ;;  %v5759_v40 = vpop.f32.mrb[34].mxu1  ;;  %v5761_v62 = vpop.f32.mrb[34].mxu0  ;;  %2354 = vadd.xlane.f32.xlu1 %v2353_v35  ;;  %v2056_v59 = vmul.f32 %v5522_v37, %v1921_v23  ;;  %v2332_v35 = vsel %vm2103_vm1, %v2051_v11, 0.0  ;;  %v5813_v11 = vadd.f32 %v5672_v45, %v1524_v10  ;;  %v2362_v28 = vsel %vm2103_vm1, %v2061_v42, 0.0 }
 0x136   : > { %v5764_v16 = vpop.f32.mrb[35].mxu1  ;;  %v5766_v63 = vpop.f32.mrb[35].mxu0  ;;  %v1583_v10 = vadd.f32 %v5683_v60, %v5498_v15  ;;  %v1573_v42 = vadd.f32 %v5498_v15, %v5604_v44  ;;  %v1993_v57 = vmul.f32 %v5522_v37, %v1858_v49  ;;  %v1581_v44 = vadd.f32 %v5498_v15, %v5691_v2 }
 0x137   : > { %v2347_v0 = vsel %vm2103_vm1, %v2056_v59, 0.0  ;;  %v1509_v59 = vadd.f32 %v5498_v15, %v5602_v43  ;;  %v2059_v43 = vmul.f32 %v5522_v37, %v1924_v52  ;;  %v1515_v2 = vadd.f32 %v5642_v19, %v5498_v15 }
 0x138   : > { %v1802_v60 = vadd.f32 %v5681_v58, %v1583_v10 }
 0x139   : > { %2141 = vadd.xlane.f32.xlu0 %v2140_v56  ;;  %2156 = vadd.xlane.f32.xlu1 %v2155_v25  ;;  %v1522_v25 = vadd.f32 %v5498_v15, %v5732_v7  ;;  %v1728_v26 = vadd.f32 %v5672_v45, %v1509_v59  ;;  %v2356_v10 = vsel %vm2103_vm1, %v2059_v43, 0.0  ;;  %v2158_v43 = vsel %vm2103_vm1, %v1993_v57, 0.0 }
 0x13a   : > { %v1513_v57 = vadd.f32 %v5498_v15, %v5649_v38 }
 0x13b   : > { %v5792_v23 = vpop.f32.mrb[36].mxu1  ;;  %v5794_v36 = vpop.f32.mrb[36].mxu0  ;;  %v5834_v7 = vadd.f32 %v5672_v45, %v1522_v25 }
 0x13c   : > { %v5803_v24 = vpop.f32.mrb[37].mxu1  ;;  %v5805_v56 = vpop.f32.mrb[37].mxu0 }
 0x13d   : > { %2333 = vadd.xlane.f32.xlu0 %v2332_v35  ;;  %v5815_v32 = vpop.f32.mrb[38].mxu1  ;;  %v5817_v9 = vpop.f32.mrb[38].mxu0  ;;  %2348 = vadd.xlane.f32.xlu1 %v2347_v0  ;;  %v1794_v35 = vadd.f32 %v5681_v58, %v1575_v18  ;;  %v2341_v0 = vsel %vm2103_vm1, %v2054_v17, 0.0 }
 0x13e   : > { %v5821_v48 = vpop.f32.mrb[39].mxu1  ;;  %v5823_v29 = vpop.f32.mrb[39].mxu0 }
 0x13f   : > { %v1922_v25 = vmax.f32 %v1794_v35, 0.0  ;;  %v1792_v35 = vadd.f32 %v5681_v58, %v1573_v42 }
 0x141   : > { %2342 = vadd.xlane.f32.xlu0 %v2341_v0  ;;  %2363 = vadd.xlane.f32.xlu1 %v2362_v28  ;;  %v1861_v28 = vmax.f32 %v1733_v20, 0.0  ;;  %v1930_v20 = vmax.f32 %v1802_v60, 0.0  ;;  %v2057_v31 = vmul.f32 %v5522_v37, %v1922_v25  ;;  %v1920_v42 = vmax.f32 %v1792_v35, 0.0 }
 0x142   : > { %v1734_v25 = vadd.f32 %v5672_v45, %v1515_v2 }
 0x143   : > { %v5841_v18 = vpop.f32.mrb[40].mxu0  ;;  %v5843_v17 = vpop.f32.mrb[40].mxu1  ;;  %v2065_v60 = vmul.f32 %v5522_v37, %v1930_v20  ;;  %v1584_v20 = vadd.f32 %v5700_v1, %v5498_v15 }
 0x144   : > { %v5848_v0 = vpop.f32.mrb[41].mxu0  ;;  %v5850_v52 = vpop.f32.mrb[41].mxu1  ;;  %v1862_v1 = vmax.f32 %v1734_v25, 0.0 }
 0x145   : > { %7706 = vst [vmem:[#allocation12_spill] sm:$0xff] %v5850_v52  ;;  %2336 = vadd.xlane.f32.xlu0 %v2335_v8  ;;  %v5856_v6 = vpop.f32.mrb[42].mxu0  ;;  %v5858_v59 = vpop.f32.mrb[42].mxu1  ;;  %2357 = vadd.xlane.f32.xlu1 %v2356_v10  ;;  %v1856_v52 = vmax.f32 %v1728_v26, 0.0  ;;  %v1800_v8 = vadd.f32 %v5681_v58, %v1581_v44  ;;  %v2173_v10 = vsel %vm2103_vm1, %v1998_v41, 0.0  ;;  %v2350_v41 = vsel %vm2103_vm1, %v2057_v31, 0.0 }
 0x146   : > { %7707 = vst [vmem:[#allocation13_spill] sm:$0xff] %v5858_v59  ;;  %v5860_v4 = vpop.f32.mrb[43].mxu0  ;;  %v5862_v49 = vpop.f32.mrb[43].mxu1  ;;  %v1520_v59 = vadd.f32 %v5702_v54, %v5498_v15 }
 0x147   : > { %7708 = vst [vmem:[#allocation14_spill] sm:$0xff] %v5862_v49  ;;  %v1996_v49 = vmul.f32 %v5522_v37, %v1861_v28  ;;  %v1991_v44 = vmul.f32 %v5522_v37, %v1856_v52  ;;  %v1928_v35 = vmax.f32 %v1800_v8, 0.0  ;;  %v1580_v8 = vadd.f32 %v5654_v27, %v5498_v15 }
 0x149   : > { %2159 = vadd.xlane.f32.xlu0 %v2158_v43  ;;  %2174 = vadd.xlane.f32.xlu1 %v2173_v10  ;;  %v1739_v43 = vadd.f32 %v5672_v45, %v1520_v59  ;;  %v2167_v2 = vsel %vm2103_vm1, %v1996_v49, 0.0  ;;  %v1732_v59 = vadd.f32 %v5672_v45, %v1513_v57  ;;  %v2055_v49 = vmul.f32 %v5522_v37, %v1920_v42 }
 0x14a   : > { %v1799_v27 = vadd.f32 %v5681_v58, %v1580_v8 }
 0x14b   : > { %v5875_v26 = vpop.f32.mrb[44].mxu1  ;;  %v5877_v19 = vpop.f32.mrb[44].mxu0  ;;  %v1860_v42 = vmax.f32 %v1732_v59, 0.0 }
 0x14c   : > { %7709 = vst [vmem:[#allocation15_spill] sm:$0xff] %v5877_v19  ;;  %v5884_v54 = vpop.f32.mrb[45].mxu1  ;;  %v5886_v28 = vpop.f32.mrb[45].mxu0  ;;  %v2374_v19 = vsel %vm2103_vm1, %v2065_v60, 0.0  ;;  %v1578_v60 = vadd.f32 %v5498_v15, %v5659_v5 }
 0x14d   : > { %2351 = vadd.xlane.f32.xlu0 %v2350_v41  ;;  %v5892_v10 = vpop.f32.mrb[46].mxu1  ;;  %v5894_v38 = vpop.f32.mrb[46].mxu0  ;;  %2168 = vadd.xlane.f32.xlu1 %v2167_v2  ;;  %v2152_v41 = vsel %vm2103_vm1, %v1991_v44, 0.0  ;;  %v1518_v2 = vadd.f32 %v5498_v15, %v5706_v22  ;;  %v1582_v44 = vadd.f32 %v5498_v15, %v5704_v21  ;;  %v1997_v22 = vmul.f32 %v5522_v37, %v1862_v1 }
 0x14e   : > { %7710 = vst [vmem:[#allocation16_spill] sm:$0xff] %v5892_v10  ;;  %7711 = vst [vmem:[#allocation17_spill] sm:$0xff] %v5894_v38  ;;  %v5896_v31 = vpop.f32.mrb[47].mxu1  ;;  %v5898_v52 = vpop.f32.mrb[47].mxu0  ;;  %v1803_v10 = vadd.f32 %v5681_v58, %v1584_v20  ;;  %v1867_v38 = vmax.f32 %v1739_v43, 0.0  ;;  %v2344_v20 = vsel %vm2103_vm1, %v2055_v49, 0.0 }
 0x14f   : > { %7712 = vst [vmem:[#allocation18_spill] sm:$0xff] %v5898_v52  ;;  %v2063_v52 = vmul.f32 %v5522_v37, %v1928_v35  ;;  %v1737_v8 = vadd.f32 %v5672_v45, %v1518_v2  ;;  %v1927_v49 = vmax.f32 %v1799_v27, 0.0  ;;  %v1519_v2 = vadd.f32 %v5685_v61, %v5498_v15 }
 0x150   : > { %v1931_v35 = vmax.f32 %v1803_v10, 0.0  ;;  %v1587_v10 = vadd.f32 %v5719_v46, %v5498_v15 }
 0x151   : > { %2153 = vadd.xlane.f32.xlu0 %v2152_v41  ;;  %2375 = vadd.xlane.f32.xlu1 %v2374_v19  ;;  %v2368_v5 = vsel %vm2103_vm1, %v2063_v52, 0.0  ;;  %v2002_v41 = vmul.f32 %v5522_v37, %v1867_v38  ;;  %v1669_v52 = vcombine.high %v5493_v14, %v5493_v14  ;;  %v1801_v38 = vadd.f32 %v5681_v58, %v1582_v44 }
 0x152   : > { %v1517_v14 = vadd.f32 %v5498_v15, %v5693_v3  ;;  %v1806_v44 = vadd.f32 %v5681_v58, %v1587_v10  ;;  %v1585_v3 = vadd.f32 %v5498_v15, %v5726_v53 }
 0x153   : > { %v5913_v25 = vpop.f32.mrb[48].mxu1  ;;  %v5915_v57 = vpop.f32.mrb[48].mxu0  ;;  %v2185_v27 = vsel %vm2103_vm1, %v2002_v41, 0.0 }
 0x154   : > { %7713 = vst [vmem:[#allocation19_spill] sm:$0xff] %v5915_v57  ;;  %v5921_v43 = vpop.f32.mrb[49].mxu1  ;;  %v5923_v19 = vpop.f32.mrb[49].mxu0  ;;  %v1934_v53 = vmax.f32 %v1806_v44, 0.0 }
 0x155   : > { %7714 = vst [vmem:[#allocation20_spill] sm:$0xff] %v5923_v19  ;;  %2345 = vadd.xlane.f32.xlu0 %v2344_v20  ;;  %v5928_v59 = vpop.f32.mrb[50].mxu1  ;;  %v5930_v57 = vpop.f32.mrb[50].mxu0  ;;  %2369 = vadd.xlane.f32.xlu1 %v2368_v5  ;;  %v1797_v19 = vadd.f32 %v5681_v58, %v1578_v60  ;;  %v2170_v20 = vsel %vm2103_vm1, %v1997_v22, 0.0  ;;  %v1995_v5 = vmul.f32 %v5522_v37, %v1860_v42  ;;  %v1929_v42 = vmax.f32 %v1801_v38, 0.0 }
 0x156   : > { %7715 = vst [vmem:[#allocation21_spill] sm:$0xff] %v5928_v59  ;;  %v5932_v21 = vpop.f32.mrb[51].mxu1  ;;  %v5934_v1 = vpop.f32.mrb[51].mxu0  ;;  %v2066_v60 = vmul.f32 %v5522_v37, %v1931_v35  ;;  %v5952_v59 = vrot.slane %v1669_v52, %v5489_v13  ;;  %v2062_v35 = vmul.f32 %v5522_v37, %v1927_v49  ;;  %v1601_v38 = vadd.f32 %v5498_v15, %v5884_v54 }
 0x157   : > { %7716 = vst [vmem:[#allocation22_spill] sm:$0xff] %v5932_v21  ;;  %v1865_v21 = vmax.f32 %v1737_v8, 0.0  ;;  %v1925_v46 = vmax.f32 %v1797_v19, 0.0  ;;  %v1738_v8 = vadd.f32 %v5672_v45, %v1519_v2  ;;  %v2164_v41 = vsel %vm2103_vm1, %v1995_v5, 0.0 }
 0x158   : > { %v2377_v10 = vsel %vm2103_vm1, %v2066_v60, 0.0  ;;  %v1668_v49 = vcombine.high %v5486_v12, %v5486_v12  ;;  %v5982_v60 = vadd.f32 %v5952_v59, %v1601_v38  ;;  %v2365_v54 = vsel %vm2103_vm1, %v2062_v35, 0.0 }
 0x159   : > { %2171 = vadd.xlane.f32.xlu0 %v2170_v20  ;;  %2186 = vadd.xlane.f32.xlu1 %v2185_v27  ;;  %v2000_v52 = vmul.f32 %v5522_v37, %v1865_v21  ;;  %v1866_v21 = vmax.f32 %v1738_v8, 0.0  ;;  %v1537_v8 = vadd.f32 %v5498_v15, %v5886_v28 }
 0x15a   : > { %v5991_v44 = vrot.slane %v1668_v49, %v5489_v13 }
 0x15b   : > { %v5954_v61 = vpop.f32.mrb[52].mxu1  ;;  %v5956_v22 = vpop.f32.mrb[52].mxu0  ;;  %v2179_v12 = vsel %vm2103_vm1, %v2000_v52, 0.0 }
 0x15c   : > { %7717 = vst [vmem:[#allocation23_spill] sm:$0xff] %v5956_v22  ;;  %v5961_v19 = vpop.f32.mrb[53].mxu1  ;;  %v5963_v20 = vpop.f32.mrb[53].mxu0  ;;  %v2060_v22 = vmul.f32 %v5522_v37, %v1925_v46  ;;  %v6005_v52 = vadd.f32 %v5991_v44, %v1537_v8  ;;  %v1870_v8 = vmax.f32 %v5801_v33, 0.0  ;;  %v1868_v33 = vmax.f32 %v5810_v50, 0.0 }
 0x15d   : > { %7718 = vst [vmem:[#allocation24_spill] sm:$0xff] %v5963_v20  ;;  %2165 = vadd.xlane.f32.xlu0 %v2164_v41  ;;  %v5971_v2 = vpop.f32.mrb[54].mxu1  ;;  %v5973_v5 = vpop.f32.mrb[54].mxu0  ;;  %2378 = vadd.xlane.f32.xlu1 %v2377_v10  ;;  %v1736_v41 = vadd.f32 %v5672_v45, %v1517_v14  ;;  %v1804_v10 = vadd.f32 %v5681_v58, %v1585_v3 }
 0x15e   : > { %v5977_v27 = vpop.f32.mrb[55].mxu1  ;;  %v5979_v20 = vpop.f32.mrb[55].mxu0  ;;  %v2069_v45 = vmul.f32 %v5522_v37, %v1934_v53  ;;  %v1602_v14 = vadd.f32 %v5498_v15, %v5896_v31  ;;  %v2359_v3 = vsel %vm2103_vm1, %v2060_v22, 0.0 }
 0x15f   : > { %7719 = vst [vmem:[#allocation25_spill] sm:$0xff] %v5977_v27  ;;  %v2064_v27 = vmul.f32 %v5522_v37, %v1929_v42  ;;  %v1864_v35 = vmax.f32 %v1736_v41, 0.0  ;;  %v2001_v42 = vmul.f32 %v5522_v37, %v1866_v21  ;;  %v1932_v49 = vmax.f32 %v1804_v10, 0.0 }
 0x160   : > { %v6013_v53 = vadd.f32 %v5952_v59, %v1602_v14  ;;  %v1871_v14 = vmax.f32 %v5813_v11, 0.0  ;;  %v2005_v11 = vmul.f32 %v5522_v37, %v1870_v8 }
 0x161   : > { %2366 = vadd.xlane.f32.xlu0 %v2365_v54  ;;  %2180 = vadd.xlane.f32.xlu1 %v2179_v12  ;;  %v2371_v31 = vsel %vm2103_vm1, %v2064_v27, 0.0  ;;  %v2386_v12 = vsel %vm2103_vm1, %v2069_v45, 0.0  ;;  %v2182_v10 = vsel %vm2103_vm1, %v2001_v42, 0.0  ;;  %v1999_v27 = vmul.f32 %v5522_v37, %v1864_v35 }
 0x163   : > { %v5998_v46 = vpop.f32.mrb[56].mxu1  ;;  %v6000_v58 = vpop.f32.mrb[56].mxu0  ;;  %v2176_v35 = vsel %vm2103_vm1, %v1999_v27, 0.0 }
 0x164   : > { %v6007_v38 = vpop.f32.mrb[57].mxu1  ;;  %v6009_v28 = vpop.f32.mrb[57].mxu0 }
 0x165   : > { %7720 = vst [vmem:[#allocation26_spill] sm:$0xff] %v6009_v28  ;;  %2360 = vadd.xlane.f32.xlu0 %v2359_v3  ;;  %v6015_v54 = vpop.f32.mrb[58].mxu1  ;;  %v6017_v41 = vpop.f32.mrb[58].mxu0  ;;  %2372 = vadd.xlane.f32.xlu1 %v2371_v31  ;;  %v2067_v3 = vmul.f32 %v5522_v37, %v1932_v49  ;;  %v1527_v31 = vadd.f32 %v5748_v30, %v5498_v15 }
 0x166   : > { %v6019_v22 = vpop.f32.mrb[59].mxu1  ;;  %v6021_v21 = vpop.f32.mrb[59].mxu0  ;;  %v1589_v28 = vadd.f32 %v5498_v15, %v5753_v47  ;;  %v2006_v15 = vmul.f32 %v5522_v37, %v1871_v14 }
 0x167   : > { %7721 = vst [vmem:[#allocation27_spill] sm:$0xff] %v6019_v22  ;;  %v2380_v30 = vsel %vm2103_vm1, %v2067_v3, 0.0  ;;  %v1746_v50 = vadd.f32 %v5991_v44, %v1527_v31  ;;  %v6061_v3 = vld [vmem:[%s7681_s3] ss:$0 sm:$0xff]  ;;  %v2003_v31 = vmul.f32 %v5522_v37, %v1868_v33 }
 0x168   : > { %v1591_v14 = vadd.f32 %v6061_v3, %v5746_v39  ;;  %v1525_v39 = vadd.f32 %v6061_v3, %v5755_v51 }
 0x169   : > { %2183 = vadd.xlane.f32.xlu0 %v2182_v10  ;;  %2387 = vadd.xlane.f32.xlu1 %v2386_v12  ;;  %v1869_v12 = vmax.f32 %v5834_v7, 0.0  ;;  %v1935_v7 = vmax.f32 %v5782_v34, 0.0  ;;  %v1528_v34 = vadd.f32 %v6061_v3, %v5761_v62  ;;  %v2188_v33 = vsel %vm2103_vm1, %v2003_v31, 0.0 }
 0x16b   : > { %v6033_v22 = vpop.f32.mrb[60].mxu1  ;;  %v6035_v45 = vpop.f32.mrb[60].mxu0  ;;  %v1747_v62 = vadd.f32 %v5991_v44, %v1528_v34 }
 0x16c   : > { %7722 = vst [vmem:[#allocation28_spill] sm:$0xff] %v6035_v45  ;;  %v6040_v42 = vpop.f32.mrb[61].mxu1  ;;  %v6042_v49 = vpop.f32.mrb[61].mxu0  ;;  %v1810_v45 = vadd.f32 %v5952_v59, %v1591_v14  ;;  %v1744_v14 = vadd.f32 %v5991_v44, %v1525_v39 }
 0x16d   : > { %7723 = vst [vmem:[#allocation29_spill] sm:$0xff] %v6040_v42  ;;  %7724 = vst [vmem:[#allocation30_spill] sm:$0xff] %v6042_v49  ;;  %2177 = vadd.xlane.f32.xlu0 %v2176_v35  ;;  %v6047_v47 = vpop.f32.mrb[62].mxu1  ;;  %v6049_v10 = vpop.f32.mrb[62].mxu0  ;;  %2381 = vadd.xlane.f32.xlu1 %v2380_v30  ;;  %v1808_v49 = vadd.f32 %v5952_v59, %v1589_v28  ;;  %v2194_v35 = vsel %vm2103_vm1, %v2005_v11, 0.0  ;;  %v1933_v30 = vmax.f32 %v5788_v55, 0.0 }
 0x16e   : > { %7725 = vst [vmem:[#allocation31_spill] sm:$0xff] %v6049_v10  ;;  %v6052_v27 = vpop.f32.mrb[63].mxu1  ;;  %v6054_v8 = vpop.f32.mrb[63].mxu0  ;;  %v2004_v28 = vmul.f32 %v5522_v37, %v1869_v12  ;;  %v1874_v10 = vmax.f32 %v1746_v50, 0.0  ;;  %v6079_v55 = vld [vmem:[%s7682_s4] ss:$0 sm:$0xff]  ;;  %v1526_v37 = vadd.f32 %v6061_v3, %v5766_v63 }
 0x16f   : > { %7726 = vst [vmem:[#allocation32_spill] sm:$0xff] %v6054_v8  ;;  %v2197_v8 = vsel %vm2103_vm1, %v2006_v15, 0.0  ;;  %v1936_v42 = vmax.f32 %v1808_v49, 0.0  ;;  %v2070_v11 = vmul.f32 %v6079_v55, %v1935_v7  ;;  %v2068_v12 = vmul.f32 %v6079_v55, %v1933_v30 }
 0x170   : > { %v2191_v49 = vsel %vm2103_vm1, %v2004_v28, 0.0  ;;  %v2009_v51 = vmul.f32 %v6079_v55, %v1874_v10  ;;  %v1595_v15 = vadd.f32 %v6061_v3, %v5792_v23  ;;  %v1592_v7 = vadd.f32 %v6061_v3, %v5759_v40 }
 0x171   : > { %2195 = vadd.xlane.f32.xlu0 %v2194_v35  ;;  %2198 = vadd.xlane.f32.xlu1 %v2197_v8  ;;  %v2071_v50 = vmul.f32 %v6079_v55, %v1936_v42  ;;  %v1938_v8 = vmax.f32 %v1810_v45, 0.0  ;;  %v2389_v63 = vsel %vm2103_vm1, %v2070_v11, 0.0  ;;  %v1875_v35 = vmax.f32 %v1747_v62, 0.0 }
 0x172   : > { %v1745_v31 = vadd.f32 %v5991_v44, %v1526_v37  ;;  %v2383_v30 = vsel %vm2103_vm1, %v2068_v12, 0.0  ;;  %v1590_v10 = vadd.f32 %v6061_v3, %v5764_v16  ;;  %v2206_v23 = vsel %vm2103_vm1, %v2009_v51, 0.0 }
 0x173   : > { %v1814_v45 = vadd.f32 %v5952_v59, %v1595_v15  ;;  %v2392_v40 = vsel %vm2103_vm1, %v2071_v50, 0.0  ;;  %v1811_v42 = vadd.f32 %v5952_v59, %v1592_v7  ;;  %v1872_v34 = vmax.f32 %v1744_v14, 0.0 }
 0x174   : > { %v2073_v28 = vmul.f32 %v6079_v55, %v1938_v8  ;;  %v1873_v39 = vmax.f32 %v1745_v31, 0.0  ;;  %v2010_v11 = vmul.f32 %v6079_v55, %v1875_v35  ;;  %v1809_v16 = vadd.f32 %v5952_v59, %v1590_v10 }
 0x175   : > { %2189 = vadd.xlane.f32.xlu0 %v2188_v33  ;;  %2192 = vadd.xlane.f32.xlu1 %v2191_v49  ;;  %v1593_v33 = vadd.f32 %v6061_v3, %v5803_v24  ;;  %v1942_v62 = vmax.f32 %v1814_v45, 0.0  ;;  %v1531_v37 = vadd.f32 %v6061_v3, %v5794_v36  ;;  %v1939_v49 = vmax.f32 %v1811_v42, 0.0 }
 0x176   : > { %v1596_v12 = vadd.f32 %v6061_v3, %v5815_v32  ;;  %v2398_v51 = vsel %vm2103_vm1, %v2073_v28, 0.0  ;;  %v2007_v15 = vmul.f32 %v6079_v55, %v1872_v34  ;;  %v2209_v50 = vsel %vm2103_vm1, %v2010_v11, 0.0 }
 0x177   : > { %v1812_v24 = vadd.f32 %v5952_v59, %v1593_v33  ;;  %v1532_v8 = vadd.f32 %v6061_v3, %v5817_v9  ;;  %v2008_v7 = vmul.f32 %v6079_v55, %v1873_v39  ;;  %v1937_v14 = vmax.f32 %v1809_v16, 0.0 }
 0x178   : > { %v1594_v36 = vadd.f32 %v6061_v3, %v5821_v48  ;;  %v1529_v32 = vadd.f32 %v6061_v3, %v5805_v56  ;;  %v1530_v35 = vadd.f32 %v6061_v3, %v5823_v29  ;;  %v2077_v31 = vmul.f32 %v6079_v55, %v1942_v62 }
 0x179   : > { %2390 = vadd.xlane.f32.xlu0 %v2389_v63  ;;  %2384 = vadd.xlane.f32.xlu1 %v2383_v30  ;;  %v1750_v63 = vadd.f32 %v5991_v44, %v1531_v37  ;;  %v7727_v30 = vlaneseq  ;;  %v6131_v9 = vadd.f32 %v5952_v59, %v1596_v12  ;;  %v2074_v48 = vmul.f32 %v6079_v55, %v1939_v49  ;;  %v7729_v49 = vld [vmem:[#allocation12_spill] sm:$0xff] }
 0x17a   : > { %v1535_v56 = vadd.f32 %v6061_v3, %v5841_v18  ;;  %v1940_v45 = vmax.f32 %v1812_v24, 0.0  ;;  %v2203_v29 = vsel %vm2103_vm1, %v2008_v7, 0.0  ;;  %v1533_v42 = vadd.f32 %v6061_v3, %v5848_v0 }
 0x17b   : > { %v6128_v10 = vand.u32 127, %v7727_v30  ;;  %v6142_v34 = vadd.f32 %v5952_v59, %v1594_v36  ;;  %v1748_v28 = vadd.f32 %v5991_v44, %v1529_v32  ;;  %v1536_v39 = vadd.f32 %v6061_v3, %v5856_v6 }
 0x17c   : > { %v1599_v18 = vadd.f32 %v6061_v3, %v5843_v17  ;;  %v1878_v33 = vmax.f32 %v1750_v63, 0.0  ;;  %v1749_v11 = vadd.f32 %v5991_v44, %v1530_v35  ;;  %v2410_v16 = vsel %vm2103_vm1, %v2077_v31, 0.0  ;;  %v7730_v35 = vld [vmem:[#allocation8_spill] sm:$0xff] }
 0x17d   : > { %2207 = vadd.xlane.f32.xlu0 %v2206_v23  ;;  %2393 = vadd.xlane.f32.xlu1 %v2392_v40  ;;  %7728 = vst [vmem:[#allocation33_spill] sm:$0xff] %v6128_v10  ;;  %v2200_v23 = vsel %vm2103_vm1, %v2007_v15, 0.0  ;;  %v1751_v40 = vadd.f32 %v5991_v44, %v1532_v8  ;;  %v2630_v62 = vadd.s32 4294967280, %v6128_v10  ;;  %v2401_v0 = vsel %vm2103_vm1, %v2074_v48, 0.0 }
 0x17e   : > { %v6154_v37 = vadd.f32 %v5991_v44, %v1535_v56  ;;  %v1597_v12 = vadd.f32 %v6061_v3, %v7729_v49  ;;  %v2072_v6 = vmul.f32 %v6079_v55, %v1937_v14  ;;  %v6161_v15 = vadd.f32 %v5991_v44, %v1533_v42  ;;  %v7731_v42 = vld [vmem:[#allocation13_spill] sm:$0xff] }
 0x17f   : > { %v1879_v17 = vmax.f32 %v1751_v40, 0.0  ;;  %v2075_v24 = vmul.f32 %v6079_v55, %v1940_v45  ;;  %v1876_v8 = vmax.f32 %v1748_v28, 0.0  ;;  %v1755_v32 = vadd.f32 %v5991_v44, %v1536_v39  ;;  %v7735_v40 = vld [vmem:[#allocation11_spill] sm:$0xff] }
 0x180   : > { %v6171_v14 = vadd.f32 %v5952_v59, %v1599_v18  ;;  %v1877_v63 = vmax.f32 %v1749_v11, 0.0  ;;  %v6174_v31 = vsub.s32 %v2630_v62, %v7730_v35  ;;  %v1534_v30 = vadd.f32 %v6061_v3, %v5860_v4 }
 0x181   : > { %2399 = vadd.xlane.f32.xlu0 %v2398_v51  ;;  %2210 = vadd.xlane.f32.xlu1 %v2209_v50  ;;  %v1943_v51 = vmax.f32 %v6131_v9, 0.0  ;;  %v1941_v50 = vmax.f32 %v6142_v34, 0.0  ;;  %v1603_v9 = vadd.f32 %v6061_v3, %v5875_v26  ;;  %v6182_v48 = vadd.f32 %v5952_v59, %v1597_v12 }
 0x182   : > { %v2395_v56 = vsel %vm2103_vm1, %v2072_v6, 0.0  ;;  %v2013_v45 = vmul.f32 %v6079_v55, %v1878_v33  ;;  %v1600_v4 = vadd.f32 %v6061_v3, %v7731_v42  ;;  %v2014_v28 = vmul.f32 %v6079_v55, %v1879_v17  ;;  %v7732_v33 = vld [vmem:[#allocation14_spill] sm:$0xff] }
 0x183   : > { %v1883_v26 = vmax.f32 %v1755_v32, 0.0  ;;  %v2637_v11 = vadd.s32 4294967272, %v6128_v10  ;;  %v1598_v62 = vadd.f32 %v6061_v3, %v7732_v33  ;;  %v6200_v49 = vsub.s32 %v6128_v10, %v7730_v35  ;;  %v7734_v33 = vld [vmem:[#allocation17_spill] sm:$0xff] }
 0x184   : > { %v1822_v12 = vadd.f32 %v5952_v59, %v1603_v9  ;;  %v2623_v6 = vadd.s32 4294967288, %v6128_v10  ;;  %v2218_v17 = vsel %vm2103_vm1, %v2013_v45, 0.0  ;;  %v2012_v32 = vmul.f32 %v6079_v55, %v1877_v63 }
 0x185   : > { %2201 = vadd.xlane.f32.xlu0 %v2200_v23  ;;  %2204 = vadd.xlane.f32.xlu1 %v2203_v29  ;;  %v2404_v29 = vsel %vm2103_vm1, %v2075_v24, 0.0  ;;  %v2011_v24 = vmul.f32 %v6079_v55, %v1876_v8  ;;  %v6210_v42 = vadd.f32 %v5952_v59, %v1600_v4  ;;  %v1540_v9 = vadd.f32 %v6061_v3, %v7734_v33 }
 0x186   : > { %v1671_v39 = vcombine.high %v7735_v40, %v7735_v40  ;;  %v6218_v45 = vsub.s32 %v2637_v11, %v7730_v35  ;;  %v6221_v8 = vadd.f32 %v5952_v59, %v1598_v62  ;;  %v2078_v4 = vmul.f32 %v6079_v55, %v1943_v51 }
 0x187   : > { %v1950_v23 = vmax.f32 %v1822_v12, 0.0  ;;  %v6226_v33 = vsub.s32 %v2623_v6, %v7730_v35  ;;  %v2212_v40 = vsel %vm2103_vm1, %v2011_v24, 0.0  ;;  %v2215_v11 = vsel %vm2103_vm1, %v2012_v32, 0.0 }
 0x188   : > { %v6234_v51 = vadd.f32 %v5991_v44, %v1540_v9  ;;  %v6239_v12 = vrot.slane %v1671_v39, %v5489_v13  ;;  %v1619_v6 = vadd.f32 %v6061_v3, %v6033_v22  ;;  %v2413_v32 = vsel %vm2103_vm1, %v2078_v4, 0.0 }
 0x189   : > { %2402 = vadd.xlane.f32.xlu0 %v2401_v0  ;;  %2411 = vadd.xlane.f32.xlu1 %v2410_v16  ;;  %v1753_v0 = vadd.f32 %v5991_v44, %v1534_v30  ;;  %v2221_v30 = vsel %vm2103_vm1, %v2014_v28, 0.0 }
 0x18a   : > { %v6165_v7 = vpop.xlane.xlu0 %2303  ;;  %v6167_v36 = vpop.xlane.xlu1 %2111  ;;  %v6253_v22 = vadd.f32 %v6239_v12, %v1619_v6 }
 0x18b   : > { %v2634_v4 = vrot.slane %v6167_v36, %v6174_v31 }
 0x18d   : > { %2396 = vadd.xlane.f32.xlu0 %v2395_v56  ;;  %2405 = vadd.xlane.f32.xlu1 %v2404_v29  ;;  %v7733_v56 = vld [vmem:[#allocation16_spill] sm:$0xff] }
 0x18e   : > { %v2106_v18 = vpop.xlane.xlu0 %2105  ;;  %v6193_v16 = vpop.xlane.xlu1 %2114  ;;  %v1604_v29 = vadd.f32 %v6061_v3, %v7733_v56  ;;  %v1881_v56 = vmax.f32 %v1753_v0, 0.0 }
 0x18f   : > { %v2622_v9 = vrot.slane %v2106_v18, %v6200_v49  ;;  %v2641_v18 = vrot.slane %v6193_v16, %v6218_v45 }
 0x190   : > { %v6231_v62 = vadd.f32 %v5952_v59, %v1604_v29  ;;  %v2076_v29 = vmul.f32 %v6079_v55, %v1941_v50 }
 0x191   : > { %2219 = vadd.xlane.f32.xlu0 %v2218_v17  ;;  %2222 = vadd.xlane.f32.xlu1 %v2221_v30  ;;  %v2018_v17 = vmul.f32 %v6079_v55, %v1883_v26  ;;  %v7736_v26 = vld [vmem:[#allocation18_spill] sm:$0xff]  ;;  %v1620_v30 = vadd.f32 %v6061_v3, %v6047_v47  ;;  %v2977_v47 = vrot.slane %v6165_v7, %v6174_v31 }
 0x192   : > { %v2298_v63 = vpop.xlane.xlu0 %2297  ;;  %v2307_v28 = vpop.xlane.xlu1 %2306  ;;  %v1538_v0 = vadd.f32 %v6061_v3, %v7736_v26  ;;  %v2016_v26 = vmul.f32 %v6079_v55, %v1881_v56 }
 0x193   : > { %v2233_v59 = vsel %vm2103_vm1, %v2018_v17, 0.0  ;;  %v2968_v17 = vrot.slane %v2298_v63, %v6200_v49  ;;  %v6260_v50 = vadd.f32 %v6239_v12, %v1620_v30  ;;  %v2982_v36 = vrot.slane %v2307_v28, %v6218_v45 }
 0x194   : > { %v7737_v30 = vmax.f32 %v6154_v37, 0.0  ;;  %v2644_v28 = vadd.s32 4294967264, %v6128_v10  ;;  %v1618_v37 = vadd.f32 %v6061_v3, %v6052_v27 }
 0x195   : > { %2213 = vadd.xlane.f32.xlu0 %v2212_v40  ;;  %2216 = vadd.xlane.f32.xlu1 %v2215_v11 }
 0x196   : > { %v2109_v24 = vpop.xlane.xlu0 %2108  ;;  %v2301_v39 = vpop.xlane.xlu1 %2300  ;;  %v2017_v7 = vmul.f32 %v6079_v55, %v7737_v30  ;;  %v6301_v27 = vadd.f32 %v6239_v12, %v1618_v37  ;;  %v7739_v37 = vld [vmem:[#allocation15_spill] sm:$0xff] }
 0x197   : > { %v2627_v40 = vrot.slane %v2109_v24, %v6226_v33  ;;  %v2972_v34 = vrot.slane %v2301_v39, %v6226_v33 }
 0x199   : > { %v2629_v11 = vsel %vm2628_vm2, %v2627_v40, %v2622_v9  ;;  %2414 = vadd.xlane.f32.xlu0 %v2413_v32  ;;  %v2973_v63 = vsel %vm2628_vm2, %v2972_v34, %v2968_v17  ;;  %2234 = vadd.xlane.f32.xlu1 %v2233_v59  ;;  %v2085_v32 = vmul.f32 %v6079_v55, %v1950_v23  ;;  %v2407_v9 = vsel %vm2103_vm1, %v2076_v29, 0.0 }
 0x19a   : > { %v2636_v6 = vsel %vm2635_vm3, %v2634_v4, %v2629_v11  ;;  %v6271_v24 = vpop.xlane.xlu0 %2123  ;;  %v2978_v16 = vsel %vm2635_vm3, %v2977_v47, %v2973_v63  ;;  %v6277_v39 = vpop.xlane.xlu1 %2126  ;;  %v2651_v59 = vadd.s32 4294967256, %v6128_v10  ;;  %v1887_v4 = vmax.f32 %v6234_v51, 0.0 }
 0x19b   : > { %v2643_v56 = vsel %vm2642_vm4, %v2641_v18, %v2636_v6  ;;  %v6285_v40 = vsel %vm2642_vm4, %v2982_v36, %v2978_v16  ;;  %v6291_v17 = vadd.f32 %v5991_v44, %v1538_v0  ;;  %v2658_v23 = vadd.s32 4294967248, %v6128_v10 }
 0x19c   : > { %v2227_v34 = vsel %vm2103_vm1, %v2016_v26, 0.0  ;;  %v1944_v29 = vmax.f32 %v6182_v48, 0.0  ;;  %v1947_v47 = vmax.f32 %v6210_v42, 0.0  ;;  %v2665_v18 = vadd.s32 4294967240, %v6128_v10 }
 0x19d   : > { %2408 = vadd.xlane.f32.xlu0 %v2407_v9  ;;  %2228 = vadd.xlane.f32.xlu1 %v2227_v34  ;;  %v2434_v36 = vsel %vm2103_vm1, %v2085_v32, 0.0  ;;  %v6308_v26 = vsub.s32 %v2644_v28, %v7730_v35  ;;  %v1607_v48 = vadd.f32 %v6061_v3, %v5913_v25  ;;  %v1951_v63 = vmax.f32 %v6231_v62, 0.0 }
 0x19e   : > { %v6298_v11 = vpop.xlane.xlu0 %2315  ;;  %v6304_v0 = vpop.xlane.xlu1 %2318  ;;  %v2230_v6 = vsel %vm2103_vm1, %v2017_v7, 0.0  ;;  %v6315_v30 = vsub.s32 %v2651_v59, %v7730_v35  ;;  %v7738_v16 = vmax.f32 %v6171_v14, 0.0  ;;  %v1539_v32 = vadd.f32 %v6061_v3, %v7739_v37  ;;  %v7741_v37 = vld [vmem:[#allocation10_spill] sm:$0xff] }
 0x19f   : > { %v1885_v28 = vmax.f32 %v6291_v17, 0.0  ;;  %v6324_v34 = vsub.s32 %v2658_v23, %v7730_v35  ;;  %v2022_v25 = vmul.f32 %v6079_v55, %v1887_v4  ;;  %v6328_v62 = vsub.s32 %v2665_v18, %v7730_v35 }
 0x1a0   : > { %v2081_v9 = vmul.f32 %v6079_v55, %v7738_v16  ;;  %v1605_v14 = vadd.f32 %v6061_v3, %v5921_v43  ;;  %v7740_v59 = vmax.f32 %v6161_v15, 0.0  ;;  %v1826_v4 = vadd.f32 %v6239_v12, %v1607_v48 }
 0x1a1   : > { %2231 = vadd.xlane.f32.xlu0 %v2230_v6  ;;  %2435 = vadd.xlane.f32.xlu1 %v2434_v36  ;;  %v2086_v6 = vmul.f32 %v6079_v55, %v1951_v63  ;;  %v1670_v43 = vcombine.high %v7741_v37, %v7741_v37  ;;  %v2662_v15 = vrot.slane %v6271_v24, %v6324_v34 }
 0x1a2   : > { %v2118_v7 = vpop.xlane.xlu0 %2117  ;;  %v2015_v16 = vmul.f32 %v6079_v55, %v7740_v59  ;;  %v2121_v23 = vpop.xlane.xlu1 %2120  ;;  %v2422_v36 = vsel %vm2103_vm1, %v2081_v9, 0.0  ;;  %v2669_v48 = vrot.slane %v6277_v39, %v6328_v62  ;;  %v1824_v9 = vadd.f32 %v6239_v12, %v1605_v14 }
 0x1a3   : > { %v2648_v17 = vrot.slane %v2118_v7, %v6308_v26  ;;  %v2655_v18 = vrot.slane %v2121_v23, %v6315_v30  ;;  %v2245_v7 = vsel %vm2103_vm1, %v2022_v25, 0.0  ;;  %v1954_v24 = vmax.f32 %v1826_v4, 0.0 }
 0x1a4   : > { %v2224_v37 = vsel %vm2103_vm1, %v2015_v16, 0.0  ;;  %v1544_v25 = vadd.f32 %v6061_v3, %v5930_v57  ;;  %v6357_v39 = vrot.slane %v1670_v43, %v5489_v13  ;;  %v2079_v14 = vmul.f32 %v6079_v55, %v1944_v29 }
 0x1a5   : > { %v2650_v59 = vsel %vm2649_vm5, %v2648_v17, %v2643_v56  ;;  %2423 = vadd.xlane.f32.xlu0 %v2422_v36  ;;  %2246 = vadd.xlane.f32.xlu1 %v2245_v7  ;;  %v2997_v16 = vrot.slane %v6298_v11, %v6324_v34  ;;  %v2020_v57 = vmul.f32 %v6079_v55, %v1885_v28 }
 0x1a6   : > { %v2657_v23 = vsel %vm2656_vm6, %v2655_v18, %v2650_v59  ;;  %v2310_v63 = vpop.xlane.xlu0 %2309  ;;  %v2313_v17 = vpop.xlane.xlu1 %2312  ;;  %v1758_v59 = vadd.f32 %v5991_v44, %v1539_v32  ;;  %v3002_v43 = vrot.slane %v6304_v0, %v6328_v62  ;;  %v1542_v11 = vadd.f32 %v6061_v3, %v5934_v1 }
 0x1a7   : > { %v2664_v51 = vsel %vm2663_vm7, %v2662_v15, %v2657_v23  ;;  %v2987_v56 = vrot.slane %v2310_v63, %v6308_v26  ;;  %v2992_v36 = vrot.slane %v2313_v17, %v6315_v30  ;;  %v2437_v15 = vsel %vm2103_vm1, %v2086_v6, 0.0 }
 0x1a8   : > { %v2671_v18 = vsel %vm2670_vm8, %v2669_v48, %v2664_v51  ;;  %v2679_v6 = vadd.s32 4294967224, %v6128_v10  ;;  %v2089_v28 = vmul.f32 %v6079_v55, %v1954_v24  ;;  %v2672_v44 = vadd.s32 4294967232, %v6128_v10 }
 0x1a9   : > { %v2988_v4 = vsel %vm2649_vm5, %v2987_v56, %v6285_v40  ;;  %2225 = vadd.xlane.f32.xlu0 %v2224_v37  ;;  %2438 = vadd.xlane.f32.xlu1 %v2437_v15  ;;  %v1763_v0 = vadd.f32 %v6357_v39, %v1544_v25  ;;  %v2416_v32 = vsel %vm2103_vm1, %v2079_v14, 0.0  ;;  %v2082_v48 = vmul.f32 %v6079_v55, %v1947_v47 }
 0x1aa   : > { %v2993_v29 = vsel %vm2656_vm6, %v2992_v36, %v2988_v4  ;;  %v6371_v51 = vpop.xlane.xlu0 %2135  ;;  %v6376_v7 = vpop.xlane.xlu1 %2138  ;;  %v1952_v23 = vmax.f32 %v1824_v9, 0.0  ;;  %v2686_v63 = vadd.s32 4294967216, %v6128_v10  ;;  %v2239_v37 = vsel %vm2103_vm1, %v2020_v57, 0.0 }
 0x1ab   : > { %v2998_v40 = vsel %vm2663_vm7, %v2997_v16, %v2993_v29  ;;  %v2693_v24 = vadd.s32 4294967208, %v6128_v10  ;;  %v1761_v56 = vadd.f32 %v6357_v39, %v1542_v11  ;;  %v1886_v25 = vmax.f32 %v1758_v59, 0.0 }
 0x1ac   : > { %v3003_v1 = vsel %vm2670_vm8, %v3002_v43, %v2998_v40  ;;  %v2446_v42 = vsel %vm2103_vm1, %v2089_v28, 0.0  ;;  %v6395_v47 = vsub.s32 %v2672_v44, %v7730_v35  ;;  %v1611_v9 = vadd.f32 %v6061_v3, %v5954_v61 }
 0x1ad   : > { %2417 = vadd.xlane.f32.xlu0 %v2416_v32  ;;  %2240 = vadd.xlane.f32.xlu1 %v2239_v37  ;;  %v1891_v14 = vmax.f32 %v1763_v0, 0.0  ;;  %v6400_v16 = vsub.s32 %v2679_v6, %v7730_v35  ;;  %v2425_v4 = vsel %vm2103_vm1, %v2082_v48, 0.0  ;;  %v7742_v15 = vmax.f32 %v6221_v8, 0.0 }
 0x1ae   : > { %v6391_v17 = vpop.xlane.xlu0 %2327  ;;  %v2133_v36 = vpop.xlane.xlu1 %2132  ;;  %v1948_v59 = vmax.f32 %v5982_v60, 0.0  ;;  %v1884_v43 = vmax.f32 %v6005_v52, 0.0  ;;  %v6409_v29 = vsub.s32 %v2686_v63, %v7730_v35  ;;  %v2087_v61 = vmul.f32 %v6079_v55, %v1952_v23 }
 0x1af   : > { %v2080_v57 = vmul.f32 %v6079_v55, %v7742_v15  ;;  %v6413_v11 = vsub.s32 %v2693_v24, %v7730_v35  ;;  %v1889_v40 = vmax.f32 %v1761_v56, 0.0  ;;  %v1609_v8 = vadd.f32 %v6061_v3, %v5961_v19  ;;  %v7743_v24 = vld [vmem:[#allocation19_spill] sm:$0xff] }
 0x1b0   : > { %v1830_v28 = vadd.f32 %v6239_v12, %v1611_v9  ;;  %v2021_v44 = vmul.f32 %v6079_v55, %v1886_v25  ;;  %v2683_v0 = vrot.slane %v2133_v36, %v6400_v16  ;;  %v2026_v48 = vmul.f32 %v6079_v55, %v1891_v14 }
 0x1b1   : > { %2426 = vadd.xlane.f32.xlu0 %v2425_v4  ;;  %2447 = vadd.xlane.f32.xlu1 %v2446_v42  ;;  %v2419_v32 = vsel %vm2103_vm1, %v2080_v57, 0.0  ;;  %v2690_v23 = vrot.slane %v6371_v51, %v6409_v29  ;;  %v2440_v63 = vsel %vm2103_vm1, %v2087_v61, 0.0  ;;  %v2697_v37 = vrot.slane %v6376_v7, %v6413_v11 }
 0x1b2   : > { %v2130_v6 = vpop.xlane.xlu0 %2129  ;;  %v2325_v52 = vpop.xlane.xlu1 %2324  ;;  %v1543_v56 = vadd.f32 %v6061_v3, %v7743_v24  ;;  %v1828_v36 = vadd.f32 %v6239_v12, %v1609_v8  ;;  %v1958_v9 = vmax.f32 %v1830_v28, 0.0  ;;  %v2242_v14 = vsel %vm2103_vm1, %v2021_v44, 0.0  ;;  %v7744_v44 = vld [vmem:[#allocation21_spill] sm:$0xff] }
 0x1b3   : > { %v2676_v60 = vrot.slane %v2130_v6, %v6395_v47  ;;  %v3012_v7 = vrot.slane %v2325_v52, %v6400_v16  ;;  %v2257_v15 = vsel %vm2103_vm1, %v2026_v48, 0.0  ;;  %v2019_v57 = vmul.f32 %v6079_v55, %v1884_v43 }
 0x1b4   : > { %v3017_v6 = vrot.slane %v6391_v17, %v6409_v29  ;;  %v2024_v28 = vmul.f32 %v6079_v55, %v1889_v40  ;;  %v1608_v52 = vadd.f32 %v6061_v3, %v7744_v44  ;;  %v1762_v17 = vadd.f32 %v6357_v39, %v1543_v56 }
 0x1b5   : > { %v2678_v19 = vsel %vm2677_vm9, %v2676_v60, %v2671_v18  ;;  %2420 = vadd.xlane.f32.xlu0 %v2419_v32  ;;  %2441 = vadd.xlane.f32.xlu1 %v2440_v63  ;;  %v1548_v60 = vadd.f32 %v6061_v3, %v5973_v5  ;;  %v2093_v5 = vmul.f32 %v6079_v55, %v1958_v9  ;;  %v1949_v40 = vmax.f32 %v6013_v53, 0.0  ;;  %v7746_v53 = vld [vmem:[#allocation22_spill] sm:$0xff] }
 0x1b6   : > { %v2685_v25 = vsel %vm2684_vm10, %v2683_v0, %v2678_v19  ;;  %v2322_v42 = vpop.xlane.xlu0 %2321  ;;  %v6434_v18 = vpop.xlane.xlu1 %2150  ;;  %v7745_v0 = vld [vmem:[#allocation20_spill] sm:$0xff]  ;;  %v1612_v63 = vadd.f32 %v6061_v3, %v5971_v2  ;;  %v2083_v24 = vmul.f32 %v6079_v55, %v1948_v59  ;;  %v6472_v9 = vadd.f32 %v6239_v12, %v1608_v52 }
 0x1b7   : > { %v3007_v51 = vrot.slane %v2322_v42, %v6395_v47  ;;  %v2692_v4 = vsel %vm2691_vm11, %v2690_v23, %v2685_v25  ;;  %v1541_v43 = vadd.f32 %v6061_v3, %v7745_v0  ;;  %v1956_v25 = vmax.f32 %v1828_v36, 0.0 }
 0x1b8   : > { %v6442_v61 = vsel %vm2698_vm12, %v2697_v37, %v2692_v4  ;;  %v2236_v37 = vsel %vm2103_vm1, %v2019_v57, 0.0  ;;  %v1767_v42 = vadd.f32 %v6357_v39, %v1548_v60  ;;  %v1546_v2 = vadd.f32 %v6061_v3, %v5979_v20 }
 0x1b9   : > { %v3008_v8 = vsel %vm2677_vm9, %v3007_v51, %v3003_v1  ;;  %2243 = vadd.xlane.f32.xlu0 %v2242_v14  ;;  %2258 = vadd.xlane.f32.xlu1 %v2257_v15  ;;  %v2251_v51 = vsel %vm2103_vm1, %v2024_v28, 0.0  ;;  %v1606_v14 = vadd.f32 %v6061_v3, %v7746_v53  ;;  %v1890_v36 = vmax.f32 %v1762_v17, 0.0 }
 0x1ba   : > { %v3013_v32 = vsel %vm2684_vm10, %v3012_v7, %v3008_v8  ;;  %v2331_v48 = vpop.xlane.xlu0 %2330  ;;  %v6458_v19 = vpop.xlane.xlu1 %2144  ;;  %v1760_v4 = vadd.f32 %v6357_v39, %v1541_v43  ;;  %v2458_v15 = vsel %vm2103_vm1, %v2093_v5, 0.0  ;;  %v2700_v57 = vadd.s32 4294967200, %v6128_v10 }
 0x1bb   : > { %v3018_v1 = vsel %vm2691_vm11, %v3017_v6, %v3013_v32  ;;  %v3022_v23 = vrot.slane %v2331_v48, %v6413_v11  ;;  %v2721_v6 = vadd.s32 4294967176, %v6128_v10  ;;  %v2707_v8 = vadd.s32 4294967192, %v6128_v10 }
 0x1bc   : > { %v2428_v60 = vsel %vm2103_vm1, %v2083_v24, 0.0  ;;  %v2084_v28 = vmul.f32 %v6079_v55, %v1949_v40  ;;  %v1831_v20 = vadd.f32 %v6239_v12, %v1612_v63  ;;  %v1895_v44 = vmax.f32 %v1767_v42, 0.0 }
 0x1bd   : > { %v6467_v56 = vsel %vm2698_vm12, %v3022_v23, %v3018_v1  ;;  %2237 = vadd.xlane.f32.xlu0 %v2236_v37  ;;  %2252 = vadd.xlane.f32.xlu1 %v2251_v51  ;;  %v2714_v52 = vadd.s32 4294967184, %v6128_v10  ;;  %v2091_v0 = vmul.f32 %v6079_v55, %v1956_v25  ;;  %v6491_v43 = vadd.f32 %v6239_v12, %v1606_v14 }
 0x1be   : > { %v2148_v59 = vpop.xlane.xlu0 %2147  ;;  %v6479_v7 = vpop.xlane.xlu1 %2162  ;;  %v1765_v32 = vadd.f32 %v6357_v39, %v1546_v2  ;;  %v1955_v17 = vmax.f32 %v6472_v9, 0.0  ;;  %v1888_v1 = vmax.f32 %v1760_v4, 0.0  ;;  %v6500_v5 = vsub.s32 %v2700_v57, %v7730_v35 }
 0x1bf   : > { %v1615_v40 = vadd.f32 %v6061_v3, %v5998_v46  ;;  %v6505_v63 = vsub.s32 %v2721_v6, %v7730_v35  ;;  %v6508_v37 = vsub.s32 %v2707_v8, %v7730_v35  ;;  %v2431_v24 = vsel %vm2103_vm1, %v2084_v28, 0.0  ;;  %v7750_v46 = vld [vmem:[#allocation23_spill] sm:$0xff] }
 0x1c0   : > { %7747 = vst [vmem:[#allocation12_spill] sm:$0xff] %v6500_v5  ;;  %v2025_v25 = vmul.f32 %v6079_v55, %v1890_v36  ;;  %v1959_v42 = vmax.f32 %v1831_v20, 0.0  ;;  %v6513_v51 = vsub.s32 %v2714_v52, %v7730_v35  ;;  %v2452_v9 = vsel %vm2103_vm1, %v2091_v0, 0.0 }
 0x1c1   : > { %2429 = vadd.xlane.f32.xlu0 %v2428_v60  ;;  %2459 = vadd.xlane.f32.xlu1 %v2458_v15  ;;  %7748 = vst [vmem:[#allocation13_spill] sm:$0xff] %v6508_v37  ;;  %v2030_v53 = vmul.f32 %v6079_v55, %v1895_v44  ;;  %v1547_v14 = vadd.f32 %v6061_v3, %v7750_v46  ;;  %v1893_v2 = vmax.f32 %v1765_v32, 0.0  ;;  %v7751_v32 = vld [vmem:[#allocation24_spill] sm:$0xff] }
 0x1c2   : > { %v6494_v48 = vpop.xlane.xlu0 %2339  ;;  %v6497_v23 = vpop.xlane.xlu1 %2354  ;;  %7749 = vst [vmem:[#allocation14_spill] sm:$0xff] %v6513_v51  ;;  %v1834_v57 = vadd.f32 %v6239_v12, %v1615_v40  ;;  %v2711_v6 = vrot.slane %v6458_v19, %v6508_v37  ;;  %v1613_v8 = vadd.f32 %v6061_v3, %v6007_v38  ;;  %v2254_v60 = vsel %vm2103_vm1, %v2025_v25, 0.0 }
 0x1c3   : > { %v2023_v28 = vmul.f32 %v6079_v55, %v1888_v1  ;;  %v2718_v20 = vrot.slane %v2148_v59, %v6513_v51  ;;  %v2269_v52 = vsel %vm2103_vm1, %v2030_v53, 0.0  ;;  %v2094_v0 = vmul.f32 %v6079_v55, %v1959_v42 }
 0x1c4   : > { %v2725_v19 = vrot.slane %v6434_v18, %v6505_v63  ;;  %v1545_v38 = vadd.f32 %v6061_v3, %v7751_v32  ;;  %v1953_v59 = vmax.f32 %v6491_v43, 0.0  ;;  %v2090_v53 = vmul.f32 %v6079_v55, %v1955_v17 }
 0x1c5   : > { %2432 = vadd.xlane.f32.xlu0 %v2431_v24  ;;  %2453 = vadd.xlane.f32.xlu1 %v2452_v9  ;;  %v1766_v9 = vadd.f32 %v6357_v39, %v1547_v14  ;;  %v2248_v18 = vsel %vm2103_vm1, %v2023_v28, 0.0  ;;  %v1832_v46 = vadd.f32 %v6239_v12, %v1613_v8  ;;  %v1552_v43 = vadd.f32 %v6061_v3, %v6017_v41 }
 0x1c6   : > { %v2142_v4 = vpop.xlane.xlu0 %2141  ;;  %v6520_v15 = vpop.xlane.xlu1 %2156  ;;  %v1616_v17 = vadd.f32 %v6061_v3, %v6015_v54 }
 0x1c7   : > { %v2704_v36 = vrot.slane %v2142_v4, %v6500_v5  ;;  %v2461_v4 = vsel %vm2103_vm1, %v2094_v0, 0.0  ;;  %v1771_v0 = vadd.f32 %v6357_v39, %v1552_v43 }
 0x1c9   : > { %v2706_v44 = vsel %vm2705_vm13, %v2704_v36, %v6442_v61  ;;  %2255 = vadd.xlane.f32.xlu0 %v2254_v60  ;;  %2270 = vadd.xlane.f32.xlu1 %v2269_v52  ;;  %v1962_v61 = vmax.f32 %v1834_v57, 0.0  ;;  %v2028_v36 = vmul.f32 %v6079_v55, %v1893_v2  ;;  %v7752_v57 = vld [vmem:[#allocation25_spill] sm:$0xff]  ;;  %v2449_v2 = vsel %vm2103_vm1, %v2090_v53, 0.0 }
 0x1ca   : > { %v2713_v40 = vsel %vm2712_vm14, %v2711_v6, %v2706_v44  ;;  %v2334_v1 = vpop.xlane.xlu0 %2333  ;;  %v6541_v25 = vpop.xlane.xlu1 %2348  ;;  %v1610_v14 = vadd.f32 %v6061_v3, %v7752_v57  ;;  %v1764_v6 = vadd.f32 %v6357_v39, %v1545_v38  ;;  %v2088_v44 = vmul.f32 %v6079_v55, %v1953_v59 }
 0x1cb   : > { %v2720_v24 = vsel %vm2719_vm15, %v2718_v20, %v2713_v40  ;;  %v2097_v28 = vmul.f32 %v6079_v55, %v1962_v61  ;;  %v1894_v20 = vmax.f32 %v1766_v9, 0.0  ;;  %v3027_v41 = vrot.slane %v2334_v1, %v6500_v5 }
 0x1cc   : > { %v6545_v42 = vsel %vm2726_vm0, %v2725_v19, %v2720_v24  ;;  %v1960_v52 = vmax.f32 %v1832_v46, 0.0  ;;  %v2263_v19 = vsel %vm2103_vm1, %v2028_v36, 0.0  ;;  %v1829_v32 = vadd.f32 %v6239_v12, %v1610_v14  ;;  %v7754_v14 = vld [vmem:[#allocation27_spill] sm:$0xff] }
 0x1cd   : > { %2249 = vadd.xlane.f32.xlu0 %v2248_v18  ;;  %2462 = vadd.xlane.f32.xlu1 %v2461_v4  ;;  %v1892_v54 = vmax.f32 %v1764_v6, 0.0  ;;  %v1835_v40 = vadd.f32 %v6239_v12, %v1616_v17  ;;  %v1551_v1 = vadd.f32 %v6061_v3, %v6000_v58  ;;  %v2470_v59 = vsel %vm2103_vm1, %v2097_v28, 0.0 }
 0x1ce   : > { %v6557_v60 = vpop.xlane.xlu0 %2342  ;;  %v6561_v8 = vpop.xlane.xlu1 %2363  ;;  %v3037_v9 = vrot.slane %v6494_v48, %v6513_v51  ;;  %v3028_v18 = vsel %vm2705_vm13, %v3027_v41, %v6467_v56  ;;  %v2443_v53 = vsel %vm2103_vm1, %v2088_v44, 0.0  ;;  %v2029_v46 = vmul.f32 %v6079_v55, %v1894_v20 }
 0x1cf   : > { %v1899_v4 = vmax.f32 %v1771_v0, 0.0  ;;  %v1550_v58 = vadd.f32 %v6061_v3, %v6021_v21  ;;  %v2095_v36 = vmul.f32 %v6079_v55, %v1960_v52  ;;  %v1957_v56 = vmax.f32 %v1829_v32, 0.0  ;;  %v7755_v21 = vld [vmem:[#allocation26_spill] sm:$0xff] }
 0x1d0   : > { %v1614_v6 = vadd.f32 %v6061_v3, %v7754_v14  ;;  %v1770_v28 = vadd.f32 %v6357_v39, %v1551_v1  ;;  %v1549_v20 = vadd.f32 %v6061_v3, %v7755_v21  ;;  %v2266_v41 = vsel %vm2103_vm1, %v2029_v46, 0.0 }
 0x1d1   : > { %2450 = vadd.xlane.f32.xlu0 %v2449_v2  ;;  %2264 = vadd.xlane.f32.xlu1 %v2263_v19  ;;  %v2027_v2 = vmul.f32 %v6079_v55, %v1892_v54  ;;  %v1963_v44 = vmax.f32 %v1835_v40, 0.0  ;;  %v1769_v52 = vadd.f32 %v6357_v39, %v1550_v58  ;;  %v2464_v0 = vsel %vm2103_vm1, %v2095_v36, 0.0 }
 0x1d2   : > { %v2337_v38 = vpop.xlane.xlu0 %2336  ;;  %v6574_v61 = vpop.xlane.xlu1 %2357  ;;  %v2034_v19 = vmul.f32 %v6079_v55, %v1899_v4  ;;  %v1898_v54 = vmax.f32 %v1770_v28, 0.0  ;;  %v1768_v40 = vadd.f32 %v6357_v39, %v1549_v20  ;;  %v1833_v46 = vadd.f32 %v6239_v12, %v1614_v6 }
 0x1d3   : > { %v3032_v24 = vrot.slane %v2337_v38, %v6508_v37  ;;  %v7756_v38 = vld [vmem:[#allocation28_spill] sm:$0xff]  ;;  %v1897_v4 = vmax.f32 %v1769_v52, 0.0 }
 0x1d4   : > { %v1555_v1 = vadd.f32 %v6061_v3, %v7756_v38  ;;  %v2281_v58 = vsel %vm2103_vm1, %v2034_v19, 0.0  ;;  %v1896_v20 = vmax.f32 %v1768_v40, 0.0  ;;  %v1961_v52 = vmax.f32 %v1833_v46, 0.0  ;;  %v7760_v46 = vld [vmem:[#allocation32_spill] sm:$0xff] }
 0x1d5   : > { %v3033_v43 = vsel %vm2712_vm14, %v3032_v24, %v3028_v18  ;;  %2444 = vadd.xlane.f32.xlu0 %v2443_v53  ;;  %2471 = vadd.xlane.f32.xlu1 %v2470_v59  ;;  %v7757_v59 = vld [vmem:[#allocation29_spill] sm:$0xff]  ;;  %v2260_v18 = vsel %vm2103_vm1, %v2027_v2, 0.0  ;;  %v2092_v53 = vmul.f32 %v6079_v55, %v1957_v56  ;;  %v7758_v56 = vld [vmem:[#allocation30_spill] sm:$0xff]  ;;  %v2033_v2 = vmul.f32 %v6079_v55, %v1898_v54 }
 0x1d6   : > { %v6588_v57 = vsel %vm2719_vm15, %v3037_v9, %v3033_v43  ;;  %v6590_v48 = vpop.xlane.xlu0 %2159  ;;  %v6594_v17 = vpop.xlane.xlu1 %2174  ;;  %v1617_v9 = vadd.f32 %v6061_v3, %v7757_v59  ;;  %v2098_v43 = vmul.f32 %v6079_v55, %v1963_v44  ;;  %v1774_v14 = vadd.f32 %v6357_v39, %v1555_v1 }
 0x1d7   : > { %7753 = vst [vmem:[#allocation16_spill] sm:$0xff] %v6588_v57  ;;  %v1553_v6 = vadd.f32 %v6061_v3, %v7758_v56  ;;  %v2032_v38 = vmul.f32 %v6079_v55, %v1897_v4  ;;  %v2278_v54 = vsel %vm2103_vm1, %v2033_v2, 0.0 }
 0x1d8   : > { %v1836_v28 = vadd.f32 %v6239_v12, %v1617_v9  ;;  %v2473_v44 = vsel %vm2103_vm1, %v2098_v43, 0.0  ;;  %v1902_v1 = vmax.f32 %v1774_v14, 0.0  ;;  %v2096_v43 = vmul.f32 %v6079_v55, %v1961_v52 }
 0x1d9   : > { %2267 = vadd.xlane.f32.xlu0 %v2266_v41  ;;  %2465 = vadd.xlane.f32.xlu1 %v2464_v0  ;;  %v2455_v41 = vsel %vm2103_vm1, %v2092_v53, 0.0  ;;  %v7759_v0 = vld [vmem:[#allocation31_spill] sm:$0xff]  ;;  %v1772_v40 = vadd.f32 %v6357_v39, %v1553_v6  ;;  %v2275_v4 = vsel %vm2103_vm1, %v2032_v38, 0.0  ;;  %v2735_v52 = vrot.slane %v6520_v15, %v6226_v33 }
 0x1da   : > { %v6604_v32 = vpop.xlane.xlu0 %2351  ;;  %v6608_v24 = vpop.xlane.xlu1 %2168  ;;  %v1556_v19 = vadd.f32 %v6061_v3, %v7759_v0  ;;  %v1964_v59 = vmax.f32 %v1836_v28, 0.0  ;;  %v2037_v28 = vmul.f32 %v6079_v55, %v1902_v1  ;;  %v2467_v0 = vsel %vm2103_vm1, %v2096_v43, 0.0 }
 0x1db   : > { %v1900_v6 = vmax.f32 %v1772_v40, 0.0  ;;  %v2740_v15 = vrot.slane %v6590_v48, %v6174_v31  ;;  %v1966_v43 = vmax.f32 %v6253_v22, 0.0  ;;  %v1967_v48 = vmax.f32 %v6260_v50, 0.0 }
 0x1dc   : > { %v1775_v53 = vadd.f32 %v6357_v39, %v1556_v19  ;;  %v2099_v56 = vmul.f32 %v6079_v55, %v1964_v59  ;;  %v2290_v38 = vsel %vm2103_vm1, %v2037_v28, 0.0  ;;  %v1965_v59 = vmax.f32 %v6301_v27, 0.0 }
 0x1dd   : > { %2261 = vadd.xlane.f32.xlu0 %v2260_v18  ;;  %2282 = vadd.xlane.f32.xlu1 %v2281_v58  ;;  %v2031_v18 = vmul.f32 %v6079_v55, %v1896_v20  ;;  %v1554_v58 = vadd.f32 %v6061_v3, %v7760_v46  ;;  %v2745_v27 = vrot.slane %v6479_v7, %v6218_v45 }
 0x1de   : > { %v2154_v36 = vpop.xlane.xlu0 %2153  ;;  %v6619_v21 = vpop.xlane.xlu1 %2375  ;;  %v2476_v55 = vsel %vm2103_vm1, %v2099_v56, 0.0  ;;  %v2755_v22 = vrot.slane %v6608_v24, %v6315_v30 }
 0x1df   : > { %v2731_v20 = vrot.slane %v2154_v36, %v6200_v49  ;;  %v2272_v2 = vsel %vm2103_vm1, %v2031_v18, 0.0  ;;  %v1773_v3 = vadd.f32 %v6357_v39, %v1554_v58  ;;  %v5080_v39 = vld [vmem:[%s7682_s4] ss:$0 sm:$0xff] }
 0x1e0   : > { %v2035_v40 = vmul.f32 %v5080_v39, %v1900_v6  ;;  %v2100_v56 = vmul.f32 %v5080_v39, %v1965_v59 }
 0x1e1   : > { %2456 = vadd.xlane.f32.xlu0 %v2455_v41  ;;  %2474 = vadd.xlane.f32.xlu1 %v2473_v44  ;;  %v1903_v44 = vmax.f32 %v1775_v53, 0.0  ;;  %v2736_v36 = vsel %vm2628_vm2, %v2735_v52, %v2731_v20  ;;  %v2101_v52 = vmul.f32 %v5080_v39, %v1966_v43 }
 0x1e2   : > { %v6630_v12 = vpop.xlane.xlu0 %2345  ;;  %v6632_v9 = vpop.xlane.xlu1 %2369  ;;  %v2741_v46 = vsel %vm2635_vm3, %v2740_v15, %v2736_v36  ;;  %v2284_v28 = vsel %vm2103_vm1, %v2035_v40, 0.0  ;;  %v2479_v7 = vsel %vm2103_vm1, %v2100_v56, 0.0 }
 0x1e3   : > { %v2038_v18 = vmul.f32 %v5080_v39, %v1903_v44  ;;  %v2482_v40 = vsel %vm2103_vm1, %v2101_v52, 0.0 }
 0x1e5   : > { %2279 = vadd.xlane.f32.xlu0 %v2278_v54  ;;  %2276 = vadd.xlane.f32.xlu1 %v2275_v4  ;;  %v1901_v54 = vmax.f32 %v1773_v3, 0.0  ;;  %v2293_v20 = vsel %vm2103_vm1, %v2038_v18, 0.0 }
 0x1e6   : > { %v2172_v14 = vpop.xlane.xlu0 %2171  ;;  %v6643_v41 = vpop.xlane.xlu1 %2186 }
 0x1e7   : > { %v2036_v6 = vmul.f32 %v5080_v39, %v1901_v54  ;;  %v2760_v36 = vrot.slane %v2172_v14, %v6324_v34  ;;  %v2765_v54 = vrot.slane %v6594_v17, %v6328_v62 }
 0x1e9   : > { %2273 = vadd.xlane.f32.xlu0 %v2272_v2  ;;  %2468 = vadd.xlane.f32.xlu1 %v2467_v0  ;;  %v2746_v2 = vsel %vm2642_vm4, %v2745_v27, %v2741_v46  ;;  %v2287_v50 = vsel %vm2103_vm1, %v2036_v6, 0.0 }
 0x1ea   : > { %v2166_v19 = vpop.xlane.xlu0 %2165  ;;  %v6653_v1 = vpop.xlane.xlu1 %2378 }
 0x1eb   : > { %v2750_v58 = vrot.slane %v2166_v19, %v6308_v26  ;;  %v2102_v19 = vmul.f32 %v5080_v39, %v1967_v48 }
 0x1ed   : > { %2291 = vadd.xlane.f32.xlu0 %v2290_v38  ;;  %2477 = vadd.xlane.f32.xlu1 %v2476_v55  ;;  %v2751_v3 = vsel %vm2649_vm5, %v2750_v58, %v2746_v2  ;;  %v2485_v24 = vsel %vm2103_vm1, %v2102_v19, 0.0  ;;  %vm3281_vm1 = vcmask 1041409  }
 0x1ee   : > { %v6663_v53 = vpop.xlane.xlu0 %2366  ;;  %v2181_v4 = vpop.xlane.xlu1 %2180  ;;  %v2756_v38 = vsel %vm2656_vm6, %v2755_v22, %v2751_v3 }
 0x1ef   : > { %v2761_v15 = vsel %vm2663_vm7, %v2760_v36, %v2756_v38  ;;  %v2775_v14 = vrot.slane %v2181_v4, %v6400_v16 }
 0x1f0   : > { %v2766_v58 = vsel %vm2670_vm8, %v2765_v54, %v2761_v15 }
 0x1f1   : > { %2285 = vadd.xlane.f32.xlu0 %v2284_v28  ;;  %2294 = vadd.xlane.f32.xlu1 %v2293_v20  ;;  %v2785_v20 = vrot.slane %v6643_v41, %v6413_v11 }
 0x1f2   : > { %v6674_v44 = vpop.xlane.xlu0 %2360  ;;  %v6677_v0 = vpop.xlane.xlu1 %2372 }
 0x1f5   : > { %2480 = vadd.xlane.f32.xlu0 %v2479_v7  ;;  %2288 = vadd.xlane.f32.xlu1 %v2287_v50 }
 0x1f6   : > { %v2184_v55 = vpop.xlane.xlu0 %2183  ;;  %v6685_v59 = vpop.xlane.xlu1 %2387 }
 0x1f7   : > { %7761 = vst [vmem:[#allocation17_spill] sm:$0xff] %v6685_v59  ;;  %v2780_v56 = vrot.slane %v2184_v55, %v6409_v29 }
 0x1f9   : > { %2483 = vadd.xlane.f32.xlu0 %v2482_v40  ;;  %2486 = vadd.xlane.f32.xlu1 %v2485_v24 }
 0x1fa   : > { %v2178_v39 = vpop.xlane.xlu0 %2177  ;;  %v6693_v46 = vpop.xlane.xlu1 %2381 }
 0x1fb   : > { %v2770_v18 = vrot.slane %v2178_v39, %v6395_v47  ;;  %7762 = vst [vmem:[#allocation11_spill] sm:$0xff] %v6693_v46 }
 0x1fd   : > { %v2771_v27 = vsel %vm2677_vm9, %v2770_v18, %v2766_v58 }
 0x1fe   : > { %v2776_v43 = vsel %vm2684_vm10, %v2775_v14, %v2771_v27  ;;  %v2196_v28 = vpop.xlane.xlu0 %2195  ;;  %v2199_v48 = vpop.xlane.xlu1 %2198 }
 0x1ff   : > { %v2781_v17 = vsel %vm2691_vm11, %v2780_v56, %v2776_v43  ;;  %v2800_v7 = vrot.slane %v2196_v28, %v6513_v51  ;;  %v2805_v50 = vrot.slane %v2199_v48, %v6505_v63 }
 0x200   : > { %v2786_v4 = vsel %vm2698_vm12, %v2785_v20, %v2781_v17 }
 0x202   : > { %v2190_v6 = vpop.xlane.xlu0 %2189  ;;  %v2193_v3 = vpop.xlane.xlu1 %2192 }
 0x203   : > { %v2790_v2 = vrot.slane %v2190_v6, %v6500_v5  ;;  %v2795_v22 = vrot.slane %v2193_v3, %v6508_v37 }
 0x205   : > { %v2791_v52 = vsel %vm2705_vm13, %v2790_v2, %v2786_v4 }
 0x206   : > { %v2796_v19 = vsel %vm2712_vm14, %v2795_v22, %v2791_v52  ;;  %v6710_v38 = vpop.xlane.xlu0 %2390  ;;  %v6713_v55 = vpop.xlane.xlu1 %2384 }
 0x207   : > { %7763 = vst [vmem:[#allocation18_spill] sm:$0xff] %v6710_v38  ;;  %v2801_v41 = vsel %vm2719_vm15, %v2800_v7, %v2796_v19  ;;  %7764 = vst [vmem:[#allocation15_spill] sm:$0xff] %v6713_v55 }
 0x208   : > { %v2806_v36 = vsel %vm2726_vm0, %v2805_v50, %v2801_v41 }
 0x209   : > { %v6718_v40 = vsel %vm3281_vm1, %v2806_v36, %v6545_v42 }
 0x20a   : > { %7765 = vst [vmem:[#allocation10_spill] sm:$0xff] %v6718_v40  ;;  %v2208_v24 = vpop.xlane.xlu0 %2207  ;;  %v6720_v15 = vpop.xlane.xlu1 %2393 }
 0x20e   : > { %v6722_v54 = vpop.xlane.xlu0 %2399  ;;  %v6724_v39 = vpop.xlane.xlu1 %2210 }
 0x212   : > { %v2202_v18 = vpop.xlane.xlu0 %2201  ;;  %v2205_v14 = vpop.xlane.xlu1 %2204 }
 0x213   : > { %v2814_v57 = vrot.slane %v2205_v14, %v6226_v33 }
 0x216   : > { %v6726_v58 = vpop.xlane.xlu0 %2402  ;;  %v6728_v27 = vpop.xlane.xlu1 %2411 }
 0x21a   : > { %v6730_v43 = vpop.xlane.xlu0 %2396  ;;  %v6732_v28 = vpop.xlane.xlu1 %2405 }
 0x21e   : > { %v6734_v56 = vpop.xlane.xlu0 %2219  ;;  %v6736_v42 = vpop.xlane.xlu1 %2222 }
 0x222   : > { %v2214_v48 = vpop.xlane.xlu0 %2213  ;;  %v6738_v17 = vpop.xlane.xlu1 %2216 }
 0x226   : > { %v6740_v20 = vpop.xlane.xlu0 %2414  ;;  %v6742_v6 = vpop.xlane.xlu1 %2234 }
 0x22a   : > { %v6744_v2 = vpop.xlane.xlu0 %2408  ;;  %v6746_v3 = vpop.xlane.xlu1 %2228 }
 0x22e   : > { %v6748_v4 = vpop.xlane.xlu0 %2231  ;;  %v6750_v22 = vpop.xlane.xlu1 %2435 }
 0x22f   : > { %7766 = vst [vmem:[#allocation19_spill] sm:$0xff] %v6750_v22 }
 0x232   : > { %v6752_v7 = vpop.xlane.xlu0 %2423  ;;  %v6754_v52 = vpop.xlane.xlu1 %2246 }
 0x233   : > { %7767 = vst [vmem:[#allocation21_spill] sm:$0xff] %v6752_v7  ;;  %7768 = vst [vmem:[#allocation20_spill] sm:$0xff] %v6754_v52 }
 0x236   : > { %v6756_v50 = vpop.xlane.xlu0 %2225  ;;  %v6758_v19 = vpop.xlane.xlu1 %2438 }
 0x237   : > { %7769 = vst [vmem:[#allocation22_spill] sm:$0xff] %v6758_v19 }
 0x23a   : > { %v6760_v41 = vpop.xlane.xlu0 %2417  ;;  %v6762_v36 = vpop.xlane.xlu1 %2240 }
 0x23b   : > { %7770 = vst [vmem:[#allocation23_spill] sm:$0xff] %v6760_v41  ;;  %7771 = vst [vmem:[#allocation24_spill] sm:$0xff] %v6762_v36  ;;  %v3047_v36 = vrot.slane %v6630_v12, %v6200_v49 }
 0x23e   : > { %v6764_v35 = vpop.xlane.xlu0 %2426  ;;  %v6766_v13 = vpop.xlane.xlu1 %2447 }
 0x23f   : > { %7772 = vst [vmem:[#allocation25_spill] sm:$0xff] %v6764_v35 }
 0x242   : > { %v6768_v10 = vpop.xlane.xlu0 %2420  ;;  %v2442_v40 = vpop.xlane.xlu1 %2441 }
 0x243   : > { %7773 = vst [vmem:[#allocation27_spill] sm:$0xff] %v6768_v10 }
 0x246   : > { %v6770_v22 = vpop.xlane.xlu0 %2243  ;;  %v6772_v38 = vpop.xlane.xlu1 %2258 }
 0x247   : > { %7774 = vst [vmem:[#allocation26_spill] sm:$0xff] %v6770_v22  ;;  %v3051_v22 = vrot.slane %v6541_v25, %v6226_v33 }
 0x249   : > { %v3052_v10 = vsel %vm2628_vm2, %v3051_v22, %v3047_v36  ;;  %v3071_v22 = vrot.slane %v6674_v44, %v6315_v30  ;;  %v3130_v44 = vrot.slane %v6730_v43, %v6226_v33 }
 0x24a   : > { %v6774_v52 = vpop.xlane.xlu0 %2237  ;;  %v2253_v7 = vpop.xlane.xlu1 %2252 }
 0x24b   : > { %7775 = vst [vmem:[#allocation28_spill] sm:$0xff] %v6774_v52 }
 0x24e   : > { %v6776_v55 = vpop.xlane.xlu0 %2429  ;;  %v6778_v19 = vpop.xlane.xlu1 %2459 }
 0x24f   : > { %7776 = vst [vmem:[#allocation29_spill] sm:$0xff] %v6776_v55  ;;  %v2810_v55 = vrot.slane %v2202_v18, %v6200_v49  ;;  %v2819_v18 = vrot.slane %v2208_v24, %v6174_v31 }
 0x251   : > { %v2815_v25 = vsel %vm2628_vm2, %v2814_v57, %v2810_v55 }
 0x252   : > { %v6780_v59 = vpop.xlane.xlu0 %2432  ;;  %v6782_v51 = vpop.xlane.xlu1 %2453 }
 0x253   : > { %7777 = vst [vmem:[#allocation30_spill] sm:$0xff] %v6780_v59  ;;  %v3056_v59 = vrot.slane %v6604_v32, %v6174_v31  ;;  %v3066_v32 = vrot.slane %v6574_v61, %v6308_v26  ;;  %v2834_v61 = vrot.slane %v6738_v17, %v6315_v30  ;;  %v3205_v17 = vrot.slane %v2442_v40, %v6200_v49 }
 0x254   : > { %v3214_v40 = vrot.slane %v6766_v13, %v6174_v31 }
 0x255   : > { %v3057_v52 = vsel %vm2635_vm3, %v3056_v59, %v3052_v10  ;;  %v2820_v10 = vsel %vm2635_vm3, %v2819_v18, %v2815_v25  ;;  %v2829_v59 = vrot.slane %v2214_v48, %v6308_v26  ;;  %v3076_v48 = vrot.slane %v6561_v8, %v6324_v34 }
 0x256   : > { %v2256_v35 = vpop.xlane.xlu0 %2255  ;;  %v6786_v37 = vpop.xlane.xlu1 %2270  ;;  %v3081_v8 = vrot.slane %v6663_v53, %v6328_v62 }
 0x257   : > { %7778 = vst [vmem:[#allocation31_spill] sm:$0xff] %v6786_v37  ;;  %v3061_v37 = vrot.slane %v6497_v23, %v6218_v45  ;;  %v2824_v23 = vrot.slane %v6724_v39, %v6218_v45 }
 0x259   : > { %v3062_v14 = vsel %vm2642_vm4, %v3061_v37, %v3057_v52  ;;  %v2825_v24 = vsel %vm2642_vm4, %v2824_v23, %v2820_v10 }
 0x25a   : > { %v2250_v46 = vpop.xlane.xlu0 %2249  ;;  %v6793_v41 = vpop.xlane.xlu1 %2462  ;;  %v3067_v55 = vsel %vm2649_vm5, %v3066_v32, %v3062_v14  ;;  %v2830_v52 = vsel %vm2649_vm5, %v2829_v59, %v2825_v24  ;;  %v3126_v14 = vrot.slane %v6720_v15, %v6200_v49  ;;  %v2893_v32 = vrot.slane %v2253_v7, %v6226_v33 }
 0x25b   : > { %v3072_v37 = vsel %vm2656_vm6, %v3071_v22, %v3067_v55  ;;  %v2889_v39 = vrot.slane %v2250_v46, %v6200_v49  ;;  %v2835_v10 = vsel %vm2656_vm6, %v2834_v61, %v2830_v52  ;;  %v3135_v59 = vrot.slane %v6722_v54, %v6174_v31 }
 0x25c   : > { %v3077_v22 = vsel %vm2663_vm7, %v3076_v48, %v3072_v37  ;;  %v3131_v46 = vsel %vm2628_vm2, %v3130_v44, %v3126_v14  ;;  %v2839_v15 = vrot.slane %v6734_v56, %v6324_v34  ;;  %v2898_v7 = vrot.slane %v2256_v35, %v6174_v31 }
 0x25d   : > { %v3082_v53 = vsel %vm2670_vm8, %v3081_v8, %v3077_v22  ;;  %v3140_v54 = vrot.slane %v6726_v58, %v6218_v45  ;;  %v3136_v56 = vsel %vm2635_vm3, %v3135_v59, %v3131_v46  ;;  %v2849_v44 = vrot.slane %v6756_v50, %v6395_v47 }
 0x25e   : > { %v6798_v12 = vpop.xlane.xlu0 %2450  ;;  %v6803_v5 = vpop.xlane.xlu1 %2264  ;;  %v2840_v37 = vsel %vm2663_vm7, %v2839_v15, %v2835_v10  ;;  %v3091_v58 = vrot.slane %v6677_v0, %v6400_v16  ;;  %v2903_v61 = vrot.slane %v6772_v38, %v6218_v45  ;;  %v3145_v52 = vrot.slane %v6732_v28, %v6308_v26 }
 0x25f   : > { %v3219_v50 = vrot.slane %v6798_v12, %v6218_v45  ;;  %v3042_v12 = vrot.slane %v6557_v60, %v6505_v63  ;;  %v2854_v28 = vrot.slane %v6746_v3, %v6400_v16  ;;  %v2913_v10 = vrot.slane %v6803_v5, %v6315_v30 }
 0x260   : > { %v3101_v60 = vrot.slane %v6653_v1, %v6413_v11  ;;  %v3160_v1 = vrot.slane %v6740_v20, %v6328_v62 }
 0x262   : > { %v2445_v36 = vpop.xlane.xlu0 %2444  ;;  %v6815_v57 = vpop.xlane.xlu1 %2471 }
 0x263   : > { %v3209_v25 = vrot.slane %v2445_v36, %v6226_v33  ;;  %v2894_v36 = vsel %vm2628_vm2, %v2893_v32, %v2889_v39  ;;  %v3086_v33 = vrot.slane %v6632_v9, %v6395_v47  ;;  %v2844_v9 = vrot.slane %v6736_v42, %v6328_v62 }
 0x264   : > { %v2899_v24 = vsel %vm2635_vm3, %v2898_v7, %v2894_v36  ;;  %v3141_v42 = vsel %vm2642_vm4, %v3140_v54, %v3136_v56  ;;  %v3150_v39 = vrot.slane %v6744_v2, %v6315_v30  ;;  %v3224_v2 = vrot.slane %v6782_v51, %v6308_v26  ;;  %v7780_v7 = vld [vmem:[#allocation28_spill] sm:$0xff] }
 0x265   : > { %v3210_v23 = vsel %vm2628_vm2, %v3209_v25, %v3205_v17  ;;  %v3087_v31 = vsel %vm2677_vm9, %v3086_v33, %v3082_v53  ;;  %v2845_v25 = vsel %vm2670_vm8, %v2844_v9, %v2840_v37  ;;  %v2904_v38 = vsel %vm2642_vm4, %v2903_v61, %v2899_v24  ;;  %v7781_v37 = vld [vmem:[#allocation23_spill] sm:$0xff]  ;;  %v7782_v9 = vld [vmem:[#allocation16_spill] sm:$0xff] }
 0x266   : > { %v6829_v18 = vpop.xlane.xlu0 %2267  ;;  %v6833_v43 = vpop.xlane.xlu1 %2465  ;;  %v3215_v13 = vsel %vm2635_vm3, %v3214_v40, %v3210_v23  ;;  %v2850_v0 = vsel %vm2677_vm9, %v2849_v44, %v2845_v25  ;;  %v3096_v32 = vrot.slane %v6619_v21, %v6409_v29  ;;  %v3092_v8 = vsel %vm2684_vm10, %v3091_v58, %v3087_v31  ;;  %v7779_v40 = vld [vmem:[#allocation12_spill] sm:$0xff]  ;;  %v7783_v24 = vld [vmem:[#allocation27_spill] sm:$0xff] }
 0x267   : > { %v3220_v22 = vsel %vm2642_vm4, %v3219_v50, %v3215_v13  ;;  %v3146_v46 = vsel %vm2649_vm5, %v3145_v52, %v3141_v42  ;;  %v3155_v21 = vrot.slane %v6728_v27, %v6324_v34  ;;  %v2859_v36 = vrot.slane %v6748_v4, %v6409_v29  ;;  %v7785_v50 = vld [vmem:[#allocation11_spill] sm:$0xff] }
 0x268   : > { %v3151_v3 = vsel %vm2656_vm6, %v3150_v39, %v3146_v46  ;;  %v3225_v51 = vsel %vm2649_vm5, %v3224_v2, %v3220_v22  ;;  %v3097_v23 = vsel %vm2691_vm11, %v3096_v32, %v3092_v8  ;;  %v2918_v33 = vrot.slane %v6829_v18, %v6324_v34  ;;  %v7788_v32 = vld [vmem:[#allocation14_spill] sm:$0xff]  ;;  %v7789_v8 = vld [vmem:[#allocation17_spill] sm:$0xff] }
 0x269   : > { %v2864_v27 = vrot.slane %v6742_v6, %v6413_v11  ;;  %v3156_v4 = vsel %vm2663_vm7, %v3155_v21, %v3151_v3  ;;  %v2869_v54 = vrot.slane %v7780_v7, %v7779_v40  ;;  %v3165_v20 = vrot.slane %v7781_v37, %v6395_v47  ;;  %v7791_v21 = vld [vmem:[#allocation21_spill] sm:$0xff]  ;;  %v7795_v37 = vld [vmem:[#allocation20_spill] sm:$0xff] }
 0x26a   : > { %v2262_v49 = vpop.xlane.xlu0 %2261  ;;  %v6854_v55 = vpop.xlane.xlu1 %2282  ;;  %v6932_v6 = vsel %vm2726_vm0, %v3042_v12, %v7782_v9  ;;  %v3170_v13 = vrot.slane %v7783_v24, %v6400_v16  ;;  %v3239_v58 = vrot.slane %v6793_v41, %v6328_v62  ;;  %v3102_v61 = vsel %vm2698_vm12, %v3101_v60, %v3097_v23  ;;  %v7786_v41 = vld [vmem:[#allocation13_spill] sm:$0xff]  ;;  %v7793_v23 = vld [vmem:[#allocation26_spill] sm:$0xff] }
 0x26b   : > { %v2908_v35 = vrot.slane %v2262_v49, %v6308_v26  ;;  %v2855_v26 = vsel %vm2684_vm10, %v2854_v28, %v2850_v0  ;;  %v3234_v49 = vrot.slane %v6778_v19, %v6324_v34  ;;  %v3161_v42 = vsel %vm2670_vm8, %v3160_v1, %v3156_v4 }
 0x26c   : > { %v2860_v53 = vsel %vm2691_vm11, %v2859_v36, %v2855_v26  ;;  %v3244_v28 = vrot.slane %v6833_v43, %v6395_v47  ;;  %v3116_v46 = vrot.slane %v7789_v8, %v7788_v32  ;;  %vm3283_vm2 = vcmask 1042434  }
 0x26d   : > { %v2909_v17 = vsel %vm2649_vm5, %v2908_v35, %v2904_v38  ;;  %v7784_v35 = vld [vmem:[#allocation31_spill] sm:$0xff]  ;;  %v2865_v52 = vsel %vm2698_vm12, %v2864_v27, %v2860_v53  ;;  %v3175_v36 = vrot.slane %v7791_v21, %v6409_v29  ;;  %v2879_v1 = vrot.slane %v7793_v23, %v7788_v32  ;;  %v7794_v27 = vld [vmem:[#allocation29_spill] sm:$0xff] }
 0x26e   : > { %v2457_v48 = vpop.xlane.xlu0 %2456  ;;  %v6880_v14 = vpop.xlane.xlu1 %2474  ;;  %v2923_v31 = vrot.slane %v7784_v35, %v6328_v62  ;;  %v2870_v39 = vsel %vm2705_vm13, %v2869_v54, %v2865_v52  ;;  %v3166_v62 = vsel %vm2677_vm9, %v3165_v20, %v3161_v42  ;;  %v3185_v4 = vrot.slane %v7794_v27, %v7779_v40 }
 0x26f   : > { %v3229_v45 = vrot.slane %v2457_v48, %v6315_v30  ;;  %v2914_v30 = vsel %vm2656_vm6, %v2913_v10, %v2909_v17  ;;  %v3106_v48 = vrot.slane %v7785_v50, %v7779_v40  ;;  %v7790_v10 = vld [vmem:[#allocation15_spill] sm:$0xff]  ;;  %v3171_v3 = vsel %vm2684_vm10, %v3170_v13, %v3166_v62 }
 0x270   : > { %v2919_v19 = vsel %vm2663_vm7, %v2918_v33, %v2914_v30  ;;  %v3111_v60 = vrot.slane %v7790_v10, %v7786_v41  ;;  %v7792_v30 = vld [vmem:[#allocation18_spill] sm:$0xff]  ;;  %v3176_v33 = vsel %vm2691_vm11, %v3175_v36, %v3171_v3  ;;  %v3254_v53 = vrot.slane %v6815_v57, %v6409_v29 }
 0x271   : > { %v3230_v5 = vsel %vm2656_vm6, %v3229_v45, %v3225_v51  ;;  %v2924_v25 = vsel %vm2670_vm8, %v2923_v31, %v2919_v19  ;;  %v7787_v45 = vld [vmem:[#allocation24_spill] sm:$0xff]  ;;  %v3107_v51 = vsel %vm2705_vm13, %v3106_v48, %v3102_v61  ;;  %v2884_v20 = vrot.slane %v7795_v37, %v6505_v63 }
 0x272   : > { %v6899_v59 = vpop.xlane.xlu0 %2279  ;;  %v2277_v15 = vpop.xlane.xlu1 %2276  ;;  %v3235_v44 = vsel %vm2663_vm7, %v3234_v49, %v3230_v5  ;;  %v2874_v12 = vrot.slane %v7787_v45, %v7786_v41  ;;  %v3121_v5 = vrot.slane %v7792_v30, %v6505_v63  ;;  %v2943_v13 = vrot.slane %v6854_v55, %v6413_v11  ;;  %v7801_v30 = vld [vmem:[#allocation33_spill] sm:$0xff] }
 0x273   : > { %v3240_v0 = vsel %vm2670_vm8, %v3239_v58, %v3235_v44  ;;  %v2933_v26 = vrot.slane %v2277_v15, %v6400_v16  ;;  %v2938_v7 = vrot.slane %v6899_v59, %v6409_v29  ;;  %v7796_v44 = vld [vmem:[#allocation25_spill] sm:$0xff]  ;;  %v3259_v35 = vrot.slane %v6880_v14, %v6413_v11 }
 0x274   : > { %v3245_v43 = vsel %vm2677_vm9, %v3244_v28, %v3240_v0  ;;  %v3180_v19 = vrot.slane %v7796_v44, %v6413_v11  ;;  %vm3285_vm3 = vcmask 1043459   ;;  %vm3287_vm4 = vcmask 1044484  }
 0x275   : > { %vm3289_vm5 = vcmask 1045509   ;;  %vm3291_vm6 = vcmask 1046534   ;;  %vm3293_vm7 = vcmask 1047559   ;;  %vm2490_vm8 = vcmp.lt.s32.totalorder %v7801_v30, 16 }
 0x276   : > { %v2274_v56 = vpop.xlane.xlu0 %2273  ;;  %v2469_v18 = vpop.xlane.xlu1 %2468  ;;  %v3181_v59 = vsel %vm2698_vm12, %v3180_v19, %v3176_v33 }
 0x277   : > { %v2928_v34 = vrot.slane %v2274_v56, %v6395_v47  ;;  %v3249_v38 = vrot.slane %v2469_v18, %v6400_v16  ;;  %v2875_v47 = vsel %vm2712_vm14, %v2874_v12, %v2870_v39  ;;  %v3112_v56 = vsel %vm2712_vm14, %v3111_v60, %v3107_v51  ;;  %v7797_v18 = vld [vmem:[#allocation30_spill] sm:$0xff] }
 0x278   : > { %v3190_v9 = vrot.slane %v7797_v18, %v7786_v41  ;;  %v3186_v61 = vsel %vm2705_vm13, %v3185_v4, %v3181_v59  ;;  %v3117_v0 = vsel %vm2719_vm15, %v3116_v46, %v3112_v56  ;;  %v7803_v56 = vld [vmem:[#allocation8_spill] sm:$0xff] }
 0x279   : > { %v2929_v2 = vsel %vm2677_vm9, %v2928_v34, %v2924_v25  ;;  %v3250_v16 = vsel %vm2684_vm10, %v3249_v38, %v3245_v43  ;;  %v2880_v34 = vsel %vm2719_vm15, %v2879_v1, %v2875_v47  ;;  %v3375_v37 = vsub.s32 1, %v7803_v56 }
 0x27a   : > { %v2292_v22 = vpop.xlane.xlu0 %2291  ;;  %v2478_v17 = vpop.xlane.xlu1 %2477  ;;  %v2934_v49 = vsel %vm2684_vm10, %v2933_v26, %v2929_v2  ;;  %v3255_v24 = vsel %vm2691_vm11, %v3254_v53, %v3250_v16  ;;  %v2885_v58 = vsel %vm2726_vm0, %v2884_v20, %v2880_v34  ;;  %v3191_v11 = vsel %vm2712_vm14, %v3190_v9, %v3186_v61  ;;  %v7800_v26 = vld [vmem:[#allocation22_spill] sm:$0xff]  ;;  %v5081_v9 = vld [vmem:[%s5337_s17] sm:$0xff]  }
 0x27b   : > { %v2939_v57 = vsel %vm2691_vm11, %v2938_v7, %v2934_v49  ;;  %v3264_v50 = vrot.slane %v2478_v17, %v7779_v40  ;;  %v3260_v42 = vsel %vm2698_vm12, %v3259_v35, %v3255_v24  ;;  %v2958_v14 = vrot.slane %v2292_v22, %v7788_v32  ;;  %v7799_v17 = vld [vmem:[#allocation10_spill] sm:$0xff]  ;;  %v7802_v7 = vld [vmem:[#allocation9_spill] sm:$0xff] }
 0x27c   : > { %v2944_v52 = vsel %vm2698_vm12, %v2943_v13, %v2939_v57  ;;  %v3284_v8 = vsel %vm3283_vm2, %v2885_v58, %v7799_v17  ;;  %v3200_v51 = vrot.slane %v7800_v26, %v6505_v63  ;;  %v3442_v44 = vsub.s32 2, %v7803_v56 }
 0x27d   : > { %v3265_v28 = vsel %vm2705_vm13, %v3264_v50, %v3260_v42  ;;  %v3509_v34 = vsub.s32 3, %v7803_v56  ;;  %v3842_v24 = vunpack.c.l.bf16 %v5081_v9  ;;  %v3843_v57 = vunpack.c.h.bf16 %v5081_v9 }
 0x27e   : > { %v2286_v15 = vpop.xlane.xlu0 %2285  ;;  %v2295_v54 = vpop.xlane.xlu1 %2294  ;;  %v3576_v61 = vsub.s32 4, %v7803_v56 }
 0x27f   : > { %v2948_v29 = vrot.slane %v2286_v15, %v7779_v40  ;;  %v7798_v40 = vld [vmem:[#allocation19_spill] sm:$0xff]  ;;  %v2963_v62 = vrot.slane %v2295_v54, %v6505_v63 }
 0x280   : > { %v3195_v38 = vrot.slane %v7798_v40, %v7788_v32 }
 0x281   : > { %v2949_v25 = vsel %vm2705_vm13, %v2948_v29, %v2944_v52 }
 0x282   : > { %v2481_v31 = vpop.xlane.xlu0 %2480  ;;  %v2289_v48 = vpop.xlane.xlu1 %2288  ;;  %v3196_v46 = vsel %vm2719_vm15, %v3195_v38, %v3191_v11 }
 0x283   : > { %v3269_v39 = vrot.slane %v2481_v31, %v7786_v41  ;;  %v2953_v55 = vrot.slane %v2289_v48, %v7786_v41  ;;  %v3201_v23 = vsel %vm2726_vm0, %v3200_v51, %v3196_v46  ;;  %v5082_v31 = vld [vmem:[%s5337_s17 + $0x8] sm:$0xff]   ;;  %v5083_v48 = vld [vmem:[%s5337_s17 + $0x10] sm:$0xff]  }
 0x284   : > { %v3844_v58 = vunpack.c.l.bf16 %v5082_v31  ;;  %v3846_v42 = vunpack.c.l.bf16 %v5083_v48 }
 0x285   : > { %v2954_v45 = vsel %vm2712_vm14, %v2953_v55, %v2949_v25  ;;  %v3270_v10 = vsel %vm2712_vm14, %v3269_v39, %v3265_v28  ;;  %v3847_v28 = vunpack.c.h.bf16 %v5083_v48 }
 0x286   : > { %v2484_v12 = vpop.xlane.xlu0 %2483  ;;  %v2959_v41 = vsel %vm2719_vm15, %v2958_v14, %v2954_v45  ;;  %v2487_v22 = vpop.xlane.xlu1 %2486  ;;  %v3845_v14 = vunpack.c.h.bf16 %v5082_v31 }
 0x287   : > { %v3274_v2 = vrot.slane %v2484_v12, %v7788_v32  ;;  %v2964_v60 = vsel %vm2726_vm0, %v2963_v62, %v2959_v41  ;;  %v3279_v3 = vrot.slane %v2487_v22, %v6505_v63  ;;  %v3122_v32 = vsel %vm2726_vm0, %v3121_v5, %v3117_v0  ;;  %v5084_v22 = vld [vmem:[%s5337_s17 + $0x18] sm:$0xff]  }
 0x288   : > { %v3286_v36 = vsel %vm3285_vm3, %v2964_v60, %v3284_v8  ;;  %v3848_v17 = vunpack.c.l.bf16 %v5084_v22  ;;  %v3849_v26 = vunpack.c.h.bf16 %v5084_v22 }
 0x289   : > { %v3275_v21 = vsel %vm2719_vm15, %v3274_v2, %v3270_v10  ;;  %v3288_v43 = vsel %vm3287_vm4, %v6932_v6, %v3286_v36 }
 0x28a   : > { %v3280_v47 = vsel %vm2726_vm0, %v3279_v3, %v3275_v21  ;;  %v3290_v63 = vsel %vm3289_vm5, %v3122_v32, %v3288_v43  ;;  %vm7804_vm0 = vcmask 261120  }
 0x28b   : > { %v3292_v1 = vsel %vm3291_vm6, %v3201_v23, %v3290_v63  ;;  %vm7805_vm9 = vmmov %vm7804_vm0  ;;  %v5085_v63 = vld [vmem:[%s5337_s17 + $0x20] sm:$0xff]  }
 0x28c   : > { %v3294_v49 = vsel %vm3293_vm7, %v3280_v47, %v3292_v1  ;;  %vm7806_vm10 = vmmov %vm7804_vm0  ;;  %v3850_v1 = vunpack.c.l.bf16 %v5085_v63 }
 0x28d   : > { %v3296_v16 = vsel %vm2490_vm8, %v3294_v49, -inf  ;;  %vm7807_vm11 = vmmov %vm7804_vm0 }
 0x28e   : > { %3297 = vmax.xlane.f32.xlu0 %v3296_v16  ;;  %vm7808_vm12 = vmmov %vm7804_vm0 }
 0x28f   : > { %vm7809_vm13 = vmmov %vm7804_vm0 }
 0x290   : > { %vm7810_vm14 = vmmov %vm7804_vm0 }
 0x291   : > { %vm7811_vm15 = vmmov %vm7804_vm0 }
 0x292   : > { %vm7812_vm8 = vmmov %vm7804_vm0 }
 0x31b   : > { %v3298_v5 = vpop.xlane.xlu0 %3297 }
 0x31c   : > { %v3299_v15 = vsub.f32 %v3296_v16, %v3298_v5 }
 0x31e   : > { %v3300_v33 = vmul.f32 1.442695, %v3299_v15 }
 0x320   : > { %5074 = vpow2.f32 %v3300_v33  ;;  %v3851_v33 = vunpack.c.h.bf16 %v5085_v63 }
 0x32a   : > { %v5075_v27 = vpop.eup %5074 }
 0x32b   : > { %3302 = vadd.xlane.f32.xlu1 %v5075_v27 }
 0x3b8   : > { %v3303_v6 = vpop.xlane.xlu1 %3302 }
 0x3b9   : > { %5076 = vrcp.f32 %v3303_v6 }
 0x3c3   : > { %v5077_v4 = vpop.eup %5076 }
 0x3c4   : > { %v7036_v53 = vmul.f32 %v5077_v4, %v5075_v27 }
 0x3c6   : > { %v3309_v54 = vrot.slane %v7036_v53, %v7802_v7  ;;  %4411 = vst [vmem:[%s7042_s26] sm:$0xff] %v7036_v53  ;;  %v3376_v20 = vrot.slane %v7036_v53, %v3375_v37  ;;  %v3443_v19 = vrot.slane %v7036_v53, %v3442_v44  ;;  %v3510_v18 = vrot.slane %v7036_v53, %v3509_v34 }
 0x3c7   : > { %v7060_v0 = vrot.slane %v7036_v53, %v3576_v61 }
 0x3c8   : > { %3315 = vbcast.lane.b32.xlu1 %v3309_v54, 264  ;;  %3311 = vbcast.lane.b32.xlu0 %v3309_v54, 256 }
 0x3cc   : > { %3319 = vbcast.lane.b32.xlu1 %v3309_v54, 272  ;;  %3327 = vbcast.lane.b32.xlu0 %v3309_v54, 288 }
 0x3d0   : > { %3323 = vbcast.lane.b32.xlu1 %v3309_v54, 280  ;;  %3335 = vbcast.lane.b32.xlu0 %v3309_v54, 304 }
 0x3d4   : > { %3331 = vbcast.lane.b32.xlu1 %v3309_v54, 296  ;;  %3343 = vbcast.lane.b32.xlu0 %v3309_v54, 320 }
 0x3d8   : > { %3339 = vbcast.lane.b32.xlu1 %v3309_v54, 312  ;;  %3351 = vbcast.lane.b32.xlu0 %v3309_v54, 336 }
 0x3dc   : > { %3347 = vbcast.lane.b32.xlu1 %v3309_v54, 328  ;;  %3359 = vbcast.lane.b32.xlu0 %v3309_v54, 352 }
 0x3e0   : > { %3355 = vbcast.lane.b32.xlu1 %v3309_v54, 344  ;;  %3367 = vbcast.lane.b32.xlu0 %v3309_v54, 368 }
 0x3e4   : > { %3363 = vbcast.lane.b32.xlu1 %v3309_v54, 360  ;;  %3378 = vbcast.lane.b32.xlu0 %v3376_v20, 256 }
 0x3e8   : > { %3371 = vbcast.lane.b32.xlu1 %v3309_v54, 376  ;;  %3386 = vbcast.lane.b32.xlu0 %v3376_v20, 272 }
 0x3ec   : > { %3382 = vbcast.lane.b32.xlu1 %v3376_v20, 264  ;;  %3394 = vbcast.lane.b32.xlu0 %v3376_v20, 288 }
 0x3f0   : > { %3390 = vbcast.lane.b32.xlu1 %v3376_v20, 280  ;;  %3402 = vbcast.lane.b32.xlu0 %v3376_v20, 304 }
 0x3f4   : > { %3398 = vbcast.lane.b32.xlu1 %v3376_v20, 296  ;;  %3410 = vbcast.lane.b32.xlu0 %v3376_v20, 320 }
 0x3f8   : > { %3406 = vbcast.lane.b32.xlu1 %v3376_v20, 312  ;;  %3418 = vbcast.lane.b32.xlu0 %v3376_v20, 336 }
 0x3fc   : > { %3414 = vbcast.lane.b32.xlu1 %v3376_v20, 328  ;;  %3426 = vbcast.lane.b32.xlu0 %v3376_v20, 352 }
 0x400   : > { %3422 = vbcast.lane.b32.xlu1 %v3376_v20, 344  ;;  %3434 = vbcast.lane.b32.xlu0 %v3376_v20, 368 }
 0x404   : > { %3430 = vbcast.lane.b32.xlu1 %v3376_v20, 360  ;;  %3445 = vbcast.lane.b32.xlu0 %v3443_v19, 256 }
 0x408   : > { %3438 = vbcast.lane.b32.xlu1 %v3376_v20, 376  ;;  %3453 = vbcast.lane.b32.xlu0 %v3443_v19, 272  ;;  %v5086_v20 = vld [vmem:[%s5337_s17 + $0x28] sm:$0xff]  }
 0x409   : > { %v3852_v44 = vunpack.c.l.bf16 %v5086_v20 }
 0x40c   : > { %3449 = vbcast.lane.b32.xlu1 %v3443_v19, 264  ;;  %3461 = vbcast.lane.b32.xlu0 %v3443_v19, 288 }
 0x410   : > { %3457 = vbcast.lane.b32.xlu1 %v3443_v19, 280  ;;  %3469 = vbcast.lane.b32.xlu0 %v3443_v19, 304 }
 0x414   : > { %3465 = vbcast.lane.b32.xlu1 %v3443_v19, 296  ;;  %3477 = vbcast.lane.b32.xlu0 %v3443_v19, 320 }
 0x418   : > { %3473 = vbcast.lane.b32.xlu1 %v3443_v19, 312  ;;  %3485 = vbcast.lane.b32.xlu0 %v3443_v19, 336 }
 0x41c   : > { %3481 = vbcast.lane.b32.xlu1 %v3443_v19, 328  ;;  %3493 = vbcast.lane.b32.xlu0 %v3443_v19, 352 }
 0x420   : > { %3489 = vbcast.lane.b32.xlu1 %v3443_v19, 344  ;;  %3501 = vbcast.lane.b32.xlu0 %v3443_v19, 368 }
 0x424   : > { %3497 = vbcast.lane.b32.xlu1 %v3443_v19, 360  ;;  %3512 = vbcast.lane.b32.xlu0 %v3510_v18, 256 }
 0x428   : > { %3505 = vbcast.lane.b32.xlu1 %v3443_v19, 376  ;;  %3520 = vbcast.lane.b32.xlu0 %v3510_v18, 272  ;;  %v3643_v19 = vsub.s32 5, %v7803_v56 }
 0x42a   : > { %v7088_v31 = vrot.slane %v7036_v53, %v3643_v19 }
 0x42c   : > { %3516 = vbcast.lane.b32.xlu1 %v3510_v18, 264  ;;  %3528 = vbcast.lane.b32.xlu0 %v3510_v18, 288 }
 0x430   : > { %3524 = vbcast.lane.b32.xlu1 %v3510_v18, 280  ;;  %3536 = vbcast.lane.b32.xlu0 %v3510_v18, 304 }
 0x434   : > { %3532 = vbcast.lane.b32.xlu1 %v3510_v18, 296  ;;  %3544 = vbcast.lane.b32.xlu0 %v3510_v18, 320 }
 0x438   : > { %3540 = vbcast.lane.b32.xlu1 %v3510_v18, 312  ;;  %3552 = vbcast.lane.b32.xlu0 %v3510_v18, 336 }
 0x43a   : > { %v3316_v29 = vpop.permute.xlu1 %3315  ;;  %v3312_v59 = vpop.permute.xlu0 %3311 }
 0x43b   : > { %v3971_v13 = vmul.f32 %v3843_v57, %v3316_v29  ;;  %v3970_v35 = vmul.f32 %v3842_v24, %v3312_v59  ;;  %v3853_v57 = vunpack.c.h.bf16 %v5086_v20  ;;  %v5087_v59 = vld [vmem:[%s5337_s17 + $0x40] sm:$0xff]  }
 0x43c   : > { %3548 = vbcast.lane.b32.xlu1 %v3510_v18, 328  ;;  %3560 = vbcast.lane.b32.xlu0 %v3510_v18, 352 }
 0x43d   : > { %v4099_v39 = vsel %vm7804_vm0, %v3971_v13, 0.0  ;;  %v4098_v55 = vsel %vm7805_vm9, %v3970_v35, 0.0  ;;  %v3858_v13 = vunpack.c.l.bf16 %v5087_v59  ;;  %v3710_v35 = vsub.s32 6, %v7803_v56  ;;  %vm7813_vm9 = vmmov %vm7804_vm0 }
 0x43e   : > { %v3320_v50 = vpop.permute.xlu1 %3319  ;;  %v3328_v52 = vpop.permute.xlu0 %3327  ;;  %v4100_v40 = vadd.f32 %v4099_v39, %v4098_v55  ;;  %v3859_v39 = vunpack.c.h.bf16 %v5087_v59  ;;  %v3777_v55 = vsub.s32 7, %v7803_v56 }
 0x43f   : > { %v3972_v11 = vmul.f32 %v3844_v58, %v3320_v50  ;;  %v3974_v45 = vmul.f32 %v3846_v42, %v3328_v52  ;;  %v5088_v42 = vld [vmem:[%s5337_s17 + $0x48] sm:$0xff]  }
 0x440   : > { %3556 = vbcast.lane.b32.xlu1 %v3510_v18, 344  ;;  %3568 = vbcast.lane.b32.xlu0 %v3510_v18, 368  ;;  %v3860_v52 = vunpack.c.l.bf16 %v5088_v42  ;;  %v3861_v56 = vunpack.c.h.bf16 %v5088_v42 }
 0x441   : > { %v4101_v25 = vsel %vm7806_vm10, %v3972_v11, 0.0  ;;  %v4105_v60 = vsel %vm7808_vm12, %v3974_v45, 0.0  ;;  %vm7814_vm10 = vmmov %vm7804_vm0 }
 0x442   : > { %v3324_v38 = vpop.permute.xlu1 %3323  ;;  %v3336_v62 = vpop.permute.xlu0 %3335  ;;  %v4102_v41 = vadd.f32 %v4101_v25, %v4100_v40  ;;  %vm7816_vm12 = vmmov %vm7804_vm0 }
 0x443   : > { %v3973_v12 = vmul.f32 %v3845_v14, %v3324_v38  ;;  %v3976_v21 = vmul.f32 %v3848_v17, %v3336_v62  ;;  %v5089_v14 = vld [vmem:[%s5337_s17 + $0x30] sm:$0xff]   ;;  %v7099_v38 = vrot.slane %v7036_v53, %v3710_v35 }
 0x444   : > { %3564 = vbcast.lane.b32.xlu1 %v3510_v18, 360  ;;  %3579 = vbcast.lane.b32.xlu0 %v7060_v0, 256  ;;  %v3854_v25 = vunpack.c.l.bf16 %v5089_v14  ;;  %v3855_v45 = vunpack.c.h.bf16 %v5089_v14 }
 0x445   : > { %v4103_v2 = vsel %vm7807_vm11, %v3973_v12, 0.0  ;;  %v4109_v23 = vsel %vm7810_vm14, %v3976_v21, 0.0  ;;  %vm7815_vm11 = vmmov %vm7804_vm0 }
 0x446   : > { %v4104_v8 = vadd.f32 %v4103_v2, %v4102_v41  ;;  %v3332_v46 = vpop.permute.xlu1 %3331  ;;  %v3344_v10 = vpop.permute.xlu0 %3343  ;;  %vm7818_vm14 = vmmov %vm7804_vm0 }
 0x447   : > { %v3975_v3 = vmul.f32 %v3847_v28, %v3332_v46  ;;  %v3978_v27 = vmul.f32 %v3850_v1, %v3344_v10  ;;  %v5090_v28 = vld [vmem:[%s5337_s17 + $0x50] sm:$0xff]   ;;  %v7106_v46 = vrot.slane %v7036_v53, %v3777_v55 }
 0x448   : > { %v4106_v51 = vadd.f32 %v4105_v60, %v4104_v8  ;;  %3572 = vbcast.lane.b32.xlu1 %v3510_v18, 376  ;;  %3587 = vbcast.lane.b32.xlu0 %v7060_v0, 272  ;;  %v3862_v41 = vunpack.c.l.bf16 %v5090_v28 }
 0x449   : > { %v4107_v36 = vsel %vm7809_vm13, %v3975_v3, 0.0  ;;  %v4113_v37 = vsel %vm7812_vm8, %v3978_v27, 0.0  ;;  %vm7817_vm13 = vmmov %vm7804_vm0 }
 0x44a   : > { %v4108_v32 = vadd.f32 %v4107_v36, %v4106_v51  ;;  %v3340_v47 = vpop.permute.xlu1 %3339  ;;  %v3352_v43 = vpop.permute.xlu0 %3351  ;;  %v5091_v36 = vld [vmem:[%s5337_s17 + $0x58] sm:$0xff]   ;;  %vm7820_vm8 = vmmov %vm7804_vm0 }
 0x44b   : > { %v3977_v30 = vmul.f32 %v3849_v26, %v3340_v47  ;;  %v3980_v29 = vmul.f32 %v3852_v44, %v3352_v43  ;;  %v3863_v43 = vunpack.c.h.bf16 %v5090_v28  ;;  %v3865_v44 = vunpack.c.h.bf16 %v5091_v36 }
 0x44c   : > { %3583 = vbcast.lane.b32.xlu1 %v7060_v0, 264  ;;  %3595 = vbcast.lane.b32.xlu0 %v7060_v0, 288  ;;  %v4110_v49 = vadd.f32 %v4109_v23, %v4108_v32  ;;  %v3864_v32 = vunpack.c.l.bf16 %v5091_v36 }
 0x44d   : > { %v4111_v15 = vsel %vm7811_vm15, %v3977_v30, 0.0  ;;  %v4117_v11 = vsel %vm7813_vm9, %v3980_v29, 0.0  ;;  %vm7819_vm15 = vmmov %vm7804_vm0 }
 0x44e   : > { %v3348_v16 = vpop.permute.xlu1 %3347  ;;  %v3360_v5 = vpop.permute.xlu0 %3359  ;;  %v4112_v6 = vadd.f32 %v4111_v15, %v4110_v49  ;;  %vm7821_vm9 = vmmov %vm7804_vm0 }
 0x44f   : > { %v3979_v54 = vmul.f32 %v3851_v33, %v3348_v16  ;;  %v3982_v10 = vmul.f32 %v3854_v25, %v3360_v5  ;;  %v5092_v16 = vld [vmem:[%s5337_s17 + $0x38] sm:$0xff]  }
 0x450   : > { %3591 = vbcast.lane.b32.xlu1 %v7060_v0, 280  ;;  %3603 = vbcast.lane.b32.xlu0 %v7060_v0, 304  ;;  %v4114_v34 = vadd.f32 %v4113_v37, %v4112_v6  ;;  %v3856_v5 = vunpack.c.l.bf16 %v5092_v16  ;;  %v3857_v15 = vunpack.c.h.bf16 %v5092_v16 }
 0x451   : > { %v4115_v24 = vsel %vm7804_vm0, %v3979_v54, 0.0  ;;  %v4121_v49 = vsel %vm7818_vm14, %v3982_v10, 0.0  ;;  %v5093_v54 = vld [vmem:[%s5337_s17 + $0x60] sm:$0xff]   ;;  %vm7826_vm14 = vmmov %vm7804_vm0 }
 0x452   : > { %v3356_v4 = vpop.permute.xlu1 %3355  ;;  %v7075_v7 = vpop.permute.xlu0 %3367  ;;  %v4116_v58 = vadd.f32 %v4115_v24, %v4114_v34  ;;  %v3866_v37 = vunpack.c.l.bf16 %v5093_v54  ;;  %v3867_v42 = vunpack.c.h.bf16 %v5093_v54  ;;  %v5097_v54 = vld [vmem:[%s5337_s17 + $0x80] sm:$0xff]  }
 0x453   : > { %v3981_v48 = vmul.f32 %v3853_v57, %v3356_v4  ;;  %v3984_v57 = vmul.f32 %v3856_v5, %v7075_v7 }
 0x454   : > { %3599 = vbcast.lane.b32.xlu1 %v7060_v0, 296  ;;  %3611 = vbcast.lane.b32.xlu0 %v7060_v0, 320  ;;  %v4118_v62 = vadd.f32 %v4117_v11, %v4116_v58  ;;  %v5094_v58 = vld [vmem:[%s5337_s17 + $0x68] sm:$0xff]  }
 0x455   : > { %v4119_v22 = vsel %vm7814_vm10, %v3981_v48, 0.0  ;;  %vm7822_vm10 = vmmov %vm7804_vm0 }
 0x456   : > { %v3364_v18 = vpop.permute.xlu1 %3363  ;;  %v3379_v9 = vpop.permute.xlu0 %3378  ;;  %v4120_v26 = vadd.f32 %v4119_v22, %v4118_v62 }
 0x457   : > { %v3986_v40 = vmul.f32 %v3858_v13, %v3379_v9  ;;  %v3983_v30 = vmul.f32 %v3855_v45, %v3364_v18 }
 0x458   : > { %3607 = vbcast.lane.b32.xlu1 %v7060_v0, 312  ;;  %3619 = vbcast.lane.b32.xlu0 %v7060_v0, 336  ;;  %v4122_v27 = vadd.f32 %v4121_v49, %v4120_v26 }
 0x459   : > { %v4135_v60 = vsel %vm7815_vm11, %v3986_v40, 0.0  ;;  %v4123_v19 = vsel %vm7820_vm8, %v3983_v30, 0.0  ;;  %vm7823_vm11 = vmmov %vm7804_vm0 }
 0x45a   : > { %v7090_v61 = vpop.permute.xlu1 %3371  ;;  %v3387_v50 = vpop.permute.xlu0 %3386  ;;  %v4124_v59 = vadd.f32 %v4123_v19, %v4122_v27  ;;  %v4125_v7 = vsel %vm7823_vm11, %v3984_v57, 0.0  ;;  %vm7828_vm8 = vmmov %vm7804_vm0 }
 0x45b   : > { %v3988_v17 = vmul.f32 %v3860_v52, %v3387_v50  ;;  %v3868_v50 = vunpack.c.l.bf16 %v5094_v58  ;;  %v3985_v52 = vmul.f32 %v3857_v15, %v7090_v61  ;;  %vm7831_vm11 = vmmov %vm7804_vm0 }
 0x45c   : > { %3615 = vbcast.lane.b32.xlu1 %v7060_v0, 328  ;;  %3650 = vbcast.lane.b32.xlu0 %v7088_v31, 264  ;;  %v4126_v40 = vadd.f32 %v4125_v7, %v4124_v59 }
 0x45d   : > { %v4138_v23 = vsel %vm7817_vm13, %v3988_v17, 0.0  ;;  %vm7825_vm13 = vmmov %vm7804_vm0 }
 0x45e   : > { %v3383_v12 = vpop.permute.xlu1 %3382  ;;  %v3395_v2 = vpop.permute.xlu0 %3394 }
 0x45f   : > { %v3987_v8 = vmul.f32 %v3859_v39, %v3383_v12  ;;  %v3990_v63 = vmul.f32 %v3862_v41, %v3395_v2  ;;  %v5095_v12 = vld [vmem:[%s5337_s17 + $0x70] sm:$0xff]   ;;  %v3869_v41 = vunpack.c.h.bf16 %v5094_v58  ;;  %v4127_v2 = vsel %vm7825_vm13, %v3985_v52, 0.0  ;;  %vm7833_vm13 = vmmov %vm7804_vm0 }
 0x460   : > { %3646 = vbcast.lane.b32.xlu1 %v7088_v31, 256  ;;  %3717 = vbcast.lane.b32.xlu0 %v7099_v38, 264  ;;  %v3870_v28 = vunpack.c.l.bf16 %v5095_v12  ;;  %v3871_v30 = vunpack.c.h.bf16 %v5095_v12 }
 0x461   : > { %v4136_v3 = vsel %vm7816_vm12, %v3987_v8, 0.0  ;;  %v4142_v34 = vsel %vm7804_vm0, %v3990_v63, 0.0  ;;  %vm7824_vm12 = vmmov %vm7804_vm0 }
 0x462   : > { %v4137_v51 = vadd.f32 %v4136_v3, %v4135_v60  ;;  %v3391_v21 = vpop.permute.xlu1 %3390  ;;  %v3403_v47 = vpop.permute.xlu0 %3402  ;;  %v4128_v60 = vadd.f32 %v4127_v2, %v4126_v40 }
 0x463   : > { %v3989_v53 = vmul.f32 %v3861_v56, %v3391_v21  ;;  %v3992_v18 = vmul.f32 %v3864_v32, %v3403_v47 }
 0x464   : > { %v4139_v1 = vadd.f32 %v4138_v23, %v4137_v51  ;;  %3713 = vbcast.lane.b32.xlu1 %v7099_v38, 256  ;;  %3780 = vbcast.lane.b32.xlu0 %v7106_v46, 256  ;;  %v5096_v51 = vld [vmem:[%s5337_s17 + $0x78] sm:$0xff]  }
 0x465   : > { %v4140_v33 = vsel %vm7819_vm15, %v3989_v53, 0.0  ;;  %v4146_v39 = vsel %vm7822_vm10, %v3992_v18, 0.0  ;;  %vm7827_vm15 = vmmov %vm7804_vm0  ;;  %v3872_v21 = vunpack.c.l.bf16 %v5096_v51  ;;  %v4129_v53 = vrot.slane %v4128_v60, 4 }
 0x466   : > { %v4141_v6 = vadd.f32 %v4140_v33, %v4139_v1  ;;  %v3399_v4 = vpop.permute.xlu1 %3398  ;;  %v3411_v20 = vpop.permute.xlu0 %3410  ;;  %v3873_v27 = vunpack.c.h.bf16 %v5096_v51  ;;  %vm7830_vm10 = vmmov %vm7804_vm0 }
 0x467   : > { %v3991_v9 = vmul.f32 %v3863_v43, %v3399_v4  ;;  %v3994_v55 = vmul.f32 %v3866_v37, %v3411_v20  ;;  %v3874_v37 = vunpack.c.l.bf16 %v5097_v54  ;;  %v4130_v20 = vadd.f32 %v4129_v53, %v4128_v60 }
 0x468   : > { %v4143_v24 = vadd.f32 %v4142_v34, %v4141_v6  ;;  %3654 = vbcast.lane.b32.xlu1 %v7088_v31, 272  ;;  %3721 = vbcast.lane.b32.xlu0 %v7099_v38, 272 }
 0x469   : > { %v4144_v29 = vsel %vm7821_vm9, %v3991_v9, 0.0  ;;  %v4150_v22 = vsel %vm7826_vm14, %v3994_v55, 0.0  ;;  %vm7829_vm9 = vmmov %vm7804_vm0  ;;  %v4131_v58 = vrot.slane %v4130_v20, 2  ;;  %v5099_v55 = vld [vmem:[%s5337_s17 + $0x90] sm:$0xff]  }
 0x46a   : > { %v4145_v13 = vadd.f32 %v4144_v29, %v4143_v24  ;;  %v3407_v35 = vpop.permute.xlu1 %3406  ;;  %v3419_v48 = vpop.permute.xlu0 %3418  ;;  %v5098_v24 = vld [vmem:[%s5337_s17 + $0x88] sm:$0xff]   ;;  %v3875_v29 = vunpack.c.h.bf16 %v5097_v54  ;;  %vm7834_vm14 = vmmov %vm7804_vm0 }
 0x46b   : > { %v3993_v11 = vmul.f32 %v3865_v44, %v3407_v35  ;;  %v3996_v17 = vmul.f32 %v3868_v50, %v3419_v48  ;;  %v3876_v57 = vunpack.c.l.bf16 %v5098_v24 }
 0x46c   : > { %v4147_v14 = vadd.f32 %v4146_v39, %v4145_v13  ;;  %3784 = vbcast.lane.b32.xlu1 %v7106_v46, 264  ;;  %3788 = vbcast.lane.b32.xlu0 %v7106_v46, 272 }
 0x46d   : > { %v4148_v25 = vsel %vm7824_vm12, %v3993_v11, 0.0  ;;  %v4154_v32 = vsel %vm7828_vm8, %v3996_v17, 0.0  ;;  %vm7832_vm12 = vmmov %vm7804_vm0  ;;  %v3878_v11 = vunpack.c.l.bf16 %v5099_v55 }
 0x46e   : > { %v4149_v62 = vadd.f32 %v4148_v25, %v4147_v14  ;;  %v3415_v45 = vpop.permute.xlu1 %3414  ;;  %v3427_v61 = vpop.permute.xlu0 %3426  ;;  %v3877_v14 = vunpack.c.h.bf16 %v5098_v24  ;;  %vm7836_vm8 = vmmov %vm7804_vm0 }
 0x46f   : > { %v3995_v8 = vmul.f32 %v3867_v42, %v3415_v45  ;;  %v3998_v47 = vmul.f32 %v3870_v28, %v3427_v61  ;;  %v5100_v61 = vld [vmem:[%s5337_s17 + $0x98] sm:$0xff]  }
 0x470   : > { %v4151_v56 = vadd.f32 %v4150_v22, %v4149_v62  ;;  %3658 = vbcast.lane.b32.xlu1 %v7088_v31, 280  ;;  %3662 = vbcast.lane.b32.xlu0 %v7088_v31, 288  ;;  %v4132_v62 = vadd.f32 %v4131_v58, %v4130_v20  ;;  %v3881_v53 = vunpack.c.h.bf16 %v5100_v61 }
 0x471   : > { %v4152_v10 = vsel %vm7827_vm15, %v3995_v8, 0.0  ;;  %v4158_v5 = vsel %vm7829_vm9, %v3998_v47, 0.0  ;;  %vm7835_vm15 = vmmov %vm7804_vm0 }
 0x472   : > { %v4153_v3 = vadd.f32 %v4152_v10, %v4151_v56  ;;  %v3423_v26 = vpop.permute.xlu1 %3422  ;;  %v3435_v36 = vpop.permute.xlu0 %3434  ;;  %v3879_v56 = vunpack.c.h.bf16 %v5099_v55  ;;  %vm7837_vm9 = vmmov %vm7804_vm0 }
 0x473   : > { %v3997_v43 = vmul.f32 %v3869_v41, %v3423_v26  ;;  %v4000_v15 = vmul.f32 %v3872_v21, %v3435_v36  ;;  %v3880_v41 = vunpack.c.l.bf16 %v5100_v61  ;;  %v4133_v26 = vrot.slane %v4132_v62, 1 }
 0x474   : > { %v4155_v23 = vadd.f32 %v4154_v32, %v4153_v3  ;;  %3725 = vbcast.lane.b32.xlu1 %v7099_v38, 280  ;;  %3729 = vbcast.lane.b32.xlu0 %v7099_v38, 288  ;;  %v5101_v32 = vld [vmem:[%s5337_s17 + $0xa0] sm:$0xff]  }
 0x475   : > { %v4156_v63 = vsel %vm7804_vm0, %v3997_v43, 0.0  ;;  %v4162_v18 = vsel %vm7831_vm11, %v4000_v15, 0.0  ;;  %v3882_v47 = vunpack.c.l.bf16 %v5101_v32  ;;  %vm7839_vm11 = vmmov %vm7804_vm0 }
 0x476   : > { %v4157_v1 = vadd.f32 %v4156_v63, %v4155_v23  ;;  %v3431_v49 = vpop.permute.xlu1 %3430  ;;  %v3446_v16 = vpop.permute.xlu0 %3445 }
 0x477   : > { %v3999_v33 = vmul.f32 %v3871_v30, %v3431_v49  ;;  %v4002_v13 = vmul.f32 %v3874_v37, %v3446_v16 }
 0x478   : > { %v4159_v6 = vadd.f32 %v4158_v5, %v4157_v1  ;;  %3792 = vbcast.lane.b32.xlu1 %v7106_v46, 280  ;;  %3796 = vbcast.lane.b32.xlu0 %v7106_v46, 288  ;;  %v4134_v5 = vadd.f32 %v4133_v26, %v4132_v62 }
 0x479   : > { %v4160_v4 = vsel %vm7830_vm10, %v3999_v33, 0.0  ;;  %v4172_v25 = vsel %vm7833_vm13, %v4002_v13, 0.0  ;;  %vm7838_vm10 = vmmov %vm7804_vm0 }
 0x47a   : > { %v4161_v44 = vadd.f32 %v4160_v4, %v4159_v6  ;;  %v3439_v19 = vpop.permute.xlu1 %3438  ;;  %v3454_v34 = vpop.permute.xlu0 %3453  ;;  %v5102_v6 = vld [vmem:[%s5337_s17 + $0xa8] sm:$0xff]   ;;  %vm7842_vm13 = vmmov %vm7804_vm0 }
 0x47b   : > { %v4001_v9 = vmul.f32 %v3873_v27, %v3439_v19  ;;  %v4004_v52 = vmul.f32 %v3876_v57, %v3454_v34  ;;  %v3884_v4 = vunpack.c.l.bf16 %v5102_v6  ;;  %v3883_v19 = vunpack.c.h.bf16 %v5101_v32 }
 0x47c   : > { %v4163_v59 = vadd.f32 %v4162_v18, %v4161_v44  ;;  %3666 = vbcast.lane.b32.xlu1 %v7088_v31, 296  ;;  %3670 = vbcast.lane.b32.xlu0 %v7088_v31, 304 }
 0x47d   : > { %v4164_v35 = vsel %vm7832_vm12, %v4001_v9, 0.0  ;;  %v4175_v22 = vsel %vm7835_vm15, %v4004_v52, 0.0  ;;  %vm7840_vm12 = vmmov %vm7804_vm0 }
 0x47e   : > { %v4165_v50 = vadd.f32 %v4164_v35, %v4163_v59  ;;  %v3450_v48 = vpop.permute.xlu1 %3449  ;;  %v3462_v42 = vpop.permute.xlu0 %3461  ;;  %vm7844_vm15 = vmmov %vm7804_vm0 }
 0x47f   : > { %v4003_v39 = vmul.f32 %v3875_v29, %v3450_v48  ;;  %v4006_v17 = vmul.f32 %v3878_v11, %v3462_v42  ;;  %v5103_v29 = vld [vmem:[%s5337_s17 + $0xb0] sm:$0xff]   ;;  %v3885_v48 = vunpack.c.h.bf16 %v5102_v6  ;;  %v5104_v11 = vld [vmem:[%s5337_s17 + $0xb8] sm:$0xff]  }
 0x480   : > { %v4166_v7 = vrot.slane %v4165_v50, 4  ;;  %3733 = vbcast.lane.b32.xlu1 %v7099_v38, 296  ;;  %3737 = vbcast.lane.b32.xlu0 %v7099_v38, 304  ;;  %v3886_v59 = vunpack.c.l.bf16 %v5103_v29 }
 0x481   : > { %v4173_v40 = vsel %vm7834_vm14, %v4003_v39, 0.0  ;;  %v4179_v30 = vsel %vm7804_vm0, %v4006_v17, 0.0  ;;  %vm7843_vm14 = vmmov %vm7804_vm0 }
 0x482   : > { %v4167_v45 = vadd.f32 %v4166_v7, %v4165_v50  ;;  %v4174_v12 = vadd.f32 %v4173_v40, %v4172_v25  ;;  %v3458_v28 = vpop.permute.xlu1 %3457  ;;  %v3470_v2 = vpop.permute.xlu0 %3469 }
 0x483   : > { %v4005_v8 = vmul.f32 %v3877_v14, %v3458_v28  ;;  %v4008_v23 = vmul.f32 %v3880_v41, %v3470_v2  ;;  %v3888_v14 = vunpack.c.l.bf16 %v5104_v11 }
 0x484   : > { %v4168_v10 = vrot.slane %v4167_v45, 2  ;;  %v4176_v60 = vadd.f32 %v4175_v22, %v4174_v12  ;;  %3800 = vbcast.lane.b32.xlu1 %v7106_v46, 296  ;;  %3804 = vbcast.lane.b32.xlu0 %v7106_v46, 304 }
 0x485   : > { %v4177_v3 = vsel %vm7836_vm8, %v4005_v8, 0.0  ;;  %v4183_v37 = vsel %vm7838_vm10, %v4008_v23, 0.0  ;;  %vm7845_vm8 = vmmov %vm7804_vm0 }
 0x486   : > { %v4169_v51 = vadd.f32 %v4168_v10, %v4167_v45  ;;  %v4178_v21 = vadd.f32 %v4177_v3, %v4176_v60  ;;  %v3466_v36 = vpop.permute.xlu1 %3465  ;;  %v3478_v43 = vpop.permute.xlu0 %3477  ;;  %v3887_v45 = vunpack.c.h.bf16 %v5103_v29  ;;  %v5105_v3 = vld [vmem:[%s5337_s17 + $0xc0] sm:$0xff]   ;;  %vm7847_vm10 = vmmov %vm7804_vm0 }
 0x487   : > { %v4007_v63 = vmul.f32 %v3879_v56, %v3466_v36  ;;  %v4010_v20 = vmul.f32 %v3882_v47, %v3478_v43  ;;  %v3889_v56 = vunpack.c.h.bf16 %v5104_v11  ;;  %v3890_v26 = vunpack.c.l.bf16 %v5105_v3  ;;  %v5106_v43 = vld [vmem:[%s5337_s17 + $0xc8] sm:$0xff]  }
 0x488   : > { %v4170_v1 = vrot.slane %v4169_v51, 1  ;;  %v4180_v49 = vadd.f32 %v4179_v30, %v4178_v21  ;;  %3674 = vbcast.lane.b32.xlu1 %v7088_v31, 312  ;;  %3678 = vbcast.lane.b32.xlu0 %v7088_v31, 320  ;;  %v3892_v30 = vunpack.c.l.bf16 %v5106_v43  ;;  %v3891_v23 = vunpack.c.h.bf16 %v5105_v3 }
 0x489   : > { %v4181_v16 = vsel %vm7837_vm9, %v4007_v63, 0.0  ;;  %v4187_v35 = vsel %vm7840_vm12, %v4010_v20, 0.0  ;;  %vm7846_vm9 = vmmov %vm7804_vm0 }
 0x48a   : > { %v4171_v15 = vadd.f32 %v4170_v1, %v4169_v51  ;;  %v4182_v33 = vadd.f32 %v4181_v16, %v4180_v49  ;;  %v3474_v27 = vpop.permute.xlu1 %3473  ;;  %v3486_v54 = vpop.permute.xlu0 %3485  ;;  %vm7849_vm12 = vmmov %vm7804_vm0 }
 0x48b   : > { %v4009_v44 = vmul.f32 %v3881_v53, %v3474_v27  ;;  %v4012_v58 = vmul.f32 %v3884_v4, %v3486_v54  ;;  %v5107_v27 = vld [vmem:[%s5337_s17 + $0xd0] sm:$0xff]   ;;  %v3893_v4 = vunpack.c.h.bf16 %v5106_v43 }
 0x48c   : > { %v7170_v34 = vsel %vm3281_vm1, %v4171_v15, %v4134_v5  ;;  %v4184_v18 = vadd.f32 %v4183_v37, %v4182_v33  ;;  %3741 = vbcast.lane.b32.xlu1 %v7099_v38, 312  ;;  %3745 = vbcast.lane.b32.xlu0 %v7099_v38, 320  ;;  %vm7841_vm1 = vmmov %vm7804_vm0  ;;  %v3894_v6 = vunpack.c.l.bf16 %v5107_v27 }
 0x48d   : > { %v4185_v9 = vsel %vm7839_vm11, %v4009_v44, 0.0  ;;  %v4191_v25 = vsel %vm7842_vm13, %v4012_v58, 0.0  ;;  %vm7848_vm11 = vmmov %vm7804_vm0 }
 0x48e   : > { %v4186_v24 = vadd.f32 %v4185_v9, %v4184_v18  ;;  %v3482_v57 = vpop.permute.xlu1 %3481  ;;  %v3494_v13 = vpop.permute.xlu0 %3493  ;;  %v5108_v9 = vld [vmem:[%s5337_s17 + $0xd8] sm:$0xff]   ;;  %vm7851_vm13 = vmmov %vm7804_vm0 }
 0x48f   : > { %v4011_v50 = vmul.f32 %v3883_v19, %v3482_v57  ;;  %v4014_v40 = vmul.f32 %v3886_v59, %v3494_v13 }
 0x490   : > { %v4188_v42 = vadd.f32 %v4187_v35, %v4186_v24  ;;  %3808 = vbcast.lane.b32.xlu1 %v7106_v46, 312  ;;  %3812 = vbcast.lane.b32.xlu0 %v7106_v46, 320  ;;  %v3896_v24 = vunpack.c.l.bf16 %v5108_v9  ;;  %v3895_v35 = vunpack.c.h.bf16 %v5107_v27 }
 0x491   : > { %v4189_v52 = vsel %vm7841_vm1, %v4011_v50, 0.0  ;;  %v4195_v22 = vsel %vm7844_vm15, %v4014_v40, 0.0  ;;  %vm7850_vm1 = vmmov %vm7804_vm0 }
 0x492   : > { %v4190_v39 = vadd.f32 %v4189_v52, %v4188_v42  ;;  %v3490_v55 = vpop.permute.xlu1 %3489  ;;  %v3502_v7 = vpop.permute.xlu0 %3501  ;;  %vm7853_vm15 = vmmov %vm7804_vm0 }
 0x493   : > { %v4013_v62 = vmul.f32 %v3885_v48, %v3490_v55  ;;  %v4016_v17 = vmul.f32 %v3888_v14, %v3502_v7  ;;  %v5109_v55 = vld [vmem:[%s5337_s17 + $0xe0] sm:$0xff]  }
 0x494   : > { %v4192_v12 = vadd.f32 %v4191_v25, %v4190_v39  ;;  %3682 = vbcast.lane.b32.xlu1 %v7088_v31, 328  ;;  %3686 = vbcast.lane.b32.xlu0 %v7088_v31, 336  ;;  %v3898_v11 = vunpack.c.l.bf16 %v5109_v55  ;;  %v3899_v3 = vunpack.c.h.bf16 %v5109_v55 }
 0x495   : > { %v4193_v28 = vsel %vm7843_vm14, %v4013_v62, 0.0  ;;  %v4199_v32 = vsel %vm7804_vm0, %v4016_v17, 0.0  ;;  %v3897_v62 = vunpack.c.h.bf16 %v5108_v9  ;;  %vm7852_vm14 = vmmov %vm7804_vm0 }
 0x496   : > { %v4194_v61 = vadd.f32 %v4193_v28, %v4192_v12  ;;  %v3498_v41 = vpop.permute.xlu1 %3497  ;;  %v3513_v2 = vpop.permute.xlu0 %3512 }
 0x497   : > { %v4015_v8 = vmul.f32 %v3887_v45, %v3498_v41  ;;  %v4018_v53 = vmul.f32 %v3890_v26, %v3513_v2 }
 0x498   : > { %v4196_v10 = vadd.f32 %v4195_v22, %v4194_v61  ;;  %3749 = vbcast.lane.b32.xlu1 %v7099_v38, 328  ;;  %3623 = vbcast.lane.b32.xlu0 %v7060_v0, 344  ;;  %v5110_v22 = vld [vmem:[%s5337_s17 + $0xe8] sm:$0xff]  }
 0x499   : > { %v4197_v60 = vsel %vm7845_vm8, %v4015_v8, 0.0  ;;  %v4209_v37 = vsel %vm7847_vm10, %v4018_v53, 0.0  ;;  %v3900_v17 = vunpack.c.l.bf16 %v5110_v22  ;;  %vm7854_vm8 = vmmov %vm7804_vm0 }
 0x49a   : > { %v4198_v51 = vadd.f32 %v4197_v60, %v4196_v10  ;;  %v3506_v21 = vpop.permute.xlu1 %3505  ;;  %v3521_v36 = vpop.permute.xlu0 %3520  ;;  %vm7857_vm10 = vmmov %vm7804_vm0 }
 0x49b   : > { %v4017_v47 = vmul.f32 %v3889_v56, %v3506_v21  ;;  %v4020_v15 = vmul.f32 %v3892_v30, %v3521_v36 }
 0x49c   : > { %v4200_v63 = vadd.f32 %v4199_v32, %v4198_v51  ;;  %3816 = vbcast.lane.b32.xlu1 %v7106_v46, 328  ;;  %3690 = vbcast.lane.b32.xlu0 %v7088_v31, 344 }
 0x49d   : > { %v4201_v1 = vsel %vm7846_vm9, %v4017_v47, 0.0  ;;  %v4212_v29 = vsel %vm7849_vm12, %v4020_v15, 0.0  ;;  %v5111_v47 = vld [vmem:[%s5337_s17 + $0xf0] sm:$0xff]   ;;  %v5112_v15 = vld [vmem:[%s5337_s17 + $0xf8] sm:$0xff]   ;;  %vm7856_vm9 = vmmov %vm7804_vm0 }
 0x49e   : > { %v4202_v49 = vadd.f32 %v4201_v1, %v4200_v63  ;;  %v3517_v16 = vpop.permute.xlu1 %3516  ;;  %v3529_v5 = vpop.permute.xlu0 %3528  ;;  %v3902_v43 = vunpack.c.l.bf16 %v5111_v47  ;;  %v3901_v1 = vunpack.c.h.bf16 %v5110_v22  ;;  %vm7859_vm12 = vmmov %vm7804_vm0 }
 0x49f   : > { %v4019_v33 = vmul.f32 %v3891_v23, %v3517_v16  ;;  %v4022_v59 = vmul.f32 %v3894_v6, %v3529_v5 }
 0x4a0   : > { %v4203_v54 = vrot.slane %v4202_v49, 4  ;;  %3753 = vbcast.lane.b32.xlu1 %v7099_v38, 336  ;;  %3627 = vbcast.lane.b32.xlu0 %v7060_v0, 352 }
 0x4a1   : > { %v4210_v20 = vsel %vm7848_vm11, %v4019_v33, 0.0  ;;  %v4216_v7 = vsel %vm7851_vm13, %v4022_v59, 0.0  ;;  %v3904_v33 = vunpack.c.l.bf16 %v5112_v15  ;;  %vm7858_vm11 = vmmov %vm7804_vm0  ;;  %v3905_v59 = vunpack.c.h.bf16 %v5112_v15 }
 0x4a2   : > { %v4204_v44 = vadd.f32 %v4203_v54, %v4202_v49  ;;  %v4211_v19 = vadd.f32 %v4210_v20, %v4209_v37  ;;  %v3525_v18 = vpop.permute.xlu1 %3524  ;;  %v3537_v57 = vpop.permute.xlu0 %3536  ;;  %v3903_v37 = vunpack.c.h.bf16 %v5111_v47  ;;  %vm7861_vm13 = vmmov %vm7804_vm0 }
 0x4a3   : > { %v4021_v13 = vmul.f32 %v3893_v4, %v3525_v18  ;;  %v4024_v25 = vmul.f32 %v3896_v24, %v3537_v57 }
 0x4a4   : > { %v4205_v58 = vrot.slane %v4204_v44, 2  ;;  %v4213_v50 = vadd.f32 %v4212_v29, %v4211_v19  ;;  %3820 = vbcast.lane.b32.xlu1 %v7106_v46, 336  ;;  %3694 = vbcast.lane.b32.xlu0 %v7088_v31, 352 }
 0x4a5   : > { %v4214_v48 = vsel %vm7850_vm1, %v4021_v13, 0.0  ;;  %v4220_v56 = vsel %vm7853_vm15, %v4024_v25, 0.0  ;;  %vm7860_vm1 = vmmov %vm7804_vm0 }
 0x4a6   : > { %v4206_v42 = vadd.f32 %v4205_v58, %v4204_v44  ;;  %v4215_v52 = vadd.f32 %v4214_v48, %v4213_v50  ;;  %v3533_v39 = vpop.permute.xlu1 %3532  ;;  %v3545_v14 = vpop.permute.xlu0 %3544  ;;  %v5113_v58 = vld [vmem:[%s5337_s17 + $0x100] sm:$0xff]   ;;  %vm7863_vm15 = vmmov %vm7804_vm0 }
 0x4a7   : > { %v4023_v40 = vmul.f32 %v3895_v35, %v3533_v39  ;;  %v4026_v10 = vmul.f32 %v3898_v11, %v3545_v14  ;;  %v3906_v50 = vunpack.c.l.bf16 %v5113_v58  ;;  %v5114_v11 = vld [vmem:[%s5337_s17 + $0x108] sm:$0xff]  }
 0x4a8   : > { %v4207_v45 = vrot.slane %v4206_v42, 1  ;;  %v4217_v12 = vadd.f32 %v4216_v7, %v4215_v52  ;;  %3757 = vbcast.lane.b32.xlu1 %v7099_v38, 344  ;;  %3631 = vbcast.lane.b32.xlu0 %v7060_v0, 360  ;;  %v3908_v14 = vunpack.c.l.bf16 %v5114_v11  ;;  %v3907_v7 = vunpack.c.h.bf16 %v5113_v58  ;;  %v5119_v58 = vld [vmem:[%s5337_s17 + $0x140] sm:$0xff]  }
 0x4a9   : > { %v4218_v28 = vsel %vm7852_vm14, %v4023_v40, 0.0  ;;  %v4224_v23 = vsel %vm7804_vm0, %v4026_v10, 0.0  ;;  %v3909_v22 = vunpack.c.h.bf16 %v5114_v11  ;;  %vm7862_vm14 = vmmov %vm7804_vm0 }
 0x4aa   : > { %v4208_v61 = vadd.f32 %v4207_v45, %v4206_v42  ;;  %v4219_v41 = vadd.f32 %v4218_v28, %v4217_v12  ;;  %v3541_v2 = vpop.permute.xlu1 %3540  ;;  %v3553_v8 = vpop.permute.xlu0 %3552 }
 0x4ab   : > { %v4025_v60 = vmul.f32 %v3897_v62, %v3541_v2  ;;  %v4028_v63 = vmul.f32 %v3900_v17, %v3553_v8 }
 0x4ac   : > { %v7214_v26 = vsel %vm3283_vm2, %v4208_v61, %v7170_v34  ;;  %v4221_v51 = vadd.f32 %v4220_v56, %v4219_v41  ;;  %3824 = vbcast.lane.b32.xlu1 %v7106_v46, 344  ;;  %3698 = vbcast.lane.b32.xlu0 %v7088_v31, 360  ;;  %vm7855_vm2 = vmmov %vm7804_vm0  ;;  %v5115_v41 = vld [vmem:[%s5337_s17 + $0x110] sm:$0xff]  }
 0x4ad   : > { %v4222_v21 = vsel %vm7854_vm8, %v4025_v60, 0.0  ;;  %v4228_v6 = vsel %vm7856_vm9, %v4028_v63, 0.0  ;;  %v3910_v2 = vunpack.c.l.bf16 %v5115_v41  ;;  %vm7864_vm8 = vmmov %vm7804_vm0 }
 0x4ae   : > { %v4223_v36 = vadd.f32 %v4222_v21, %v4221_v51  ;;  %v3549_v32 = vpop.permute.xlu1 %3548  ;;  %v3561_v30 = vpop.permute.xlu0 %3560  ;;  %vm7866_vm9 = vmmov %vm7804_vm0 }
 0x4af   : > { %v4027_v53 = vmul.f32 %v3899_v3, %v3549_v32  ;;  %v4030_v4 = vmul.f32 %v3902_v43, %v3561_v30  ;;  %v5116_v3 = vld [vmem:[%s5337_s17 + $0x118] sm:$0xff]   ;;  %v3911_v43 = vunpack.c.h.bf16 %v5115_v41 }
 0x4b0   : > { %v4225_v34 = vadd.f32 %v4224_v23, %v4223_v36  ;;  %3761 = vbcast.lane.b32.xlu1 %v7099_v38, 352  ;;  %3635 = vbcast.lane.b32.xlu0 %v7060_v0, 368  ;;  %v3912_v51 = vunpack.c.l.bf16 %v5116_v3 }
 0x4b1   : > { %v4226_v49 = vsel %vm7855_vm2, %v4027_v53, 0.0  ;;  %v4232_v24 = vsel %vm7858_vm11, %v4030_v4, 0.0  ;;  %vm7865_vm2 = vmmov %vm7804_vm0 }
 0x4b2   : > { %v4227_v16 = vadd.f32 %v4226_v49, %v4225_v34  ;;  %v3557_v5 = vpop.permute.xlu1 %3556  ;;  %v3569_v27 = vpop.permute.xlu0 %3568  ;;  %v5117_v34 = vld [vmem:[%s5337_s17 + $0x120] sm:$0xff]   ;;  %vm7868_vm11 = vmmov %vm7804_vm0 }
 0x4b3   : > { %v4029_v54 = vmul.f32 %v3901_v1, %v3557_v5  ;;  %v4032_v57 = vmul.f32 %v3904_v33, %v3569_v27  ;;  %v3914_v49 = vunpack.c.l.bf16 %v5117_v34  ;;  %v3913_v27 = vunpack.c.h.bf16 %v5116_v3 }
 0x4b4   : > { %v4229_v20 = vadd.f32 %v4228_v6, %v4227_v16  ;;  %3828 = vbcast.lane.b32.xlu1 %v7106_v46, 352  ;;  %3702 = vbcast.lane.b32.xlu0 %v7088_v31, 368 }
 0x4b5   : > { %v4230_v44 = vsel %vm7857_vm10, %v4029_v54, 0.0  ;;  %v4236_v39 = vsel %vm7860_vm1, %v4032_v57, 0.0  ;;  %vm7867_vm10 = vmmov %vm7804_vm0 }
 0x4b6   : > { %v4231_v19 = vadd.f32 %v4230_v44, %v4229_v20  ;;  %v3565_v18 = vpop.permute.xlu1 %3564  ;;  %v3580_v9 = vpop.permute.xlu0 %3579 }
 0x4b7   : > { %v4031_v29 = vmul.f32 %v3903_v37, %v3565_v18 }
 0x4b8   : > { %v4233_v13 = vadd.f32 %v4232_v24, %v4231_v19  ;;  %3765 = vbcast.lane.b32.xlu1 %v7099_v38, 360  ;;  %3639 = vbcast.lane.b32.xlu0 %v7060_v0, 376  ;;  %v4034_v0 = vmul.f32 %v3906_v50, %v3580_v9  ;;  %v7253_v19 = vld [vmem:[%s5337_s17 + $0x128] sm:$0xff]   ;;  %v3923_v50 = vunpack.c.h.bf16 %v5119_v58 }
 0x4b9   : > { %v4234_v35 = vsel %vm7859_vm12, %v4031_v29, 0.0  ;;  %v3916_v18 = vunpack.c.l.bf16 %v7253_v19  ;;  %vm7869_vm12 = vmmov %vm7804_vm0 }
 0x4ba   : > { %v4235_v48 = vadd.f32 %v4234_v35, %v4233_v13  ;;  %v3573_v42 = vpop.permute.xlu1 %3572  ;;  %v3588_v52 = vpop.permute.xlu0 %3587  ;;  %v4246_v8 = vsel %vm7862_vm14, %v4034_v0, 0.0  ;;  %v5120_v0 = vld [vmem:[%s5337_s17 + $0x180] sm:$0xff]  }
 0x4bb   : > { %v4033_v55 = vmul.f32 %v3905_v59, %v3573_v42  ;;  %v4036_v28 = vmul.f32 %v3908_v14, %v3588_v52  ;;  %v3915_v59 = vunpack.c.h.bf16 %v5117_v34  ;;  %v3922_v14 = vunpack.c.l.bf16 %v5119_v58 }
 0x4bc   : > { %v4237_v25 = vadd.f32 %v4236_v39, %v4235_v48  ;;  %3832 = vbcast.lane.b32.xlu1 %v7106_v46, 360  ;;  %3706 = vbcast.lane.b32.xlu0 %v7088_v31, 376 }
 0x4bd   : > { %v4238_v40 = vsel %vm7861_vm13, %v4033_v55, 0.0  ;;  %v4249_v36 = vsel %vm7864_vm8, %v4036_v28, 0.0 }
 0x4be   : > { %v4239_v62 = vadd.f32 %v4238_v40, %v4237_v25  ;;  %v3584_v45 = vpop.permute.xlu1 %3583  ;;  %v3596_v12 = vpop.permute.xlu0 %3595  ;;  %v3939_v40 = vunpack.c.h.bf16 %v5120_v0 }
 0x4bf   : > { %v4035_v61 = vmul.f32 %v3907_v7, %v3584_v45  ;;  %v4038_v32 = vmul.f32 %v3910_v2, %v3596_v12 }
 0x4c0   : > { %v4240_v17 = vrot.slane %v4239_v62, 4  ;;  %3769 = vbcast.lane.b32.xlu1 %v7099_v38, 368  ;;  %3773 = vbcast.lane.b32.xlu0 %v7099_v38, 376 }
 0x4c1   : > { %v4247_v31 = vsel %vm7863_vm15, %v4035_v61, 0.0  ;;  %v4253_v5 = vsel %vm7865_vm2, %v4038_v32, 0.0 }
 0x4c2   : > { %v4241_v56 = vadd.f32 %v4240_v17, %v4239_v62  ;;  %v4248_v10 = vadd.f32 %v4247_v31, %v4246_v8  ;;  %v3592_v60 = vpop.permute.xlu1 %3591  ;;  %v3604_v21 = vpop.permute.xlu0 %3603 }
 0x4c3   : > { %v4037_v47 = vmul.f32 %v3909_v22, %v3592_v60  ;;  %v4040_v15 = vmul.f32 %v3912_v51, %v3604_v21 }
 0x4c4   : > { %v4242_v30 = vrot.slane %v4241_v56, 2  ;;  %v4250_v23 = vadd.f32 %v4249_v36, %v4248_v10  ;;  %3836 = vbcast.lane.b32.xlu1 %v7106_v46, 368 }
 0x4c5   : > { %v4251_v38 = vsel %vm7804_vm0, %v4037_v47, 0.0  ;;  %v4257_v24 = vsel %vm7867_vm10, %v4040_v15, 0.0 }
 0x4c6   : > { %v4243_v63 = vadd.f32 %v4242_v30, %v4241_v56  ;;  %v4252_v53 = vadd.f32 %v4251_v38, %v4250_v23  ;;  %v3600_v1 = vpop.permute.xlu1 %3599  ;;  %v3612_v16 = vpop.permute.xlu0 %3611 }
 0x4c7   : > { %v4039_v33 = vmul.f32 %v3911_v43, %v3600_v1  ;;  %v4042_v57 = vmul.f32 %v3914_v49, %v3612_v16 }
 0x4c8   : > { %v4244_v6 = vrot.slane %v4243_v63, 1  ;;  %v4254_v4 = vadd.f32 %v4253_v5, %v4252_v53  ;;  %3840 = vbcast.lane.b32.xlu1 %v7106_v46, 376 }
 0x4c9   : > { %v4255_v54 = vsel %vm7866_vm9, %v4039_v33, 0.0  ;;  %v4261_v39 = vsel %vm7869_vm12, %v4042_v57, 0.0 }
 0x4ca   : > { %v4245_v37 = vadd.f32 %v4244_v6, %v4243_v63  ;;  %v4256_v20 = vadd.f32 %v4255_v54, %v4254_v4  ;;  %v3608_v44 = vpop.permute.xlu1 %3607  ;;  %v3620_v9 = vpop.permute.xlu0 %3619 }
 0x4cb   : > { %v4041_v29 = vmul.f32 %v3913_v27, %v3608_v44  ;;  %v4044_v55 = vmul.f32 %v3916_v18, %v3620_v9 }
 0x4cc   : > { %v7259_v46 = vsel %vm3285_vm3, %v4245_v37, %v7214_v26  ;;  %v4258_v13 = vadd.f32 %v4257_v24, %v4256_v20  ;;  %vm7870_vm3 = vmmov %vm7804_vm0 }
 0x4cd   : > { %v4259_v35 = vsel %vm7868_vm11, %v4041_v29, 0.0 }
 0x4ce   : > { %v4260_v48 = vadd.f32 %v4259_v35, %v4258_v13  ;;  %v3616_v42 = vpop.permute.xlu1 %3615  ;;  %v3651_v52 = vpop.permute.xlu0 %3650 }
 0x4cf   : > { %v4043_v11 = vmul.f32 %v3915_v59, %v3616_v42  ;;  %v4051_v25 = vmul.f32 %v3923_v50, %v3651_v52 }
 0x4d0   : > { %v4262_v7 = vadd.f32 %v4261_v39, %v4260_v48 }
 0x4d1   : > { %v4263_v26 = vsel %vm7870_vm3, %v4043_v11, 0.0 }
 0x4d2   : > { %v4264_v62 = vadd.f32 %v4263_v26, %v4262_v7  ;;  %v3647_v45 = vpop.permute.xlu1 %3646  ;;  %v3718_v12 = vpop.permute.xlu0 %3717 }
 0x4d3   : > { %5158 = shalt.err (!%p5155_p4)
}
 0x4d4   : > { %s5159_s18 = scalar_lea.hbm %s7270_s10, 128  ;;  %s5163_s9 = scalar_lea.hbm %s7684_s6, 256 }
 0x4d5   : > { %p5160_p7 = scmp.ne.s32.totalorder %s7270_s10, %s5159_s18  ;;  %p5164_p10 = scmp.lt.u32.totalorder %s7270_s10, %s7684_s6 }
 0x4d6   : > { %p5165_p11 = scmp.lt.u32.totalorder %s5163_s9, %s5159_s18  ;;  %p5167_p13 = scmp.lt.u32.totalorder %s5159_s18, %s7270_s10 }
 0x4d7   : > { %p5161_p8 = pnand %p5160_p7, %p5317_p5 }
 0x4d8   : > { %p5166_p12 = por %p5165_p11, %p5164_p10 }
 0x4d9   : > { %p5162_p9 = pneg %p5161_p8 }
 0x4da   : > { %p5168_p0 = por %p5167_p13, %p5166_p12 }
 0x4dc   : > { %p5169_p1 = pnand %p5168_p0, %p5162_p9 }
 0x4de   : > { %5172 = shalt.err (!%p5169_p1)
}
 0x4df   : > { %4899 = dma.vmem_to_hbm [thread:$0]  (%p5317_p5), %s7275_s11, 128, %s7270_s10, %s4418_s12   ;;  %vm7871_vm1 = vmmov %vm7804_vm0  ;;  %v4050_v61 = vmul.f32 %v3922_v14, %v3647_v45  ;;  %v3938_v41 = vunpack.c.l.bf16 %v5120_v0  ;;  %v4067_v8 = vmul.f32 %v3939_v40, %v3718_v12  ;;  %v3714_v56 = vpop.permute.xlu1 %3713  ;;  %v3781_v10 = vpop.permute.xlu0 %3780  ;;  %v5121_v3 = vld [vmem:[%s5337_s17 + $0x148] sm:$0xff]   ;;  %v5122_v32 = vld [vmem:[%s5337_s17 + $0x1c0] sm:$0xff]  }
 0x4e0   : > { %v4265_v28 = vsel %vm7871_vm1, %v4044_v55, 0.0  ;;  %vm7872_vm13 = vmmov %vm7804_vm0  ;;  %v3924_v51 = vunpack.c.l.bf16 %v5121_v3  ;;  %v3954_v47 = vunpack.c.l.bf16 %v5122_v32  ;;  %v3955_v63 = vunpack.c.h.bf16 %v5122_v32  ;;  %v5123_v11 = vld [vmem:[%s5337_s17 + $0x188] sm:$0xff]   ;;  %s7633_s13 = scalar_lea.hbm %s7683_s5, %s4691_s28  ;;  %s4413_s16 = scalar_lea.sflag [#allocation3], %s7033_s19 }
 0x4e1   : > { %v7300_v2 = vadd.f32 %v4265_v28, %v4264_v62  ;;  %v4284_v22 = vsel %vm7872_vm13, %v4051_v25, 0.0  ;;  %vm7873_vm14 = vmmov %vm7804_vm0  ;;  %v4066_v60 = vmul.f32 %v3938_v41, %v3714_v56  ;;  %v3925_v55 = vunpack.c.h.bf16 %v5121_v3  ;;  %v5124_v7 = vld [vmem:[%s5337_s17 + $0x1c8] sm:$0xff]   ;;  %v5125_v25 = vld [vmem:[%s5337_s17 + $0x150] sm:$0xff]   ;;  %s5243_s25 = smov [#allocation2]  }
 0x4e2   : > { %v4283_v17 = vsel %vm7873_vm14, %v4050_v61, 0.0  ;;  %vm7874_vm15 = vmmov %vm7804_vm0  ;;  %v4082_v53 = vmul.f32 %v3954_v47, %v3781_v10  ;;  %v3940_v14 = vunpack.c.l.bf16 %v5123_v11  ;;  %v3956_v26 = vunpack.c.l.bf16 %v5124_v7  ;;  %v7365_v28 = vld [vmem:[%s5337_s17 + $0x190] sm:$0xff]   ;;  %v7388_v47 = vld [vmem:[%s5337_s17 + $0x160] sm:$0xff]  }
 0x4e3   : > { %v4285_v31 = vadd.f32 %v4284_v22, %v4283_v17  ;;  %v4321_v21 = vsel %vm7874_vm15, %v4067_v8, 0.0  ;;  %vm7875_vm8 = vmmov %vm7804_vm0  ;;  %v3655_v30 = vpop.permute.xlu1 %3654  ;;  %v7310_v23 = vpop.permute.xlu0 %3721  ;;  %v3926_v0 = vunpack.c.l.bf16 %v5125_v25  ;;  %v3941_v12 = vunpack.c.h.bf16 %v5123_v11  ;;  %v7369_v22 = vld [vmem:[%s5337_s17 + $0x1d0] sm:$0xff]  }
 0x4e4   : > { %v4320_v36 = vsel %vm7875_vm8, %v4066_v60, 0.0  ;;  %v4052_v38 = vmul.f32 %v3924_v51, %v3655_v30  ;;  %vm7876_vm2 = vmmov %vm7804_vm0  ;;  %v3942_v61 = vunpack.c.l.bf16 %v7365_v28  ;;  %v3957_v41 = vunpack.c.h.bf16 %v5124_v7  ;;  %v7378_v60 = vld [vmem:[%s5337_s17 + $0x198] sm:$0xff]   ;;  %v7409_v7 = vld [vmem:[%s5337_s17 + $0x168] sm:$0xff]  }
 0x4e5   : > { %v7308_v43 = vadd.f32 %v4321_v21, %v4320_v36  ;;  %v4357_v15 = vsel %vm7876_vm2, %v4082_v53, 0.0  ;;  %vm7877_vm9 = vmmov %vm7804_vm0  ;;  %v3958_v17 = vunpack.c.l.bf16 %v7369_v22  ;;  %v3927_v8 = vunpack.c.h.bf16 %v5125_v25  ;;  %v7383_v21 = vld [vmem:[%s5337_s17 + $0x1d8] sm:$0xff]   ;;  %v7421_v25 = vld [vmem:[%s5337_s17 + $0x1a8] sm:$0xff]  }
 0x4e6   : > { %v4286_v1 = vsel %vm7804_vm0, %v4052_v38, 0.0  ;;  %v3943_v10 = vunpack.c.h.bf16 %v7365_v28  ;;  %v3944_v3 = vunpack.c.l.bf16 %v7378_v60  ;;  %v3959_v51 = vunpack.c.h.bf16 %v7369_v22  ;;  %vm7878_vm10 = vmmov %vm7804_vm0  ;;  %v7427_v11 = vld [vmem:[%s5337_s17 + $0x130] sm:$0xff]  }
 0x4e7   : > { %v7313_v34 = vadd.f32 %v4286_v1, %v4285_v31  ;;  %v3785_v49 = vpop.permute.xlu1 %3784  ;;  %v7315_v16 = vpop.permute.xlu0 %3788  ;;  %v7373_v31 = vld [vmem:[%s5337_s17 + $0x158] sm:$0xff]   ;;  %v3930_v30 = vunpack.c.l.bf16 %v7388_v47  ;;  %v3945_v38 = vunpack.c.h.bf16 %v7378_v60  ;;  %vm7879_vm11 = vmmov %vm7804_vm0 }
 0x4e8   : > { %v4083_v5 = vmul.f32 %v3955_v63, %v3785_v49  ;;  %v3928_v56 = vunpack.c.l.bf16 %v7373_v31  ;;  %v3929_v32 = vunpack.c.h.bf16 %v7373_v31  ;;  %v7393_v63 = vld [vmem:[%s5337_s17 + $0x1a0] sm:$0xff]   ;;  %v4084_v53 = vmul.f32 %v3956_v26, %v7315_v16  ;;  %v7435_v16 = vld [vmem:[%s5337_s17 + $0x1e8] sm:$0xff]   ;;  %v7439_v26 = vld [vmem:[%s5337_s17 + $0x170] sm:$0xff]  }
 0x4e9   : > { %vm7880_vm12 = vmmov %vm7804_vm0 }
 0x4ea   : > { %v4358_v33 = vsel %vm7877_vm9, %v4083_v5, 0.0  ;;  %vm7881_vm3 = vmmov %vm7804_vm0 }
 0x4eb   : > { %v7319_v27 = vadd.f32 %v4358_v33, %v4357_v15  ;;  %v3659_v6 = vpop.permute.xlu1 %3658  ;;  %v7321_v4 = vpop.permute.xlu0 %3662  ;;  %v4068_v15 = vmul.f32 %v3940_v14, %v7310_v23  ;;  %vm7882_vm1 = vmmov %vm7804_vm0 }
 0x4ec   : > { %v4053_v45 = vmul.f32 %v3925_v55, %v3659_v6  ;;  %v7404_v6 = vld [vmem:[%s5337_s17 + $0x1e0] sm:$0xff]   ;;  %v4054_v14 = vmul.f32 %v3926_v0, %v7321_v4  ;;  %vm7883_vm13 = vmmov %vm7804_vm0 }
 0x4ed   : > { %vm7884_vm14 = vmmov %vm7804_vm0 }
 0x4ee   : > { %v4288_v33 = vsel %vm7878_vm10, %v4053_v45, 0.0  ;;  %vm7885_vm15 = vmmov %vm7804_vm0 }
 0x4ef   : > { %v7323_v54 = vpop.permute.xlu1 %3725  ;;  %v7325_v37 = vpop.permute.xlu0 %3729  ;;  %v4289_v36 = vadd.f32 %v4288_v33, %v7313_v34  ;;  %v7450_v34 = vld [vmem:[%s5337_s17 + $0x1b0] sm:$0xff]   ;;  %vm7886_vm8 = vmmov %vm7804_vm0 }
 0x4f0   : > { %v4069_v45 = vmul.f32 %v3941_v12, %v7323_v54  ;;  %v4323_v54 = vsel %vm7879_vm11, %v4068_v15, 0.0  ;;  %v4290_v15 = vsel %vm7880_vm12, %v4054_v14, 0.0  ;;  %v4070_v23 = vmul.f32 %v3942_v61, %v7325_v37  ;;  %vm7887_vm2 = vmmov %vm7804_vm0 }
 0x4f1   : > { %v4324_v12 = vadd.f32 %v4323_v54, %v7308_v43  ;;  %v4291_v33 = vadd.f32 %v4290_v15, %v4289_v36  ;;  %v7466_v36 = vld [vmem:[%s5337_s17 + $0x138] sm:$0xff]   ;;  %vm7888_vm9 = vmmov %vm7804_vm0 }
 0x4f2   : > { %v3920_v37 = vunpack.c.l.bf16 %v7466_v36  ;;  %vm7889_vm10 = vmmov %vm7804_vm0 }
 0x4f3   : > { %v7327_v20 = vpop.permute.xlu1 %3792  ;;  %v7329_v44 = vpop.permute.xlu0 %3796  ;;  %vm7893_vm11 = vmmov %vm7804_vm0 }
 0x4f4   : > { %v4086_v61 = vmul.f32 %v3958_v17, %v7329_v44  ;;  %v3921_v44 = vunpack.c.h.bf16 %v7466_v36  ;;  %vm7894_vm12 = vmmov %vm7804_vm0 }
 0x4f7   : > { %v3667_v18 = vpop.permute.xlu1 %3666  ;;  %v7331_v9 = vpop.permute.xlu0 %3670 }
 0x4f8   : > { %v4055_v55 = vmul.f32 %v3927_v8, %v3667_v18  ;;  %v4085_v18 = vmul.f32 %v3957_v41, %v7327_v20  ;;  %v4325_v20 = vsel %vm7881_vm3, %v4069_v45, 0.0  ;;  %v4360_v8 = vsel %vm7883_vm13, %v4084_v53, 0.0  ;;  %vm7895_vm3 = vmmov %vm7804_vm0 }
 0x4f9   : > { %v4056_v45 = vmul.f32 %v3928_v56, %v7331_v9  ;;  %v4361_v43 = vadd.f32 %v4360_v8, %v7319_v27  ;;  %v4326_v53 = vadd.f32 %v4325_v20, %v4324_v12  ;;  %v7476_v56 = vld [vmem:[%s5337_s17 + $0x1f0] sm:$0xff]   ;;  %v3951_v12 = vunpack.c.h.bf16 %v7450_v34  ;;  %vm7901_vm13 = vmmov %vm7804_vm0 }
 0x4fa   : > { %v4292_v41 = vsel %vm7882_vm1, %v4055_v55, 0.0  ;;  %v4362_v55 = vsel %vm7884_vm14, %v4085_v18, 0.0  ;;  %v3967_v17 = vunpack.c.h.bf16 %v7476_v56  ;;  %vm7897_vm1 = vmmov %vm7804_vm0 }
 0x4fb   : > { %v7333_v24 = vpop.permute.xlu1 %3733  ;;  %v7335_v57 = vpop.permute.xlu0 %3737  ;;  %v4293_v54 = vadd.f32 %v4292_v41, %v4291_v33  ;;  %v4294_v22 = vsel %vm7886_vm8, %v4056_v45, 0.0  ;;  %vm7902_vm14 = vmmov %vm7804_vm0 }
 0x4fc   : > { %v4071_v4 = vmul.f32 %v3943_v10, %v7333_v24  ;;  %v3966_v24 = vunpack.c.l.bf16 %v7476_v56  ;;  %v4363_v10 = vadd.f32 %v4362_v55, %v4361_v43  ;;  %v4072_v20 = vmul.f32 %v3944_v3, %v7335_v57  ;;  %vm7907_vm8 = vmmov %vm7804_vm0 }
 0x4fd   : > { %v4295_v15 = vadd.f32 %v4294_v22, %v4293_v54  ;;  %v4364_v55 = vsel %vm7888_vm9, %v4086_v61, 0.0  ;;  %v7523_v22 = vld [vmem:[%s5337_s17 + $0x1f8] sm:$0xff]   ;;  %vm7911_vm9 = vmmov %vm7804_vm0 }
 0x4fe   : > { %v4365_v43 = vadd.f32 %v4364_v55, %v4363_v10 }
 0x4ff   : > { %v7337_v29 = vpop.permute.xlu1 %3800  ;;  %v7339_v59 = vpop.permute.xlu0 %3804 }
 0x500   : > { %v4087_v9 = vmul.f32 %v3959_v51, %v7337_v29  ;;  %v4327_v29 = vsel %vm7885_vm15, %v4070_v23, 0.0  ;;  %v4329_v51 = vsel %vm7804_vm0, %v4071_v4, 0.0  ;;  %vm7906_vm15 = vmmov %vm7804_vm0 }
 0x501   : > { %v4328_v33 = vadd.f32 %v4327_v29, %v4326_v53 }
 0x502   : > { %v4366_v23 = vsel %vm7889_vm10, %v4087_v9, 0.0  ;;  %v4331_v9 = vsel %vm7893_vm11, %v4072_v20, 0.0  ;;  %vm7913_vm10 = vmmov %vm7804_vm0 }
 0x503   : > { %v7341_v13 = vpop.permute.xlu1 %3674  ;;  %v7343_v35 = vpop.permute.xlu0 %3678  ;;  %v4330_v53 = vadd.f32 %v4329_v51, %v4328_v33  ;;  %v4367_v10 = vadd.f32 %v4366_v23, %v4365_v43  ;;  %v3968_v51 = vunpack.c.l.bf16 %v7523_v22  ;;  %v7898_v33 = vunpack.c.l.bf16 %v7427_v11  ;;  %vm7915_vm11 = vmmov %vm7804_vm0 }
 0x504   : > { %v4057_v1 = vmul.f32 %v3929_v32, %v7341_v13  ;;  %v7480_v13 = vld [vmem:[%s5337_s17 + $0x178] sm:$0xff]   ;;  %v4058_v41 = vmul.f32 %v3930_v30, %v7343_v35  ;;  %v7891_v30 = vunpack.c.l.bf16 %v7383_v21 }
 0x505   : > { %v3936_v27 = vunpack.c.l.bf16 %v7480_v13  ;;  %v3937_v35 = vunpack.c.h.bf16 %v7480_v13  ;;  %v4332_v20 = vadd.f32 %v4331_v9, %v4330_v53  ;;  %v7904_v53 = vunpack.c.h.bf16 %v7427_v11 }
 0x506   : > { %v4296_v8 = vsel %vm7887_vm2, %v4057_v1, 0.0  ;;  %v7890_v1 = vunpack.c.h.bf16 %v7388_v47  ;;  %v4088_v61 = vmul.f32 %v7891_v30, %v7339_v59  ;;  %v4298_v29 = vsel %vm7894_vm12, %v4058_v41, 0.0  ;;  %vm7910_vm2 = vmmov %vm7804_vm0 }
 0x507   : > { %v7345_v58 = vpop.permute.xlu1 %3741  ;;  %v7347_v50 = vpop.permute.xlu0 %3745  ;;  %v4297_v57 = vadd.f32 %v4296_v8, %v4295_v15  ;;  %v7899_v41 = vunpack.c.h.bf16 %v7383_v21  ;;  %v7909_v11 = vunpack.c.l.bf16 %v7404_v6  ;;  %vm7916_vm12 = vmmov %vm7804_vm0 }
 0x508   : > { %v4073_v4 = vmul.f32 %v3945_v38, %v7345_v58  ;;  %v7892_v58 = vunpack.c.h.bf16 %v7253_v19  ;;  %v7516_v38 = vld [vmem:[%s5337_s17 + $0x1b8] sm:$0xff]   ;;  %v7896_v19 = vunpack.c.l.bf16 %v7393_v63  ;;  %s264_s17 = scalar_lea.vmem [#allocation2], %s4551_s20  ;;  %s5177_s20 = sshll.u32 %s5243_s25, 4  ;;  %s5178_s20 = int_to_ptr.vmem [resolvable:$false] %s5177_s20 }
 0x509   : > { %v3953_v47 = vunpack.c.h.bf16 %v7516_v38  ;;  %v4299_v55 = vadd.f32 %v4298_v29, %v4297_v57  ;;  %v7905_v29 = vunpack.c.h.bf16 %v7393_v63  ;;  %s4431_s10 = sshll.u32 %s264_s17, 4  ;;  %s5179_s28 = scalar_lea.vmem %s5178_s20, 256  ;;  %s7635_s10 = int_to_ptr.vmem [resolvable:$true] %s4431_s10 }
 0x50a   : > { %v4333_v59 = vsel %vm7895_vm3, %v4073_v4, 0.0  ;;  %vm7918_vm3 = vmmov %vm7804_vm0  ;;  %s5173_s18 = scalar_lea.vmem %s7635_s10, 128  ;;  %p5180_p7 = scmp.lt.s32.totalorder %s7635_s10, %s5178_s20 }
 0x50b   : > { %v7349_v48 = vpop.permute.xlu1 %3808  ;;  %v7351_v42 = vpop.permute.xlu0 %3812  ;;  %v4334_v21 = vadd.f32 %v4333_v59, %v4332_v20  ;;  %p5174_p2 = scmp.ne.s32.totalorder %s7635_s10, %s5173_s18  ;;  %p5181_p8 = scmp.lt.s32.totalorder %s5179_s28, %s5173_s18 }
 0x50c   : > { %v4089_v23 = vmul.f32 %v7899_v41, %v7349_v48 }
 0x50d   : > { %p5175_p3 = pnand %p5174_p2, %p5317_p5  ;;  %p5182_p9 = por %p5181_p8, %p5180_p7 }
 0x50f   : > { %v7353_v52 = vpop.permute.xlu1 %3682  ;;  %v7355_v39 = vpop.permute.xlu0 %3686  ;;  %p5176_p4 = pneg %p5175_p3 }
 0x510   : > { %v4059_v45 = vmul.f32 %v7890_v1, %v7353_v52  ;;  %v3952_v52 = vunpack.c.l.bf16 %v7516_v38  ;;  %v7900_v1 = vunpack.c.l.bf16 %v7409_v7 }
 0x511   : > { %p5183_p10 = pnand %p5182_p9, %p5176_p4 }
 0x512   : > { %v4300_v8 = vsel %vm7897_vm1, %v4059_v45, 0.0  ;;  %v4060_v4 = vmul.f32 %v7900_v1, %v7355_v39  ;;  %v7917_v1 = vunpack.c.h.bf16 %v7421_v25  ;;  %vm7920_vm1 = vmmov %vm7804_vm0 }
 0x513   : > { %v7360_v40 = vpop.permute.xlu1 %3749  ;;  %v7362_v62 = vpop.permute.xlu0 %3623  ;;  %v4301_v48 = vadd.f32 %v4300_v8, %v4299_v55  ;;  %v7912_v8 = vunpack.c.l.bf16 %v7421_v25  ;;  %v7922_v25 = vunpack.c.l.bf16 %v7450_v34 }
 0x514   : > { %v4045_v60 = vmul.f32 %v7892_v58, %v7362_v62  ;;  %v4074_v62 = vmul.f32 %v7896_v19, %v7347_v50  ;;  %v4368_v50 = vsel %vm7901_vm13, %v4088_v61, 0.0  ;;  %v7903_v58 = vunpack.c.h.bf16 %v7409_v7  ;;  %vm7921_vm13 = vmmov %vm7804_vm0 }
 0x515   : > { %v4369_v9 = vadd.f32 %v4368_v50, %v4367_v10  ;;  %v4075_v39 = vmul.f32 %v7905_v29, %v7360_v40  ;;  %v4302_v10 = vsel %vm7910_vm2, %v4060_v4, 0.0  ;;  %vm7927_vm2 = vmmov %vm7804_vm0 }
 0x516   : > { %v4267_v45 = vsel %vm7902_vm14, %v4045_v60, 0.0  ;;  %v4335_v19 = vsel %vm7906_vm15, %v4074_v62, 0.0  ;;  %v7908_v60 = vunpack.c.l.bf16 %v7439_v26  ;;  %v4303_v41 = vadd.f32 %v4302_v10, %v4301_v48  ;;  %vm7924_vm14 = vmmov %vm7804_vm0 }
 0x517   : > { %v7397_v49 = vpop.permute.xlu1 %3816  ;;  %v7399_v5 = vpop.permute.xlu0 %3690  ;;  %v4268_v63 = vadd.f32 %v4267_v45, %v7300_v2  ;;  %v4336_v55 = vadd.f32 %v4335_v19, %v4334_v21  ;;  %vm7925_vm15 = vmmov %vm7804_vm0 }
 0x51b   : > { %v7424_v31 = vpop.permute.xlu1 %3753  ;;  %v7430_v0 = vpop.permute.xlu0 %3627 }
 0x51c   : > { %v4046_v15 = vmul.f32 %v7898_v33, %v7430_v0  ;;  %v4061_v0 = vmul.f32 %v7903_v58, %v7399_v5  ;;  %v4370_v5 = vsel %vm7804_vm0, %v4089_v23, 0.0 }
 0x51d   : > { %v4371_v50 = vadd.f32 %v4370_v5, %v4369_v9  ;;  %v7923_v9 = vunpack.c.l.bf16 %v7435_v16 }
 0x51e   : > { %v4269_v61 = vsel %vm7907_vm8, %v4046_v15, 0.0  ;;  %v4304_v62 = vsel %vm7911_vm9, %v4061_v0, 0.0  ;;  %v4076_v15 = vmul.f32 %v7912_v8, %v7424_v31  ;;  %vm7926_vm8 = vmmov %vm7804_vm0 }
 0x51f   : > { %v7456_v28 = vpop.permute.xlu1 %3820  ;;  %v7458_v14 = vpop.permute.xlu0 %3694  ;;  %v4270_v23 = vadd.f32 %v4269_v61, %v4268_v63  ;;  %v4305_v45 = vadd.f32 %v4304_v62, %v4303_v41  ;;  %vm7929_vm9 = vmmov %vm7804_vm0 }
 0x520   : > { %v4062_v33 = vmul.f32 %v7908_v60, %v7458_v14 }
 0x522   : > { %v4306_v2 = vsel %vm7916_vm12, %v4062_v33, 0.0  ;;  %vm7932_vm12 = vmmov %vm7804_vm0 }
 0x523   : > { %v7483_v32 = vpop.permute.xlu1 %3757  ;;  %v3632_v18 = vpop.permute.xlu0 %3631 }
 0x524   : > { %v4047_v57 = vmul.f32 %v7904_v53, %v3632_v18  ;;  %v4090_v18 = vmul.f32 %v7909_v11, %v7351_v42  ;;  %v4337_v42 = vsel %vm7915_vm11, %v4075_v39, 0.0  ;;  %v4077_v4 = vmul.f32 %v7917_v1, %v7483_v32  ;;  %vm7931_vm11 = vmmov %vm7804_vm0 }
 0x525   : > { %v7928_v11 = vunpack.c.h.bf16 %v7435_v16 }
 0x526   : > { %v4271_v14 = vsel %vm7913_vm10, %v4047_v57, 0.0  ;;  %v4339_v57 = vsel %vm7920_vm1, %v4076_v15, 0.0  ;;  %v4341_v39 = vsel %vm7924_vm14, %v4077_v4, 0.0  ;;  %vm7930_vm10 = vmmov %vm7804_vm0 }
 0x527   : > { %v7506_v3 = vpop.permute.xlu1 %3824  ;;  %v3699_v54 = vpop.permute.xlu0 %3698  ;;  %v4272_v58 = vadd.f32 %v4271_v14, %v4270_v23  ;;  %vm7934_vm1 = vmmov %vm7804_vm0 }
 0x528   : > { %v4093_v10 = vmul.f32 %v7928_v11, %v7506_v3  ;;  %vm7936_vm14 = vmmov %vm7804_vm0 }
 0x52b   : > { %v3762_v43 = vpop.permute.xlu1 %3761  ;;  %v3636_v30 = vpop.permute.xlu0 %3635 }
 0x52c   : > { %v4048_v7 = vmul.f32 %v3920_v37, %v3636_v30  ;;  %v7914_v37 = vunpack.c.h.bf16 %v7439_v26  ;;  %v7919_v26 = vunpack.c.h.bf16 %v7404_v6  ;;  %v4078_v32 = vmul.f32 %v7922_v25, %v3762_v43 }
 0x52d   : > { %v4092_v6 = vmul.f32 %v7923_v9, %v7456_v28  ;;  %v4372_v43 = vsel %vm7804_vm0, %v4090_v18, 0.0 }
 0x52e   : > { %v4063_v20 = vmul.f32 %v7914_v37, %v3699_v54  ;;  %v4273_v30 = vsel %vm7918_vm3, %v4048_v7, 0.0  ;;  %v4091_v54 = vmul.f32 %v7919_v26, %v7397_v49  ;;  %v4307_v49 = vadd.f32 %v4306_v2, %v4305_v45  ;;  %vm7933_vm3 = vmmov %vm7804_vm0 }
 0x52f   : > { %v3829_v40 = vpop.permute.xlu1 %3828  ;;  %v3703_v59 = vpop.permute.xlu0 %3702  ;;  %v4274_v29 = vadd.f32 %v4273_v30, %v4272_v58  ;;  %v4343_v63 = vsel %vm7929_vm9, %v4078_v32, 0.0  ;;  %v4376_v8 = vsel %vm7930_vm10, %v4092_v6, 0.0 }
 0x530   : > { %v4064_v31 = vmul.f32 %v3936_v27, %v3703_v59  ;;  %v4308_v21 = vsel %vm7921_vm13, %v4063_v20, 0.0  ;;  %v4338_v27 = vadd.f32 %v4337_v42, %v4336_v55  ;;  %v4374_v28 = vsel %vm7927_vm2, %v4091_v54, 0.0  ;;  %vm7935_vm13 = vmmov %vm7804_vm0 }
 0x531   : > { %v4094_v15 = vmul.f32 %v3966_v24, %v3829_v40 }
 0x532   : > { %v4310_v19 = vsel %vm7925_vm15, %v4064_v31, 0.0  ;;  %v4340_v36 = vadd.f32 %v4339_v57, %v4338_v27  ;;  %vm7937_vm15 = vmmov %vm7804_vm0 }
 0x533   : > { %v3766_v0 = vpop.permute.xlu1 %3765  ;;  %v3640_v53 = vpop.permute.xlu0 %3639  ;;  %v4380_v30 = vsel %vm7934_vm1, %v4094_v15, 0.0 }
 0x534   : > { %v4049_v48 = vmul.f32 %v3921_v44, %v3640_v53  ;;  %v4079_v61 = vmul.f32 %v3951_v12, %v3766_v0  ;;  %v4309_v44 = vadd.f32 %v4308_v21, %v4307_v49  ;;  %v4373_v12 = vadd.f32 %v4372_v43, %v4371_v50 }
 0x535   : > { %v4342_v59 = vadd.f32 %v4341_v39, %v4340_v36 }
 0x536   : > { %v4275_v60 = vsel %vm7926_vm8, %v4049_v48, 0.0  ;;  %v4311_v62 = vadd.f32 %v4310_v19, %v4309_v44  ;;  %v4345_v14 = vsel %vm7931_vm11, %v4079_v61, 0.0  ;;  %v4375_v16 = vadd.f32 %v4374_v28, %v4373_v12  ;;  %vm7938_vm8 = vmmov %vm7804_vm0 }
 0x537   : > { %v4276_v33 = vadd.f32 %v4275_v60, %v4274_v29  ;;  %v3833_v7 = vpop.permute.xlu1 %3832  ;;  %v3707_v5 = vpop.permute.xlu0 %3706  ;;  %v4344_v3 = vadd.f32 %v4343_v63, %v4342_v59 }
 0x538   : > { %v4065_v34 = vmul.f32 %v3937_v35, %v3707_v5  ;;  %v4378_v35 = vsel %vm7933_vm3, %v4093_v10, 0.0  ;;  %v4095_v42 = vmul.f32 %v3967_v17, %v3833_v7  ;;  %v4377_v40 = vadd.f32 %v4376_v8, %v4375_v16 }
 0x539   : > { %v4277_v18 = vrot.slane %v4276_v33, 4  ;;  %v4346_v2 = vadd.f32 %v4345_v14, %v4344_v3 }
 0x53a   : > { %v4312_v37 = vsel %vm7932_vm12, %v4065_v34, 0.0  ;;  %v4379_v50 = vadd.f32 %v4378_v35, %v4377_v40  ;;  %v4382_v17 = vsel %vm7936_vm14, %v4095_v42, 0.0 }
 0x53b   : > { %v4278_v20 = vadd.f32 %v4277_v18, %v4276_v33  ;;  %v4313_v55 = vadd.f32 %v4312_v37, %v4311_v62  ;;  %v3770_v41 = vpop.permute.xlu1 %3769  ;;  %v3774_v13 = vpop.permute.xlu0 %3773 }
 0x53c   : > { %v4080_v23 = vmul.f32 %v3952_v52, %v3770_v41  ;;  %v4081_v24 = vmul.f32 %v3953_v47, %v3774_v13  ;;  %v3969_v47 = vunpack.c.h.bf16 %v7523_v22  ;;  %v4381_v58 = vadd.f32 %v4380_v30, %v4379_v50 }
 0x53d   : > { %v4279_v1 = vrot.slane %v4278_v20, 2  ;;  %v4314_v4 = vrot.slane %v4313_v55, 4 }
 0x53e   : > { %v4347_v31 = vsel %vm7935_vm13, %v4080_v23, 0.0  ;;  %v4349_v52 = vsel %vm7937_vm15, %v4081_v24, 0.0  ;;  %v4383_v32 = vadd.f32 %v4382_v17, %v4381_v58 }
 0x53f   : > { %v4280_v26 = vadd.f32 %v4279_v1, %v4278_v20  ;;  %v4315_v54 = vadd.f32 %v4314_v4, %v4313_v55  ;;  %v4348_v45 = vadd.f32 %v4347_v31, %v4346_v2  ;;  %v3837_v56 = vpop.permute.xlu1 %3836 }
 0x540   : > { %v4096_v38 = vmul.f32 %v3968_v51, %v3837_v56 }
 0x541   : > { %v4281_v0 = vrot.slane %v4280_v26, 1  ;;  %v4316_v53 = vrot.slane %v4315_v54, 2  ;;  %v4350_v57 = vadd.f32 %v4349_v52, %v4348_v45 }
 0x542   : > { %v4384_v21 = vsel %vm7938_vm8, %v4096_v38, 0.0 }
 0x543   : > { %v4282_v25 = vadd.f32 %v4281_v0, %v4280_v26  ;;  %v4317_v48 = vadd.f32 %v4316_v53, %v4315_v54  ;;  %v4351_v27 = vrot.slane %v4350_v57, 4  ;;  %v3841_v9 = vpop.permute.xlu1 %3840  ;;  %v4385_v39 = vadd.f32 %v4384_v21, %v4383_v32 }
 0x544   : > { %v4097_v6 = vmul.f32 %v3969_v47, %v3841_v9 }
 0x545   : > { %v4318_v49 = vrot.slane %v4317_v48, 1  ;;  %v4352_v29 = vadd.f32 %v4351_v27, %v4350_v57  ;;  %v4405_v51 = vsel %vm3287_vm4, %v4282_v25, %v7259_v46  ;;  %vm7939_vm4 = vmmov %vm7804_vm0 }
 0x546   : > { %v4386_v22 = vsel %vm7804_vm0, %v4097_v6, 0.0 }
 0x547   : > { %v4319_v19 = vadd.f32 %v4318_v49, %v4317_v48  ;;  %v4353_v61 = vrot.slane %v4352_v29, 2  ;;  %v4387_v60 = vadd.f32 %v4386_v22, %v4385_v39 }
 0x549   : > { %v4354_v43 = vadd.f32 %v4353_v61, %v4352_v29  ;;  %v4388_v36 = vrot.slane %v4387_v60, 4  ;;  %v4406_v44 = vsel %vm3289_vm5, %v4319_v19, %v4405_v51 }
 0x54b   : > { %v4355_v33 = vrot.slane %v4354_v43, 1  ;;  %v4389_v7 = vadd.f32 %v4388_v36, %v4387_v60 }
 0x54d   : > { %v4356_v5 = vadd.f32 %v4355_v33, %v4354_v43  ;;  %v4390_v28 = vrot.slane %v4389_v7, 2 }
 0x54f   : > { %v4391_v11 = vadd.f32 %v4390_v28, %v4389_v7  ;;  %v4407_v10 = vsel %vm3291_vm6, %v4356_v5, %v4406_v44 }
 0x551   : > { %v4392_v46 = vrot.slane %v4391_v11, 1 }
 0x553   : > { %v4393_v63 = vadd.f32 %v4392_v46, %v4391_v11 }
 0x555   : > { %v4408_v34 = vsel %vm3293_vm7, %v4393_v63, %v4407_v10 }
 0x556   : > { %4410 = vst.msk [vmem:[%s264_s17] sm:$0xff] %vm7939_vm4, %v4408_v34 }
 0x557   : > { %5186 = shalt.err (!%p5183_p10)
}
 0x558   : > { %s5187_s19 = scalar_lea.hbm %s7633_s13, 128  ;;  %s5191_s9 = scalar_lea.hbm %s7683_s5, 256 }
 0x559   : > { %p5188_p11 = scmp.ne.s32.totalorder %s7633_s13, %s5187_s19  ;;  %p5192_p0 = scmp.lt.u32.totalorder %s7633_s13, %s7683_s5 }
 0x55a   : > { %p5193_p1 = scmp.lt.u32.totalorder %s5191_s9, %s5187_s19  ;;  %p5195_p3 = scmp.lt.u32.totalorder %s5187_s19, %s7633_s13 }
 0x55b   : > { %p5189_p12 = pnand %p5188_p11, %p5317_p5 }
 0x55c   : > { %p5194_p2 = por %p5193_p1, %p5192_p0 }
 0x55d   : > { %p5190_p13 = pneg %p5189_p12 }
 0x55e   : > { %p5196_p4 = por %p5195_p3, %p5194_p2 }
 0x560   : > { %p5197_p7 = pnand %p5196_p4, %p5190_p13 }
 0x562   : > { %5200 = shalt.err (!%p5197_p7)
}
 0x563   : > { %4898 = dma.vmem_to_hbm [thread:$0]  (%p5317_p5), %s7635_s10, 128, %s7633_s13, %s4413_s16  }
 0x564 PF: > { %p4909_p8 = scmp.ge.s32.totalorder %s5239_s24, 2  ;;  %s4456_s17 = sand.u32 1, %s5227_s21  }
 0x565   : > { %s4457_s11 = scalar_lea.sflag [#allocation3], %s4456_s17 }
 0x566   : > { %p4903_p9 = pnand %p4909_p8, %p5321_p6 }
 0x568   : > { %5218 = dma.done.wait (!%p4903_p9), %s4457_s11, 128  }
 0x569   : > { %5220 = vsyncadd (!%p4903_p9), %s4457_s11, 4294967168  ;;  %s4466_s12 = scalar_lea.sflag [#allocation5], %s4456_s17 }
 0x56a   : > { %5222 = dma.done.wait (!%p4903_p9), %s4466_s12, 128  }
 0x56b   : > { %5224 = vsyncadd (!%p4903_p9), %s4466_s12, 4294967168  ;;  %p20_p5 = scmp.ge.s32.totalorder %s5304_s27, 4   ;;  %s7940_s21 = smov %s5231_s22 }
 0x56c   : > { %s7941_s22 = smov %s5235_s23  ;;  %s7942_s23 = smov %s5315_s30 }
 0x56d   : > { %s7943_s24 = smov %s5304_s27  ;;  %22 = sbr.rel (!%p20_p5) target bundleno = 5 (0x5), region = 95 }
 0x574   :  { %4471 = vsyncpa [#allocation3], 1 }
 0x575   :  { %4473 = vsyncpa [#allocation3 + $0x1], 1 }
 0x576   :  { %4474 = vsyncpa [#allocation5], 1 }
 0x577   :  { %4476 = vsyncpa [#allocation5 + $0x1], 1 }

// kernel: tpu_custom_call.1
= control target key start
LH: loop header
LB: loop body
LE: loop exit
PB: predicated region body
PF: predicated region fallthrough
CT: control target
= control target key end

     0   :  { %12 = vsyncpa [#allocation3], 0  ;;  %s7678_s0 = inlined_call_operand.vmem [shape: bf16[16,128,32], index: 0, kind: input, shape index: {}]   ;;  %s7679_s1 = inlined_call_operand.vmem [shape: f32[16,40], index: 1, kind: input, shape index: {}]   ;;  %s7680_s2 = inlined_call_operand.vmem [shape: bf16[32,40], index: 2, kind: input, shape index: {}]   ;;  %s7681_s3 = inlined_call_operand.vmem [shape: f32[1,40], index: 3, kind: input, shape index: {}]   ;;  %s7682_s4 = inlined_call_operand.vmem [shape: f32[1,40], index: 4, kind: input, shape index: {}]   ;;  %s7683_s5 = inlined_call_operand.hbm [shape: f32[16,32], index: 5, kind: output, shape index: {0}]   ;;  %s7684_s6 = inlined_call_operand.hbm [shape: f32[16,128], index: 6, kind: output, shape index: {1}]  }
   0x1   :  { %14 = vsyncpa [#allocation3 + $0x1], 0 }
   0x2   :  { %15 = vsyncpa [#allocation5], 0 }
   0x3   :  { %17 = vsyncpa [#allocation5 + $0x1], 0  ;;  %s5279_s21 = smov 0   ;;  %s5281_s22 = smov 0  }
   0x4   :  { %s5283_s23 = smov 0   ;;  %s5285_s24 = smov 0  }
   0x5 LB: > { %s5300_s25 = sadd.s32 4294967295, %s5239_s24   ;;  %s4547_s26 = sadd.s32 4294967294, %s5239_s24   ;;  %s5239_s24 = sphi %s5285_s24, %s7943_s24   ;;  %s5235_s23 = sphi %s5283_s23, %s7942_s23   ;;  %s5231_s22 = sphi %s5281_s22, %s7941_s22   ;;  %s5227_s21 = sphi %s5279_s21, %s7940_s21  }
   0x6   : > { %s5304_s27 = sadd.s32 1, %s5239_s24   ;;  %s145_s28 = sadd.s32 1, %s5235_s23 }
   0x7   : > { %s142_s29 = ssub.s32 %s5239_s24, %s5304_s27  ;;  %p155_p0 = scmp.ne.s32.totalorder %s5235_s23, %s5231_s22 }
   0x8   : > { %p143_p1 = scmp.eq.s32.totalorder %s142_s29, 0  ;;  %p156_p2 = scmp.eq.s32.totalorder %s5300_s25, 1 }
   0x9   : > { %p161_p3 = scmp.ne.s32.totalorder %s5231_s22, %s5227_s21  ;;  %p162_p4 = scmp.eq.s32.totalorder %s4547_s26, 1 }
   0xa   : > { %s5315_s30 = scalar_select %p143_p1, %s5235_s23, %s145_s28  }
   0xb   : > { %p5317_p5 = por %p156_p2, %p155_p0  ;;  %p5321_p6 = por %p162_p4, %p161_p3 }
   0xc   : > { %p4550_p7 = scmp.ge.s32.totalorder %s5239_s24, 1  ;;  %p232_p8 = scmp.lt.s32.totalorder %s5239_s24, 3 }
   0xe   : > { %p233_p9 = pnand %p4550_p7, %p232_p8 }
  0x10   : > { %236 = sbr.rel (%p233_p9) target bundleno = 1380 (0x564), region = 40 }
  0x17   : > { %v4943_v0 = vld [vmem:[%s7680_s2] sm:$0xff]   ;;  %s4553_s11 = sshll.u32 %s5300_s25, 3  ;;  %v4944_v1 = vld [vmem:[%s7680_s2 + $0x8] sm:$0xff]   ;;  %vm7690_vm0 = vcmask 261120   ;;  %p279_p11 = scmp.lt.s32.totalorder %s5300_s25, 1  ;;  %vm2103_vm1 = vcmask 326656  }
  0x18   : > { %p273_p10 = scmp.lt.s32.totalorder %s4553_s11, 15  ;;  %4762 = vmatprep.subr.bf16.mxu0 %v4943_v0  ;;  %4894 = vmatprep.subr.bf16.mxu1 %v4943_v0  ;;  %vm2628_vm2 = vcmask 130112   ;;  %vm2635_vm3 = vcmask 195712   ;;  %vm2642_vm4 = vcmask 261312   ;;  %vm2649_vm5 = vcmask 326912  }
  0x19   : > { %4763 = vmatpush3.bf16.msra.mxu0 %v4943_v0  ;;  %4896 = vmatpush3.bf16.msra.mxu1 %v4943_v0  ;;  %s280_s18 = scalar_select %p279_p11, %s5300_s25, 1  ;;  %vm2656_vm6 = vcmask 392512   ;;  %vm2663_vm7 = vcmask 458112   ;;  %vm2670_vm8 = vcmask 523712   ;;  %vm2677_vm9 = vcmask 589312  }
  0x1a   : > { %s7945_s11 = smov (!%p273_p10, %s4553_s11), 15  ;;  %4764 = vmatprep.subr.bf16.mxu0 %v4944_v1  ;;  %4895 = vmatprep.subr.bf16.mxu1 %v4944_v1  ;;  %vm2684_vm10 = vcmask 654912   ;;  %vm2691_vm11 = vcmask 720512   ;;  %vm2698_vm12 = vcmask 786112   ;;  %vm2705_vm13 = vcmask 851712  }
  0x1b   : > { %s4695_s14 = sshll.u32 %s7945_s11, 6  ;;  %s4556_s19 = sshll.u32 %s280_s18, 3  ;;  %vm2712_vm14 = vcmask 917312   ;;  %vm2719_vm15 = vcmask 982912  }
  0x1c   : > { %s5337_s17 = scalar_lea.vmem %s7678_s0, %s4695_s14  ;;  %s282_s28 = scalar_lea.vmem %s7679_s1, %s4556_s19 }
  0x1d   : > { %4765 = vmatpush3.bf16.msra.mxu0 %v4944_v1  ;;  %4897 = vmatpush3.bf16.msra.mxu1 %v4944_v1  ;;  %v284_v2 = vld [vmem:[%s5337_s17] sm:$0xff]   ;;  %v286_v4 = vld [vmem:[%s5337_s17 + $0x8] sm:$0xff]   ;;  %v288_v6 = vld [vmem:[%s5337_s17 + $0x10] sm:$0xff]   ;;  %s7033_s19 = sand.u32 1, %s5231_s22   ;;  %s5242_s14 = smov [#allocation4]  }
  0x1e   : > { %v348_v3 = vld [vmem:[%s5337_s17 + $0x100] sm:$0xff]   ;;  %v350_v5 = vld [vmem:[%s5337_s17 + $0x108] sm:$0xff]   ;;  %v352_v7 = vld [vmem:[%s5337_s17 + $0x110] sm:$0xff]   ;;  %4766 = vmatprep.mubr.msk.bf16.mxu0 %vm7690_vm0, %v284_v2  ;;  %v5241_v2 = vmov 1966171168   ;;  %s4551_s20 = sshll.u32 %s7033_s19, 3 }
  0x1f   : > { %4830 = vmatprep.mubr.msk.bf16.mxu1 %vm7690_vm0, %v348_v3  ;;  %v290_v8 = vld [vmem:[%s5337_s17 + $0x18] sm:$0xff]   ;;  %v292_v10 = vld [vmem:[%s5337_s17 + $0x20] sm:$0xff]   ;;  %v294_v12 = vld [vmem:[%s5337_s17 + $0x28] sm:$0xff]   ;;  %v1625_v3 = vunpack.c.l.s4 %v5241_v2  ;;  %s7042_s26 = scalar_lea.vmem [#allocation4], %s4551_s20  ;;  %s4418_s12 = scalar_lea.sflag [#allocation5], %s7033_s19 }
  0x20   : > { %4767 = vmatmul.mubr.msk.bf16.vlgmr.msra.gmra.mrb[0].mxu0 %vm7690_vm0, %v286_v4  ;;  %4831 = vmatmul.mubr.msk.bf16.vlgmr.msra.gmra.mrb[0].mxu1 %vm7690_vm0, %v350_v5  ;;  %v354_v9 = vld [vmem:[%s5337_s17 + $0x118] sm:$0xff]   ;;  %v356_v11 = vld [vmem:[%s5337_s17 + $0x120] sm:$0xff]   ;;  %v358_v13 = vld [vmem:[%s5337_s17 + $0x128] sm:$0xff]   ;;  %v7685_v4 = vlaneseq  ;;  %s4444_s11 = sshll.u32 %s7042_s26, 4  ;;  %s5149_s15 = sshll.u32 %s5242_s14, 4  ;;  %s7275_s11 = int_to_ptr.vmem [resolvable:$true] %s4444_s11  ;;  %s5150_s15 = int_to_ptr.vmem [resolvable:$false] %s5149_s15 }
  0x21   : > { %4770 = vmatprep.mubr.msk.bf16.mxu0 %vm7690_vm0, %v288_v6  ;;  %4834 = vmatprep.mubr.msk.bf16.mxu1 %vm7690_vm0, %v352_v7  ;;  %v296_v14 = vld [vmem:[%s5337_s17 + $0x30] sm:$0xff]   ;;  %v298_v16 = vld [vmem:[%s5337_s17 + $0x38] sm:$0xff]   ;;  %v300_v18 = vld [vmem:[%s5337_s17 + $0x40] sm:$0xff]   ;;  %v1626_v5 = vunpack.c.0.s8 %v1625_v3  ;;  %s5145_s13 = scalar_lea.vmem %s7275_s11, 128  ;;  %s5151_s16 = scalar_lea.vmem %s5150_s15, 256 }
  0x22   : > { %v360_v15 = vld [vmem:[%s5337_s17 + $0x130] sm:$0xff]   ;;  %v362_v17 = vld [vmem:[%s5337_s17 + $0x138] sm:$0xff]   ;;  %v364_v19 = vld [vmem:[%s5337_s17 + $0x140] sm:$0xff]   ;;  %v5473_v6 = vshrl.u32 %v7685_v4, 7  ;;  %p5146_p12 = scmp.ne.s32.totalorder %s7275_s11, %s5145_s13  ;;  %p5152_p1 = scmp.lt.s32.totalorder %s7275_s11, %s5150_s15 }
  0x23   : > { %v302_v20 = vld [vmem:[%s5337_s17 + $0x48] sm:$0xff]   ;;  %v368_v22 = vld [vmem:[%s5337_s17 + $0x150] sm:$0xff]   ;;  %v370_v24 = vld [vmem:[%s5337_s17 + $0x158] sm:$0xff]   ;;  %p5153_p2 = scmp.lt.s32.totalorder %s5151_s16, %s5145_s13 }
  0x24   : > { %v366_v21 = vld [vmem:[%s5337_s17 + $0x148] sm:$0xff]   ;;  %v304_v23 = vld [vmem:[%s5337_s17 + $0x50] sm:$0xff]   ;;  %v306_v25 = vld [vmem:[%s5337_s17 + $0x58] sm:$0xff]   ;;  %7702 = vst [vmem:[#allocation8_spill] sm:$0xff] %v5473_v6  ;;  %p5147_p13 = pnand %p5146_p12, %p5317_p5 }
  0x25   : > { %v372_v26 = vld [vmem:[%s5337_s17 + $0x160] sm:$0xff]   ;;  %v374_v28 = vld [vmem:[%s5337_s17 + $0x168] sm:$0xff]   ;;  %v376_v30 = vld [vmem:[%s5337_s17 + $0x170] sm:$0xff]   ;;  %p5154_p3 = por %p5153_p2, %p5152_p1 }
  0x26   : > { %v308_v27 = vld [vmem:[%s5337_s17 + $0x60] sm:$0xff]   ;;  %v310_v29 = vld [vmem:[%s5337_s17 + $0x68] sm:$0xff]   ;;  %v312_v31 = vld [vmem:[%s5337_s17 + $0x70] sm:$0xff]   ;;  %p5148_p0 = pneg %p5147_p13 }
  0x27   : > { %v378_v32 = vld [vmem:[%s5337_s17 + $0x178] sm:$0xff]   ;;  %v380_v34 = vld [vmem:[%s5337_s17 + $0x180] sm:$0xff]   ;;  %v382_v36 = vld [vmem:[%s5337_s17 + $0x188] sm:$0xff]  }
  0x28   : > { %4771 = vmatmul.mubr.msk.bf16.gmra.mrb[4].mxu0 %vm7690_vm0, %v290_v8  ;;  %4835 = vmatmul.mubr.msk.bf16.gmra.mrb[4].mxu1 %vm7690_vm0, %v354_v9  ;;  %v314_v33 = vld [vmem:[%s5337_s17 + $0x78] sm:$0xff]   ;;  %v316_v35 = vld [vmem:[%s5337_s17 + $0x80] sm:$0xff]   ;;  %v318_v37 = vld [vmem:[%s5337_s17 + $0x88] sm:$0xff]   ;;  %v5476_v8 = vsub.s32 %v1626_v5, %v5473_v6  ;;  %p5155_p4 = pnand %p5154_p3, %p5148_p0 }
  0x29   : > { %4774 = vmatprep.mubr.msk.bf16.mxu0 %vm7690_vm0, %v292_v10  ;;  %4838 = vmatprep.mubr.msk.bf16.mxu1 %vm7690_vm0, %v356_v11  ;;  %v384_v38 = vld [vmem:[%s5337_s17 + $0x190] sm:$0xff]   ;;  %v386_v40 = vld [vmem:[%s5337_s17 + $0x198] sm:$0xff]   ;;  %v324_v42 = vld [vmem:[%s5337_s17 + $0xa0] sm:$0xff]  }
  0x2a   : > { %v320_v39 = vld [vmem:[%s5337_s17 + $0x90] sm:$0xff]   ;;  %v322_v41 = vld [vmem:[%s5337_s17 + $0x98] sm:$0xff]   ;;  %v388_v43 = vld [vmem:[%s5337_s17 + $0x1a0] sm:$0xff]  }
  0x2b   : > { %v326_v44 = vld [vmem:[%s5337_s17 + $0xa8] sm:$0xff]   ;;  %v392_v46 = vld [vmem:[%s5337_s17 + $0x1b0] sm:$0xff]   ;;  %v394_v48 = vld [vmem:[%s5337_s17 + $0x1b8] sm:$0xff]  }
  0x2c   : > { %v390_v45 = vld [vmem:[%s5337_s17 + $0x1a8] sm:$0xff]   ;;  %v328_v47 = vld [vmem:[%s5337_s17 + $0xb0] sm:$0xff]   ;;  %v330_v49 = vld [vmem:[%s5337_s17 + $0xb8] sm:$0xff]  }
  0x2d   : > { %v396_v50 = vld [vmem:[%s5337_s17 + $0x1c0] sm:$0xff]   ;;  %v398_v52 = vld [vmem:[%s5337_s17 + $0x1c8] sm:$0xff]   ;;  %v400_v54 = vld [vmem:[%s5337_s17 + $0x1d0] sm:$0xff]  }
  0x2e   : > { %v332_v51 = vld [vmem:[%s5337_s17 + $0xc0] sm:$0xff]   ;;  %v334_v53 = vld [vmem:[%s5337_s17 + $0xc8] sm:$0xff]   ;;  %v336_v55 = vld [vmem:[%s5337_s17 + $0xd0] sm:$0xff]  }
  0x2f   : > { %v402_v56 = vld [vmem:[%s5337_s17 + $0x1d8] sm:$0xff]   ;;  %v404_v58 = vld [vmem:[%s5337_s17 + $0x1e0] sm:$0xff]   ;;  %v406_v60 = vld [vmem:[%s5337_s17 + $0x1e8] sm:$0xff]  }
  0x30   : > { %4775 = vmatmul.mubr.msk.bf16.gmra.mrb[8].mxu0 %vm7690_vm0, %v294_v12  ;;  %4839 = vmatmul.mubr.msk.bf16.gmra.mrb[8].mxu1 %vm7690_vm0, %v358_v13  ;;  %v338_v57 = vld [vmem:[%s5337_s17 + $0xd8] sm:$0xff]   ;;  %v340_v59 = vld [vmem:[%s5337_s17 + $0xe0] sm:$0xff]   ;;  %v342_v61 = vld [vmem:[%s5337_s17 + $0xe8] sm:$0xff]   ;;  %v5489_v13 = vsub.s32 0, %v5473_v6 }
  0x31   : > { %4778 = vmatprep.mubr.msk.bf16.mxu0 %vm7690_vm0, %v296_v14  ;;  %4842 = vmatprep.mubr.msk.bf16.mxu1 %vm7690_vm0, %v360_v15  ;;  %v408_v62 = vld [vmem:[%s5337_s17 + $0x1f0] sm:$0xff]   ;;  %v410_v0 = vld [vmem:[%s5337_s17 + $0x1f8] sm:$0xff]   ;;  %v1621_v7 = vld [vmem:[%s282_s28] sm:$0xff]  ;;  %s4691_s28 = sshll.u32 %s5300_s25, 7 }
  0x32   : > { %v344_v63 = vld [vmem:[%s5337_s17 + $0xf0] sm:$0xff]   ;;  %v346_v1 = vld [vmem:[%s5337_s17 + $0xf8] sm:$0xff]   ;;  %v1623_v9 = vcombine.high %v1621_v7, %v1621_v7  ;;  %v5479_v10 = vrot.slane %v1621_v7, %v5476_v8  ;;  %7703 = vst [vmem:[#allocation9_spill] sm:$0xff] %v5489_v13  ;;  %v5498_v15 = vld [vmem:[%s7681_s3] ss:$0 sm:$0xff]  ;;  %s7270_s10 = scalar_lea.hbm %s7684_s6, %s4691_s28 }
  0x34   : > { %v5482_v11 = vrot.slane %v1623_v9, %v5476_v8  ;;  %v5486_v12 = vrot.slane %v5479_v10, %v5476_v8 }
  0x36   : > { %v5493_v14 = vrot.slane %v5482_v11, %v5476_v8 }
  0x38   : > { %4779 = vmatmul.mubr.msk.bf16.gmra.mrb[12].mxu0 %vm7690_vm0, %v298_v16  ;;  %4843 = vmatmul.mubr.msk.bf16.gmra.mrb[12].mxu1 %vm7690_vm0, %v362_v17  ;;  %v5502_v16 = vrot.slane %v5486_v12, %v5489_v13  ;;  %v5506_v17 = vrot.slane %v5493_v14, %v5489_v13 }
  0x39   : > { %4782 = vmatprep.mubr.msk.bf16.mxu0 %vm7690_vm0, %v300_v18  ;;  %4846 = vmatprep.mubr.msk.bf16.mxu1 %vm7690_vm0, %v364_v19 }
  0x40   : > { %4783 = vmatmul.mubr.msk.bf16.gmra.mrb[16].mxu0 %vm7690_vm0, %v302_v20  ;;  %4847 = vmatmul.mubr.msk.bf16.gmra.mrb[16].mxu1 %vm7690_vm0, %v366_v21 }
  0x41   : > { %4850 = vmatprep.mubr.msk.bf16.mxu1 %vm7690_vm0, %v368_v22  ;;  %4786 = vmatprep.mubr.msk.bf16.mxu0 %vm7690_vm0, %v304_v23 }
  0x48   : > { %4851 = vmatmul.mubr.msk.bf16.gmra.mrb[20].mxu1 %vm7690_vm0, %v370_v24  ;;  %4787 = vmatmul.mubr.msk.bf16.gmra.mrb[20].mxu0 %vm7690_vm0, %v306_v25 }
  0x49   : > { %4854 = vmatprep.mubr.msk.bf16.mxu1 %vm7690_vm0, %v372_v26  ;;  %4790 = vmatprep.mubr.msk.bf16.mxu0 %vm7690_vm0, %v308_v27 }
  0x50   : > { %4855 = vmatmul.mubr.msk.bf16.gmra.mrb[24].mxu1 %vm7690_vm0, %v374_v28  ;;  %4791 = vmatmul.mubr.msk.bf16.gmra.mrb[24].mxu0 %vm7690_vm0, %v310_v29 }
  0x51   : > { %4858 = vmatprep.mubr.msk.bf16.mxu1 %vm7690_vm0, %v376_v30  ;;  %4794 = vmatprep.mubr.msk.bf16.mxu0 %vm7690_vm0, %v312_v31 }
  0x58   : > { %4859 = vmatmul.mubr.msk.bf16.gmra.mrb[28].mxu1 %vm7690_vm0, %v378_v32  ;;  %4795 = vmatmul.mubr.msk.bf16.gmra.mrb[28].mxu0 %vm7690_vm0, %v314_v33 }
  0x59   : > { %4862 = vmatprep.mubr.msk.bf16.mxu1 %vm7690_vm0, %v380_v34  ;;  %4798 = vmatprep.mubr.msk.bf16.mxu0 %vm7690_vm0, %v316_v35 }
  0x60   : > { %4863 = vmatmul.mubr.msk.bf16.gmra.mrb[32].mxu1 %vm7690_vm0, %v382_v36  ;;  %4799 = vmatmul.mubr.msk.bf16.gmra.mrb[32].mxu0 %vm7690_vm0, %v318_v37  ;;  %v5522_v37 = vld [vmem:[%s7682_s4] ss:$0 sm:$0xff] }
  0x61   : > { %4866 = vmatprep.mubr.msk.bf16.mxu1 %vm7690_vm0, %v384_v38  ;;  %4802 = vmatprep.mubr.msk.bf16.mxu0 %vm7690_vm0, %v320_v39 }
  0x68   : > { %4867 = vmatmul.mubr.msk.bf16.gmra.mrb[36].mxu1 %vm7690_vm0, %v386_v40  ;;  %4803 = vmatmul.mubr.msk.bf16.gmra.mrb[36].mxu0 %vm7690_vm0, %v322_v41 }
  0x69   : > { %4806 = vmatprep.mubr.msk.bf16.mxu0 %vm7690_vm0, %v324_v42  ;;  %4870 = vmatprep.mubr.msk.bf16.mxu1 %vm7690_vm0, %v388_v43 }
  0x70   : > { %4807 = vmatmul.mubr.msk.bf16.gmra.mrb[40].mxu0 %vm7690_vm0, %v326_v44  ;;  %4871 = vmatmul.mubr.msk.bf16.gmra.mrb[40].mxu1 %vm7690_vm0, %v390_v45 }
  0x71   : > { %4874 = vmatprep.mubr.msk.bf16.mxu1 %vm7690_vm0, %v392_v46  ;;  %4810 = vmatprep.mubr.msk.bf16.mxu0 %vm7690_vm0, %v328_v47 }
  0x78   : > { %4875 = vmatmul.mubr.msk.bf16.gmra.mrb[44].mxu1 %vm7690_vm0, %v394_v48  ;;  %4811 = vmatmul.mubr.msk.bf16.gmra.mrb[44].mxu0 %vm7690_vm0, %v330_v49 }
  0x79   : > { %4878 = vmatprep.mubr.msk.bf16.mxu1 %vm7690_vm0, %v396_v50  ;;  %4814 = vmatprep.mubr.msk.bf16.mxu0 %vm7690_vm0, %v332_v51 }
  0x80   : > { %4879 = vmatmul.mubr.msk.bf16.gmra.mrb[48].mxu1 %vm7690_vm0, %v398_v52  ;;  %4815 = vmatmul.mubr.msk.bf16.gmra.mrb[48].mxu0 %vm7690_vm0, %v334_v53 }
  0x81   : > { %4882 = vmatprep.mubr.msk.bf16.mxu1 %vm7690_vm0, %v400_v54  ;;  %4818 = vmatprep.mubr.msk.bf16.mxu0 %vm7690_vm0, %v336_v55 }
  0x88   : > { %4883 = vmatmul.mubr.msk.bf16.gmra.mrb[52].mxu1 %vm7690_vm0, %v402_v56  ;;  %4819 = vmatmul.mubr.msk.bf16.gmra.mrb[52].mxu0 %vm7690_vm0, %v338_v57 }
  0x89   : > { %4886 = vmatprep.mubr.msk.bf16.mxu1 %vm7690_vm0, %v404_v58  ;;  %4822 = vmatprep.mubr.msk.bf16.mxu0 %vm7690_vm0, %v340_v59 }
  0x90   : > { %4887 = vmatmul.mubr.msk.bf16.gmra.mrb[56].mxu1 %vm7690_vm0, %v406_v60  ;;  %4823 = vmatmul.mubr.msk.bf16.gmra.mrb[56].mxu0 %vm7690_vm0, %v342_v61 }
  0x91   : > { %4890 = vmatprep.mubr.msk.bf16.mxu1 %vm7690_vm0, %v408_v62  ;;  %4826 = vmatprep.mubr.msk.bf16.mxu0 %vm7690_vm0, %v344_v63 }
  0x98   : > { %4891 = vmatmul.mubr.msk.bf16.gmra.mrb[60].mxu1 %vm7690_vm0, %v410_v0  ;;  %4827 = vmatmul.mubr.msk.bf16.gmra.mrb[60].mxu0 %vm7690_vm0, %v346_v1  ;;  %vm2726_vm0 = vcmask 1048512  }
  0xf3   : > { %v4768_v18 = vpop.f32.mrb[0].mxu0  ;;  %v4832_v19 = vpop.f32.mrb[0].mxu1 }
  0xf4   : > { %v1495_v20 = vadd.f32 %v4768_v18, %v5498_v15  ;;  %v1559_v21 = vadd.f32 %v4832_v19, %v5498_v15  ;;  %v975_v22 = vpop.f32.mrb[1].mxu0  ;;  %v1231_v23 = vpop.f32.mrb[1].mxu1 }
  0xf5   : > { %v1493_v24 = vadd.f32 %v5498_v15, %v975_v22  ;;  %v1557_v25 = vadd.f32 %v5498_v15, %v1231_v23  ;;  %v4769_v26 = vpop.f32.mrb[2].mxu0  ;;  %v4833_v27 = vpop.f32.mrb[2].mxu1 }
  0xf6   : > { %v1714_v28 = vadd.f32 %v5502_v16, %v1495_v20  ;;  %v1778_v29 = vadd.f32 %v5506_v17, %v1559_v21  ;;  %v1496_v30 = vadd.f32 %v4769_v26, %v5498_v15  ;;  %v978_v31 = vpop.f32.mrb[3].mxu0  ;;  %v1234_v32 = vpop.f32.mrb[3].mxu1  ;;  %v1560_v35 = vadd.f32 %v4833_v27, %v5498_v15 }
  0xf7   : > { %v1712_v33 = vadd.f32 %v5502_v16, %v1493_v24  ;;  %v1776_v34 = vadd.f32 %v5506_v17, %v1557_v25  ;;  %v1494_v36 = vadd.f32 %v5498_v15, %v978_v31  ;;  %v1558_v42 = vadd.f32 %v5498_v15, %v1234_v32 }
  0xf8   : > { %v1842_v38 = vmax.f32 %v1714_v28, 0.0  ;;  %v1906_v39 = vmax.f32 %v1778_v29, 0.0  ;;  %v1715_v40 = vadd.f32 %v5502_v16, %v1496_v30  ;;  %v1779_v47 = vadd.f32 %v5506_v17, %v1560_v35 }
  0xf9   : > { %v1840_v41 = vmax.f32 %v1712_v33, 0.0  ;;  %v1904_v46 = vmax.f32 %v1776_v34, 0.0  ;;  %v1713_v48 = vadd.f32 %v5502_v16, %v1494_v36  ;;  %v1777_v58 = vadd.f32 %v5506_v17, %v1558_v42 }
  0xfa   : > { %v1843_v43 = vmax.f32 %v1715_v40, 0.0  ;;  %v2041_v44 = vmul.f32 %v5522_v37, %v1906_v39  ;;  %v1977_v45 = vmul.f32 %v5522_v37, %v1842_v38  ;;  %v1907_v0 = vmax.f32 %v1779_v47, 0.0 }
  0xfb   : > { %v4772_v49 = vpop.f32.mrb[4].mxu0  ;;  %v1975_v50 = vmul.f32 %v5522_v37, %v1840_v41  ;;  %v4836_v51 = vpop.f32.mrb[4].mxu1  ;;  %v1841_v1 = vmax.f32 %v1713_v48, 0.0  ;;  %v2039_v2 = vmul.f32 %v5522_v37, %v1904_v46  ;;  %v1905_v18 = vmax.f32 %v1777_v58, 0.0 }
  0xfc   : > { %v2302_v52 = vsel %vm2103_vm1, %v2041_v44, 0.0  ;;  %v2110_v53 = vsel %vm2103_vm1, %v1977_v45, 0.0  ;;  %v1499_v54 = vadd.f32 %v4772_v49, %v5498_v15  ;;  %v991_v55 = vpop.f32.mrb[5].mxu0  ;;  %v1978_v56 = vmul.f32 %v5522_v37, %v1843_v43  ;;  %v1247_v57 = vpop.f32.mrb[5].mxu1 }
  0xfd   : > { %2303 = vadd.xlane.f32.xlu0 %v2302_v52  ;;  %2111 = vadd.xlane.f32.xlu1 %v2110_v53  ;;  %v4773_v59 = vpop.f32.mrb[6].mxu0  ;;  %v4837_v60 = vpop.f32.mrb[6].mxu1  ;;  %v2104_v5 = vsel %vm2103_vm1, %v1975_v50, 0.0  ;;  %v1563_v9 = vadd.f32 %v4836_v51, %v5498_v15  ;;  %v1497_v21 = vadd.f32 %v5498_v15, %v991_v55  ;;  %v2042_v23 = vmul.f32 %v5522_v37, %v1907_v0 }
  0xfe   : > { %v1500_v61 = vadd.f32 %v4773_v59, %v5498_v15  ;;  %v994_v62 = vpop.f32.mrb[7].mxu0  ;;  %v1250_v63 = vpop.f32.mrb[7].mxu1  ;;  %v1718_v3 = vadd.f32 %v5502_v16, %v1499_v54  ;;  %v2113_v7 = vsel %vm2103_vm1, %v1978_v56, 0.0  ;;  %v1564_v20 = vadd.f32 %v4837_v60, %v5498_v15 }
  0xff   : > { %v1498_v22 = vadd.f32 %v5498_v15, %v994_v62  ;;  %v1782_v27 = vadd.f32 %v5506_v17, %v1563_v9  ;;  %v2296_v28 = vsel %vm2103_vm1, %v2039_v2, 0.0  ;;  %v1976_v29 = vmul.f32 %v5522_v37, %v1841_v1 }
 0x100   : > { %v1719_v19 = vadd.f32 %v5502_v16, %v1500_v61  ;;  %v1846_v26 = vmax.f32 %v1718_v3, 0.0  ;;  %v1783_v33 = vadd.f32 %v5506_v17, %v1564_v20  ;;  %v2305_v34 = vsel %vm2103_vm1, %v2042_v23, 0.0 }
 0x101   : > { %2105 = vadd.xlane.f32.xlu0 %v2104_v5  ;;  %2114 = vadd.xlane.f32.xlu1 %v2113_v7  ;;  %v2040_v35 = vmul.f32 %v5522_v37, %v1905_v18  ;;  %v1716_v41 = vadd.f32 %v5502_v16, %v1497_v21  ;;  %v1561_v42 = vadd.f32 %v5498_v15, %v1247_v57  ;;  %v1910_v43 = vmax.f32 %v1782_v27, 0.0 }
 0x102   : > { %v1847_v32 = vmax.f32 %v1719_v19, 0.0  ;;  %v1562_v44 = vadd.f32 %v5498_v15, %v1250_v63  ;;  %v2107_v45 = vsel %vm2103_vm1, %v1976_v29, 0.0  ;;  %v1981_v46 = vmul.f32 %v5522_v37, %v1846_v26 }
 0x103   : > { %v4776_v24 = vpop.f32.mrb[8].mxu0  ;;  %v4840_v25 = vpop.f32.mrb[8].mxu1  ;;  %v1717_v47 = vadd.f32 %v5502_v16, %v1498_v22  ;;  %v1911_v48 = vmax.f32 %v1783_v33, 0.0  ;;  %v2299_v49 = vsel %vm2103_vm1, %v2040_v35, 0.0  ;;  %v1780_v51 = vadd.f32 %v5506_v17, %v1561_v42 }
 0x104   : > { %v1007_v30 = vpop.f32.mrb[9].mxu0  ;;  %v5550_v31 = vpop.f32.mrb[9].mxu1  ;;  %v1982_v50 = vmul.f32 %v5522_v37, %v1847_v32  ;;  %v1503_v52 = vadd.f32 %v4776_v24, %v5498_v15  ;;  %v1844_v55 = vmax.f32 %v1716_v41, 0.0  ;;  %v2122_v56 = vsel %vm2103_vm1, %v1981_v46, 0.0 }
 0x105   : > { %2297 = vadd.xlane.f32.xlu0 %v2296_v28  ;;  %v4777_v36 = vpop.f32.mrb[10].mxu0  ;;  %v5555_v38 = vpop.f32.mrb[10].mxu1  ;;  %2306 = vadd.xlane.f32.xlu1 %v2305_v34  ;;  %v2045_v58 = vmul.f32 %v5522_v37, %v1910_v43  ;;  %v1845_v61 = vmax.f32 %v1717_v47, 0.0  ;;  %v1781_v62 = vadd.f32 %v5506_v17, %v1562_v44  ;;  %v2046_v0 = vmul.f32 %v5522_v37, %v1911_v48 }
 0x106   : > { %v1010_v39 = vpop.f32.mrb[11].mxu0  ;;  %v1266_v40 = vpop.f32.mrb[11].mxu1  ;;  %v1504_v57 = vadd.f32 %v4777_v36, %v5498_v15  ;;  %v2125_v63 = vsel %vm2103_vm1, %v1982_v50, 0.0  ;;  %v1567_v3 = vadd.f32 %v4840_v25, %v5498_v15  ;;  %v1722_v9 = vadd.f32 %v5502_v16, %v1503_v52 }
 0x107   : > { %v1502_v18 = vadd.f32 %v5498_v15, %v1010_v39  ;;  %v1908_v19 = vmax.f32 %v1780_v51, 0.0  ;;  %v2314_v21 = vsel %vm2103_vm1, %v2045_v58, 0.0  ;;  %v1979_v22 = vmul.f32 %v5522_v37, %v1844_v55 }
 0x108   : > { %v1723_v20 = vadd.f32 %v5502_v16, %v1504_v57  ;;  %v1909_v23 = vmax.f32 %v1781_v62, 0.0  ;;  %v2317_v24 = vsel %vm2103_vm1, %v2046_v0, 0.0  ;;  %v1980_v26 = vmul.f32 %v5522_v37, %v1845_v61 }
 0x109   : > { %2108 = vadd.xlane.f32.xlu0 %v2107_v45  ;;  %2300 = vadd.xlane.f32.xlu1 %v2299_v49  ;;  %v1501_v27 = vadd.f32 %v5498_v15, %v1007_v30  ;;  %v1786_v28 = vadd.f32 %v5506_v17, %v1567_v3  ;;  %v1850_v29 = vmax.f32 %v1722_v9, 0.0  ;;  %v1721_v32 = vadd.f32 %v5502_v16, %v1502_v18 }
 0x10a   : > { %v1851_v39 = vmax.f32 %v1723_v20, 0.0  ;;  %v2116_v41 = vsel %vm2103_vm1, %v1979_v22, 0.0  ;;  %v2043_v30 = vmul.f32 %v5522_v37, %v1908_v19  ;;  %v2119_v45 = vsel %vm2103_vm1, %v1980_v26, 0.0 }
 0x10b   : > { %v5567_v53 = vpop.f32.mrb[12].mxu0  ;;  %v5569_v54 = vpop.f32.mrb[12].mxu1  ;;  %v1566_v46 = vadd.f32 %v5498_v15, %v1266_v40  ;;  %v2044_v47 = vmul.f32 %v5522_v37, %v1909_v23  ;;  %v1914_v51 = vmax.f32 %v1786_v28, 0.0  ;;  %v1720_v57 = vadd.f32 %v5502_v16, %v1501_v27 }
 0x10c   : > { %v5574_v59 = vpop.f32.mrb[13].mxu0  ;;  %v1279_v60 = vpop.f32.mrb[13].mxu1  ;;  %v1638_v40 = vcombine.high %v5479_v10, %v5479_v10  ;;  %v1849_v58 = vmax.f32 %v1721_v32, 0.0  ;;  %v2308_v61 = vsel %vm2103_vm1, %v2043_v30, 0.0  ;;  %v1985_v62 = vmul.f32 %v5522_v37, %v1850_v29 }
 0x10d   : > { %2123 = vadd.xlane.f32.xlu0 %v2122_v56  ;;  %v4781_v1 = vpop.f32.mrb[14].mxu0  ;;  %v4845_v2 = vpop.f32.mrb[14].mxu1  ;;  %2126 = vadd.xlane.f32.xlu1 %v2125_v63  ;;  %v1569_v25 = vadd.f32 %v5498_v15, %v1279_v60  ;;  %v1565_v60 = vadd.f32 %v5498_v15, %v5550_v31  ;;  %v1785_v63 = vadd.f32 %v5506_v17, %v1566_v46  ;;  %v2311_v0 = vsel %vm2103_vm1, %v2044_v47, 0.0 }
 0x10e   : > { %v1026_v5 = vpop.f32.mrb[15].mxu0  ;;  %v1282_v7 = vpop.f32.mrb[15].mxu1  ;;  %v1572_v34 = vadd.f32 %v4845_v2, %v5498_v15  ;;  %v1508_v2 = vadd.f32 %v4781_v1, %v5498_v15  ;;  %v1986_v3 = vmul.f32 %v5522_v37, %v1851_v39  ;;  %v2049_v10 = vmul.f32 %v5522_v37, %v1914_v51 }
 0x10f   : > { %v5592_v33 = vadd.f32 %v5506_v17, %v1569_v25  ;;  %v1570_v42 = vadd.f32 %v5498_v15, %v1282_v7  ;;  %v1568_v7 = vadd.f32 %v5555_v38, %v5498_v15  ;;  %v5636_v31 = vrot.slane %v1638_v40, %v5476_v8 }
 0x110   : > { %v5610_v48 = vadd.f32 %v5506_v17, %v1572_v34  ;;  %v1639_v9 = vcombine.high %v5482_v11, %v5482_v11  ;;  %v1848_v20 = vmax.f32 %v1720_v57, 0.0  ;;  %v1784_v1 = vadd.f32 %v5506_v17, %v1565_v60 }
 0x111   : > { %2315 = vadd.xlane.f32.xlu0 %v2314_v21  ;;  %2318 = vadd.xlane.f32.xlu1 %v2317_v24  ;;  %v5615_v52 = vadd.f32 %v5506_v17, %v1570_v42  ;;  %7704 = vst [vmem:[#allocation10_spill] sm:$0xff] %v5636_v31  ;;  %v2134_v21 = vsel %vm2103_vm1, %v1985_v62, 0.0  ;;  %v1506_v22 = vadd.f32 %v5498_v15, %v1026_v5  ;;  %v1913_v24 = vmax.f32 %v1785_v63, 0.0 }
 0x112   : > { %v1727_v26 = vadd.f32 %v5502_v16, %v1508_v2  ;;  %v2137_v11 = vsel %vm2103_vm1, %v1986_v3, 0.0  ;;  %v1984_v25 = vmul.f32 %v5522_v37, %v1849_v58  ;;  %v2326_v29 = vsel %vm2103_vm1, %v2049_v10, 0.0 }
 0x113   : > { %v5595_v35 = vpop.f32.mrb[16].mxu0  ;;  %v5597_v36 = vpop.f32.mrb[16].mxu1  ;;  %v1787_v34 = vadd.f32 %v5506_v17, %v1568_v7  ;;  %v1507_v39 = vadd.f32 %v5567_v53, %v5498_v15  ;;  %v1912_v30 = vmax.f32 %v1784_v1, 0.0  ;;  %v1725_v42 = vadd.f32 %v5502_v16, %v1506_v22 }
 0x114   : > { %v5602_v43 = vpop.f32.mrb[17].mxu0  ;;  %v5604_v44 = vpop.f32.mrb[17].mxu1  ;;  %v1983_v46 = vmul.f32 %v5522_v37, %v1848_v20  ;;  %v1855_v47 = vmax.f32 %v1727_v26, 0.0  ;;  %v2131_v51 = vsel %vm2103_vm1, %v1984_v25, 0.0  ;;  %v2048_v53 = vmul.f32 %v5522_v37, %v1913_v24 }
 0x115   : > { %2117 = vadd.xlane.f32.xlu0 %v2116_v41  ;;  %v4785_v49 = vpop.f32.mrb[18].mxu0  ;;  %v5612_v50 = vpop.f32.mrb[18].mxu1  ;;  %2120 = vadd.xlane.f32.xlu1 %v2119_v45  ;;  %v5667_v41 = vrot.slane %v1639_v9, %v5476_v8  ;;  %v5672_v45 = vrot.slane %v5636_v31, %v5489_v13  ;;  %v1915_v8 = vmax.f32 %v1787_v34, 0.0  ;;  %v1726_v40 = vadd.f32 %v5502_v16, %v1507_v39 }
 0x116   : > { %v5617_v55 = vpop.f32.mrb[19].mxu0  ;;  %v5619_v56 = vpop.f32.mrb[19].mxu1  ;;  %v1512_v57 = vadd.f32 %v4785_v49, %v5498_v15  ;;  %v1853_v62 = vmax.f32 %v1725_v42, 0.0  ;;  %v1571_v63 = vadd.f32 %v5569_v54, %v5498_v15  ;;  %v2128_v49 = vsel %vm2103_vm1, %v1983_v46, 0.0 }
 0x117   : > { %7705 = vst [vmem:[#allocation11_spill] sm:$0xff] %v5667_v41  ;;  %v5681_v58 = vrot.slane %v5667_v41, %v5489_v13  ;;  %v2323_v7 = vsel %vm2103_vm1, %v2048_v53, 0.0  ;;  %v1576_v9 = vadd.f32 %v5612_v50, %v5498_v15  ;;  %v1990_v20 = vmul.f32 %v5522_v37, %v1855_v47 }
 0x118   : > { %v1731_v10 = vadd.f32 %v5672_v45, %v1512_v57  ;;  %v1854_v24 = vmax.f32 %v1726_v40, 0.0  ;;  %v1505_v26 = vadd.f32 %v5498_v15, %v5574_v59  ;;  %v1510_v50 = vadd.f32 %v5498_v15, %v5617_v55 }
 0x119   : > { %2309 = vadd.xlane.f32.xlu0 %v2308_v61  ;;  %2312 = vadd.xlane.f32.xlu1 %v2311_v0  ;;  %v2047_v0 = vmul.f32 %v5522_v37, %v1912_v30  ;;  %v1795_v39 = vadd.f32 %v5681_v58, %v1576_v9  ;;  %v2149_v30 = vsel %vm2103_vm1, %v1990_v20, 0.0  ;;  %v1988_v42 = vmul.f32 %v5522_v37, %v1853_v62 }
 0x11a   : > { %v1859_v34 = vmax.f32 %v1731_v10, 0.0  ;;  %v1724_v59 = vadd.f32 %v5502_v16, %v1505_v26  ;;  %v1729_v47 = vadd.f32 %v5672_v45, %v1510_v50  ;;  %v1989_v57 = vmul.f32 %v5522_v37, %v1854_v24 }
 0x11b   : > { %v5640_v18 = vpop.f32.mrb[20].mxu1  ;;  %v5642_v19 = vpop.f32.mrb[20].mxu0  ;;  %v2320_v25 = vsel %vm2103_vm1, %v2047_v0, 0.0  ;;  %v1923_v40 = vmax.f32 %v1795_v39, 0.0  ;;  %v1574_v62 = vadd.f32 %v5498_v15, %v5619_v56  ;;  %v2143_v16 = vsel %vm2103_vm1, %v1988_v42, 0.0 }
 0x11c   : > { %v5647_v23 = vpop.f32.mrb[21].mxu1  ;;  %v5649_v38 = vpop.f32.mrb[21].mxu0  ;;  %v1579_v9 = vadd.f32 %v5640_v18, %v5498_v15  ;;  %v1852_v20 = vmax.f32 %v1724_v59, 0.0  ;;  %v2146_v24 = vsel %vm2103_vm1, %v1989_v57, 0.0  ;;  %v1857_v56 = vmax.f32 %v1729_v47, 0.0 }
 0x11d   : > { %2135 = vadd.xlane.f32.xlu0 %v2134_v21  ;;  %v5654_v27 = vpop.f32.mrb[22].mxu1  ;;  %v5656_v28 = vpop.f32.mrb[22].mxu0  ;;  %2138 = vadd.xlane.f32.xlu1 %v2137_v11  ;;  %v1790_v11 = vadd.f32 %v5506_v17, %v1571_v63  ;;  %v1994_v63 = vmul.f32 %v5522_v37, %v1859_v34  ;;  %v1511_v18 = vadd.f32 %v5595_v35, %v5498_v15  ;;  %v1916_v42 = vmax.f32 %v5592_v33, 0.0 }
 0x11e   : > { %v5659_v5 = vpop.f32.mrb[23].mxu1  ;;  %v5661_v32 = vpop.f32.mrb[23].mxu0  ;;  %v1798_v34 = vadd.f32 %v5681_v58, %v1579_v9  ;;  %v1992_v57 = vmul.f32 %v5522_v37, %v1857_v56  ;;  %v1919_v9 = vmax.f32 %v5610_v48, 0.0 }
 0x11f   : > { %v1918_v55 = vmax.f32 %v1790_v11, 0.0  ;;  %v1793_v11 = vadd.f32 %v5681_v58, %v1574_v62  ;;  %v2161_v50 = vsel %vm2103_vm1, %v1994_v63, 0.0 }
 0x121   : > { %2327 = vadd.xlane.f32.xlu0 %v2326_v29  ;;  %2132 = vadd.xlane.f32.xlu1 %v2131_v51  ;;  %v2050_v29 = vmul.f32 %v5522_v37, %v1915_v8  ;;  %v2053_v26 = vmul.f32 %v5522_v37, %v1918_v55  ;;  %v1987_v55 = vmul.f32 %v5522_v37, %v1852_v20 }
 0x122   : > { %v1730_v20 = vadd.f32 %v5672_v45, %v1511_v18  ;;  %v1575_v18 = vadd.f32 %v5597_v36, %v5498_v15 }
 0x123   : > { %v5683_v60 = vpop.f32.mrb[24].mxu1  ;;  %v5685_v61 = vpop.f32.mrb[24].mxu0  ;;  %v2329_v51 = vsel %vm2103_vm1, %v2050_v29, 0.0  ;;  %v1577_v29 = vadd.f32 %v5498_v15, %v5647_v23  ;;  %v2338_v59 = vsel %vm2103_vm1, %v2053_v26, 0.0  ;;  %v1921_v23 = vmax.f32 %v1793_v11, 0.0 }
 0x124   : > { %v5691_v2 = vpop.f32.mrb[25].mxu1  ;;  %v5693_v3 = vpop.f32.mrb[25].mxu0  ;;  %v1917_v26 = vmax.f32 %v5615_v52, 0.0  ;;  %v2140_v56 = vsel %vm2103_vm1, %v1987_v55, 0.0  ;;  %v2051_v11 = vmul.f32 %v5522_v37, %v1916_v42 }
 0x125   : > { %2129 = vadd.xlane.f32.xlu0 %v2128_v49  ;;  %v5700_v1 = vpop.f32.mrb[26].mxu1  ;;  %v5702_v54 = vpop.f32.mrb[26].mxu0  ;;  %2324 = vadd.xlane.f32.xlu1 %v2323_v7  ;;  %v1796_v33 = vadd.f32 %v5681_v58, %v1577_v29  ;;  %v1516_v29 = vadd.f32 %v5656_v28, %v5498_v15 }
 0x126   : > { %v5704_v21 = vpop.f32.mrb[27].mxu1  ;;  %v5706_v22 = vpop.f32.mrb[27].mxu0  ;;  %v2052_v4 = vmul.f32 %v5522_v37, %v1917_v26 }
 0x127   : > { %v1924_v52 = vmax.f32 %v1796_v33, 0.0 }
 0x129   : > { %2321 = vadd.xlane.f32.xlu0 %v2320_v25  ;;  %2150 = vadd.xlane.f32.xlu1 %v2149_v30  ;;  %v2058_v25 = vmul.f32 %v5522_v37, %v1923_v40 }
 0x12b   : > { %v5719_v46 = vpop.f32.mrb[28].mxu1  ;;  %v5721_v17 = vpop.f32.mrb[28].mxu0  ;;  %v2353_v35 = vsel %vm2103_vm1, %v2058_v25, 0.0  ;;  %v2155_v25 = vsel %vm2103_vm1, %v1992_v57, 0.0  ;;  %v1514_v57 = vadd.f32 %v5498_v15, %v5661_v32 }
 0x12c   : > { %v5726_v53 = vpop.f32.mrb[29].mxu1  ;;  %v1087_v8 = vpop.f32.mrb[29].mxu0 }
 0x12d   : > { %2330 = vadd.xlane.f32.xlu0 %v2329_v51  ;;  %v4861_v49 = vpop.f32.mrb[30].mxu1  ;;  %v4797_v0 = vpop.f32.mrb[30].mxu0  ;;  %2144 = vadd.xlane.f32.xlu1 %v2143_v16  ;;  %v1521_v28 = vadd.f32 %v5498_v15, %v1087_v8  ;;  %v1735_v8 = vadd.f32 %v5672_v45, %v1516_v29 }
 0x12e   : > { %v1346_v10 = vpop.f32.mrb[31].mxu1  ;;  %v5732_v7 = vpop.f32.mrb[31].mxu0 }
 0x12f   : > { %v1586_v48 = vadd.f32 %v5498_v15, %v1346_v10  ;;  %v1524_v10 = vadd.f32 %v4797_v0, %v5498_v15  ;;  %v1863_v31 = vmax.f32 %v1735_v8, 0.0  ;;  %v2335_v8 = vsel %vm2103_vm1, %v2052_v4, 0.0 }
 0x131   : > { %2147 = vadd.xlane.f32.xlu0 %v2146_v24  ;;  %2162 = vadd.xlane.f32.xlu1 %v2161_v50  ;;  %v1926_v24 = vmax.f32 %v1798_v34, 0.0  ;;  %v1588_v50 = vadd.f32 %v4861_v49, %v5498_v15  ;;  %v1523_v49 = vadd.f32 %v5721_v17, %v5498_v15  ;;  %v5788_v55 = vadd.f32 %v5681_v58, %v1586_v48 }
 0x132   : > { %v2054_v17 = vmul.f32 %v5522_v37, %v1919_v9  ;;  %v1998_v41 = vmul.f32 %v5522_v37, %v1863_v31 }
 0x133   : > { %v5746_v39 = vpop.f32.mrb[32].mxu1  ;;  %v5748_v30 = vpop.f32.mrb[32].mxu0  ;;  %v5782_v34 = vadd.f32 %v5681_v58, %v1588_v50  ;;  %v2061_v42 = vmul.f32 %v5522_v37, %v1926_v24  ;;  %v5801_v33 = vadd.f32 %v5672_v45, %v1523_v49  ;;  %v5810_v50 = vadd.f32 %v5672_v45, %v1521_v28 }
 0x134   : > { %v5753_v47 = vpop.f32.mrb[33].mxu1  ;;  %v5755_v51 = vpop.f32.mrb[33].mxu0  ;;  %v1858_v49 = vmax.f32 %v1730_v20, 0.0  ;;  %v1733_v20 = vadd.f32 %v5672_v45, %v1514_v57 }
 0x135   : > { %2339 = vadd.xlane.f32.xlu0 %v2338_v59  ;;  %v5759_v40 = vpop.f32.mrb[34].mxu1  ;;  %v5761_v62 = vpop.f32.mrb[34].mxu0  ;;  %2354 = vadd.xlane.f32.xlu1 %v2353_v35  ;;  %v2056_v59 = vmul.f32 %v5522_v37, %v1921_v23  ;;  %v2332_v35 = vsel %vm2103_vm1, %v2051_v11, 0.0  ;;  %v5813_v11 = vadd.f32 %v5672_v45, %v1524_v10  ;;  %v2362_v28 = vsel %vm2103_vm1, %v2061_v42, 0.0 }
 0x136   : > { %v5764_v16 = vpop.f32.mrb[35].mxu1  ;;  %v5766_v63 = vpop.f32.mrb[35].mxu0  ;;  %v1583_v10 = vadd.f32 %v5683_v60, %v5498_v15  ;;  %v1573_v42 = vadd.f32 %v5498_v15, %v5604_v44  ;;  %v1993_v57 = vmul.f32 %v5522_v37, %v1858_v49  ;;  %v1581_v44 = vadd.f32 %v5498_v15, %v5691_v2 }
 0x137   : > { %v2347_v0 = vsel %vm2103_vm1, %v2056_v59, 0.0  ;;  %v1509_v59 = vadd.f32 %v5498_v15, %v5602_v43  ;;  %v2059_v43 = vmul.f32 %v5522_v37, %v1924_v52  ;;  %v1515_v2 = vadd.f32 %v5642_v19, %v5498_v15 }
 0x138   : > { %v1802_v60 = vadd.f32 %v5681_v58, %v1583_v10 }
 0x139   : > { %2141 = vadd.xlane.f32.xlu0 %v2140_v56  ;;  %2156 = vadd.xlane.f32.xlu1 %v2155_v25  ;;  %v1522_v25 = vadd.f32 %v5498_v15, %v5732_v7  ;;  %v1728_v26 = vadd.f32 %v5672_v45, %v1509_v59  ;;  %v2356_v10 = vsel %vm2103_vm1, %v2059_v43, 0.0  ;;  %v2158_v43 = vsel %vm2103_vm1, %v1993_v57, 0.0 }
 0x13a   : > { %v1513_v57 = vadd.f32 %v5498_v15, %v5649_v38 }
 0x13b   : > { %v5792_v23 = vpop.f32.mrb[36].mxu1  ;;  %v5794_v36 = vpop.f32.mrb[36].mxu0  ;;  %v5834_v7 = vadd.f32 %v5672_v45, %v1522_v25 }
 0x13c   : > { %v5803_v24 = vpop.f32.mrb[37].mxu1  ;;  %v5805_v56 = vpop.f32.mrb[37].mxu0 }
 0x13d   : > { %2333 = vadd.xlane.f32.xlu0 %v2332_v35  ;;  %v5815_v32 = vpop.f32.mrb[38].mxu1  ;;  %v5817_v9 = vpop.f32.mrb[38].mxu0  ;;  %2348 = vadd.xlane.f32.xlu1 %v2347_v0  ;;  %v1794_v35 = vadd.f32 %v5681_v58, %v1575_v18  ;;  %v2341_v0 = vsel %vm2103_vm1, %v2054_v17, 0.0 }
 0x13e   : > { %v5821_v48 = vpop.f32.mrb[39].mxu1  ;;  %v5823_v29 = vpop.f32.mrb[39].mxu0 }
 0x13f   : > { %v1922_v25 = vmax.f32 %v1794_v35, 0.0  ;;  %v1792_v35 = vadd.f32 %v5681_v58, %v1573_v42 }
 0x141   : > { %2342 = vadd.xlane.f32.xlu0 %v2341_v0  ;;  %2363 = vadd.xlane.f32.xlu1 %v2362_v28  ;;  %v1861_v28 = vmax.f32 %v1733_v20, 0.0  ;;  %v1930_v20 = vmax.f32 %v1802_v60, 0.0  ;;  %v2057_v31 = vmul.f32 %v5522_v37, %v1922_v25  ;;  %v1920_v42 = vmax.f32 %v1792_v35, 0.0 }
 0x142   : > { %v1734_v25 = vadd.f32 %v5672_v45, %v1515_v2 }
 0x143   : > { %v5841_v18 = vpop.f32.mrb[40].mxu0  ;;  %v5843_v17 = vpop.f32.mrb[40].mxu1  ;;  %v2065_v60 = vmul.f32 %v5522_v37, %v1930_v20  ;;  %v1584_v20 = vadd.f32 %v5700_v1, %v5498_v15 }
 0x144   : > { %v5848_v0 = vpop.f32.mrb[41].mxu0  ;;  %v5850_v52 = vpop.f32.mrb[41].mxu1  ;;  %v1862_v1 = vmax.f32 %v1734_v25, 0.0 }
 0x145   : > { %7706 = vst [vmem:[#allocation12_spill] sm:$0xff] %v5850_v52  ;;  %2336 = vadd.xlane.f32.xlu0 %v2335_v8  ;;  %v5856_v6 = vpop.f32.mrb[42].mxu0  ;;  %v5858_v59 = vpop.f32.mrb[42].mxu1  ;;  %2357 = vadd.xlane.f32.xlu1 %v2356_v10  ;;  %v1856_v52 = vmax.f32 %v1728_v26, 0.0  ;;  %v1800_v8 = vadd.f32 %v5681_v58, %v1581_v44  ;;  %v2173_v10 = vsel %vm2103_vm1, %v1998_v41, 0.0  ;;  %v2350_v41 = vsel %vm2103_vm1, %v2057_v31, 0.0 }
 0x146   : > { %7707 = vst [vmem:[#allocation13_spill] sm:$0xff] %v5858_v59  ;;  %v5860_v4 = vpop.f32.mrb[43].mxu0  ;;  %v5862_v49 = vpop.f32.mrb[43].mxu1  ;;  %v1520_v59 = vadd.f32 %v5702_v54, %v5498_v15 }
 0x147   : > { %7708 = vst [vmem:[#allocation14_spill] sm:$0xff] %v5862_v49  ;;  %v1996_v49 = vmul.f32 %v5522_v37, %v1861_v28  ;;  %v1991_v44 = vmul.f32 %v5522_v37, %v1856_v52  ;;  %v1928_v35 = vmax.f32 %v1800_v8, 0.0  ;;  %v1580_v8 = vadd.f32 %v5654_v27, %v5498_v15 }
 0x149   : > { %2159 = vadd.xlane.f32.xlu0 %v2158_v43  ;;  %2174 = vadd.xlane.f32.xlu1 %v2173_v10  ;;  %v1739_v43 = vadd.f32 %v5672_v45, %v1520_v59  ;;  %v2167_v2 = vsel %vm2103_vm1, %v1996_v49, 0.0  ;;  %v1732_v59 = vadd.f32 %v5672_v45, %v1513_v57  ;;  %v2055_v49 = vmul.f32 %v5522_v37, %v1920_v42 }
 0x14a   : > { %v1799_v27 = vadd.f32 %v5681_v58, %v1580_v8 }
 0x14b   : > { %v5875_v26 = vpop.f32.mrb[44].mxu1  ;;  %v5877_v19 = vpop.f32.mrb[44].mxu0  ;;  %v1860_v42 = vmax.f32 %v1732_v59, 0.0 }
 0x14c   : > { %7709 = vst [vmem:[#allocation15_spill] sm:$0xff] %v5877_v19  ;;  %v5884_v54 = vpop.f32.mrb[45].mxu1  ;;  %v5886_v28 = vpop.f32.mrb[45].mxu0  ;;  %v2374_v19 = vsel %vm2103_vm1, %v2065_v60, 0.0  ;;  %v1578_v60 = vadd.f32 %v5498_v15, %v5659_v5 }
 0x14d   : > { %2351 = vadd.xlane.f32.xlu0 %v2350_v41  ;;  %v5892_v10 = vpop.f32.mrb[46].mxu1  ;;  %v5894_v38 = vpop.f32.mrb[46].mxu0  ;;  %2168 = vadd.xlane.f32.xlu1 %v2167_v2  ;;  %v2152_v41 = vsel %vm2103_vm1, %v1991_v44, 0.0  ;;  %v1518_v2 = vadd.f32 %v5498_v15, %v5706_v22  ;;  %v1582_v44 = vadd.f32 %v5498_v15, %v5704_v21  ;;  %v1997_v22 = vmul.f32 %v5522_v37, %v1862_v1 }
 0x14e   : > { %7710 = vst [vmem:[#allocation16_spill] sm:$0xff] %v5892_v10  ;;  %7711 = vst [vmem:[#allocation17_spill] sm:$0xff] %v5894_v38  ;;  %v5896_v31 = vpop.f32.mrb[47].mxu1  ;;  %v5898_v52 = vpop.f32.mrb[47].mxu0  ;;  %v1803_v10 = vadd.f32 %v5681_v58, %v1584_v20  ;;  %v1867_v38 = vmax.f32 %v1739_v43, 0.0  ;;  %v2344_v20 = vsel %vm2103_vm1, %v2055_v49, 0.0 }
 0x14f   : > { %7712 = vst [vmem:[#allocation18_spill] sm:$0xff] %v5898_v52  ;;  %v2063_v52 = vmul.f32 %v5522_v37, %v1928_v35  ;;  %v1737_v8 = vadd.f32 %v5672_v45, %v1518_v2  ;;  %v1927_v49 = vmax.f32 %v1799_v27, 0.0  ;;  %v1519_v2 = vadd.f32 %v5685_v61, %v5498_v15 }
 0x150   : > { %v1931_v35 = vmax.f32 %v1803_v10, 0.0  ;;  %v1587_v10 = vadd.f32 %v5719_v46, %v5498_v15 }
 0x151   : > { %2153 = vadd.xlane.f32.xlu0 %v2152_v41  ;;  %2375 = vadd.xlane.f32.xlu1 %v2374_v19  ;;  %v2368_v5 = vsel %vm2103_vm1, %v2063_v52, 0.0  ;;  %v2002_v41 = vmul.f32 %v5522_v37, %v1867_v38  ;;  %v1669_v52 = vcombine.high %v5493_v14, %v5493_v14  ;;  %v1801_v38 = vadd.f32 %v5681_v58, %v1582_v44 }
 0x152   : > { %v1517_v14 = vadd.f32 %v5498_v15, %v5693_v3  ;;  %v1806_v44 = vadd.f32 %v5681_v58, %v1587_v10  ;;  %v1585_v3 = vadd.f32 %v5498_v15, %v5726_v53 }
 0x153   : > { %v5913_v25 = vpop.f32.mrb[48].mxu1  ;;  %v5915_v57 = vpop.f32.mrb[48].mxu0  ;;  %v2185_v27 = vsel %vm2103_vm1, %v2002_v41, 0.0 }
 0x154   : > { %7713 = vst [vmem:[#allocation19_spill] sm:$0xff] %v5915_v57  ;;  %v5921_v43 = vpop.f32.mrb[49].mxu1  ;;  %v5923_v19 = vpop.f32.mrb[49].mxu0  ;;  %v1934_v53 = vmax.f32 %v1806_v44, 0.0 }
 0x155   : > { %7714 = vst [vmem:[#allocation20_spill] sm:$0xff] %v5923_v19  ;;  %2345 = vadd.xlane.f32.xlu0 %v2344_v20  ;;  %v5928_v59 = vpop.f32.mrb[50].mxu1  ;;  %v5930_v57 = vpop.f32.mrb[50].mxu0  ;;  %2369 = vadd.xlane.f32.xlu1 %v2368_v5  ;;  %v1797_v19 = vadd.f32 %v5681_v58, %v1578_v60  ;;  %v2170_v20 = vsel %vm2103_vm1, %v1997_v22, 0.0  ;;  %v1995_v5 = vmul.f32 %v5522_v37, %v1860_v42  ;;  %v1929_v42 = vmax.f32 %v1801_v38, 0.0 }
 0x156   : > { %7715 = vst [vmem:[#allocation21_spill] sm:$0xff] %v5928_v59  ;;  %v5932_v21 = vpop.f32.mrb[51].mxu1  ;;  %v5934_v1 = vpop.f32.mrb[51].mxu0  ;;  %v2066_v60 = vmul.f32 %v5522_v37, %v1931_v35  ;;  %v5952_v59 = vrot.slane %v1669_v52, %v5489_v13  ;;  %v2062_v35 = vmul.f32 %v5522_v37, %v1927_v49  ;;  %v1601_v38 = vadd.f32 %v5498_v15, %v5884_v54 }
 0x157   : > { %7716 = vst [vmem:[#allocation22_spill] sm:$0xff] %v5932_v21  ;;  %v1865_v21 = vmax.f32 %v1737_v8, 0.0  ;;  %v1925_v46 = vmax.f32 %v1797_v19, 0.0  ;;  %v1738_v8 = vadd.f32 %v5672_v45, %v1519_v2  ;;  %v2164_v41 = vsel %vm2103_vm1, %v1995_v5, 0.0 }
 0x158   : > { %v2377_v10 = vsel %vm2103_vm1, %v2066_v60, 0.0  ;;  %v1668_v49 = vcombine.high %v5486_v12, %v5486_v12  ;;  %v5982_v60 = vadd.f32 %v5952_v59, %v1601_v38  ;;  %v2365_v54 = vsel %vm2103_vm1, %v2062_v35, 0.0 }
 0x159   : > { %2171 = vadd.xlane.f32.xlu0 %v2170_v20  ;;  %2186 = vadd.xlane.f32.xlu1 %v2185_v27  ;;  %v2000_v52 = vmul.f32 %v5522_v37, %v1865_v21  ;;  %v1866_v21 = vmax.f32 %v1738_v8, 0.0  ;;  %v1537_v8 = vadd.f32 %v5498_v15, %v5886_v28 }
 0x15a   : > { %v5991_v44 = vrot.slane %v1668_v49, %v5489_v13 }
 0x15b   : > { %v5954_v61 = vpop.f32.mrb[52].mxu1  ;;  %v5956_v22 = vpop.f32.mrb[52].mxu0  ;;  %v2179_v12 = vsel %vm2103_vm1, %v2000_v52, 0.0 }
 0x15c   : > { %7717 = vst [vmem:[#allocation23_spill] sm:$0xff] %v5956_v22  ;;  %v5961_v19 = vpop.f32.mrb[53].mxu1  ;;  %v5963_v20 = vpop.f32.mrb[53].mxu0  ;;  %v2060_v22 = vmul.f32 %v5522_v37, %v1925_v46  ;;  %v6005_v52 = vadd.f32 %v5991_v44, %v1537_v8  ;;  %v1870_v8 = vmax.f32 %v5801_v33, 0.0  ;;  %v1868_v33 = vmax.f32 %v5810_v50, 0.0 }
 0x15d   : > { %7718 = vst [vmem:[#allocation24_spill] sm:$0xff] %v5963_v20  ;;  %2165 = vadd.xlane.f32.xlu0 %v2164_v41  ;;  %v5971_v2 = vpop.f32.mrb[54].mxu1  ;;  %v5973_v5 = vpop.f32.mrb[54].mxu0  ;;  %2378 = vadd.xlane.f32.xlu1 %v2377_v10  ;;  %v1736_v41 = vadd.f32 %v5672_v45, %v1517_v14  ;;  %v1804_v10 = vadd.f32 %v5681_v58, %v1585_v3 }
 0x15e   : > { %v5977_v27 = vpop.f32.mrb[55].mxu1  ;;  %v5979_v20 = vpop.f32.mrb[55].mxu0  ;;  %v2069_v45 = vmul.f32 %v5522_v37, %v1934_v53  ;;  %v1602_v14 = vadd.f32 %v5498_v15, %v5896_v31  ;;  %v2359_v3 = vsel %vm2103_vm1, %v2060_v22, 0.0 }
 0x15f   : > { %7719 = vst [vmem:[#allocation25_spill] sm:$0xff] %v5977_v27  ;;  %v2064_v27 = vmul.f32 %v5522_v37, %v1929_v42  ;;  %v1864_v35 = vmax.f32 %v1736_v41, 0.0  ;;  %v2001_v42 = vmul.f32 %v5522_v37, %v1866_v21  ;;  %v1932_v49 = vmax.f32 %v1804_v10, 0.0 }
 0x160   : > { %v6013_v53 = vadd.f32 %v5952_v59, %v1602_v14  ;;  %v1871_v14 = vmax.f32 %v5813_v11, 0.0  ;;  %v2005_v11 = vmul.f32 %v5522_v37, %v1870_v8 }
 0x161   : > { %2366 = vadd.xlane.f32.xlu0 %v2365_v54  ;;  %2180 = vadd.xlane.f32.xlu1 %v2179_v12  ;;  %v2371_v31 = vsel %vm2103_vm1, %v2064_v27, 0.0  ;;  %v2386_v12 = vsel %vm2103_vm1, %v2069_v45, 0.0  ;;  %v2182_v10 = vsel %vm2103_vm1, %v2001_v42, 0.0  ;;  %v1999_v27 = vmul.f32 %v5522_v37, %v1864_v35 }
 0x163   : > { %v5998_v46 = vpop.f32.mrb[56].mxu1  ;;  %v6000_v58 = vpop.f32.mrb[56].mxu0  ;;  %v2176_v35 = vsel %vm2103_vm1, %v1999_v27, 0.0 }
 0x164   : > { %v6007_v38 = vpop.f32.mrb[57].mxu1  ;;  %v6009_v28 = vpop.f32.mrb[57].mxu0 }
 0x165   : > { %7720 = vst [vmem:[#allocation26_spill] sm:$0xff] %v6009_v28  ;;  %2360 = vadd.xlane.f32.xlu0 %v2359_v3  ;;  %v6015_v54 = vpop.f32.mrb[58].mxu1  ;;  %v6017_v41 = vpop.f32.mrb[58].mxu0  ;;  %2372 = vadd.xlane.f32.xlu1 %v2371_v31  ;;  %v2067_v3 = vmul.f32 %v5522_v37, %v1932_v49  ;;  %v1527_v31 = vadd.f32 %v5748_v30, %v5498_v15 }
 0x166   : > { %v6019_v22 = vpop.f32.mrb[59].mxu1  ;;  %v6021_v21 = vpop.f32.mrb[59].mxu0  ;;  %v1589_v28 = vadd.f32 %v5498_v15, %v5753_v47  ;;  %v2006_v15 = vmul.f32 %v5522_v37, %v1871_v14 }
 0x167   : > { %7721 = vst [vmem:[#allocation27_spill] sm:$0xff] %v6019_v22  ;;  %v2380_v30 = vsel %vm2103_vm1, %v2067_v3, 0.0  ;;  %v1746_v50 = vadd.f32 %v5991_v44, %v1527_v31  ;;  %v6061_v3 = vld [vmem:[%s7681_s3] ss:$0 sm:$0xff]  ;;  %v2003_v31 = vmul.f32 %v5522_v37, %v1868_v33 }
 0x168   : > { %v1591_v14 = vadd.f32 %v6061_v3, %v5746_v39  ;;  %v1525_v39 = vadd.f32 %v6061_v3, %v5755_v51 }
 0x169   : > { %2183 = vadd.xlane.f32.xlu0 %v2182_v10  ;;  %2387 = vadd.xlane.f32.xlu1 %v2386_v12  ;;  %v1869_v12 = vmax.f32 %v5834_v7, 0.0  ;;  %v1935_v7 = vmax.f32 %v5782_v34, 0.0  ;;  %v1528_v34 = vadd.f32 %v6061_v3, %v5761_v62  ;;  %v2188_v33 = vsel %vm2103_vm1, %v2003_v31, 0.0 }
 0x16b   : > { %v6033_v22 = vpop.f32.mrb[60].mxu1  ;;  %v6035_v45 = vpop.f32.mrb[60].mxu0  ;;  %v1747_v62 = vadd.f32 %v5991_v44, %v1528_v34 }
 0x16c   : > { %7722 = vst [vmem:[#allocation28_spill] sm:$0xff] %v6035_v45  ;;  %v6040_v42 = vpop.f32.mrb[61].mxu1  ;;  %v6042_v49 = vpop.f32.mrb[61].mxu0  ;;  %v1810_v45 = vadd.f32 %v5952_v59, %v1591_v14  ;;  %v1744_v14 = vadd.f32 %v5991_v44, %v1525_v39 }
 0x16d   : > { %7723 = vst [vmem:[#allocation29_spill] sm:$0xff] %v6040_v42  ;;  %7724 = vst [vmem:[#allocation30_spill] sm:$0xff] %v6042_v49  ;;  %2177 = vadd.xlane.f32.xlu0 %v2176_v35  ;;  %v6047_v47 = vpop.f32.mrb[62].mxu1  ;;  %v6049_v10 = vpop.f32.mrb[62].mxu0  ;;  %2381 = vadd.xlane.f32.xlu1 %v2380_v30  ;;  %v1808_v49 = vadd.f32 %v5952_v59, %v1589_v28  ;;  %v2194_v35 = vsel %vm2103_vm1, %v2005_v11, 0.0  ;;  %v1933_v30 = vmax.f32 %v5788_v55, 0.0 }
 0x16e   : > { %7725 = vst [vmem:[#allocation31_spill] sm:$0xff] %v6049_v10  ;;  %v6052_v27 = vpop.f32.mrb[63].mxu1  ;;  %v6054_v8 = vpop.f32.mrb[63].mxu0  ;;  %v2004_v28 = vmul.f32 %v5522_v37, %v1869_v12  ;;  %v1874_v10 = vmax.f32 %v1746_v50, 0.0  ;;  %v6079_v55 = vld [vmem:[%s7682_s4] ss:$0 sm:$0xff]  ;;  %v1526_v37 = vadd.f32 %v6061_v3, %v5766_v63 }
 0x16f   : > { %7726 = vst [vmem:[#allocation32_spill] sm:$0xff] %v6054_v8  ;;  %v2197_v8 = vsel %vm2103_vm1, %v2006_v15, 0.0  ;;  %v1936_v42 = vmax.f32 %v1808_v49, 0.0  ;;  %v2070_v11 = vmul.f32 %v6079_v55, %v1935_v7  ;;  %v2068_v12 = vmul.f32 %v6079_v55, %v1933_v30 }
 0x170   : > { %v2191_v49 = vsel %vm2103_vm1, %v2004_v28, 0.0  ;;  %v2009_v51 = vmul.f32 %v6079_v55, %v1874_v10  ;;  %v1595_v15 = vadd.f32 %v6061_v3, %v5792_v23  ;;  %v1592_v7 = vadd.f32 %v6061_v3, %v5759_v40 }
 0x171   : > { %2195 = vadd.xlane.f32.xlu0 %v2194_v35  ;;  %2198 = vadd.xlane.f32.xlu1 %v2197_v8  ;;  %v2071_v50 = vmul.f32 %v6079_v55, %v1936_v42  ;;  %v1938_v8 = vmax.f32 %v1810_v45, 0.0  ;;  %v2389_v63 = vsel %vm2103_vm1, %v2070_v11, 0.0  ;;  %v1875_v35 = vmax.f32 %v1747_v62, 0.0 }
 0x172   : > { %v1745_v31 = vadd.f32 %v5991_v44, %v1526_v37  ;;  %v2383_v30 = vsel %vm2103_vm1, %v2068_v12, 0.0  ;;  %v1590_v10 = vadd.f32 %v6061_v3, %v5764_v16  ;;  %v2206_v23 = vsel %vm2103_vm1, %v2009_v51, 0.0 }
 0x173   : > { %v1814_v45 = vadd.f32 %v5952_v59, %v1595_v15  ;;  %v2392_v40 = vsel %vm2103_vm1, %v2071_v50, 0.0  ;;  %v1811_v42 = vadd.f32 %v5952_v59, %v1592_v7  ;;  %v1872_v34 = vmax.f32 %v1744_v14, 0.0 }
 0x174   : > { %v2073_v28 = vmul.f32 %v6079_v55, %v1938_v8  ;;  %v1873_v39 = vmax.f32 %v1745_v31, 0.0  ;;  %v2010_v11 = vmul.f32 %v6079_v55, %v1875_v35  ;;  %v1809_v16 = vadd.f32 %v5952_v59, %v1590_v10 }
 0x175   : > { %2189 = vadd.xlane.f32.xlu0 %v2188_v33  ;;  %2192 = vadd.xlane.f32.xlu1 %v2191_v49  ;;  %v1593_v33 = vadd.f32 %v6061_v3, %v5803_v24  ;;  %v1942_v62 = vmax.f32 %v1814_v45, 0.0  ;;  %v1531_v37 = vadd.f32 %v6061_v3, %v5794_v36  ;;  %v1939_v49 = vmax.f32 %v1811_v42, 0.0 }
 0x176   : > { %v1596_v12 = vadd.f32 %v6061_v3, %v5815_v32  ;;  %v2398_v51 = vsel %vm2103_vm1, %v2073_v28, 0.0  ;;  %v2007_v15 = vmul.f32 %v6079_v55, %v1872_v34  ;;  %v2209_v50 = vsel %vm2103_vm1, %v2010_v11, 0.0 }
 0x177   : > { %v1812_v24 = vadd.f32 %v5952_v59, %v1593_v33  ;;  %v1532_v8 = vadd.f32 %v6061_v3, %v5817_v9  ;;  %v2008_v7 = vmul.f32 %v6079_v55, %v1873_v39  ;;  %v1937_v14 = vmax.f32 %v1809_v16, 0.0 }
 0x178   : > { %v1594_v36 = vadd.f32 %v6061_v3, %v5821_v48  ;;  %v1529_v32 = vadd.f32 %v6061_v3, %v5805_v56  ;;  %v1530_v35 = vadd.f32 %v6061_v3, %v5823_v29  ;;  %v2077_v31 = vmul.f32 %v6079_v55, %v1942_v62 }
 0x179   : > { %2390 = vadd.xlane.f32.xlu0 %v2389_v63  ;;  %2384 = vadd.xlane.f32.xlu1 %v2383_v30  ;;  %v1750_v63 = vadd.f32 %v5991_v44, %v1531_v37  ;;  %v7727_v30 = vlaneseq  ;;  %v6131_v9 = vadd.f32 %v5952_v59, %v1596_v12  ;;  %v2074_v48 = vmul.f32 %v6079_v55, %v1939_v49  ;;  %v7729_v49 = vld [vmem:[#allocation12_spill] sm:$0xff] }
 0x17a   : > { %v1535_v56 = vadd.f32 %v6061_v3, %v5841_v18  ;;  %v1940_v45 = vmax.f32 %v1812_v24, 0.0  ;;  %v2203_v29 = vsel %vm2103_vm1, %v2008_v7, 0.0  ;;  %v1533_v42 = vadd.f32 %v6061_v3, %v5848_v0 }
 0x17b   : > { %v6128_v10 = vand.u32 127, %v7727_v30  ;;  %v6142_v34 = vadd.f32 %v5952_v59, %v1594_v36  ;;  %v1748_v28 = vadd.f32 %v5991_v44, %v1529_v32  ;;  %v1536_v39 = vadd.f32 %v6061_v3, %v5856_v6 }
 0x17c   : > { %v1599_v18 = vadd.f32 %v6061_v3, %v5843_v17  ;;  %v1878_v33 = vmax.f32 %v1750_v63, 0.0  ;;  %v1749_v11 = vadd.f32 %v5991_v44, %v1530_v35  ;;  %v2410_v16 = vsel %vm2103_vm1, %v2077_v31, 0.0  ;;  %v7730_v35 = vld [vmem:[#allocation8_spill] sm:$0xff] }
 0x17d   : > { %2207 = vadd.xlane.f32.xlu0 %v2206_v23  ;;  %2393 = vadd.xlane.f32.xlu1 %v2392_v40  ;;  %7728 = vst [vmem:[#allocation33_spill] sm:$0xff] %v6128_v10  ;;  %v2200_v23 = vsel %vm2103_vm1, %v2007_v15, 0.0  ;;  %v1751_v40 = vadd.f32 %v5991_v44, %v1532_v8  ;;  %v2630_v62 = vadd.s32 4294967280, %v6128_v10  ;;  %v2401_v0 = vsel %vm2103_vm1, %v2074_v48, 0.0 }
 0x17e   : > { %v6154_v37 = vadd.f32 %v5991_v44, %v1535_v56  ;;  %v1597_v12 = vadd.f32 %v6061_v3, %v7729_v49  ;;  %v2072_v6 = vmul.f32 %v6079_v55, %v1937_v14  ;;  %v6161_v15 = vadd.f32 %v5991_v44, %v1533_v42  ;;  %v7731_v42 = vld [vmem:[#allocation13_spill] sm:$0xff] }
 0x17f   : > { %v1879_v17 = vmax.f32 %v1751_v40, 0.0  ;;  %v2075_v24 = vmul.f32 %v6079_v55, %v1940_v45  ;;  %v1876_v8 = vmax.f32 %v1748_v28, 0.0  ;;  %v1755_v32 = vadd.f32 %v5991_v44, %v1536_v39  ;;  %v7735_v40 = vld [vmem:[#allocation11_spill] sm:$0xff] }
 0x180   : > { %v6171_v14 = vadd.f32 %v5952_v59, %v1599_v18  ;;  %v1877_v63 = vmax.f32 %v1749_v11, 0.0  ;;  %v6174_v31 = vsub.s32 %v2630_v62, %v7730_v35  ;;  %v1534_v30 = vadd.f32 %v6061_v3, %v5860_v4 }
 0x181   : > { %2399 = vadd.xlane.f32.xlu0 %v2398_v51  ;;  %2210 = vadd.xlane.f32.xlu1 %v2209_v50  ;;  %v1943_v51 = vmax.f32 %v6131_v9, 0.0  ;;  %v1941_v50 = vmax.f32 %v6142_v34, 0.0  ;;  %v1603_v9 = vadd.f32 %v6061_v3, %v5875_v26  ;;  %v6182_v48 = vadd.f32 %v5952_v59, %v1597_v12 }
 0x182   : > { %v2395_v56 = vsel %vm2103_vm1, %v2072_v6, 0.0  ;;  %v2013_v45 = vmul.f32 %v6079_v55, %v1878_v33  ;;  %v1600_v4 = vadd.f32 %v6061_v3, %v7731_v42  ;;  %v2014_v28 = vmul.f32 %v6079_v55, %v1879_v17  ;;  %v7732_v33 = vld [vmem:[#allocation14_spill] sm:$0xff] }
 0x183   : > { %v1883_v26 = vmax.f32 %v1755_v32, 0.0  ;;  %v2637_v11 = vadd.s32 4294967272, %v6128_v10  ;;  %v1598_v62 = vadd.f32 %v6061_v3, %v7732_v33  ;;  %v6200_v49 = vsub.s32 %v6128_v10, %v7730_v35  ;;  %v7734_v33 = vld [vmem:[#allocation17_spill] sm:$0xff] }
 0x184   : > { %v1822_v12 = vadd.f32 %v5952_v59, %v1603_v9  ;;  %v2623_v6 = vadd.s32 4294967288, %v6128_v10  ;;  %v2218_v17 = vsel %vm2103_vm1, %v2013_v45, 0.0  ;;  %v2012_v32 = vmul.f32 %v6079_v55, %v1877_v63 }
 0x185   : > { %2201 = vadd.xlane.f32.xlu0 %v2200_v23  ;;  %2204 = vadd.xlane.f32.xlu1 %v2203_v29  ;;  %v2404_v29 = vsel %vm2103_vm1, %v2075_v24, 0.0  ;;  %v2011_v24 = vmul.f32 %v6079_v55, %v1876_v8  ;;  %v6210_v42 = vadd.f32 %v5952_v59, %v1600_v4  ;;  %v1540_v9 = vadd.f32 %v6061_v3, %v7734_v33 }
 0x186   : > { %v1671_v39 = vcombine.high %v7735_v40, %v7735_v40  ;;  %v6218_v45 = vsub.s32 %v2637_v11, %v7730_v35  ;;  %v6221_v8 = vadd.f32 %v5952_v59, %v1598_v62  ;;  %v2078_v4 = vmul.f32 %v6079_v55, %v1943_v51 }
 0x187   : > { %v1950_v23 = vmax.f32 %v1822_v12, 0.0  ;;  %v6226_v33 = vsub.s32 %v2623_v6, %v7730_v35  ;;  %v2212_v40 = vsel %vm2103_vm1, %v2011_v24, 0.0  ;;  %v2215_v11 = vsel %vm2103_vm1, %v2012_v32, 0.0 }
 0x188   : > { %v6234_v51 = vadd.f32 %v5991_v44, %v1540_v9  ;;  %v6239_v12 = vrot.slane %v1671_v39, %v5489_v13  ;;  %v1619_v6 = vadd.f32 %v6061_v3, %v6033_v22  ;;  %v2413_v32 = vsel %vm2103_vm1, %v2078_v4, 0.0 }
 0x189   : > { %2402 = vadd.xlane.f32.xlu0 %v2401_v0  ;;  %2411 = vadd.xlane.f32.xlu1 %v2410_v16  ;;  %v1753_v0 = vadd.f32 %v5991_v44, %v1534_v30  ;;  %v2221_v30 = vsel %vm2103_vm1, %v2014_v28, 0.0 }
 0x18a   : > { %v6165_v7 = vpop.xlane.xlu0 %2303  ;;  %v6167_v36 = vpop.xlane.xlu1 %2111  ;;  %v6253_v22 = vadd.f32 %v6239_v12, %v1619_v6 }
 0x18b   : > { %v2634_v4 = vrot.slane %v6167_v36, %v6174_v31 }
 0x18d   : > { %2396 = vadd.xlane.f32.xlu0 %v2395_v56  ;;  %2405 = vadd.xlane.f32.xlu1 %v2404_v29  ;;  %v7733_v56 = vld [vmem:[#allocation16_spill] sm:$0xff] }
 0x18e   : > { %v2106_v18 = vpop.xlane.xlu0 %2105  ;;  %v6193_v16 = vpop.xlane.xlu1 %2114  ;;  %v1604_v29 = vadd.f32 %v6061_v3, %v7733_v56  ;;  %v1881_v56 = vmax.f32 %v1753_v0, 0.0 }
 0x18f   : > { %v2622_v9 = vrot.slane %v2106_v18, %v6200_v49  ;;  %v2641_v18 = vrot.slane %v6193_v16, %v6218_v45 }
 0x190   : > { %v6231_v62 = vadd.f32 %v5952_v59, %v1604_v29  ;;  %v2076_v29 = vmul.f32 %v6079_v55, %v1941_v50 }
 0x191   : > { %2219 = vadd.xlane.f32.xlu0 %v2218_v17  ;;  %2222 = vadd.xlane.f32.xlu1 %v2221_v30  ;;  %v2018_v17 = vmul.f32 %v6079_v55, %v1883_v26  ;;  %v7736_v26 = vld [vmem:[#allocation18_spill] sm:$0xff]  ;;  %v1620_v30 = vadd.f32 %v6061_v3, %v6047_v47  ;;  %v2977_v47 = vrot.slane %v6165_v7, %v6174_v31 }
 0x192   : > { %v2298_v63 = vpop.xlane.xlu0 %2297  ;;  %v2307_v28 = vpop.xlane.xlu1 %2306  ;;  %v1538_v0 = vadd.f32 %v6061_v3, %v7736_v26  ;;  %v2016_v26 = vmul.f32 %v6079_v55, %v1881_v56 }
 0x193   : > { %v2233_v59 = vsel %vm2103_vm1, %v2018_v17, 0.0  ;;  %v2968_v17 = vrot.slane %v2298_v63, %v6200_v49  ;;  %v6260_v50 = vadd.f32 %v6239_v12, %v1620_v30  ;;  %v2982_v36 = vrot.slane %v2307_v28, %v6218_v45 }
 0x194   : > { %v7737_v30 = vmax.f32 %v6154_v37, 0.0  ;;  %v2644_v28 = vadd.s32 4294967264, %v6128_v10  ;;  %v1618_v37 = vadd.f32 %v6061_v3, %v6052_v27 }
 0x195   : > { %2213 = vadd.xlane.f32.xlu0 %v2212_v40  ;;  %2216 = vadd.xlane.f32.xlu1 %v2215_v11 }
 0x196   : > { %v2109_v24 = vpop.xlane.xlu0 %2108  ;;  %v2301_v39 = vpop.xlane.xlu1 %2300  ;;  %v2017_v7 = vmul.f32 %v6079_v55, %v7737_v30  ;;  %v6301_v27 = vadd.f32 %v6239_v12, %v1618_v37  ;;  %v7739_v37 = vld [vmem:[#allocation15_spill] sm:$0xff] }
 0x197   : > { %v2627_v40 = vrot.slane %v2109_v24, %v6226_v33  ;;  %v2972_v34 = vrot.slane %v2301_v39, %v6226_v33 }
 0x199   : > { %v2629_v11 = vsel %vm2628_vm2, %v2627_v40, %v2622_v9  ;;  %2414 = vadd.xlane.f32.xlu0 %v2413_v32  ;;  %v2973_v63 = vsel %vm2628_vm2, %v2972_v34, %v2968_v17  ;;  %2234 = vadd.xlane.f32.xlu1 %v2233_v59  ;;  %v2085_v32 = vmul.f32 %v6079_v55, %v1950_v23  ;;  %v2407_v9 = vsel %vm2103_vm1, %v2076_v29, 0.0 }
 0x19a   : > { %v2636_v6 = vsel %vm2635_vm3, %v2634_v4, %v2629_v11  ;;  %v6271_v24 = vpop.xlane.xlu0 %2123  ;;  %v2978_v16 = vsel %vm2635_vm3, %v2977_v47, %v2973_v63  ;;  %v6277_v39 = vpop.xlane.xlu1 %2126  ;;  %v2651_v59 = vadd.s32 4294967256, %v6128_v10  ;;  %v1887_v4 = vmax.f32 %v6234_v51, 0.0 }
 0x19b   : > { %v2643_v56 = vsel %vm2642_vm4, %v2641_v18, %v2636_v6  ;;  %v6285_v40 = vsel %vm2642_vm4, %v2982_v36, %v2978_v16  ;;  %v6291_v17 = vadd.f32 %v5991_v44, %v1538_v0  ;;  %v2658_v23 = vadd.s32 4294967248, %v6128_v10 }
 0x19c   : > { %v2227_v34 = vsel %vm2103_vm1, %v2016_v26, 0.0  ;;  %v1944_v29 = vmax.f32 %v6182_v48, 0.0  ;;  %v1947_v47 = vmax.f32 %v6210_v42, 0.0  ;;  %v2665_v18 = vadd.s32 4294967240, %v6128_v10 }
 0x19d   : > { %2408 = vadd.xlane.f32.xlu0 %v2407_v9  ;;  %2228 = vadd.xlane.f32.xlu1 %v2227_v34  ;;  %v2434_v36 = vsel %vm2103_vm1, %v2085_v32, 0.0  ;;  %v6308_v26 = vsub.s32 %v2644_v28, %v7730_v35  ;;  %v1607_v48 = vadd.f32 %v6061_v3, %v5913_v25  ;;  %v1951_v63 = vmax.f32 %v6231_v62, 0.0 }
 0x19e   : > { %v6298_v11 = vpop.xlane.xlu0 %2315  ;;  %v6304_v0 = vpop.xlane.xlu1 %2318  ;;  %v2230_v6 = vsel %vm2103_vm1, %v2017_v7, 0.0  ;;  %v6315_v30 = vsub.s32 %v2651_v59, %v7730_v35  ;;  %v7738_v16 = vmax.f32 %v6171_v14, 0.0  ;;  %v1539_v32 = vadd.f32 %v6061_v3, %v7739_v37  ;;  %v7741_v37 = vld [vmem:[#allocation10_spill] sm:$0xff] }
 0x19f   : > { %v1885_v28 = vmax.f32 %v6291_v17, 0.0  ;;  %v6324_v34 = vsub.s32 %v2658_v23, %v7730_v35  ;;  %v2022_v25 = vmul.f32 %v6079_v55, %v1887_v4  ;;  %v6328_v62 = vsub.s32 %v2665_v18, %v7730_v35 }
 0x1a0   : > { %v2081_v9 = vmul.f32 %v6079_v55, %v7738_v16  ;;  %v1605_v14 = vadd.f32 %v6061_v3, %v5921_v43  ;;  %v7740_v59 = vmax.f32 %v6161_v15, 0.0  ;;  %v1826_v4 = vadd.f32 %v6239_v12, %v1607_v48 }
 0x1a1   : > { %2231 = vadd.xlane.f32.xlu0 %v2230_v6  ;;  %2435 = vadd.xlane.f32.xlu1 %v2434_v36  ;;  %v2086_v6 = vmul.f32 %v6079_v55, %v1951_v63  ;;  %v1670_v43 = vcombine.high %v7741_v37, %v7741_v37  ;;  %v2662_v15 = vrot.slane %v6271_v24, %v6324_v34 }
 0x1a2   : > { %v2118_v7 = vpop.xlane.xlu0 %2117  ;;  %v2015_v16 = vmul.f32 %v6079_v55, %v7740_v59  ;;  %v2121_v23 = vpop.xlane.xlu1 %2120  ;;  %v2422_v36 = vsel %vm2103_vm1, %v2081_v9, 0.0  ;;  %v2669_v48 = vrot.slane %v6277_v39, %v6328_v62  ;;  %v1824_v9 = vadd.f32 %v6239_v12, %v1605_v14 }
 0x1a3   : > { %v2648_v17 = vrot.slane %v2118_v7, %v6308_v26  ;;  %v2655_v18 = vrot.slane %v2121_v23, %v6315_v30  ;;  %v2245_v7 = vsel %vm2103_vm1, %v2022_v25, 0.0  ;;  %v1954_v24 = vmax.f32 %v1826_v4, 0.0 }
 0x1a4   : > { %v2224_v37 = vsel %vm2103_vm1, %v2015_v16, 0.0  ;;  %v1544_v25 = vadd.f32 %v6061_v3, %v5930_v57  ;;  %v6357_v39 = vrot.slane %v1670_v43, %v5489_v13  ;;  %v2079_v14 = vmul.f32 %v6079_v55, %v1944_v29 }
 0x1a5   : > { %v2650_v59 = vsel %vm2649_vm5, %v2648_v17, %v2643_v56  ;;  %2423 = vadd.xlane.f32.xlu0 %v2422_v36  ;;  %2246 = vadd.xlane.f32.xlu1 %v2245_v7  ;;  %v2997_v16 = vrot.slane %v6298_v11, %v6324_v34  ;;  %v2020_v57 = vmul.f32 %v6079_v55, %v1885_v28 }
 0x1a6   : > { %v2657_v23 = vsel %vm2656_vm6, %v2655_v18, %v2650_v59  ;;  %v2310_v63 = vpop.xlane.xlu0 %2309  ;;  %v2313_v17 = vpop.xlane.xlu1 %2312  ;;  %v1758_v59 = vadd.f32 %v5991_v44, %v1539_v32  ;;  %v3002_v43 = vrot.slane %v6304_v0, %v6328_v62  ;;  %v1542_v11 = vadd.f32 %v6061_v3, %v5934_v1 }
 0x1a7   : > { %v2664_v51 = vsel %vm2663_vm7, %v2662_v15, %v2657_v23  ;;  %v2987_v56 = vrot.slane %v2310_v63, %v6308_v26  ;;  %v2992_v36 = vrot.slane %v2313_v17, %v6315_v30  ;;  %v2437_v15 = vsel %vm2103_vm1, %v2086_v6, 0.0 }
 0x1a8   : > { %v2671_v18 = vsel %vm2670_vm8, %v2669_v48, %v2664_v51  ;;  %v2679_v6 = vadd.s32 4294967224, %v6128_v10  ;;  %v2089_v28 = vmul.f32 %v6079_v55, %v1954_v24  ;;  %v2672_v44 = vadd.s32 4294967232, %v6128_v10 }
 0x1a9   : > { %v2988_v4 = vsel %vm2649_vm5, %v2987_v56, %v6285_v40  ;;  %2225 = vadd.xlane.f32.xlu0 %v2224_v37  ;;  %2438 = vadd.xlane.f32.xlu1 %v2437_v15  ;;  %v1763_v0 = vadd.f32 %v6357_v39, %v1544_v25  ;;  %v2416_v32 = vsel %vm2103_vm1, %v2079_v14, 0.0  ;;  %v2082_v48 = vmul.f32 %v6079_v55, %v1947_v47 }
 0x1aa   : > { %v2993_v29 = vsel %vm2656_vm6, %v2992_v36, %v2988_v4  ;;  %v6371_v51 = vpop.xlane.xlu0 %2135  ;;  %v6376_v7 = vpop.xlane.xlu1 %2138  ;;  %v1952_v23 = vmax.f32 %v1824_v9, 0.0  ;;  %v2686_v63 = vadd.s32 4294967216, %v6128_v10  ;;  %v2239_v37 = vsel %vm2103_vm1, %v2020_v57, 0.0 }
 0x1ab   : > { %v2998_v40 = vsel %vm2663_vm7, %v2997_v16, %v2993_v29  ;;  %v2693_v24 = vadd.s32 4294967208, %v6128_v10  ;;  %v1761_v56 = vadd.f32 %v6357_v39, %v1542_v11  ;;  %v1886_v25 = vmax.f32 %v1758_v59, 0.0 }
 0x1ac   : > { %v3003_v1 = vsel %vm2670_vm8, %v3002_v43, %v2998_v40  ;;  %v2446_v42 = vsel %vm2103_vm1, %v2089_v28, 0.0  ;;  %v6395_v47 = vsub.s32 %v2672_v44, %v7730_v35  ;;  %v1611_v9 = vadd.f32 %v6061_v3, %v5954_v61 }
 0x1ad   : > { %2417 = vadd.xlane.f32.xlu0 %v2416_v32  ;;  %2240 = vadd.xlane.f32.xlu1 %v2239_v37  ;;  %v1891_v14 = vmax.f32 %v1763_v0, 0.0  ;;  %v6400_v16 = vsub.s32 %v2679_v6, %v7730_v35  ;;  %v2425_v4 = vsel %vm2103_vm1, %v2082_v48, 0.0  ;;  %v7742_v15 = vmax.f32 %v6221_v8, 0.0 }
 0x1ae   : > { %v6391_v17 = vpop.xlane.xlu0 %2327  ;;  %v2133_v36 = vpop.xlane.xlu1 %2132  ;;  %v1948_v59 = vmax.f32 %v5982_v60, 0.0  ;;  %v1884_v43 = vmax.f32 %v6005_v52, 0.0  ;;  %v6409_v29 = vsub.s32 %v2686_v63, %v7730_v35  ;;  %v2087_v61 = vmul.f32 %v6079_v55, %v1952_v23 }
 0x1af   : > { %v2080_v57 = vmul.f32 %v6079_v55, %v7742_v15  ;;  %v6413_v11 = vsub.s32 %v2693_v24, %v7730_v35  ;;  %v1889_v40 = vmax.f32 %v1761_v56, 0.0  ;;  %v1609_v8 = vadd.f32 %v6061_v3, %v5961_v19  ;;  %v7743_v24 = vld [vmem:[#allocation19_spill] sm:$0xff] }
 0x1b0   : > { %v1830_v28 = vadd.f32 %v6239_v12, %v1611_v9  ;;  %v2021_v44 = vmul.f32 %v6079_v55, %v1886_v25  ;;  %v2683_v0 = vrot.slane %v2133_v36, %v6400_v16  ;;  %v2026_v48 = vmul.f32 %v6079_v55, %v1891_v14 }
 0x1b1   : > { %2426 = vadd.xlane.f32.xlu0 %v2425_v4  ;;  %2447 = vadd.xlane.f32.xlu1 %v2446_v42  ;;  %v2419_v32 = vsel %vm2103_vm1, %v2080_v57, 0.0  ;;  %v2690_v23 = vrot.slane %v6371_v51, %v6409_v29  ;;  %v2440_v63 = vsel %vm2103_vm1, %v2087_v61, 0.0  ;;  %v2697_v37 = vrot.slane %v6376_v7, %v6413_v11 }
 0x1b2   : > { %v2130_v6 = vpop.xlane.xlu0 %2129  ;;  %v2325_v52 = vpop.xlane.xlu1 %2324  ;;  %v1543_v56 = vadd.f32 %v6061_v3, %v7743_v24  ;;  %v1828_v36 = vadd.f32 %v6239_v12, %v1609_v8  ;;  %v1958_v9 = vmax.f32 %v1830_v28, 0.0  ;;  %v2242_v14 = vsel %vm2103_vm1, %v2021_v44, 0.0  ;;  %v7744_v44 = vld [vmem:[#allocation21_spill] sm:$0xff] }
 0x1b3   : > { %v2676_v60 = vrot.slane %v2130_v6, %v6395_v47  ;;  %v3012_v7 = vrot.slane %v2325_v52, %v6400_v16  ;;  %v2257_v15 = vsel %vm2103_vm1, %v2026_v48, 0.0  ;;  %v2019_v57 = vmul.f32 %v6079_v55, %v1884_v43 }
 0x1b4   : > { %v3017_v6 = vrot.slane %v6391_v17, %v6409_v29  ;;  %v2024_v28 = vmul.f32 %v6079_v55, %v1889_v40  ;;  %v1608_v52 = vadd.f32 %v6061_v3, %v7744_v44  ;;  %v1762_v17 = vadd.f32 %v6357_v39, %v1543_v56 }
 0x1b5   : > { %v2678_v19 = vsel %vm2677_vm9, %v2676_v60, %v2671_v18  ;;  %2420 = vadd.xlane.f32.xlu0 %v2419_v32  ;;  %2441 = vadd.xlane.f32.xlu1 %v2440_v63  ;;  %v1548_v60 = vadd.f32 %v6061_v3, %v5973_v5  ;;  %v2093_v5 = vmul.f32 %v6079_v55, %v1958_v9  ;;  %v1949_v40 = vmax.f32 %v6013_v53, 0.0  ;;  %v7746_v53 = vld [vmem:[#allocation22_spill] sm:$0xff] }
 0x1b6   : > { %v2685_v25 = vsel %vm2684_vm10, %v2683_v0, %v2678_v19  ;;  %v2322_v42 = vpop.xlane.xlu0 %2321  ;;  %v6434_v18 = vpop.xlane.xlu1 %2150  ;;  %v7745_v0 = vld [vmem:[#allocation20_spill] sm:$0xff]  ;;  %v1612_v63 = vadd.f32 %v6061_v3, %v5971_v2  ;;  %v2083_v24 = vmul.f32 %v6079_v55, %v1948_v59  ;;  %v6472_v9 = vadd.f32 %v6239_v12, %v1608_v52 }
 0x1b7   : > { %v3007_v51 = vrot.slane %v2322_v42, %v6395_v47  ;;  %v2692_v4 = vsel %vm2691_vm11, %v2690_v23, %v2685_v25  ;;  %v1541_v43 = vadd.f32 %v6061_v3, %v7745_v0  ;;  %v1956_v25 = vmax.f32 %v1828_v36, 0.0 }
 0x1b8   : > { %v6442_v61 = vsel %vm2698_vm12, %v2697_v37, %v2692_v4  ;;  %v2236_v37 = vsel %vm2103_vm1, %v2019_v57, 0.0  ;;  %v1767_v42 = vadd.f32 %v6357_v39, %v1548_v60  ;;  %v1546_v2 = vadd.f32 %v6061_v3, %v5979_v20 }
 0x1b9   : > { %v3008_v8 = vsel %vm2677_vm9, %v3007_v51, %v3003_v1  ;;  %2243 = vadd.xlane.f32.xlu0 %v2242_v14  ;;  %2258 = vadd.xlane.f32.xlu1 %v2257_v15  ;;  %v2251_v51 = vsel %vm2103_vm1, %v2024_v28, 0.0  ;;  %v1606_v14 = vadd.f32 %v6061_v3, %v7746_v53  ;;  %v1890_v36 = vmax.f32 %v1762_v17, 0.0 }
 0x1ba   : > { %v3013_v32 = vsel %vm2684_vm10, %v3012_v7, %v3008_v8  ;;  %v2331_v48 = vpop.xlane.xlu0 %2330  ;;  %v6458_v19 = vpop.xlane.xlu1 %2144  ;;  %v1760_v4 = vadd.f32 %v6357_v39, %v1541_v43  ;;  %v2458_v15 = vsel %vm2103_vm1, %v2093_v5, 0.0  ;;  %v2700_v57 = vadd.s32 4294967200, %v6128_v10 }
 0x1bb   : > { %v3018_v1 = vsel %vm2691_vm11, %v3017_v6, %v3013_v32  ;;  %v3022_v23 = vrot.slane %v2331_v48, %v6413_v11  ;;  %v2721_v6 = vadd.s32 4294967176, %v6128_v10  ;;  %v2707_v8 = vadd.s32 4294967192, %v6128_v10 }
 0x1bc   : > { %v2428_v60 = vsel %vm2103_vm1, %v2083_v24, 0.0  ;;  %v2084_v28 = vmul.f32 %v6079_v55, %v1949_v40  ;;  %v1831_v20 = vadd.f32 %v6239_v12, %v1612_v63  ;;  %v1895_v44 = vmax.f32 %v1767_v42, 0.0 }
 0x1bd   : > { %v6467_v56 = vsel %vm2698_vm12, %v3022_v23, %v3018_v1  ;;  %2237 = vadd.xlane.f32.xlu0 %v2236_v37  ;;  %2252 = vadd.xlane.f32.xlu1 %v2251_v51  ;;  %v2714_v52 = vadd.s32 4294967184, %v6128_v10  ;;  %v2091_v0 = vmul.f32 %v6079_v55, %v1956_v25  ;;  %v6491_v43 = vadd.f32 %v6239_v12, %v1606_v14 }
 0x1be   : > { %v2148_v59 = vpop.xlane.xlu0 %2147  ;;  %v6479_v7 = vpop.xlane.xlu1 %2162  ;;  %v1765_v32 = vadd.f32 %v6357_v39, %v1546_v2  ;;  %v1955_v17 = vmax.f32 %v6472_v9, 0.0  ;;  %v1888_v1 = vmax.f32 %v1760_v4, 0.0  ;;  %v6500_v5 = vsub.s32 %v2700_v57, %v7730_v35 }
 0x1bf   : > { %v1615_v40 = vadd.f32 %v6061_v3, %v5998_v46  ;;  %v6505_v63 = vsub.s32 %v2721_v6, %v7730_v35  ;;  %v6508_v37 = vsub.s32 %v2707_v8, %v7730_v35  ;;  %v2431_v24 = vsel %vm2103_vm1, %v2084_v28, 0.0  ;;  %v7750_v46 = vld [vmem:[#allocation23_spill] sm:$0xff] }
 0x1c0   : > { %7747 = vst [vmem:[#allocation12_spill] sm:$0xff] %v6500_v5  ;;  %v2025_v25 = vmul.f32 %v6079_v55, %v1890_v36  ;;  %v1959_v42 = vmax.f32 %v1831_v20, 0.0  ;;  %v6513_v51 = vsub.s32 %v2714_v52, %v7730_v35  ;;  %v2452_v9 = vsel %vm2103_vm1, %v2091_v0, 0.0 }
 0x1c1   : > { %2429 = vadd.xlane.f32.xlu0 %v2428_v60  ;;  %2459 = vadd.xlane.f32.xlu1 %v2458_v15  ;;  %7748 = vst [vmem:[#allocation13_spill] sm:$0xff] %v6508_v37  ;;  %v2030_v53 = vmul.f32 %v6079_v55, %v1895_v44  ;;  %v1547_v14 = vadd.f32 %v6061_v3, %v7750_v46  ;;  %v1893_v2 = vmax.f32 %v1765_v32, 0.0  ;;  %v7751_v32 = vld [vmem:[#allocation24_spill] sm:$0xff] }
 0x1c2   : > { %v6494_v48 = vpop.xlane.xlu0 %2339  ;;  %v6497_v23 = vpop.xlane.xlu1 %2354  ;;  %7749 = vst [vmem:[#allocation14_spill] sm:$0xff] %v6513_v51  ;;  %v1834_v57 = vadd.f32 %v6239_v12, %v1615_v40  ;;  %v2711_v6 = vrot.slane %v6458_v19, %v6508_v37  ;;  %v1613_v8 = vadd.f32 %v6061_v3, %v6007_v38  ;;  %v2254_v60 = vsel %vm2103_vm1, %v2025_v25, 0.0 }
 0x1c3   : > { %v2023_v28 = vmul.f32 %v6079_v55, %v1888_v1  ;;  %v2718_v20 = vrot.slane %v2148_v59, %v6513_v51  ;;  %v2269_v52 = vsel %vm2103_vm1, %v2030_v53, 0.0  ;;  %v2094_v0 = vmul.f32 %v6079_v55, %v1959_v42 }
 0x1c4   : > { %v2725_v19 = vrot.slane %v6434_v18, %v6505_v63  ;;  %v1545_v38 = vadd.f32 %v6061_v3, %v7751_v32  ;;  %v1953_v59 = vmax.f32 %v6491_v43, 0.0  ;;  %v2090_v53 = vmul.f32 %v6079_v55, %v1955_v17 }
 0x1c5   : > { %2432 = vadd.xlane.f32.xlu0 %v2431_v24  ;;  %2453 = vadd.xlane.f32.xlu1 %v2452_v9  ;;  %v1766_v9 = vadd.f32 %v6357_v39, %v1547_v14  ;;  %v2248_v18 = vsel %vm2103_vm1, %v2023_v28, 0.0  ;;  %v1832_v46 = vadd.f32 %v6239_v12, %v1613_v8  ;;  %v1552_v43 = vadd.f32 %v6061_v3, %v6017_v41 }
 0x1c6   : > { %v2142_v4 = vpop.xlane.xlu0 %2141  ;;  %v6520_v15 = vpop.xlane.xlu1 %2156  ;;  %v1616_v17 = vadd.f32 %v6061_v3, %v6015_v54 }
 0x1c7   : > { %v2704_v36 = vrot.slane %v2142_v4, %v6500_v5  ;;  %v2461_v4 = vsel %vm2103_vm1, %v2094_v0, 0.0  ;;  %v1771_v0 = vadd.f32 %v6357_v39, %v1552_v43 }
 0x1c9   : > { %v2706_v44 = vsel %vm2705_vm13, %v2704_v36, %v6442_v61  ;;  %2255 = vadd.xlane.f32.xlu0 %v2254_v60  ;;  %2270 = vadd.xlane.f32.xlu1 %v2269_v52  ;;  %v1962_v61 = vmax.f32 %v1834_v57, 0.0  ;;  %v2028_v36 = vmul.f32 %v6079_v55, %v1893_v2  ;;  %v7752_v57 = vld [vmem:[#allocation25_spill] sm:$0xff]  ;;  %v2449_v2 = vsel %vm2103_vm1, %v2090_v53, 0.0 }
 0x1ca   : > { %v2713_v40 = vsel %vm2712_vm14, %v2711_v6, %v2706_v44  ;;  %v2334_v1 = vpop.xlane.xlu0 %2333  ;;  %v6541_v25 = vpop.xlane.xlu1 %2348  ;;  %v1610_v14 = vadd.f32 %v6061_v3, %v7752_v57  ;;  %v1764_v6 = vadd.f32 %v6357_v39, %v1545_v38  ;;  %v2088_v44 = vmul.f32 %v6079_v55, %v1953_v59 }
 0x1cb   : > { %v2720_v24 = vsel %vm2719_vm15, %v2718_v20, %v2713_v40  ;;  %v2097_v28 = vmul.f32 %v6079_v55, %v1962_v61  ;;  %v1894_v20 = vmax.f32 %v1766_v9, 0.0  ;;  %v3027_v41 = vrot.slane %v2334_v1, %v6500_v5 }
 0x1cc   : > { %v6545_v42 = vsel %vm2726_vm0, %v2725_v19, %v2720_v24  ;;  %v1960_v52 = vmax.f32 %v1832_v46, 0.0  ;;  %v2263_v19 = vsel %vm2103_vm1, %v2028_v36, 0.0  ;;  %v1829_v32 = vadd.f32 %v6239_v12, %v1610_v14  ;;  %v7754_v14 = vld [vmem:[#allocation27_spill] sm:$0xff] }
 0x1cd   : > { %2249 = vadd.xlane.f32.xlu0 %v2248_v18  ;;  %2462 = vadd.xlane.f32.xlu1 %v2461_v4  ;;  %v1892_v54 = vmax.f32 %v1764_v6, 0.0  ;;  %v1835_v40 = vadd.f32 %v6239_v12, %v1616_v17  ;;  %v1551_v1 = vadd.f32 %v6061_v3, %v6000_v58  ;;  %v2470_v59 = vsel %vm2103_vm1, %v2097_v28, 0.0 }
 0x1ce   : > { %v6557_v60 = vpop.xlane.xlu0 %2342  ;;  %v6561_v8 = vpop.xlane.xlu1 %2363  ;;  %v3037_v9 = vrot.slane %v6494_v48, %v6513_v51  ;;  %v3028_v18 = vsel %vm2705_vm13, %v3027_v41, %v6467_v56  ;;  %v2443_v53 = vsel %vm2103_vm1, %v2088_v44, 0.0  ;;  %v2029_v46 = vmul.f32 %v6079_v55, %v1894_v20 }
 0x1cf   : > { %v1899_v4 = vmax.f32 %v1771_v0, 0.0  ;;  %v1550_v58 = vadd.f32 %v6061_v3, %v6021_v21  ;;  %v2095_v36 = vmul.f32 %v6079_v55, %v1960_v52  ;;  %v1957_v56 = vmax.f32 %v1829_v32, 0.0  ;;  %v7755_v21 = vld [vmem:[#allocation26_spill] sm:$0xff] }
 0x1d0   : > { %v1614_v6 = vadd.f32 %v6061_v3, %v7754_v14  ;;  %v1770_v28 = vadd.f32 %v6357_v39, %v1551_v1  ;;  %v1549_v20 = vadd.f32 %v6061_v3, %v7755_v21  ;;  %v2266_v41 = vsel %vm2103_vm1, %v2029_v46, 0.0 }
 0x1d1   : > { %2450 = vadd.xlane.f32.xlu0 %v2449_v2  ;;  %2264 = vadd.xlane.f32.xlu1 %v2263_v19  ;;  %v2027_v2 = vmul.f32 %v6079_v55, %v1892_v54  ;;  %v1963_v44 = vmax.f32 %v1835_v40, 0.0  ;;  %v1769_v52 = vadd.f32 %v6357_v39, %v1550_v58  ;;  %v2464_v0 = vsel %vm2103_vm1, %v2095_v36, 0.0 }
 0x1d2   : > { %v2337_v38 = vpop.xlane.xlu0 %2336  ;;  %v6574_v61 = vpop.xlane.xlu1 %2357  ;;  %v2034_v19 = vmul.f32 %v6079_v55, %v1899_v4  ;;  %v1898_v54 = vmax.f32 %v1770_v28, 0.0  ;;  %v1768_v40 = vadd.f32 %v6357_v39, %v1549_v20  ;;  %v1833_v46 = vadd.f32 %v6239_v12, %v1614_v6 }
 0x1d3   : > { %v3032_v24 = vrot.slane %v2337_v38, %v6508_v37  ;;  %v7756_v38 = vld [vmem:[#allocation28_spill] sm:$0xff]  ;;  %v1897_v4 = vmax.f32 %v1769_v52, 0.0 }
 0x1d4   : > { %v1555_v1 = vadd.f32 %v6061_v3, %v7756_v38  ;;  %v2281_v58 = vsel %vm2103_vm1, %v2034_v19, 0.0  ;;  %v1896_v20 = vmax.f32 %v1768_v40, 0.0  ;;  %v1961_v52 = vmax.f32 %v1833_v46, 0.0  ;;  %v7760_v46 = vld [vmem:[#allocation32_spill] sm:$0xff] }
 0x1d5   : > { %v3033_v43 = vsel %vm2712_vm14, %v3032_v24, %v3028_v18  ;;  %2444 = vadd.xlane.f32.xlu0 %v2443_v53  ;;  %2471 = vadd.xlane.f32.xlu1 %v2470_v59  ;;  %v7757_v59 = vld [vmem:[#allocation29_spill] sm:$0xff]  ;;  %v2260_v18 = vsel %vm2103_vm1, %v2027_v2, 0.0  ;;  %v2092_v53 = vmul.f32 %v6079_v55, %v1957_v56  ;;  %v7758_v56 = vld [vmem:[#allocation30_spill] sm:$0xff]  ;;  %v2033_v2 = vmul.f32 %v6079_v55, %v1898_v54 }
 0x1d6   : > { %v6588_v57 = vsel %vm2719_vm15, %v3037_v9, %v3033_v43  ;;  %v6590_v48 = vpop.xlane.xlu0 %2159  ;;  %v6594_v17 = vpop.xlane.xlu1 %2174  ;;  %v1617_v9 = vadd.f32 %v6061_v3, %v7757_v59  ;;  %v2098_v43 = vmul.f32 %v6079_v55, %v1963_v44  ;;  %v1774_v14 = vadd.f32 %v6357_v39, %v1555_v1 }
 0x1d7   : > { %7753 = vst [vmem:[#allocation16_spill] sm:$0xff] %v6588_v57  ;;  %v1553_v6 = vadd.f32 %v6061_v3, %v7758_v56  ;;  %v2032_v38 = vmul.f32 %v6079_v55, %v1897_v4  ;;  %v2278_v54 = vsel %vm2103_vm1, %v2033_v2, 0.0 }
 0x1d8   : > { %v1836_v28 = vadd.f32 %v6239_v12, %v1617_v9  ;;  %v2473_v44 = vsel %vm2103_vm1, %v2098_v43, 0.0  ;;  %v1902_v1 = vmax.f32 %v1774_v14, 0.0  ;;  %v2096_v43 = vmul.f32 %v6079_v55, %v1961_v52 }
 0x1d9   : > { %2267 = vadd.xlane.f32.xlu0 %v2266_v41  ;;  %2465 = vadd.xlane.f32.xlu1 %v2464_v0  ;;  %v2455_v41 = vsel %vm2103_vm1, %v2092_v53, 0.0  ;;  %v7759_v0 = vld [vmem:[#allocation31_spill] sm:$0xff]  ;;  %v1772_v40 = vadd.f32 %v6357_v39, %v1553_v6  ;;  %v2275_v4 = vsel %vm2103_vm1, %v2032_v38, 0.0  ;;  %v2735_v52 = vrot.slane %v6520_v15, %v6226_v33 }
 0x1da   : > { %v6604_v32 = vpop.xlane.xlu0 %2351  ;;  %v6608_v24 = vpop.xlane.xlu1 %2168  ;;  %v1556_v19 = vadd.f32 %v6061_v3, %v7759_v0  ;;  %v1964_v59 = vmax.f32 %v1836_v28, 0.0  ;;  %v2037_v28 = vmul.f32 %v6079_v55, %v1902_v1  ;;  %v2467_v0 = vsel %vm2103_vm1, %v2096_v43, 0.0 }
 0x1db   : > { %v1900_v6 = vmax.f32 %v1772_v40, 0.0  ;;  %v2740_v15 = vrot.slane %v6590_v48, %v6174_v31  ;;  %v1966_v43 = vmax.f32 %v6253_v22, 0.0  ;;  %v1967_v48 = vmax.f32 %v6260_v50, 0.0 }
 0x1dc   : > { %v1775_v53 = vadd.f32 %v6357_v39, %v1556_v19  ;;  %v2099_v56 = vmul.f32 %v6079_v55, %v1964_v59  ;;  %v2290_v38 = vsel %vm2103_vm1, %v2037_v28, 0.0  ;;  %v1965_v59 = vmax.f32 %v6301_v27, 0.0 }
 0x1dd   : > { %2261 = vadd.xlane.f32.xlu0 %v2260_v18  ;;  %2282 = vadd.xlane.f32.xlu1 %v2281_v58  ;;  %v2031_v18 = vmul.f32 %v6079_v55, %v1896_v20  ;;  %v1554_v58 = vadd.f32 %v6061_v3, %v7760_v46  ;;  %v2745_v27 = vrot.slane %v6479_v7, %v6218_v45 }
 0x1de   : > { %v2154_v36 = vpop.xlane.xlu0 %2153  ;;  %v6619_v21 = vpop.xlane.xlu1 %2375  ;;  %v2476_v55 = vsel %vm2103_vm1, %v2099_v56, 0.0  ;;  %v2755_v22 = vrot.slane %v6608_v24, %v6315_v30 }
 0x1df   : > { %v2731_v20 = vrot.slane %v2154_v36, %v6200_v49  ;;  %v2272_v2 = vsel %vm2103_vm1, %v2031_v18, 0.0  ;;  %v1773_v3 = vadd.f32 %v6357_v39, %v1554_v58  ;;  %v5080_v39 = vld [vmem:[%s7682_s4] ss:$0 sm:$0xff] }
 0x1e0   : > { %v2035_v40 = vmul.f32 %v5080_v39, %v1900_v6  ;;  %v2100_v56 = vmul.f32 %v5080_v39, %v1965_v59 }
 0x1e1   : > { %2456 = vadd.xlane.f32.xlu0 %v2455_v41  ;;  %2474 = vadd.xlane.f32.xlu1 %v2473_v44  ;;  %v1903_v44 = vmax.f32 %v1775_v53, 0.0  ;;  %v2736_v36 = vsel %vm2628_vm2, %v2735_v52, %v2731_v20  ;;  %v2101_v52 = vmul.f32 %v5080_v39, %v1966_v43 }
 0x1e2   : > { %v6630_v12 = vpop.xlane.xlu0 %2345  ;;  %v6632_v9 = vpop.xlane.xlu1 %2369  ;;  %v2741_v46 = vsel %vm2635_vm3, %v2740_v15, %v2736_v36  ;;  %v2284_v28 = vsel %vm2103_vm1, %v2035_v40, 0.0  ;;  %v2479_v7 = vsel %vm2103_vm1, %v2100_v56, 0.0 }
 0x1e3   : > { %v2038_v18 = vmul.f32 %v5080_v39, %v1903_v44  ;;  %v2482_v40 = vsel %vm2103_vm1, %v2101_v52, 0.0 }
 0x1e5   : > { %2279 = vadd.xlane.f32.xlu0 %v2278_v54  ;;  %2276 = vadd.xlane.f32.xlu1 %v2275_v4  ;;  %v1901_v54 = vmax.f32 %v1773_v3, 0.0  ;;  %v2293_v20 = vsel %vm2103_vm1, %v2038_v18, 0.0 }
 0x1e6   : > { %v2172_v14 = vpop.xlane.xlu0 %2171  ;;  %v6643_v41 = vpop.xlane.xlu1 %2186 }
 0x1e7   : > { %v2036_v6 = vmul.f32 %v5080_v39, %v1901_v54  ;;  %v2760_v36 = vrot.slane %v2172_v14, %v6324_v34  ;;  %v2765_v54 = vrot.slane %v6594_v17, %v6328_v62 }
 0x1e9   : > { %2273 = vadd.xlane.f32.xlu0 %v2272_v2  ;;  %2468 = vadd.xlane.f32.xlu1 %v2467_v0  ;;  %v2746_v2 = vsel %vm2642_vm4, %v2745_v27, %v2741_v46  ;;  %v2287_v50 = vsel %vm2103_vm1, %v2036_v6, 0.0 }
 0x1ea   : > { %v2166_v19 = vpop.xlane.xlu0 %2165  ;;  %v6653_v1 = vpop.xlane.xlu1 %2378 }
 0x1eb   : > { %v2750_v58 = vrot.slane %v2166_v19, %v6308_v26  ;;  %v2102_v19 = vmul.f32 %v5080_v39, %v1967_v48 }
 0x1ed   : > { %2291 = vadd.xlane.f32.xlu0 %v2290_v38  ;;  %2477 = vadd.xlane.f32.xlu1 %v2476_v55  ;;  %v2751_v3 = vsel %vm2649_vm5, %v2750_v58, %v2746_v2  ;;  %v2485_v24 = vsel %vm2103_vm1, %v2102_v19, 0.0  ;;  %vm3281_vm1 = vcmask 1041409  }
 0x1ee   : > { %v6663_v53 = vpop.xlane.xlu0 %2366  ;;  %v2181_v4 = vpop.xlane.xlu1 %2180  ;;  %v2756_v38 = vsel %vm2656_vm6, %v2755_v22, %v2751_v3 }
 0x1ef   : > { %v2761_v15 = vsel %vm2663_vm7, %v2760_v36, %v2756_v38  ;;  %v2775_v14 = vrot.slane %v2181_v4, %v6400_v16 }
 0x1f0   : > { %v2766_v58 = vsel %vm2670_vm8, %v2765_v54, %v2761_v15 }
 0x1f1   : > { %2285 = vadd.xlane.f32.xlu0 %v2284_v28  ;;  %2294 = vadd.xlane.f32.xlu1 %v2293_v20  ;;  %v2785_v20 = vrot.slane %v6643_v41, %v6413_v11 }
 0x1f2   : > { %v6674_v44 = vpop.xlane.xlu0 %2360  ;;  %v6677_v0 = vpop.xlane.xlu1 %2372 }
 0x1f5   : > { %2480 = vadd.xlane.f32.xlu0 %v2479_v7  ;;  %2288 = vadd.xlane.f32.xlu1 %v2287_v50 }
 0x1f6   : > { %v2184_v55 = vpop.xlane.xlu0 %2183  ;;  %v6685_v59 = vpop.xlane.xlu1 %2387 }
 0x1f7   : > { %7761 = vst [vmem:[#allocation17_spill] sm:$0xff] %v6685_v59  ;;  %v2780_v56 = vrot.slane %v2184_v55, %v6409_v29 }
 0x1f9   : > { %2483 = vadd.xlane.f32.xlu0 %v2482_v40  ;;  %2486 = vadd.xlane.f32.xlu1 %v2485_v24 }
 0x1fa   : > { %v2178_v39 = vpop.xlane.xlu0 %2177  ;;  %v6693_v46 = vpop.xlane.xlu1 %2381 }
 0x1fb   : > { %v2770_v18 = vrot.slane %v2178_v39, %v6395_v47  ;;  %7762 = vst [vmem:[#allocation11_spill] sm:$0xff] %v6693_v46 }
 0x1fd   : > { %v2771_v27 = vsel %vm2677_vm9, %v2770_v18, %v2766_v58 }
 0x1fe   : > { %v2776_v43 = vsel %vm2684_vm10, %v2775_v14, %v2771_v27  ;;  %v2196_v28 = vpop.xlane.xlu0 %2195  ;;  %v2199_v48 = vpop.xlane.xlu1 %2198 }
 0x1ff   : > { %v2781_v17 = vsel %vm2691_vm11, %v2780_v56, %v2776_v43  ;;  %v2800_v7 = vrot.slane %v2196_v28, %v6513_v51  ;;  %v2805_v50 = vrot.slane %v2199_v48, %v6505_v63 }
 0x200   : > { %v2786_v4 = vsel %vm2698_vm12, %v2785_v20, %v2781_v17 }
 0x202   : > { %v2190_v6 = vpop.xlane.xlu0 %2189  ;;  %v2193_v3 = vpop.xlane.xlu1 %2192 }
 0x203   : > { %v2790_v2 = vrot.slane %v2190_v6, %v6500_v5  ;;  %v2795_v22 = vrot.slane %v2193_v3, %v6508_v37 }
 0x205   : > { %v2791_v52 = vsel %vm2705_vm13, %v2790_v2, %v2786_v4 }
 0x206   : > { %v2796_v19 = vsel %vm2712_vm14, %v2795_v22, %v2791_v52  ;;  %v6710_v38 = vpop.xlane.xlu0 %2390  ;;  %v6713_v55 = vpop.xlane.xlu1 %2384 }
 0x207   : > { %7763 = vst [vmem:[#allocation18_spill] sm:$0xff] %v6710_v38  ;;  %v2801_v41 = vsel %vm2719_vm15, %v2800_v7, %v2796_v19  ;;  %7764 = vst [vmem:[#allocation15_spill] sm:$0xff] %v6713_v55 }
 0x208   : > { %v2806_v36 = vsel %vm2726_vm0, %v2805_v50, %v2801_v41 }
 0x209   : > { %v6718_v40 = vsel %vm3281_vm1, %v2806_v36, %v6545_v42 }
 0x20a   : > { %7765 = vst [vmem:[#allocation10_spill] sm:$0xff] %v6718_v40  ;;  %v2208_v24 = vpop.xlane.xlu0 %2207  ;;  %v6720_v15 = vpop.xlane.xlu1 %2393 }
 0x20e   : > { %v6722_v54 = vpop.xlane.xlu0 %2399  ;;  %v6724_v39 = vpop.xlane.xlu1 %2210 }
 0x212   : > { %v2202_v18 = vpop.xlane.xlu0 %2201  ;;  %v2205_v14 = vpop.xlane.xlu1 %2204 }
 0x213   : > { %v2814_v57 = vrot.slane %v2205_v14, %v6226_v33 }
 0x216   : > { %v6726_v58 = vpop.xlane.xlu0 %2402  ;;  %v6728_v27 = vpop.xlane.xlu1 %2411 }
 0x21a   : > { %v6730_v43 = vpop.xlane.xlu0 %2396  ;;  %v6732_v28 = vpop.xlane.xlu1 %2405 }
 0x21e   : > { %v6734_v56 = vpop.xlane.xlu0 %2219  ;;  %v6736_v42 = vpop.xlane.xlu1 %2222 }
 0x222   : > { %v2214_v48 = vpop.xlane.xlu0 %2213  ;;  %v6738_v17 = vpop.xlane.xlu1 %2216 }
 0x226   : > { %v6740_v20 = vpop.xlane.xlu0 %2414  ;;  %v6742_v6 = vpop.xlane.xlu1 %2234 }
 0x22a   : > { %v6744_v2 = vpop.xlane.xlu0 %2408  ;;  %v6746_v3 = vpop.xlane.xlu1 %2228 }
 0x22e   : > { %v6748_v4 = vpop.xlane.xlu0 %2231  ;;  %v6750_v22 = vpop.xlane.xlu1 %2435 }
 0x22f   : > { %7766 = vst [vmem:[#allocation19_spill] sm:$0xff] %v6750_v22 }
 0x232   : > { %v6752_v7 = vpop.xlane.xlu0 %2423  ;;  %v6754_v52 = vpop.xlane.xlu1 %2246 }
 0x233   : > { %7767 = vst [vmem:[#allocation21_spill] sm:$0xff] %v6752_v7  ;;  %7768 = vst [vmem:[#allocation20_spill] sm:$0xff] %v6754_v52 }
 0x236   : > { %v6756_v50 = vpop.xlane.xlu0 %2225  ;;  %v6758_v19 = vpop.xlane.xlu1 %2438 }
 0x237   : > { %7769 = vst [vmem:[#allocation22_spill] sm:$0xff] %v6758_v19 }
 0x23a   : > { %v6760_v41 = vpop.xlane.xlu0 %2417  ;;  %v6762_v36 = vpop.xlane.xlu1 %2240 }
 0x23b   : > { %7770 = vst [vmem:[#allocation23_spill] sm:$0xff] %v6760_v41  ;;  %7771 = vst [vmem:[#allocation24_spill] sm:$0xff] %v6762_v36  ;;  %v3047_v36 = vrot.slane %v6630_v12, %v6200_v49 }
 0x23e   : > { %v6764_v35 = vpop.xlane.xlu0 %2426  ;;  %v6766_v13 = vpop.xlane.xlu1 %2447 }
 0x23f   : > { %7772 = vst [vmem:[#allocation25_spill] sm:$0xff] %v6764_v35 }
 0x242   : > { %v6768_v10 = vpop.xlane.xlu0 %2420  ;;  %v2442_v40 = vpop.xlane.xlu1 %2441 }
 0x243   : > { %7773 = vst [vmem:[#allocation27_spill] sm:$0xff] %v6768_v10 }
 0x246   : > { %v6770_v22 = vpop.xlane.xlu0 %2243  ;;  %v6772_v38 = vpop.xlane.xlu1 %2258 }
 0x247   : > { %7774 = vst [vmem:[#allocation26_spill] sm:$0xff] %v6770_v22  ;;  %v3051_v22 = vrot.slane %v6541_v25, %v6226_v33 }
 0x249   : > { %v3052_v10 = vsel %vm2628_vm2, %v3051_v22, %v3047_v36  ;;  %v3071_v22 = vrot.slane %v6674_v44, %v6315_v30  ;;  %v3130_v44 = vrot.slane %v6730_v43, %v6226_v33 }
 0x24a   : > { %v6774_v52 = vpop.xlane.xlu0 %2237  ;;  %v2253_v7 = vpop.xlane.xlu1 %2252 }
 0x24b   : > { %7775 = vst [vmem:[#allocation28_spill] sm:$0xff] %v6774_v52 }
 0x24e   : > { %v6776_v55 = vpop.xlane.xlu0 %2429  ;;  %v6778_v19 = vpop.xlane.xlu1 %2459 }
 0x24f   : > { %7776 = vst [vmem:[#allocation29_spill] sm:$0xff] %v6776_v55  ;;  %v2810_v55 = vrot.slane %v2202_v18, %v6200_v49  ;;  %v2819_v18 = vrot.slane %v2208_v24, %v6174_v31 }
 0x251   : > { %v2815_v25 = vsel %vm2628_vm2, %v2814_v57, %v2810_v55 }
 0x252   : > { %v6780_v59 = vpop.xlane.xlu0 %2432  ;;  %v6782_v51 = vpop.xlane.xlu1 %2453 }
 0x253   : > { %7777 = vst [vmem:[#allocation30_spill] sm:$0xff] %v6780_v59  ;;  %v3056_v59 = vrot.slane %v6604_v32, %v6174_v31  ;;  %v3066_v32 = vrot.slane %v6574_v61, %v6308_v26  ;;  %v2834_v61 = vrot.slane %v6738_v17, %v6315_v30  ;;  %v3205_v17 = vrot.slane %v2442_v40, %v6200_v49 }
 0x254   : > { %v3214_v40 = vrot.slane %v6766_v13, %v6174_v31 }
 0x255   : > { %v3057_v52 = vsel %vm2635_vm3, %v3056_v59, %v3052_v10  ;;  %v2820_v10 = vsel %vm2635_vm3, %v2819_v18, %v2815_v25  ;;  %v2829_v59 = vrot.slane %v2214_v48, %v6308_v26  ;;  %v3076_v48 = vrot.slane %v6561_v8, %v6324_v34 }
 0x256   : > { %v2256_v35 = vpop.xlane.xlu0 %2255  ;;  %v6786_v37 = vpop.xlane.xlu1 %2270  ;;  %v3081_v8 = vrot.slane %v6663_v53, %v6328_v62 }
 0x257   : > { %7778 = vst [vmem:[#allocation31_spill] sm:$0xff] %v6786_v37  ;;  %v3061_v37 = vrot.slane %v6497_v23, %v6218_v45  ;;  %v2824_v23 = vrot.slane %v6724_v39, %v6218_v45 }
 0x259   : > { %v3062_v14 = vsel %vm2642_vm4, %v3061_v37, %v3057_v52  ;;  %v2825_v24 = vsel %vm2642_vm4, %v2824_v23, %v2820_v10 }
 0x25a   : > { %v2250_v46 = vpop.xlane.xlu0 %2249  ;;  %v6793_v41 = vpop.xlane.xlu1 %2462  ;;  %v3067_v55 = vsel %vm2649_vm5, %v3066_v32, %v3062_v14  ;;  %v2830_v52 = vsel %vm2649_vm5, %v2829_v59, %v2825_v24  ;;  %v3126_v14 = vrot.slane %v6720_v15, %v6200_v49  ;;  %v2893_v32 = vrot.slane %v2253_v7, %v6226_v33 }
 0x25b   : > { %v3072_v37 = vsel %vm2656_vm6, %v3071_v22, %v3067_v55  ;;  %v2889_v39 = vrot.slane %v2250_v46, %v6200_v49  ;;  %v2835_v10 = vsel %vm2656_vm6, %v2834_v61, %v2830_v52  ;;  %v3135_v59 = vrot.slane %v6722_v54, %v6174_v31 }
 0x25c   : > { %v3077_v22 = vsel %vm2663_vm7, %v3076_v48, %v3072_v37  ;;  %v3131_v46 = vsel %vm2628_vm2, %v3130_v44, %v3126_v14  ;;  %v2839_v15 = vrot.slane %v6734_v56, %v6324_v34  ;;  %v2898_v7 = vrot.slane %v2256_v35, %v6174_v31 }
 0x25d   : > { %v3082_v53 = vsel %vm2670_vm8, %v3081_v8, %v3077_v22  ;;  %v3140_v54 = vrot.slane %v6726_v58, %v6218_v45  ;;  %v3136_v56 = vsel %vm2635_vm3, %v3135_v59, %v3131_v46  ;;  %v2849_v44 = vrot.slane %v6756_v50, %v6395_v47 }
 0x25e   : > { %v6798_v12 = vpop.xlane.xlu0 %2450  ;;  %v6803_v5 = vpop.xlane.xlu1 %2264  ;;  %v2840_v37 = vsel %vm2663_vm7, %v2839_v15, %v2835_v10  ;;  %v3091_v58 = vrot.slane %v6677_v0, %v6400_v16  ;;  %v2903_v61 = vrot.slane %v6772_v38, %v6218_v45  ;;  %v3145_v52 = vrot.slane %v6732_v28, %v6308_v26 }
 0x25f   : > { %v3219_v50 = vrot.slane %v6798_v12, %v6218_v45  ;;  %v3042_v12 = vrot.slane %v6557_v60, %v6505_v63  ;;  %v2854_v28 = vrot.slane %v6746_v3, %v6400_v16  ;;  %v2913_v10 = vrot.slane %v6803_v5, %v6315_v30 }
 0x260   : > { %v3101_v60 = vrot.slane %v6653_v1, %v6413_v11  ;;  %v3160_v1 = vrot.slane %v6740_v20, %v6328_v62 }
 0x262   : > { %v2445_v36 = vpop.xlane.xlu0 %2444  ;;  %v6815_v57 = vpop.xlane.xlu1 %2471 }
 0x263   : > { %v3209_v25 = vrot.slane %v2445_v36, %v6226_v33  ;;  %v2894_v36 = vsel %vm2628_vm2, %v2893_v32, %v2889_v39  ;;  %v3086_v33 = vrot.slane %v6632_v9, %v6395_v47  ;;  %v2844_v9 = vrot.slane %v6736_v42, %v6328_v62 }
 0x264   : > { %v2899_v24 = vsel %vm2635_vm3, %v2898_v7, %v2894_v36  ;;  %v3141_v42 = vsel %vm2642_vm4, %v3140_v54, %v3136_v56  ;;  %v3150_v39 = vrot.slane %v6744_v2, %v6315_v30  ;;  %v3224_v2 = vrot.slane %v6782_v51, %v6308_v26  ;;  %v7780_v7 = vld [vmem:[#allocation28_spill] sm:$0xff] }
 0x265   : > { %v3210_v23 = vsel %vm2628_vm2, %v3209_v25, %v3205_v17  ;;  %v3087_v31 = vsel %vm2677_vm9, %v3086_v33, %v3082_v53  ;;  %v2845_v25 = vsel %vm2670_vm8, %v2844_v9, %v2840_v37  ;;  %v2904_v38 = vsel %vm2642_vm4, %v2903_v61, %v2899_v24  ;;  %v7781_v37 = vld [vmem:[#allocation23_spill] sm:$0xff]  ;;  %v7782_v9 = vld [vmem:[#allocation16_spill] sm:$0xff] }
 0x266   : > { %v6829_v18 = vpop.xlane.xlu0 %2267  ;;  %v6833_v43 = vpop.xlane.xlu1 %2465  ;;  %v3215_v13 = vsel %vm2635_vm3, %v3214_v40, %v3210_v23  ;;  %v2850_v0 = vsel %vm2677_vm9, %v2849_v44, %v2845_v25  ;;  %v3096_v32 = vrot.slane %v6619_v21, %v6409_v29  ;;  %v3092_v8 = vsel %vm2684_vm10, %v3091_v58, %v3087_v31  ;;  %v7779_v40 = vld [vmem:[#allocation12_spill] sm:$0xff]  ;;  %v7783_v24 = vld [vmem:[#allocation27_spill] sm:$0xff] }
 0x267   : > { %v3220_v22 = vsel %vm2642_vm4, %v3219_v50, %v3215_v13  ;;  %v3146_v46 = vsel %vm2649_vm5, %v3145_v52, %v3141_v42  ;;  %v3155_v21 = vrot.slane %v6728_v27, %v6324_v34  ;;  %v2859_v36 = vrot.slane %v6748_v4, %v6409_v29  ;;  %v7785_v50 = vld [vmem:[#allocation11_spill] sm:$0xff] }
 0x268   : > { %v3151_v3 = vsel %vm2656_vm6, %v3150_v39, %v3146_v46  ;;  %v3225_v51 = vsel %vm2649_vm5, %v3224_v2, %v3220_v22  ;;  %v3097_v23 = vsel %vm2691_vm11, %v3096_v32, %v3092_v8  ;;  %v2918_v33 = vrot.slane %v6829_v18, %v6324_v34  ;;  %v7788_v32 = vld [vmem:[#allocation14_spill] sm:$0xff]  ;;  %v7789_v8 = vld [vmem:[#allocation17_spill] sm:$0xff] }
 0x269   : > { %v2864_v27 = vrot.slane %v6742_v6, %v6413_v11  ;;  %v3156_v4 = vsel %vm2663_vm7, %v3155_v21, %v3151_v3  ;;  %v2869_v54 = vrot.slane %v7780_v7, %v7779_v40  ;;  %v3165_v20 = vrot.slane %v7781_v37, %v6395_v47  ;;  %v7791_v21 = vld [vmem:[#allocation21_spill] sm:$0xff]  ;;  %v7795_v37 = vld [vmem:[#allocation20_spill] sm:$0xff] }
 0x26a   : > { %v2262_v49 = vpop.xlane.xlu0 %2261  ;;  %v6854_v55 = vpop.xlane.xlu1 %2282  ;;  %v6932_v6 = vsel %vm2726_vm0, %v3042_v12, %v7782_v9  ;;  %v3170_v13 = vrot.slane %v7783_v24, %v6400_v16  ;;  %v3239_v58 = vrot.slane %v6793_v41, %v6328_v62  ;;  %v3102_v61 = vsel %vm2698_vm12, %v3101_v60, %v3097_v23  ;;  %v7786_v41 = vld [vmem:[#allocation13_spill] sm:$0xff]  ;;  %v7793_v23 = vld [vmem:[#allocation26_spill] sm:$0xff] }
 0x26b   : > { %v2908_v35 = vrot.slane %v2262_v49, %v6308_v26  ;;  %v2855_v26 = vsel %vm2684_vm10, %v2854_v28, %v2850_v0  ;;  %v3234_v49 = vrot.slane %v6778_v19, %v6324_v34  ;;  %v3161_v42 = vsel %vm2670_vm8, %v3160_v1, %v3156_v4 }
 0x26c   : > { %v2860_v53 = vsel %vm2691_vm11, %v2859_v36, %v2855_v26  ;;  %v3244_v28 = vrot.slane %v6833_v43, %v6395_v47  ;;  %v3116_v46 = vrot.slane %v7789_v8, %v7788_v32  ;;  %vm3283_vm2 = vcmask 1042434  }
 0x26d   : > { %v2909_v17 = vsel %vm2649_vm5, %v2908_v35, %v2904_v38  ;;  %v7784_v35 = vld [vmem:[#allocation31_spill] sm:$0xff]  ;;  %v2865_v52 = vsel %vm2698_vm12, %v2864_v27, %v2860_v53  ;;  %v3175_v36 = vrot.slane %v7791_v21, %v6409_v29  ;;  %v2879_v1 = vrot.slane %v7793_v23, %v7788_v32  ;;  %v7794_v27 = vld [vmem:[#allocation29_spill] sm:$0xff] }
 0x26e   : > { %v2457_v48 = vpop.xlane.xlu0 %2456  ;;  %v6880_v14 = vpop.xlane.xlu1 %2474  ;;  %v2923_v31 = vrot.slane %v7784_v35, %v6328_v62  ;;  %v2870_v39 = vsel %vm2705_vm13, %v2869_v54, %v2865_v52  ;;  %v3166_v62 = vsel %vm2677_vm9, %v3165_v20, %v3161_v42  ;;  %v3185_v4 = vrot.slane %v7794_v27, %v7779_v40 }
 0x26f   : > { %v3229_v45 = vrot.slane %v2457_v48, %v6315_v30  ;;  %v2914_v30 = vsel %vm2656_vm6, %v2913_v10, %v2909_v17  ;;  %v3106_v48 = vrot.slane %v7785_v50, %v7779_v40  ;;  %v7790_v10 = vld [vmem:[#allocation15_spill] sm:$0xff]  ;;  %v3171_v3 = vsel %vm2684_vm10, %v3170_v13, %v3166_v62 }
 0x270   : > { %v2919_v19 = vsel %vm2663_vm7, %v2918_v33, %v2914_v30  ;;  %v3111_v60 = vrot.slane %v7790_v10, %v7786_v41  ;;  %v7792_v30 = vld [vmem:[#allocation18_spill] sm:$0xff]  ;;  %v3176_v33 = vsel %vm2691_vm11, %v3175_v36, %v3171_v3  ;;  %v3254_v53 = vrot.slane %v6815_v57, %v6409_v29 }
 0x271   : > { %v3230_v5 = vsel %vm2656_vm6, %v3229_v45, %v3225_v51  ;;  %v2924_v25 = vsel %vm2670_vm8, %v2923_v31, %v2919_v19  ;;  %v7787_v45 = vld [vmem:[#allocation24_spill] sm:$0xff]  ;;  %v3107_v51 = vsel %vm2705_vm13, %v3106_v48, %v3102_v61  ;;  %v2884_v20 = vrot.slane %v7795_v37, %v6505_v63 }
 0x272   : > { %v6899_v59 = vpop.xlane.xlu0 %2279  ;;  %v2277_v15 = vpop.xlane.xlu1 %2276  ;;  %v3235_v44 = vsel %vm2663_vm7, %v3234_v49, %v3230_v5  ;;  %v2874_v12 = vrot.slane %v7787_v45, %v7786_v41  ;;  %v3121_v5 = vrot.slane %v7792_v30, %v6505_v63  ;;  %v2943_v13 = vrot.slane %v6854_v55, %v6413_v11  ;;  %v7801_v30 = vld [vmem:[#allocation33_spill] sm:$0xff] }
 0x273   : > { %v3240_v0 = vsel %vm2670_vm8, %v3239_v58, %v3235_v44  ;;  %v2933_v26 = vrot.slane %v2277_v15, %v6400_v16  ;;  %v2938_v7 = vrot.slane %v6899_v59, %v6409_v29  ;;  %v7796_v44 = vld [vmem:[#allocation25_spill] sm:$0xff]  ;;  %v3259_v35 = vrot.slane %v6880_v14, %v6413_v11 }
 0x274   : > { %v3245_v43 = vsel %vm2677_vm9, %v3244_v28, %v3240_v0  ;;  %v3180_v19 = vrot.slane %v7796_v44, %v6413_v11  ;;  %vm3285_vm3 = vcmask 1043459   ;;  %vm3287_vm4 = vcmask 1044484  }
 0x275   : > { %vm3289_vm5 = vcmask 1045509   ;;  %vm3291_vm6 = vcmask 1046534   ;;  %vm3293_vm7 = vcmask 1047559   ;;  %vm2490_vm8 = vcmp.lt.s32.totalorder %v7801_v30, 16 }
 0x276   : > { %v2274_v56 = vpop.xlane.xlu0 %2273  ;;  %v2469_v18 = vpop.xlane.xlu1 %2468  ;;  %v3181_v59 = vsel %vm2698_vm12, %v3180_v19, %v3176_v33 }
 0x277   : > { %v2928_v34 = vrot.slane %v2274_v56, %v6395_v47  ;;  %v3249_v38 = vrot.slane %v2469_v18, %v6400_v16  ;;  %v2875_v47 = vsel %vm2712_vm14, %v2874_v12, %v2870_v39  ;;  %v3112_v56 = vsel %vm2712_vm14, %v3111_v60, %v3107_v51  ;;  %v7797_v18 = vld [vmem:[#allocation30_spill] sm:$0xff] }
 0x278   : > { %v3190_v9 = vrot.slane %v7797_v18, %v7786_v41  ;;  %v3186_v61 = vsel %vm2705_vm13, %v3185_v4, %v3181_v59  ;;  %v3117_v0 = vsel %vm2719_vm15, %v3116_v46, %v3112_v56  ;;  %v7803_v56 = vld [vmem:[#allocation8_spill] sm:$0xff] }
 0x279   : > { %v2929_v2 = vsel %vm2677_vm9, %v2928_v34, %v2924_v25  ;;  %v3250_v16 = vsel %vm2684_vm10, %v3249_v38, %v3245_v43  ;;  %v2880_v34 = vsel %vm2719_vm15, %v2879_v1, %v2875_v47  ;;  %v3375_v37 = vsub.s32 1, %v7803_v56 }
 0x27a   : > { %v2292_v22 = vpop.xlane.xlu0 %2291  ;;  %v2478_v17 = vpop.xlane.xlu1 %2477  ;;  %v2934_v49 = vsel %vm2684_vm10, %v2933_v26, %v2929_v2  ;;  %v3255_v24 = vsel %vm2691_vm11, %v3254_v53, %v3250_v16  ;;  %v2885_v58 = vsel %vm2726_vm0, %v2884_v20, %v2880_v34  ;;  %v3191_v11 = vsel %vm2712_vm14, %v3190_v9, %v3186_v61  ;;  %v7800_v26 = vld [vmem:[#allocation22_spill] sm:$0xff]  ;;  %v5081_v9 = vld [vmem:[%s5337_s17] sm:$0xff]  }
 0x27b   : > { %v2939_v57 = vsel %vm2691_vm11, %v2938_v7, %v2934_v49  ;;  %v3264_v50 = vrot.slane %v2478_v17, %v7779_v40  ;;  %v3260_v42 = vsel %vm2698_vm12, %v3259_v35, %v3255_v24  ;;  %v2958_v14 = vrot.slane %v2292_v22, %v7788_v32  ;;  %v7799_v17 = vld [vmem:[#allocation10_spill] sm:$0xff]  ;;  %v7802_v7 = vld [vmem:[#allocation9_spill] sm:$0xff] }
 0x27c   : > { %v2944_v52 = vsel %vm2698_vm12, %v2943_v13, %v2939_v57  ;;  %v3284_v8 = vsel %vm3283_vm2, %v2885_v58, %v7799_v17  ;;  %v3200_v51 = vrot.slane %v7800_v26, %v6505_v63  ;;  %v3442_v44 = vsub.s32 2, %v7803_v56 }
 0x27d   : > { %v3265_v28 = vsel %vm2705_vm13, %v3264_v50, %v3260_v42  ;;  %v3509_v34 = vsub.s32 3, %v7803_v56  ;;  %v3842_v24 = vunpack.c.l.bf16 %v5081_v9  ;;  %v3843_v57 = vunpack.c.h.bf16 %v5081_v9 }
 0x27e   : > { %v2286_v15 = vpop.xlane.xlu0 %2285  ;;  %v2295_v54 = vpop.xlane.xlu1 %2294  ;;  %v3576_v61 = vsub.s32 4, %v7803_v56 }
 0x27f   : > { %v2948_v29 = vrot.slane %v2286_v15, %v7779_v40  ;;  %v7798_v40 = vld [vmem:[#allocation19_spill] sm:$0xff]  ;;  %v2963_v62 = vrot.slane %v2295_v54, %v6505_v63 }
 0x280   : > { %v3195_v38 = vrot.slane %v7798_v40, %v7788_v32 }
 0x281   : > { %v2949_v25 = vsel %vm2705_vm13, %v2948_v29, %v2944_v52 }
 0x282   : > { %v2481_v31 = vpop.xlane.xlu0 %2480  ;;  %v2289_v48 = vpop.xlane.xlu1 %2288  ;;  %v3196_v46 = vsel %vm2719_vm15, %v3195_v38, %v3191_v11 }
 0x283   : > { %v3269_v39 = vrot.slane %v2481_v31, %v7786_v41  ;;  %v2953_v55 = vrot.slane %v2289_v48, %v7786_v41  ;;  %v3201_v23 = vsel %vm2726_vm0, %v3200_v51, %v3196_v46  ;;  %v5082_v31 = vld [vmem:[%s5337_s17 + $0x8] sm:$0xff]   ;;  %v5083_v48 = vld [vmem:[%s5337_s17 + $0x10] sm:$0xff]  }
 0x284   : > { %v3844_v58 = vunpack.c.l.bf16 %v5082_v31  ;;  %v3846_v42 = vunpack.c.l.bf16 %v5083_v48 }
 0x285   : > { %v2954_v45 = vsel %vm2712_vm14, %v2953_v55, %v2949_v25  ;;  %v3270_v10 = vsel %vm2712_vm14, %v3269_v39, %v3265_v28  ;;  %v3847_v28 = vunpack.c.h.bf16 %v5083_v48 }
 0x286   : > { %v2484_v12 = vpop.xlane.xlu0 %2483  ;;  %v2959_v41 = vsel %vm2719_vm15, %v2958_v14, %v2954_v45  ;;  %v2487_v22 = vpop.xlane.xlu1 %2486  ;;  %v3845_v14 = vunpack.c.h.bf16 %v5082_v31 }
 0x287   : > { %v3274_v2 = vrot.slane %v2484_v12, %v7788_v32  ;;  %v2964_v60 = vsel %vm2726_vm0, %v2963_v62, %v2959_v41  ;;  %v3279_v3 = vrot.slane %v2487_v22, %v6505_v63  ;;  %v3122_v32 = vsel %vm2726_vm0, %v3121_v5, %v3117_v0  ;;  %v5084_v22 = vld [vmem:[%s5337_s17 + $0x18] sm:$0xff]  }
 0x288   : > { %v3286_v36 = vsel %vm3285_vm3, %v2964_v60, %v3284_v8  ;;  %v3848_v17 = vunpack.c.l.bf16 %v5084_v22  ;;  %v3849_v26 = vunpack.c.h.bf16 %v5084_v22 }
 0x289   : > { %v3275_v21 = vsel %vm2719_vm15, %v3274_v2, %v3270_v10  ;;  %v3288_v43 = vsel %vm3287_vm4, %v6932_v6, %v3286_v36 }
 0x28a   : > { %v3280_v47 = vsel %vm2726_vm0, %v3279_v3, %v3275_v21  ;;  %v3290_v63 = vsel %vm3289_vm5, %v3122_v32, %v3288_v43  ;;  %vm7804_vm0 = vcmask 261120  }
 0x28b   : > { %v3292_v1 = vsel %vm3291_vm6, %v3201_v23, %v3290_v63  ;;  %vm7805_vm9 = vmmov %vm7804_vm0  ;;  %v5085_v63 = vld [vmem:[%s5337_s17 + $0x20] sm:$0xff]  }
 0x28c   : > { %v3294_v49 = vsel %vm3293_vm7, %v3280_v47, %v3292_v1  ;;  %vm7806_vm10 = vmmov %vm7804_vm0  ;;  %v3850_v1 = vunpack.c.l.bf16 %v5085_v63 }
 0x28d   : > { %v3296_v16 = vsel %vm2490_vm8, %v3294_v49, -inf  ;;  %vm7807_vm11 = vmmov %vm7804_vm0 }
 0x28e   : > { %3297 = vmax.xlane.f32.xlu0 %v3296_v16  ;;  %vm7808_vm12 = vmmov %vm7804_vm0 }
 0x28f   : > { %vm7809_vm13 = vmmov %vm7804_vm0 }
 0x290   : > { %vm7810_vm14 = vmmov %vm7804_vm0 }
 0x291   : > { %vm7811_vm15 = vmmov %vm7804_vm0 }
 0x292   : > { %vm7812_vm8 = vmmov %vm7804_vm0 }
 0x31b   : > { %v3298_v5 = vpop.xlane.xlu0 %3297 }
 0x31c   : > { %v3299_v15 = vsub.f32 %v3296_v16, %v3298_v5 }
 0x31e   : > { %v3300_v33 = vmul.f32 1.442695, %v3299_v15 }
 0x320   : > { %5074 = vpow2.f32 %v3300_v33  ;;  %v3851_v33 = vunpack.c.h.bf16 %v5085_v63 }
 0x32a   : > { %v5075_v27 = vpop.eup %5074 }
 0x32b   : > { %3302 = vadd.xlane.f32.xlu1 %v5075_v27 }
 0x3b8   : > { %v3303_v6 = vpop.xlane.xlu1 %3302 }
 0x3b9   : > { %5076 = vrcp.f32 %v3303_v6 }
 0x3c3   : > { %v5077_v4 = vpop.eup %5076 }
 0x3c4   : > { %v7036_v53 = vmul.f32 %v5077_v4, %v5075_v27 }
 0x3c6   : > { %v3309_v54 = vrot.slane %v7036_v53, %v7802_v7  ;;  %4411 = vst [vmem:[%s7042_s26] sm:$0xff] %v7036_v53  ;;  %v3376_v20 = vrot.slane %v7036_v53, %v3375_v37  ;;  %v3443_v19 = vrot.slane %v7036_v53, %v3442_v44  ;;  %v3510_v18 = vrot.slane %v7036_v53, %v3509_v34 }
 0x3c7   : > { %v7060_v0 = vrot.slane %v7036_v53, %v3576_v61 }
 0x3c8   : > { %3315 = vbcast.lane.b32.xlu1 %v3309_v54, 264  ;;  %3311 = vbcast.lane.b32.xlu0 %v3309_v54, 256 }
 0x3cc   : > { %3319 = vbcast.lane.b32.xlu1 %v3309_v54, 272  ;;  %3327 = vbcast.lane.b32.xlu0 %v3309_v54, 288 }
 0x3d0   : > { %3323 = vbcast.lane.b32.xlu1 %v3309_v54, 280  ;;  %3335 = vbcast.lane.b32.xlu0 %v3309_v54, 304 }
 0x3d4   : > { %3331 = vbcast.lane.b32.xlu1 %v3309_v54, 296  ;;  %3343 = vbcast.lane.b32.xlu0 %v3309_v54, 320 }
 0x3d8   : > { %3339 = vbcast.lane.b32.xlu1 %v3309_v54, 312  ;;  %3351 = vbcast.lane.b32.xlu0 %v3309_v54, 336 }
 0x3dc   : > { %3347 = vbcast.lane.b32.xlu1 %v3309_v54, 328  ;;  %3359 = vbcast.lane.b32.xlu0 %v3309_v54, 352 }
 0x3e0   : > { %3355 = vbcast.lane.b32.xlu1 %v3309_v54, 344  ;;  %3367 = vbcast.lane.b32.xlu0 %v3309_v54, 368 }
 0x3e4   : > { %3363 = vbcast.lane.b32.xlu1 %v3309_v54, 360  ;;  %3378 = vbcast.lane.b32.xlu0 %v3376_v20, 256 }
 0x3e8   : > { %3371 = vbcast.lane.b32.xlu1 %v3309_v54, 376  ;;  %3386 = vbcast.lane.b32.xlu0 %v3376_v20, 272 }
 0x3ec   : > { %3382 = vbcast.lane.b32.xlu1 %v3376_v20, 264  ;;  %3394 = vbcast.lane.b32.xlu0 %v3376_v20, 288 }
 0x3f0   : > { %3390 = vbcast.lane.b32.xlu1 %v3376_v20, 280  ;;  %3402 = vbcast.lane.b32.xlu0 %v3376_v20, 304 }
 0x3f4   : > { %3398 = vbcast.lane.b32.xlu1 %v3376_v20, 296  ;;  %3410 = vbcast.lane.b32.xlu0 %v3376_v20, 320 }
 0x3f8   : > { %3406 = vbcast.lane.b32.xlu1 %v3376_v20, 312  ;;  %3418 = vbcast.lane.b32.xlu0 %v3376_v20, 336 }
 0x3fc   : > { %3414 = vbcast.lane.b32.xlu1 %v3376_v20, 328  ;;  %3426 = vbcast.lane.b32.xlu0 %v3376_v20, 352 }
 0x400   : > { %3422 = vbcast.lane.b32.xlu1 %v3376_v20, 344  ;;  %3434 = vbcast.lane.b32.xlu0 %v3376_v20, 368 }
 0x404   : > { %3430 = vbcast.lane.b32.xlu1 %v3376_v20, 360  ;;  %3445 = vbcast.lane.b32.xlu0 %v3443_v19, 256 }
 0x408   : > { %3438 = vbcast.lane.b32.xlu1 %v3376_v20, 376  ;;  %3453 = vbcast.lane.b32.xlu0 %v3443_v19, 272  ;;  %v5086_v20 = vld [vmem:[%s5337_s17 + $0x28] sm:$0xff]  }
 0x409   : > { %v3852_v44 = vunpack.c.l.bf16 %v5086_v20 }
 0x40c   : > { %3449 = vbcast.lane.b32.xlu1 %v3443_v19, 264  ;;  %3461 = vbcast.lane.b32.xlu0 %v3443_v19, 288 }
 0x410   : > { %3457 = vbcast.lane.b32.xlu1 %v3443_v19, 280  ;;  %3469 = vbcast.lane.b32.xlu0 %v3443_v19, 304 }
 0x414   : > { %3465 = vbcast.lane.b32.xlu1 %v3443_v19, 296  ;;  %3477 = vbcast.lane.b32.xlu0 %v3443_v19, 320 }
 0x418   : > { %3473 = vbcast.lane.b32.xlu1 %v3443_v19, 312  ;;  %3485 = vbcast.lane.b32.xlu0 %v3443_v19, 336 }
 0x41c   : > { %3481 = vbcast.lane.b32.xlu1 %v3443_v19, 328  ;;  %3493 = vbcast.lane.b32.xlu0 %v3443_v19, 352 }
 0x420   : > { %3489 = vbcast.lane.b32.xlu1 %v3443_v19, 344  ;;  %3501 = vbcast.lane.b32.xlu0 %v3443_v19, 368 }
 0x424   : > { %3497 = vbcast.lane.b32.xlu1 %v3443_v19, 360  ;;  %3512 = vbcast.lane.b32.xlu0 %v3510_v18, 256 }
 0x428   : > { %3505 = vbcast.lane.b32.xlu1 %v3443_v19, 376  ;;  %3520 = vbcast.lane.b32.xlu0 %v3510_v18, 272  ;;  %v3643_v19 = vsub.s32 5, %v7803_v56 }
 0x42a   : > { %v7088_v31 = vrot.slane %v7036_v53, %v3643_v19 }
 0x42c   : > { %3516 = vbcast.lane.b32.xlu1 %v3510_v18, 264  ;;  %3528 = vbcast.lane.b32.xlu0 %v3510_v18, 288 }
 0x430   : > { %3524 = vbcast.lane.b32.xlu1 %v3510_v18, 280  ;;  %3536 = vbcast.lane.b32.xlu0 %v3510_v18, 304 }
 0x434   : > { %3532 = vbcast.lane.b32.xlu1 %v3510_v18, 296  ;;  %3544 = vbcast.lane.b32.xlu0 %v3510_v18, 320 }
 0x438   : > { %3540 = vbcast.lane.b32.xlu1 %v3510_v18, 312  ;;  %3552 = vbcast.lane.b32.xlu0 %v3510_v18, 336 }
 0x43a   : > { %v3316_v29 = vpop.permute.xlu1 %3315  ;;  %v3312_v59 = vpop.permute.xlu0 %3311 }
 0x43b   : > { %v3971_v13 = vmul.f32 %v3843_v57, %v3316_v29  ;;  %v3970_v35 = vmul.f32 %v3842_v24, %v3312_v59  ;;  %v3853_v57 = vunpack.c.h.bf16 %v5086_v20  ;;  %v5087_v59 = vld [vmem:[%s5337_s17 + $0x40] sm:$0xff]  }
 0x43c   : > { %3548 = vbcast.lane.b32.xlu1 %v3510_v18, 328  ;;  %3560 = vbcast.lane.b32.xlu0 %v3510_v18, 352 }
 0x43d   : > { %v4099_v39 = vsel %vm7804_vm0, %v3971_v13, 0.0  ;;  %v4098_v55 = vsel %vm7805_vm9, %v3970_v35, 0.0  ;;  %v3858_v13 = vunpack.c.l.bf16 %v5087_v59  ;;  %v3710_v35 = vsub.s32 6, %v7803_v56  ;;  %vm7813_vm9 = vmmov %vm7804_vm0 }
 0x43e   : > { %v3320_v50 = vpop.permute.xlu1 %3319  ;;  %v3328_v52 = vpop.permute.xlu0 %3327  ;;  %v4100_v40 = vadd.f32 %v4099_v39, %v4098_v55  ;;  %v3859_v39 = vunpack.c.h.bf16 %v5087_v59  ;;  %v3777_v55 = vsub.s32 7, %v7803_v56 }
 0x43f   : > { %v3972_v11 = vmul.f32 %v3844_v58, %v3320_v50  ;;  %v3974_v45 = vmul.f32 %v3846_v42, %v3328_v52  ;;  %v5088_v42 = vld [vmem:[%s5337_s17 + $0x48] sm:$0xff]  }
 0x440   : > { %3556 = vbcast.lane.b32.xlu1 %v3510_v18, 344  ;;  %3568 = vbcast.lane.b32.xlu0 %v3510_v18, 368  ;;  %v3860_v52 = vunpack.c.l.bf16 %v5088_v42  ;;  %v3861_v56 = vunpack.c.h.bf16 %v5088_v42 }
 0x441   : > { %v4101_v25 = vsel %vm7806_vm10, %v3972_v11, 0.0  ;;  %v4105_v60 = vsel %vm7808_vm12, %v3974_v45, 0.0  ;;  %vm7814_vm10 = vmmov %vm7804_vm0 }
 0x442   : > { %v3324_v38 = vpop.permute.xlu1 %3323  ;;  %v3336_v62 = vpop.permute.xlu0 %3335  ;;  %v4102_v41 = vadd.f32 %v4101_v25, %v4100_v40  ;;  %vm7816_vm12 = vmmov %vm7804_vm0 }
 0x443   : > { %v3973_v12 = vmul.f32 %v3845_v14, %v3324_v38  ;;  %v3976_v21 = vmul.f32 %v3848_v17, %v3336_v62  ;;  %v5089_v14 = vld [vmem:[%s5337_s17 + $0x30] sm:$0xff]   ;;  %v7099_v38 = vrot.slane %v7036_v53, %v3710_v35 }
 0x444   : > { %3564 = vbcast.lane.b32.xlu1 %v3510_v18, 360  ;;  %3579 = vbcast.lane.b32.xlu0 %v7060_v0, 256  ;;  %v3854_v25 = vunpack.c.l.bf16 %v5089_v14  ;;  %v3855_v45 = vunpack.c.h.bf16 %v5089_v14 }
 0x445   : > { %v4103_v2 = vsel %vm7807_vm11, %v3973_v12, 0.0  ;;  %v4109_v23 = vsel %vm7810_vm14, %v3976_v21, 0.0  ;;  %vm7815_vm11 = vmmov %vm7804_vm0 }
 0x446   : > { %v4104_v8 = vadd.f32 %v4103_v2, %v4102_v41  ;;  %v3332_v46 = vpop.permute.xlu1 %3331  ;;  %v3344_v10 = vpop.permute.xlu0 %3343  ;;  %vm7818_vm14 = vmmov %vm7804_vm0 }
 0x447   : > { %v3975_v3 = vmul.f32 %v3847_v28, %v3332_v46  ;;  %v3978_v27 = vmul.f32 %v3850_v1, %v3344_v10  ;;  %v5090_v28 = vld [vmem:[%s5337_s17 + $0x50] sm:$0xff]   ;;  %v7106_v46 = vrot.slane %v7036_v53, %v3777_v55 }
 0x448   : > { %v4106_v51 = vadd.f32 %v4105_v60, %v4104_v8  ;;  %3572 = vbcast.lane.b32.xlu1 %v3510_v18, 376  ;;  %3587 = vbcast.lane.b32.xlu0 %v7060_v0, 272  ;;  %v3862_v41 = vunpack.c.l.bf16 %v5090_v28 }
 0x449   : > { %v4107_v36 = vsel %vm7809_vm13, %v3975_v3, 0.0  ;;  %v4113_v37 = vsel %vm7812_vm8, %v3978_v27, 0.0  ;;  %vm7817_vm13 = vmmov %vm7804_vm0 }
 0x44a   : > { %v4108_v32 = vadd.f32 %v4107_v36, %v4106_v51  ;;  %v3340_v47 = vpop.permute.xlu1 %3339  ;;  %v3352_v43 = vpop.permute.xlu0 %3351  ;;  %v5091_v36 = vld [vmem:[%s5337_s17 + $0x58] sm:$0xff]   ;;  %vm7820_vm8 = vmmov %vm7804_vm0 }
 0x44b   : > { %v3977_v30 = vmul.f32 %v3849_v26, %v3340_v47  ;;  %v3980_v29 = vmul.f32 %v3852_v44, %v3352_v43  ;;  %v3863_v43 = vunpack.c.h.bf16 %v5090_v28  ;;  %v3865_v44 = vunpack.c.h.bf16 %v5091_v36 }
 0x44c   : > { %3583 = vbcast.lane.b32.xlu1 %v7060_v0, 264  ;;  %3595 = vbcast.lane.b32.xlu0 %v7060_v0, 288  ;;  %v4110_v49 = vadd.f32 %v4109_v23, %v4108_v32  ;;  %v3864_v32 = vunpack.c.l.bf16 %v5091_v36 }
 0x44d   : > { %v4111_v15 = vsel %vm7811_vm15, %v3977_v30, 0.0  ;;  %v4117_v11 = vsel %vm7813_vm9, %v3980_v29, 0.0  ;;  %vm7819_vm15 = vmmov %vm7804_vm0 }
 0x44e   : > { %v3348_v16 = vpop.permute.xlu1 %3347  ;;  %v3360_v5 = vpop.permute.xlu0 %3359  ;;  %v4112_v6 = vadd.f32 %v4111_v15, %v4110_v49  ;;  %vm7821_vm9 = vmmov %vm7804_vm0 }
 0x44f   : > { %v3979_v54 = vmul.f32 %v3851_v33, %v3348_v16  ;;  %v3982_v10 = vmul.f32 %v3854_v25, %v3360_v5  ;;  %v5092_v16 = vld [vmem:[%s5337_s17 + $0x38] sm:$0xff]  }
 0x450   : > { %3591 = vbcast.lane.b32.xlu1 %v7060_v0, 280  ;;  %3603 = vbcast.lane.b32.xlu0 %v7060_v0, 304  ;;  %v4114_v34 = vadd.f32 %v4113_v37, %v4112_v6  ;;  %v3856_v5 = vunpack.c.l.bf16 %v5092_v16  ;;  %v3857_v15 = vunpack.c.h.bf16 %v5092_v16 }
 0x451   : > { %v4115_v24 = vsel %vm7804_vm0, %v3979_v54, 0.0  ;;  %v4121_v49 = vsel %vm7818_vm14, %v3982_v10, 0.0  ;;  %v5093_v54 = vld [vmem:[%s5337_s17 + $0x60] sm:$0xff]   ;;  %vm7826_vm14 = vmmov %vm7804_vm0 }
 0x452   : > { %v3356_v4 = vpop.permute.xlu1 %3355  ;;  %v7075_v7 = vpop.permute.xlu0 %3367  ;;  %v4116_v58 = vadd.f32 %v4115_v24, %v4114_v34  ;;  %v3866_v37 = vunpack.c.l.bf16 %v5093_v54  ;;  %v3867_v42 = vunpack.c.h.bf16 %v5093_v54  ;;  %v5097_v54 = vld [vmem:[%s5337_s17 + $0x80] sm:$0xff]  }
 0x453   : > { %v3981_v48 = vmul.f32 %v3853_v57, %v3356_v4  ;;  %v3984_v57 = vmul.f32 %v3856_v5, %v7075_v7 }
 0x454   : > { %3599 = vbcast.lane.b32.xlu1 %v7060_v0, 296  ;;  %3611 = vbcast.lane.b32.xlu0 %v7060_v0, 320  ;;  %v4118_v62 = vadd.f32 %v4117_v11, %v4116_v58  ;;  %v5094_v58 = vld [vmem:[%s5337_s17 + $0x68] sm:$0xff]  }
 0x455   : > { %v4119_v22 = vsel %vm7814_vm10, %v3981_v48, 0.0  ;;  %vm7822_vm10 = vmmov %vm7804_vm0 }
 0x456   : > { %v3364_v18 = vpop.permute.xlu1 %3363  ;;  %v3379_v9 = vpop.permute.xlu0 %3378  ;;  %v4120_v26 = vadd.f32 %v4119_v22, %v4118_v62 }
 0x457   : > { %v3986_v40 = vmul.f32 %v3858_v13, %v3379_v9  ;;  %v3983_v30 = vmul.f32 %v3855_v45, %v3364_v18 }
 0x458   : > { %3607 = vbcast.lane.b32.xlu1 %v7060_v0, 312  ;;  %3619 = vbcast.lane.b32.xlu0 %v7060_v0, 336  ;;  %v4122_v27 = vadd.f32 %v4121_v49, %v4120_v26 }
 0x459   : > { %v4135_v60 = vsel %vm7815_vm11, %v3986_v40, 0.0  ;;  %v4123_v19 = vsel %vm7820_vm8, %v3983_v30, 0.0  ;;  %vm7823_vm11 = vmmov %vm7804_vm0 }
 0x45a   : > { %v7090_v61 = vpop.permute.xlu1 %3371  ;;  %v3387_v50 = vpop.permute.xlu0 %3386  ;;  %v4124_v59 = vadd.f32 %v4123_v19, %v4122_v27  ;;  %v4125_v7 = vsel %vm7823_vm11, %v3984_v57, 0.0  ;;  %vm7828_vm8 = vmmov %vm7804_vm0 }
 0x45b   : > { %v3988_v17 = vmul.f32 %v3860_v52, %v3387_v50  ;;  %v3868_v50 = vunpack.c.l.bf16 %v5094_v58  ;;  %v3985_v52 = vmul.f32 %v3857_v15, %v7090_v61  ;;  %vm7831_vm11 = vmmov %vm7804_vm0 }
 0x45c   : > { %3615 = vbcast.lane.b32.xlu1 %v7060_v0, 328  ;;  %3650 = vbcast.lane.b32.xlu0 %v7088_v31, 264  ;;  %v4126_v40 = vadd.f32 %v4125_v7, %v4124_v59 }
 0x45d   : > { %v4138_v23 = vsel %vm7817_vm13, %v3988_v17, 0.0  ;;  %vm7825_vm13 = vmmov %vm7804_vm0 }
 0x45e   : > { %v3383_v12 = vpop.permute.xlu1 %3382  ;;  %v3395_v2 = vpop.permute.xlu0 %3394 }
 0x45f   : > { %v3987_v8 = vmul.f32 %v3859_v39, %v3383_v12  ;;  %v3990_v63 = vmul.f32 %v3862_v41, %v3395_v2  ;;  %v5095_v12 = vld [vmem:[%s5337_s17 + $0x70] sm:$0xff]   ;;  %v3869_v41 = vunpack.c.h.bf16 %v5094_v58  ;;  %v4127_v2 = vsel %vm7825_vm13, %v3985_v52, 0.0  ;;  %vm7833_vm13 = vmmov %vm7804_vm0 }
 0x460   : > { %3646 = vbcast.lane.b32.xlu1 %v7088_v31, 256  ;;  %3717 = vbcast.lane.b32.xlu0 %v7099_v38, 264  ;;  %v3870_v28 = vunpack.c.l.bf16 %v5095_v12  ;;  %v3871_v30 = vunpack.c.h.bf16 %v5095_v12 }
 0x461   : > { %v4136_v3 = vsel %vm7816_vm12, %v3987_v8, 0.0  ;;  %v4142_v34 = vsel %vm7804_vm0, %v3990_v63, 0.0  ;;  %vm7824_vm12 = vmmov %vm7804_vm0 }
 0x462   : > { %v4137_v51 = vadd.f32 %v4136_v3, %v4135_v60  ;;  %v3391_v21 = vpop.permute.xlu1 %3390  ;;  %v3403_v47 = vpop.permute.xlu0 %3402  ;;  %v4128_v60 = vadd.f32 %v4127_v2, %v4126_v40 }
 0x463   : > { %v3989_v53 = vmul.f32 %v3861_v56, %v3391_v21  ;;  %v3992_v18 = vmul.f32 %v3864_v32, %v3403_v47 }
 0x464   : > { %v4139_v1 = vadd.f32 %v4138_v23, %v4137_v51  ;;  %3713 = vbcast.lane.b32.xlu1 %v7099_v38, 256  ;;  %3780 = vbcast.lane.b32.xlu0 %v7106_v46, 256  ;;  %v5096_v51 = vld [vmem:[%s5337_s17 + $0x78] sm:$0xff]  }
 0x465   : > { %v4140_v33 = vsel %vm7819_vm15, %v3989_v53, 0.0  ;;  %v4146_v39 = vsel %vm7822_vm10, %v3992_v18, 0.0  ;;  %vm7827_vm15 = vmmov %vm7804_vm0  ;;  %v3872_v21 = vunpack.c.l.bf16 %v5096_v51  ;;  %v4129_v53 = vrot.slane %v4128_v60, 4 }
 0x466   : > { %v4141_v6 = vadd.f32 %v4140_v33, %v4139_v1  ;;  %v3399_v4 = vpop.permute.xlu1 %3398  ;;  %v3411_v20 = vpop.permute.xlu0 %3410  ;;  %v3873_v27 = vunpack.c.h.bf16 %v5096_v51  ;;  %vm7830_vm10 = vmmov %vm7804_vm0 }
 0x467   : > { %v3991_v9 = vmul.f32 %v3863_v43, %v3399_v4  ;;  %v3994_v55 = vmul.f32 %v3866_v37, %v3411_v20  ;;  %v3874_v37 = vunpack.c.l.bf16 %v5097_v54  ;;  %v4130_v20 = vadd.f32 %v4129_v53, %v4128_v60 }
 0x468   : > { %v4143_v24 = vadd.f32 %v4142_v34, %v4141_v6  ;;  %3654 = vbcast.lane.b32.xlu1 %v7088_v31, 272  ;;  %3721 = vbcast.lane.b32.xlu0 %v7099_v38, 272 }
 0x469   : > { %v4144_v29 = vsel %vm7821_vm9, %v3991_v9, 0.0  ;;  %v4150_v22 = vsel %vm7826_vm14, %v3994_v55, 0.0  ;;  %vm7829_vm9 = vmmov %vm7804_vm0  ;;  %v4131_v58 = vrot.slane %v4130_v20, 2  ;;  %v5099_v55 = vld [vmem:[%s5337_s17 + $0x90] sm:$0xff]  }
 0x46a   : > { %v4145_v13 = vadd.f32 %v4144_v29, %v4143_v24  ;;  %v3407_v35 = vpop.permute.xlu1 %3406  ;;  %v3419_v48 = vpop.permute.xlu0 %3418  ;;  %v5098_v24 = vld [vmem:[%s5337_s17 + $0x88] sm:$0xff]   ;;  %v3875_v29 = vunpack.c.h.bf16 %v5097_v54  ;;  %vm7834_vm14 = vmmov %vm7804_vm0 }
 0x46b   : > { %v3993_v11 = vmul.f32 %v3865_v44, %v3407_v35  ;;  %v3996_v17 = vmul.f32 %v3868_v50, %v3419_v48  ;;  %v3876_v57 = vunpack.c.l.bf16 %v5098_v24 }
 0x46c   : > { %v4147_v14 = vadd.f32 %v4146_v39, %v4145_v13  ;;  %3784 = vbcast.lane.b32.xlu1 %v7106_v46, 264  ;;  %3788 = vbcast.lane.b32.xlu0 %v7106_v46, 272 }
 0x46d   : > { %v4148_v25 = vsel %vm7824_vm12, %v3993_v11, 0.0  ;;  %v4154_v32 = vsel %vm7828_vm8, %v3996_v17, 0.0  ;;  %vm7832_vm12 = vmmov %vm7804_vm0  ;;  %v3878_v11 = vunpack.c.l.bf16 %v5099_v55 }
 0x46e   : > { %v4149_v62 = vadd.f32 %v4148_v25, %v4147_v14  ;;  %v3415_v45 = vpop.permute.xlu1 %3414  ;;  %v3427_v61 = vpop.permute.xlu0 %3426  ;;  %v3877_v14 = vunpack.c.h.bf16 %v5098_v24  ;;  %vm7836_vm8 = vmmov %vm7804_vm0 }
 0x46f   : > { %v3995_v8 = vmul.f32 %v3867_v42, %v3415_v45  ;;  %v3998_v47 = vmul.f32 %v3870_v28, %v3427_v61  ;;  %v5100_v61 = vld [vmem:[%s5337_s17 + $0x98] sm:$0xff]  }
 0x470   : > { %v4151_v56 = vadd.f32 %v4150_v22, %v4149_v62  ;;  %3658 = vbcast.lane.b32.xlu1 %v7088_v31, 280  ;;  %3662 = vbcast.lane.b32.xlu0 %v7088_v31, 288  ;;  %v4132_v62 = vadd.f32 %v4131_v58, %v4130_v20  ;;  %v3881_v53 = vunpack.c.h.bf16 %v5100_v61 }
 0x471   : > { %v4152_v10 = vsel %vm7827_vm15, %v3995_v8, 0.0  ;;  %v4158_v5 = vsel %vm7829_vm9, %v3998_v47, 0.0  ;;  %vm7835_vm15 = vmmov %vm7804_vm0 }
 0x472   : > { %v4153_v3 = vadd.f32 %v4152_v10, %v4151_v56  ;;  %v3423_v26 = vpop.permute.xlu1 %3422  ;;  %v3435_v36 = vpop.permute.xlu0 %3434  ;;  %v3879_v56 = vunpack.c.h.bf16 %v5099_v55  ;;  %vm7837_vm9 = vmmov %vm7804_vm0 }
 0x473   : > { %v3997_v43 = vmul.f32 %v3869_v41, %v3423_v26  ;;  %v4000_v15 = vmul.f32 %v3872_v21, %v3435_v36  ;;  %v3880_v41 = vunpack.c.l.bf16 %v5100_v61  ;;  %v4133_v26 = vrot.slane %v4132_v62, 1 }
 0x474   : > { %v4155_v23 = vadd.f32 %v4154_v32, %v4153_v3  ;;  %3725 = vbcast.lane.b32.xlu1 %v7099_v38, 280  ;;  %3729 = vbcast.lane.b32.xlu0 %v7099_v38, 288  ;;  %v5101_v32 = vld [vmem:[%s5337_s17 + $0xa0] sm:$0xff]  }
 0x475   : > { %v4156_v63 = vsel %vm7804_vm0, %v3997_v43, 0.0  ;;  %v4162_v18 = vsel %vm7831_vm11, %v4000_v15, 0.0  ;;  %v3882_v47 = vunpack.c.l.bf16 %v5101_v32  ;;  %vm7839_vm11 = vmmov %vm7804_vm0 }
 0x476   : > { %v4157_v1 = vadd.f32 %v4156_v63, %v4155_v23  ;;  %v3431_v49 = vpop.permute.xlu1 %3430  ;;  %v3446_v16 = vpop.permute.xlu0 %3445 }
 0x477   : > { %v3999_v33 = vmul.f32 %v3871_v30, %v3431_v49  ;;  %v4002_v13 = vmul.f32 %v3874_v37, %v3446_v16 }
 0x478   : > { %v4159_v6 = vadd.f32 %v4158_v5, %v4157_v1  ;;  %3792 = vbcast.lane.b32.xlu1 %v7106_v46, 280  ;;  %3796 = vbcast.lane.b32.xlu0 %v7106_v46, 288  ;;  %v4134_v5 = vadd.f32 %v4133_v26, %v4132_v62 }
 0x479   : > { %v4160_v4 = vsel %vm7830_vm10, %v3999_v33, 0.0  ;;  %v4172_v25 = vsel %vm7833_vm13, %v4002_v13, 0.0  ;;  %vm7838_vm10 = vmmov %vm7804_vm0 }
 0x47a   : > { %v4161_v44 = vadd.f32 %v4160_v4, %v4159_v6  ;;  %v3439_v19 = vpop.permute.xlu1 %3438  ;;  %v3454_v34 = vpop.permute.xlu0 %3453  ;;  %v5102_v6 = vld [vmem:[%s5337_s17 + $0xa8] sm:$0xff]   ;;  %vm7842_vm13 = vmmov %vm7804_vm0 }
 0x47b   : > { %v4001_v9 = vmul.f32 %v3873_v27, %v3439_v19  ;;  %v4004_v52 = vmul.f32 %v3876_v57, %v3454_v34  ;;  %v3884_v4 = vunpack.c.l.bf16 %v5102_v6  ;;  %v3883_v19 = vunpack.c.h.bf16 %v5101_v32 }
 0x47c   : > { %v4163_v59 = vadd.f32 %v4162_v18, %v4161_v44  ;;  %3666 = vbcast.lane.b32.xlu1 %v7088_v31, 296  ;;  %3670 = vbcast.lane.b32.xlu0 %v7088_v31, 304 }
 0x47d   : > { %v4164_v35 = vsel %vm7832_vm12, %v4001_v9, 0.0  ;;  %v4175_v22 = vsel %vm7835_vm15, %v4004_v52, 0.0  ;;  %vm7840_vm12 = vmmov %vm7804_vm0 }
 0x47e   : > { %v4165_v50 = vadd.f32 %v4164_v35, %v4163_v59  ;;  %v3450_v48 = vpop.permute.xlu1 %3449  ;;  %v3462_v42 = vpop.permute.xlu0 %3461  ;;  %vm7844_vm15 = vmmov %vm7804_vm0 }
 0x47f   : > { %v4003_v39 = vmul.f32 %v3875_v29, %v3450_v48  ;;  %v4006_v17 = vmul.f32 %v3878_v11, %v3462_v42  ;;  %v5103_v29 = vld [vmem:[%s5337_s17 + $0xb0] sm:$0xff]   ;;  %v3885_v48 = vunpack.c.h.bf16 %v5102_v6  ;;  %v5104_v11 = vld [vmem:[%s5337_s17 + $0xb8] sm:$0xff]  }
 0x480   : > { %v4166_v7 = vrot.slane %v4165_v50, 4  ;;  %3733 = vbcast.lane.b32.xlu1 %v7099_v38, 296  ;;  %3737 = vbcast.lane.b32.xlu0 %v7099_v38, 304  ;;  %v3886_v59 = vunpack.c.l.bf16 %v5103_v29 }
 0x481   : > { %v4173_v40 = vsel %vm7834_vm14, %v4003_v39, 0.0  ;;  %v4179_v30 = vsel %vm7804_vm0, %v4006_v17, 0.0  ;;  %vm7843_vm14 = vmmov %vm7804_vm0 }
 0x482   : > { %v4167_v45 = vadd.f32 %v4166_v7, %v4165_v50  ;;  %v4174_v12 = vadd.f32 %v4173_v40, %v4172_v25  ;;  %v3458_v28 = vpop.permute.xlu1 %3457  ;;  %v3470_v2 = vpop.permute.xlu0 %3469 }
 0x483   : > { %v4005_v8 = vmul.f32 %v3877_v14, %v3458_v28  ;;  %v4008_v23 = vmul.f32 %v3880_v41, %v3470_v2  ;;  %v3888_v14 = vunpack.c.l.bf16 %v5104_v11 }
 0x484   : > { %v4168_v10 = vrot.slane %v4167_v45, 2  ;;  %v4176_v60 = vadd.f32 %v4175_v22, %v4174_v12  ;;  %3800 = vbcast.lane.b32.xlu1 %v7106_v46, 296  ;;  %3804 = vbcast.lane.b32.xlu0 %v7106_v46, 304 }
 0x485   : > { %v4177_v3 = vsel %vm7836_vm8, %v4005_v8, 0.0  ;;  %v4183_v37 = vsel %vm7838_vm10, %v4008_v23, 0.0  ;;  %vm7845_vm8 = vmmov %vm7804_vm0 }
 0x486   : > { %v4169_v51 = vadd.f32 %v4168_v10, %v4167_v45  ;;  %v4178_v21 = vadd.f32 %v4177_v3, %v4176_v60  ;;  %v3466_v36 = vpop.permute.xlu1 %3465  ;;  %v3478_v43 = vpop.permute.xlu0 %3477  ;;  %v3887_v45 = vunpack.c.h.bf16 %v5103_v29  ;;  %v5105_v3 = vld [vmem:[%s5337_s17 + $0xc0] sm:$0xff]   ;;  %vm7847_vm10 = vmmov %vm7804_vm0 }
 0x487   : > { %v4007_v63 = vmul.f32 %v3879_v56, %v3466_v36  ;;  %v4010_v20 = vmul.f32 %v3882_v47, %v3478_v43  ;;  %v3889_v56 = vunpack.c.h.bf16 %v5104_v11  ;;  %v3890_v26 = vunpack.c.l.bf16 %v5105_v3  ;;  %v5106_v43 = vld [vmem:[%s5337_s17 + $0xc8] sm:$0xff]  }
 0x488   : > { %v4170_v1 = vrot.slane %v4169_v51, 1  ;;  %v4180_v49 = vadd.f32 %v4179_v30, %v4178_v21  ;;  %3674 = vbcast.lane.b32.xlu1 %v7088_v31, 312  ;;  %3678 = vbcast.lane.b32.xlu0 %v7088_v31, 320  ;;  %v3892_v30 = vunpack.c.l.bf16 %v5106_v43  ;;  %v3891_v23 = vunpack.c.h.bf16 %v5105_v3 }
 0x489   : > { %v4181_v16 = vsel %vm7837_vm9, %v4007_v63, 0.0  ;;  %v4187_v35 = vsel %vm7840_vm12, %v4010_v20, 0.0  ;;  %vm7846_vm9 = vmmov %vm7804_vm0 }
 0x48a   : > { %v4171_v15 = vadd.f32 %v4170_v1, %v4169_v51  ;;  %v4182_v33 = vadd.f32 %v4181_v16, %v4180_v49  ;;  %v3474_v27 = vpop.permute.xlu1 %3473  ;;  %v3486_v54 = vpop.permute.xlu0 %3485  ;;  %vm7849_vm12 = vmmov %vm7804_vm0 }
 0x48b   : > { %v4009_v44 = vmul.f32 %v3881_v53, %v3474_v27  ;;  %v4012_v58 = vmul.f32 %v3884_v4, %v3486_v54  ;;  %v5107_v27 = vld [vmem:[%s5337_s17 + $0xd0] sm:$0xff]   ;;  %v3893_v4 = vunpack.c.h.bf16 %v5106_v43 }
 0x48c   : > { %v7170_v34 = vsel %vm3281_vm1, %v4171_v15, %v4134_v5  ;;  %v4184_v18 = vadd.f32 %v4183_v37, %v4182_v33  ;;  %3741 = vbcast.lane.b32.xlu1 %v7099_v38, 312  ;;  %3745 = vbcast.lane.b32.xlu0 %v7099_v38, 320  ;;  %vm7841_vm1 = vmmov %vm7804_vm0  ;;  %v3894_v6 = vunpack.c.l.bf16 %v5107_v27 }
 0x48d   : > { %v4185_v9 = vsel %vm7839_vm11, %v4009_v44, 0.0  ;;  %v4191_v25 = vsel %vm7842_vm13, %v4012_v58, 0.0  ;;  %vm7848_vm11 = vmmov %vm7804_vm0 }
 0x48e   : > { %v4186_v24 = vadd.f32 %v4185_v9, %v4184_v18  ;;  %v3482_v57 = vpop.permute.xlu1 %3481  ;;  %v3494_v13 = vpop.permute.xlu0 %3493  ;;  %v5108_v9 = vld [vmem:[%s5337_s17 + $0xd8] sm:$0xff]   ;;  %vm7851_vm13 = vmmov %vm7804_vm0 }
 0x48f   : > { %v4011_v50 = vmul.f32 %v3883_v19, %v3482_v57  ;;  %v4014_v40 = vmul.f32 %v3886_v59, %v3494_v13 }
 0x490   : > { %v4188_v42 = vadd.f32 %v4187_v35, %v4186_v24  ;;  %3808 = vbcast.lane.b32.xlu1 %v7106_v46, 312  ;;  %3812 = vbcast.lane.b32.xlu0 %v7106_v46, 320  ;;  %v3896_v24 = vunpack.c.l.bf16 %v5108_v9  ;;  %v3895_v35 = vunpack.c.h.bf16 %v5107_v27 }
 0x491   : > { %v4189_v52 = vsel %vm7841_vm1, %v4011_v50, 0.0  ;;  %v4195_v22 = vsel %vm7844_vm15, %v4014_v40, 0.0  ;;  %vm7850_vm1 = vmmov %vm7804_vm0 }
 0x492   : > { %v4190_v39 = vadd.f32 %v4189_v52, %v4188_v42  ;;  %v3490_v55 = vpop.permute.xlu1 %3489  ;;  %v3502_v7 = vpop.permute.xlu0 %3501  ;;  %vm7853_vm15 = vmmov %vm7804_vm0 }
 0x493   : > { %v4013_v62 = vmul.f32 %v3885_v48, %v3490_v55  ;;  %v4016_v17 = vmul.f32 %v3888_v14, %v3502_v7  ;;  %v5109_v55 = vld [vmem:[%s5337_s17 + $0xe0] sm:$0xff]  }
 0x494   : > { %v4192_v12 = vadd.f32 %v4191_v25, %v4190_v39  ;;  %3682 = vbcast.lane.b32.xlu1 %v7088_v31, 328  ;;  %3686 = vbcast.lane.b32.xlu0 %v7088_v31, 336  ;;  %v3898_v11 = vunpack.c.l.bf16 %v5109_v55  ;;  %v3899_v3 = vunpack.c.h.bf16 %v5109_v55 }
 0x495   : > { %v4193_v28 = vsel %vm7843_vm14, %v4013_v62, 0.0  ;;  %v4199_v32 = vsel %vm7804_vm0, %v4016_v17, 0.0  ;;  %v3897_v62 = vunpack.c.h.bf16 %v5108_v9  ;;  %vm7852_vm14 = vmmov %vm7804_vm0 }
 0x496   : > { %v4194_v61 = vadd.f32 %v4193_v28, %v4192_v12  ;;  %v3498_v41 = vpop.permute.xlu1 %3497  ;;  %v3513_v2 = vpop.permute.xlu0 %3512 }
 0x497   : > { %v4015_v8 = vmul.f32 %v3887_v45, %v3498_v41  ;;  %v4018_v53 = vmul.f32 %v3890_v26, %v3513_v2 }
 0x498   : > { %v4196_v10 = vadd.f32 %v4195_v22, %v4194_v61  ;;  %3749 = vbcast.lane.b32.xlu1 %v7099_v38, 328  ;;  %3623 = vbcast.lane.b32.xlu0 %v7060_v0, 344  ;;  %v5110_v22 = vld [vmem:[%s5337_s17 + $0xe8] sm:$0xff]  }
 0x499   : > { %v4197_v60 = vsel %vm7845_vm8, %v4015_v8, 0.0  ;;  %v4209_v37 = vsel %vm7847_vm10, %v4018_v53, 0.0  ;;  %v3900_v17 = vunpack.c.l.bf16 %v5110_v22  ;;  %vm7854_vm8 = vmmov %vm7804_vm0 }
 0x49a   : > { %v4198_v51 = vadd.f32 %v4197_v60, %v4196_v10  ;;  %v3506_v21 = vpop.permute.xlu1 %3505  ;;  %v3521_v36 = vpop.permute.xlu0 %3520  ;;  %vm7857_vm10 = vmmov %vm7804_vm0 }
 0x49b   : > { %v4017_v47 = vmul.f32 %v3889_v56, %v3506_v21  ;;  %v4020_v15 = vmul.f32 %v3892_v30, %v3521_v36 }
 0x49c   : > { %v4200_v63 = vadd.f32 %v4199_v32, %v4198_v51  ;;  %3816 = vbcast.lane.b32.xlu1 %v7106_v46, 328  ;;  %3690 = vbcast.lane.b32.xlu0 %v7088_v31, 344 }
 0x49d   : > { %v4201_v1 = vsel %vm7846_vm9, %v4017_v47, 0.0  ;;  %v4212_v29 = vsel %vm7849_vm12, %v4020_v15, 0.0  ;;  %v5111_v47 = vld [vmem:[%s5337_s17 + $0xf0] sm:$0xff]   ;;  %v5112_v15 = vld [vmem:[%s5337_s17 + $0xf8] sm:$0xff]   ;;  %vm7856_vm9 = vmmov %vm7804_vm0 }
 0x49e   : > { %v4202_v49 = vadd.f32 %v4201_v1, %v4200_v63  ;;  %v3517_v16 = vpop.permute.xlu1 %3516  ;;  %v3529_v5 = vpop.permute.xlu0 %3528  ;;  %v3902_v43 = vunpack.c.l.bf16 %v5111_v47  ;;  %v3901_v1 = vunpack.c.h.bf16 %v5110_v22  ;;  %vm7859_vm12 = vmmov %vm7804_vm0 }
 0x49f   : > { %v4019_v33 = vmul.f32 %v3891_v23, %v3517_v16  ;;  %v4022_v59 = vmul.f32 %v3894_v6, %v3529_v5 }
 0x4a0   : > { %v4203_v54 = vrot.slane %v4202_v49, 4  ;;  %3753 = vbcast.lane.b32.xlu1 %v7099_v38, 336  ;;  %3627 = vbcast.lane.b32.xlu0 %v7060_v0, 352 }
 0x4a1   : > { %v4210_v20 = vsel %vm7848_vm11, %v4019_v33, 0.0  ;;  %v4216_v7 = vsel %vm7851_vm13, %v4022_v59, 0.0  ;;  %v3904_v33 = vunpack.c.l.bf16 %v5112_v15  ;;  %vm7858_vm11 = vmmov %vm7804_vm0  ;;  %v3905_v59 = vunpack.c.h.bf16 %v5112_v15 }
 0x4a2   : > { %v4204_v44 = vadd.f32 %v4203_v54, %v4202_v49  ;;  %v4211_v19 = vadd.f32 %v4210_v20, %v4209_v37  ;;  %v3525_v18 = vpop.permute.xlu1 %3524  ;;  %v3537_v57 = vpop.permute.xlu0 %3536  ;;  %v3903_v37 = vunpack.c.h.bf16 %v5111_v47  ;;  %vm7861_vm13 = vmmov %vm7804_vm0 }
 0x4a3   : > { %v4021_v13 = vmul.f32 %v3893_v4, %v3525_v18  ;;  %v4024_v25 = vmul.f32 %v3896_v24, %v3537_v57 }
 0x4a4   : > { %v4205_v58 = vrot.slane %v4204_v44, 2  ;;  %v4213_v50 = vadd.f32 %v4212_v29, %v4211_v19  ;;  %3820 = vbcast.lane.b32.xlu1 %v7106_v46, 336  ;;  %3694 = vbcast.lane.b32.xlu0 %v7088_v31, 352 }
 0x4a5   : > { %v4214_v48 = vsel %vm7850_vm1, %v4021_v13, 0.0  ;;  %v4220_v56 = vsel %vm7853_vm15, %v4024_v25, 0.0  ;;  %vm7860_vm1 = vmmov %vm7804_vm0 }
 0x4a6   : > { %v4206_v42 = vadd.f32 %v4205_v58, %v4204_v44  ;;  %v4215_v52 = vadd.f32 %v4214_v48, %v4213_v50  ;;  %v3533_v39 = vpop.permute.xlu1 %3532  ;;  %v3545_v14 = vpop.permute.xlu0 %3544  ;;  %v5113_v58 = vld [vmem:[%s5337_s17 + $0x100] sm:$0xff]   ;;  %vm7863_vm15 = vmmov %vm7804_vm0 }
 0x4a7   : > { %v4023_v40 = vmul.f32 %v3895_v35, %v3533_v39  ;;  %v4026_v10 = vmul.f32 %v3898_v11, %v3545_v14  ;;  %v3906_v50 = vunpack.c.l.bf16 %v5113_v58  ;;  %v5114_v11 = vld [vmem:[%s5337_s17 + $0x108] sm:$0xff]  }
 0x4a8   : > { %v4207_v45 = vrot.slane %v4206_v42, 1  ;;  %v4217_v12 = vadd.f32 %v4216_v7, %v4215_v52  ;;  %3757 = vbcast.lane.b32.xlu1 %v7099_v38, 344  ;;  %3631 = vbcast.lane.b32.xlu0 %v7060_v0, 360  ;;  %v3908_v14 = vunpack.c.l.bf16 %v5114_v11  ;;  %v3907_v7 = vunpack.c.h.bf16 %v5113_v58  ;;  %v5119_v58 = vld [vmem:[%s5337_s17 + $0x140] sm:$0xff]  }
 0x4a9   : > { %v4218_v28 = vsel %vm7852_vm14, %v4023_v40, 0.0  ;;  %v4224_v23 = vsel %vm7804_vm0, %v4026_v10, 0.0  ;;  %v3909_v22 = vunpack.c.h.bf16 %v5114_v11  ;;  %vm7862_vm14 = vmmov %vm7804_vm0 }
 0x4aa   : > { %v4208_v61 = vadd.f32 %v4207_v45, %v4206_v42  ;;  %v4219_v41 = vadd.f32 %v4218_v28, %v4217_v12  ;;  %v3541_v2 = vpop.permute.xlu1 %3540  ;;  %v3553_v8 = vpop.permute.xlu0 %3552 }
 0x4ab   : > { %v4025_v60 = vmul.f32 %v3897_v62, %v3541_v2  ;;  %v4028_v63 = vmul.f32 %v3900_v17, %v3553_v8 }
 0x4ac   : > { %v7214_v26 = vsel %vm3283_vm2, %v4208_v61, %v7170_v34  ;;  %v4221_v51 = vadd.f32 %v4220_v56, %v4219_v41  ;;  %3824 = vbcast.lane.b32.xlu1 %v7106_v46, 344  ;;  %3698 = vbcast.lane.b32.xlu0 %v7088_v31, 360  ;;  %vm7855_vm2 = vmmov %vm7804_vm0  ;;  %v5115_v41 = vld [vmem:[%s5337_s17 + $0x110] sm:$0xff]  }
 0x4ad   : > { %v4222_v21 = vsel %vm7854_vm8, %v4025_v60, 0.0  ;;  %v4228_v6 = vsel %vm7856_vm9, %v4028_v63, 0.0  ;;  %v3910_v2 = vunpack.c.l.bf16 %v5115_v41  ;;  %vm7864_vm8 = vmmov %vm7804_vm0 }
 0x4ae   : > { %v4223_v36 = vadd.f32 %v4222_v21, %v4221_v51  ;;  %v3549_v32 = vpop.permute.xlu1 %3548  ;;  %v3561_v30 = vpop.permute.xlu0 %3560  ;;  %vm7866_vm9 = vmmov %vm7804_vm0 }
 0x4af   : > { %v4027_v53 = vmul.f32 %v3899_v3, %v3549_v32  ;;  %v4030_v4 = vmul.f32 %v3902_v43, %v3561_v30  ;;  %v5116_v3 = vld [vmem:[%s5337_s17 + $0x118] sm:$0xff]   ;;  %v3911_v43 = vunpack.c.h.bf16 %v5115_v41 }
 0x4b0   : > { %v4225_v34 = vadd.f32 %v4224_v23, %v4223_v36  ;;  %3761 = vbcast.lane.b32.xlu1 %v7099_v38, 352  ;;  %3635 = vbcast.lane.b32.xlu0 %v7060_v0, 368  ;;  %v3912_v51 = vunpack.c.l.bf16 %v5116_v3 }
 0x4b1   : > { %v4226_v49 = vsel %vm7855_vm2, %v4027_v53, 0.0  ;;  %v4232_v24 = vsel %vm7858_vm11, %v4030_v4, 0.0  ;;  %vm7865_vm2 = vmmov %vm7804_vm0 }
 0x4b2   : > { %v4227_v16 = vadd.f32 %v4226_v49, %v4225_v34  ;;  %v3557_v5 = vpop.permute.xlu1 %3556  ;;  %v3569_v27 = vpop.permute.xlu0 %3568  ;;  %v5117_v34 = vld [vmem:[%s5337_s17 + $0x120] sm:$0xff]   ;;  %vm7868_vm11 = vmmov %vm7804_vm0 }
 0x4b3   : > { %v4029_v54 = vmul.f32 %v3901_v1, %v3557_v5  ;;  %v4032_v57 = vmul.f32 %v3904_v33, %v3569_v27  ;;  %v3914_v49 = vunpack.c.l.bf16 %v5117_v34  ;;  %v3913_v27 = vunpack.c.h.bf16 %v5116_v3 }
 0x4b4   : > { %v4229_v20 = vadd.f32 %v4228_v6, %v4227_v16  ;;  %3828 = vbcast.lane.b32.xlu1 %v7106_v46, 352  ;;  %3702 = vbcast.lane.b32.xlu0 %v7088_v31, 368 }
 0x4b5   : > { %v4230_v44 = vsel %vm7857_vm10, %v4029_v54, 0.0  ;;  %v4236_v39 = vsel %vm7860_vm1, %v4032_v57, 0.0  ;;  %vm7867_vm10 = vmmov %vm7804_vm0 }
 0x4b6   : > { %v4231_v19 = vadd.f32 %v4230_v44, %v4229_v20  ;;  %v3565_v18 = vpop.permute.xlu1 %3564  ;;  %v3580_v9 = vpop.permute.xlu0 %3579 }
 0x4b7   : > { %v4031_v29 = vmul.f32 %v3903_v37, %v3565_v18 }
 0x4b8   : > { %v4233_v13 = vadd.f32 %v4232_v24, %v4231_v19  ;;  %3765 = vbcast.lane.b32.xlu1 %v7099_v38, 360  ;;  %3639 = vbcast.lane.b32.xlu0 %v7060_v0, 376  ;;  %v4034_v0 = vmul.f32 %v3906_v50, %v3580_v9  ;;  %v7253_v19 = vld [vmem:[%s5337_s17 + $0x128] sm:$0xff]   ;;  %v3923_v50 = vunpack.c.h.bf16 %v5119_v58 }
 0x4b9   : > { %v4234_v35 = vsel %vm7859_vm12, %v4031_v29, 0.0  ;;  %v3916_v18 = vunpack.c.l.bf16 %v7253_v19  ;;  %vm7869_vm12 = vmmov %vm7804_vm0 }
 0x4ba   : > { %v4235_v48 = vadd.f32 %v4234_v35, %v4233_v13  ;;  %v3573_v42 = vpop.permute.xlu1 %3572  ;;  %v3588_v52 = vpop.permute.xlu0 %3587  ;;  %v4246_v8 = vsel %vm7862_vm14, %v4034_v0, 0.0  ;;  %v5120_v0 = vld [vmem:[%s5337_s17 + $0x180] sm:$0xff]  }
 0x4bb   : > { %v4033_v55 = vmul.f32 %v3905_v59, %v3573_v42  ;;  %v4036_v28 = vmul.f32 %v3908_v14, %v3588_v52  ;;  %v3915_v59 = vunpack.c.h.bf16 %v5117_v34  ;;  %v3922_v14 = vunpack.c.l.bf16 %v5119_v58 }
 0x4bc   : > { %v4237_v25 = vadd.f32 %v4236_v39, %v4235_v48  ;;  %3832 = vbcast.lane.b32.xlu1 %v7106_v46, 360  ;;  %3706 = vbcast.lane.b32.xlu0 %v7088_v31, 376 }
 0x4bd   : > { %v4238_v40 = vsel %vm7861_vm13, %v4033_v55, 0.0  ;;  %v4249_v36 = vsel %vm7864_vm8, %v4036_v28, 0.0 }
 0x4be   : > { %v4239_v62 = vadd.f32 %v4238_v40, %v4237_v25  ;;  %v3584_v45 = vpop.permute.xlu1 %3583  ;;  %v3596_v12 = vpop.permute.xlu0 %3595  ;;  %v3939_v40 = vunpack.c.h.bf16 %v5120_v0 }
 0x4bf   : > { %v4035_v61 = vmul.f32 %v3907_v7, %v3584_v45  ;;  %v4038_v32 = vmul.f32 %v3910_v2, %v3596_v12 }
 0x4c0   : > { %v4240_v17 = vrot.slane %v4239_v62, 4  ;;  %3769 = vbcast.lane.b32.xlu1 %v7099_v38, 368  ;;  %3773 = vbcast.lane.b32.xlu0 %v7099_v38, 376 }
 0x4c1   : > { %v4247_v31 = vsel %vm7863_vm15, %v4035_v61, 0.0  ;;  %v4253_v5 = vsel %vm7865_vm2, %v4038_v32, 0.0 }
 0x4c2   : > { %v4241_v56 = vadd.f32 %v4240_v17, %v4239_v62  ;;  %v4248_v10 = vadd.f32 %v4247_v31, %v4246_v8  ;;  %v3592_v60 = vpop.permute.xlu1 %3591  ;;  %v3604_v21 = vpop.permute.xlu0 %3603 }
 0x4c3   : > { %v4037_v47 = vmul.f32 %v3909_v22, %v3592_v60  ;;  %v4040_v15 = vmul.f32 %v3912_v51, %v3604_v21 }
 0x4c4   : > { %v4242_v30 = vrot.slane %v4241_v56, 2  ;;  %v4250_v23 = vadd.f32 %v4249_v36, %v4248_v10  ;;  %3836 = vbcast.lane.b32.xlu1 %v7106_v46, 368 }
 0x4c5   : > { %v4251_v38 = vsel %vm7804_vm0, %v4037_v47, 0.0  ;;  %v4257_v24 = vsel %vm7867_vm10, %v4040_v15, 0.0 }
 0x4c6   : > { %v4243_v63 = vadd.f32 %v4242_v30, %v4241_v56  ;;  %v4252_v53 = vadd.f32 %v4251_v38, %v4250_v23  ;;  %v3600_v1 = vpop.permute.xlu1 %3599  ;;  %v3612_v16 = vpop.permute.xlu0 %3611 }
 0x4c7   : > { %v4039_v33 = vmul.f32 %v3911_v43, %v3600_v1  ;;  %v4042_v57 = vmul.f32 %v3914_v49, %v3612_v16 }
 0x4c8   : > { %v4244_v6 = vrot.slane %v4243_v63, 1  ;;  %v4254_v4 = vadd.f32 %v4253_v5, %v4252_v53  ;;  %3840 = vbcast.lane.b32.xlu1 %v7106_v46, 376 }
 0x4c9   : > { %v4255_v54 = vsel %vm7866_vm9, %v4039_v33, 0.0  ;;  %v4261_v39 = vsel %vm7869_vm12, %v4042_v57, 0.0 }
 0x4ca   : > { %v4245_v37 = vadd.f32 %v4244_v6, %v4243_v63  ;;  %v4256_v20 = vadd.f32 %v4255_v54, %v4254_v4  ;;  %v3608_v44 = vpop.permute.xlu1 %3607  ;;  %v3620_v9 = vpop.permute.xlu0 %3619 }
 0x4cb   : > { %v4041_v29 = vmul.f32 %v3913_v27, %v3608_v44  ;;  %v4044_v55 = vmul.f32 %v3916_v18, %v3620_v9 }
 0x4cc   : > { %v7259_v46 = vsel %vm3285_vm3, %v4245_v37, %v7214_v26  ;;  %v4258_v13 = vadd.f32 %v4257_v24, %v4256_v20  ;;  %vm7870_vm3 = vmmov %vm7804_vm0 }
 0x4cd   : > { %v4259_v35 = vsel %vm7868_vm11, %v4041_v29, 0.0 }
 0x4ce   : > { %v4260_v48 = vadd.f32 %v4259_v35, %v4258_v13  ;;  %v3616_v42 = vpop.permute.xlu1 %3615  ;;  %v3651_v52 = vpop.permute.xlu0 %3650 }
 0x4cf   : > { %v4043_v11 = vmul.f32 %v3915_v59, %v3616_v42  ;;  %v4051_v25 = vmul.f32 %v3923_v50, %v3651_v52 }
 0x4d0   : > { %v4262_v7 = vadd.f32 %v4261_v39, %v4260_v48 }
 0x4d1   : > { %v4263_v26 = vsel %vm7870_vm3, %v4043_v11, 0.0 }
 0x4d2   : > { %v4264_v62 = vadd.f32 %v4263_v26, %v4262_v7  ;;  %v3647_v45 = vpop.permute.xlu1 %3646  ;;  %v3718_v12 = vpop.permute.xlu0 %3717 }
 0x4d3   : > { %5158 = shalt.err (!%p5155_p4)
}
 0x4d4   : > { %s5159_s18 = scalar_lea.hbm %s7270_s10, 128  ;;  %s5163_s9 = scalar_lea.hbm %s7684_s6, 256 }
 0x4d5   : > { %p5160_p7 = scmp.ne.s32.totalorder %s7270_s10, %s5159_s18  ;;  %p5164_p10 = scmp.lt.u32.totalorder %s7270_s10, %s7684_s6 }
 0x4d6   : > { %p5165_p11 = scmp.lt.u32.totalorder %s5163_s9, %s5159_s18  ;;  %p5167_p13 = scmp.lt.u32.totalorder %s5159_s18, %s7270_s10 }
 0x4d7   : > { %p5161_p8 = pnand %p5160_p7, %p5317_p5 }
 0x4d8   : > { %p5166_p12 = por %p5165_p11, %p5164_p10 }
 0x4d9   : > { %p5162_p9 = pneg %p5161_p8 }
 0x4da   : > { %p5168_p0 = por %p5167_p13, %p5166_p12 }
 0x4dc   : > { %p5169_p1 = pnand %p5168_p0, %p5162_p9 }
 0x4de   : > { %5172 = shalt.err (!%p5169_p1)
}
 0x4df   : > { %4899 = dma.vmem_to_hbm [thread:$0]  (%p5317_p5), %s7275_s11, 128, %s7270_s10, %s4418_s12   ;;  %vm7871_vm1 = vmmov %vm7804_vm0  ;;  %v4050_v61 = vmul.f32 %v3922_v14, %v3647_v45  ;;  %v3938_v41 = vunpack.c.l.bf16 %v5120_v0  ;;  %v4067_v8 = vmul.f32 %v3939_v40, %v3718_v12  ;;  %v3714_v56 = vpop.permute.xlu1 %3713  ;;  %v3781_v10 = vpop.permute.xlu0 %3780  ;;  %v5121_v3 = vld [vmem:[%s5337_s17 + $0x148] sm:$0xff]   ;;  %v5122_v32 = vld [vmem:[%s5337_s17 + $0x1c0] sm:$0xff]  }
 0x4e0   : > { %v4265_v28 = vsel %vm7871_vm1, %v4044_v55, 0.0  ;;  %vm7872_vm13 = vmmov %vm7804_vm0  ;;  %v3924_v51 = vunpack.c.l.bf16 %v5121_v3  ;;  %v3954_v47 = vunpack.c.l.bf16 %v5122_v32  ;;  %v3955_v63 = vunpack.c.h.bf16 %v5122_v32  ;;  %v5123_v11 = vld [vmem:[%s5337_s17 + $0x188] sm:$0xff]   ;;  %s7633_s13 = scalar_lea.hbm %s7683_s5, %s4691_s28  ;;  %s4413_s16 = scalar_lea.sflag [#allocation3], %s7033_s19 }
 0x4e1   : > { %v7300_v2 = vadd.f32 %v4265_v28, %v4264_v62  ;;  %v4284_v22 = vsel %vm7872_vm13, %v4051_v25, 0.0  ;;  %vm7873_vm14 = vmmov %vm7804_vm0  ;;  %v4066_v60 = vmul.f32 %v3938_v41, %v3714_v56  ;;  %v3925_v55 = vunpack.c.h.bf16 %v5121_v3  ;;  %v5124_v7 = vld [vmem:[%s5337_s17 + $0x1c8] sm:$0xff]   ;;  %v5125_v25 = vld [vmem:[%s5337_s17 + $0x150] sm:$0xff]   ;;  %s5243_s25 = smov [#allocation2]  }
 0x4e2   : > { %v4283_v17 = vsel %vm7873_vm14, %v4050_v61, 0.0  ;;  %vm7874_vm15 = vmmov %vm7804_vm0  ;;  %v4082_v53 = vmul.f32 %v3954_v47, %v3781_v10  ;;  %v3940_v14 = vunpack.c.l.bf16 %v5123_v11  ;;  %v3956_v26 = vunpack.c.l.bf16 %v5124_v7  ;;  %v7365_v28 = vld [vmem:[%s5337_s17 + $0x190] sm:$0xff]   ;;  %v7388_v47 = vld [vmem:[%s5337_s17 + $0x160] sm:$0xff]  }
 0x4e3   : > { %v4285_v31 = vadd.f32 %v4284_v22, %v4283_v17  ;;  %v4321_v21 = vsel %vm7874_vm15, %v4067_v8, 0.0  ;;  %vm7875_vm8 = vmmov %vm7804_vm0  ;;  %v3655_v30 = vpop.permute.xlu1 %3654  ;;  %v7310_v23 = vpop.permute.xlu0 %3721  ;;  %v3926_v0 = vunpack.c.l.bf16 %v5125_v25  ;;  %v3941_v12 = vunpack.c.h.bf16 %v5123_v11  ;;  %v7369_v22 = vld [vmem:[%s5337_s17 + $0x1d0] sm:$0xff]  }
 0x4e4   : > { %v4320_v36 = vsel %vm7875_vm8, %v4066_v60, 0.0  ;;  %v4052_v38 = vmul.f32 %v3924_v51, %v3655_v30  ;;  %vm7876_vm2 = vmmov %vm7804_vm0  ;;  %v3942_v61 = vunpack.c.l.bf16 %v7365_v28  ;;  %v3957_v41 = vunpack.c.h.bf16 %v5124_v7  ;;  %v7378_v60 = vld [vmem:[%s5337_s17 + $0x198] sm:$0xff]   ;;  %v7409_v7 = vld [vmem:[%s5337_s17 + $0x168] sm:$0xff]  }
 0x4e5   : > { %v7308_v43 = vadd.f32 %v4321_v21, %v4320_v36  ;;  %v4357_v15 = vsel %vm7876_vm2, %v4082_v53, 0.0  ;;  %vm7877_vm9 = vmmov %vm7804_vm0  ;;  %v3958_v17 = vunpack.c.l.bf16 %v7369_v22  ;;  %v3927_v8 = vunpack.c.h.bf16 %v5125_v25  ;;  %v7383_v21 = vld [vmem:[%s5337_s17 + $0x1d8] sm:$0xff]   ;;  %v7421_v25 = vld [vmem:[%s5337_s17 + $0x1a8] sm:$0xff]  }
 0x4e6   : > { %v4286_v1 = vsel %vm7804_vm0, %v4052_v38, 0.0  ;;  %v3943_v10 = vunpack.c.h.bf16 %v7365_v28  ;;  %v3944_v3 = vunpack.c.l.bf16 %v7378_v60  ;;  %v3959_v51 = vunpack.c.h.bf16 %v7369_v22  ;;  %vm7878_vm10 = vmmov %vm7804_vm0  ;;  %v7427_v11 = vld [vmem:[%s5337_s17 + $0x130] sm:$0xff]  }
 0x4e7   : > { %v7313_v34 = vadd.f32 %v4286_v1, %v4285_v31  ;;  %v3785_v49 = vpop.permute.xlu1 %3784  ;;  %v7315_v16 = vpop.permute.xlu0 %3788  ;;  %v7373_v31 = vld [vmem:[%s5337_s17 + $0x158] sm:$0xff]   ;;  %v3930_v30 = vunpack.c.l.bf16 %v7388_v47  ;;  %v3945_v38 = vunpack.c.h.bf16 %v7378_v60  ;;  %vm7879_vm11 = vmmov %vm7804_vm0 }
 0x4e8   : > { %v4083_v5 = vmul.f32 %v3955_v63, %v3785_v49  ;;  %v3928_v56 = vunpack.c.l.bf16 %v7373_v31  ;;  %v3929_v32 = vunpack.c.h.bf16 %v7373_v31  ;;  %v7393_v63 = vld [vmem:[%s5337_s17 + $0x1a0] sm:$0xff]   ;;  %v4084_v53 = vmul.f32 %v3956_v26, %v7315_v16  ;;  %v7435_v16 = vld [vmem:[%s5337_s17 + $0x1e8] sm:$0xff]   ;;  %v7439_v26 = vld [vmem:[%s5337_s17 + $0x170] sm:$0xff]  }
 0x4e9   : > { %vm7880_vm12 = vmmov %vm7804_vm0 }
 0x4ea   : > { %v4358_v33 = vsel %vm7877_vm9, %v4083_v5, 0.0  ;;  %vm7881_vm3 = vmmov %vm7804_vm0 }
 0x4eb   : > { %v7319_v27 = vadd.f32 %v4358_v33, %v4357_v15  ;;  %v3659_v6 = vpop.permute.xlu1 %3658  ;;  %v7321_v4 = vpop.permute.xlu0 %3662  ;;  %v4068_v15 = vmul.f32 %v3940_v14, %v7310_v23  ;;  %vm7882_vm1 = vmmov %vm7804_vm0 }
 0x4ec   : > { %v4053_v45 = vmul.f32 %v3925_v55, %v3659_v6  ;;  %v7404_v6 = vld [vmem:[%s5337_s17 + $0x1e0] sm:$0xff]   ;;  %v4054_v14 = vmul.f32 %v3926_v0, %v7321_v4  ;;  %vm7883_vm13 = vmmov %vm7804_vm0 }
 0x4ed   : > { %vm7884_vm14 = vmmov %vm7804_vm0 }
 0x4ee   : > { %v4288_v33 = vsel %vm7878_vm10, %v4053_v45, 0.0  ;;  %vm7885_vm15 = vmmov %vm7804_vm0 }
 0x4ef   : > { %v7323_v54 = vpop.permute.xlu1 %3725  ;;  %v7325_v37 = vpop.permute.xlu0 %3729  ;;  %v4289_v36 = vadd.f32 %v4288_v33, %v7313_v34  ;;  %v7450_v34 = vld [vmem:[%s5337_s17 + $0x1b0] sm:$0xff]   ;;  %vm7886_vm8 = vmmov %vm7804_vm0 }
 0x4f0   : > { %v4069_v45 = vmul.f32 %v3941_v12, %v7323_v54  ;;  %v4323_v54 = vsel %vm7879_vm11, %v4068_v15, 0.0  ;;  %v4290_v15 = vsel %vm7880_vm12, %v4054_v14, 0.0  ;;  %v4070_v23 = vmul.f32 %v3942_v61, %v7325_v37  ;;  %vm7887_vm2 = vmmov %vm7804_vm0 }
 0x4f1   : > { %v4324_v12 = vadd.f32 %v4323_v54, %v7308_v43  ;;  %v4291_v33 = vadd.f32 %v4290_v15, %v4289_v36  ;;  %v7466_v36 = vld [vmem:[%s5337_s17 + $0x138] sm:$0xff]   ;;  %vm7888_vm9 = vmmov %vm7804_vm0 }
 0x4f2   : > { %v3920_v37 = vunpack.c.l.bf16 %v7466_v36  ;;  %vm7889_vm10 = vmmov %vm7804_vm0 }
 0x4f3   : > { %v7327_v20 = vpop.permute.xlu1 %3792  ;;  %v7329_v44 = vpop.permute.xlu0 %3796  ;;  %vm7893_vm11 = vmmov %vm7804_vm0 }
 0x4f4   : > { %v4086_v61 = vmul.f32 %v3958_v17, %v7329_v44  ;;  %v3921_v44 = vunpack.c.h.bf16 %v7466_v36  ;;  %vm7894_vm12 = vmmov %vm7804_vm0 }
 0x4f7   : > { %v3667_v18 = vpop.permute.xlu1 %3666  ;;  %v7331_v9 = vpop.permute.xlu0 %3670 }
 0x4f8   : > { %v4055_v55 = vmul.f32 %v3927_v8, %v3667_v18  ;;  %v4085_v18 = vmul.f32 %v3957_v41, %v7327_v20  ;;  %v4325_v20 = vsel %vm7881_vm3, %v4069_v45, 0.0  ;;  %v4360_v8 = vsel %vm7883_vm13, %v4084_v53, 0.0  ;;  %vm7895_vm3 = vmmov %vm7804_vm0 }
 0x4f9   : > { %v4056_v45 = vmul.f32 %v3928_v56, %v7331_v9  ;;  %v4361_v43 = vadd.f32 %v4360_v8, %v7319_v27  ;;  %v4326_v53 = vadd.f32 %v4325_v20, %v4324_v12  ;;  %v7476_v56 = vld [vmem:[%s5337_s17 + $0x1f0] sm:$0xff]   ;;  %v3951_v12 = vunpack.c.h.bf16 %v7450_v34  ;;  %vm7901_vm13 = vmmov %vm7804_vm0 }
 0x4fa   : > { %v4292_v41 = vsel %vm7882_vm1, %v4055_v55, 0.0  ;;  %v4362_v55 = vsel %vm7884_vm14, %v4085_v18, 0.0  ;;  %v3967_v17 = vunpack.c.h.bf16 %v7476_v56  ;;  %vm7897_vm1 = vmmov %vm7804_vm0 }
 0x4fb   : > { %v7333_v24 = vpop.permute.xlu1 %3733  ;;  %v7335_v57 = vpop.permute.xlu0 %3737  ;;  %v4293_v54 = vadd.f32 %v4292_v41, %v4291_v33  ;;  %v4294_v22 = vsel %vm7886_vm8, %v4056_v45, 0.0  ;;  %vm7902_vm14 = vmmov %vm7804_vm0 }
 0x4fc   : > { %v4071_v4 = vmul.f32 %v3943_v10, %v7333_v24  ;;  %v3966_v24 = vunpack.c.l.bf16 %v7476_v56  ;;  %v4363_v10 = vadd.f32 %v4362_v55, %v4361_v43  ;;  %v4072_v20 = vmul.f32 %v3944_v3, %v7335_v57  ;;  %vm7907_vm8 = vmmov %vm7804_vm0 }
 0x4fd   : > { %v4295_v15 = vadd.f32 %v4294_v22, %v4293_v54  ;;  %v4364_v55 = vsel %vm7888_vm9, %v4086_v61, 0.0  ;;  %v7523_v22 = vld [vmem:[%s5337_s17 + $0x1f8] sm:$0xff]   ;;  %vm7911_vm9 = vmmov %vm7804_vm0 }
 0x4fe   : > { %v4365_v43 = vadd.f32 %v4364_v55, %v4363_v10 }
 0x4ff   : > { %v7337_v29 = vpop.permute.xlu1 %3800  ;;  %v7339_v59 = vpop.permute.xlu0 %3804 }
 0x500   : > { %v4087_v9 = vmul.f32 %v3959_v51, %v7337_v29  ;;  %v4327_v29 = vsel %vm7885_vm15, %v4070_v23, 0.0  ;;  %v4329_v51 = vsel %vm7804_vm0, %v4071_v4, 0.0  ;;  %vm7906_vm15 = vmmov %vm7804_vm0 }
 0x501   : > { %v4328_v33 = vadd.f32 %v4327_v29, %v4326_v53 }
 0x502   : > { %v4366_v23 = vsel %vm7889_vm10, %v4087_v9, 0.0  ;;  %v4331_v9 = vsel %vm7893_vm11, %v4072_v20, 0.0  ;;  %vm7913_vm10 = vmmov %vm7804_vm0 }
 0x503   : > { %v7341_v13 = vpop.permute.xlu1 %3674  ;;  %v7343_v35 = vpop.permute.xlu0 %3678  ;;  %v4330_v53 = vadd.f32 %v4329_v51, %v4328_v33  ;;  %v4367_v10 = vadd.f32 %v4366_v23, %v4365_v43  ;;  %v3968_v51 = vunpack.c.l.bf16 %v7523_v22  ;;  %v7898_v33 = vunpack.c.l.bf16 %v7427_v11  ;;  %vm7915_vm11 = vmmov %vm7804_vm0 }
 0x504   : > { %v4057_v1 = vmul.f32 %v3929_v32, %v7341_v13  ;;  %v7480_v13 = vld [vmem:[%s5337_s17 + $0x178] sm:$0xff]   ;;  %v4058_v41 = vmul.f32 %v3930_v30, %v7343_v35  ;;  %v7891_v30 = vunpack.c.l.bf16 %v7383_v21 }
 0x505   : > { %v3936_v27 = vunpack.c.l.bf16 %v7480_v13  ;;  %v3937_v35 = vunpack.c.h.bf16 %v7480_v13  ;;  %v4332_v20 = vadd.f32 %v4331_v9, %v4330_v53  ;;  %v7904_v53 = vunpack.c.h.bf16 %v7427_v11 }
 0x506   : > { %v4296_v8 = vsel %vm7887_vm2, %v4057_v1, 0.0  ;;  %v7890_v1 = vunpack.c.h.bf16 %v7388_v47  ;;  %v4088_v61 = vmul.f32 %v7891_v30, %v7339_v59  ;;  %v4298_v29 = vsel %vm7894_vm12, %v4058_v41, 0.0  ;;  %vm7910_vm2 = vmmov %vm7804_vm0 }
 0x507   : > { %v7345_v58 = vpop.permute.xlu1 %3741  ;;  %v7347_v50 = vpop.permute.xlu0 %3745  ;;  %v4297_v57 = vadd.f32 %v4296_v8, %v4295_v15  ;;  %v7899_v41 = vunpack.c.h.bf16 %v7383_v21  ;;  %v7909_v11 = vunpack.c.l.bf16 %v7404_v6  ;;  %vm7916_vm12 = vmmov %vm7804_vm0 }
 0x508   : > { %v4073_v4 = vmul.f32 %v3945_v38, %v7345_v58  ;;  %v7892_v58 = vunpack.c.h.bf16 %v7253_v19  ;;  %v7516_v38 = vld [vmem:[%s5337_s17 + $0x1b8] sm:$0xff]   ;;  %v7896_v19 = vunpack.c.l.bf16 %v7393_v63  ;;  %s264_s17 = scalar_lea.vmem [#allocation2], %s4551_s20  ;;  %s5177_s20 = sshll.u32 %s5243_s25, 4  ;;  %s5178_s20 = int_to_ptr.vmem [resolvable:$false] %s5177_s20 }
 0x509   : > { %v3953_v47 = vunpack.c.h.bf16 %v7516_v38  ;;  %v4299_v55 = vadd.f32 %v4298_v29, %v4297_v57  ;;  %v7905_v29 = vunpack.c.h.bf16 %v7393_v63  ;;  %s4431_s10 = sshll.u32 %s264_s17, 4  ;;  %s5179_s28 = scalar_lea.vmem %s5178_s20, 256  ;;  %s7635_s10 = int_to_ptr.vmem [resolvable:$true] %s4431_s10 }
 0x50a   : > { %v4333_v59 = vsel %vm7895_vm3, %v4073_v4, 0.0  ;;  %vm7918_vm3 = vmmov %vm7804_vm0  ;;  %s5173_s18 = scalar_lea.vmem %s7635_s10, 128  ;;  %p5180_p7 = scmp.lt.s32.totalorder %s7635_s10, %s5178_s20 }
 0x50b   : > { %v7349_v48 = vpop.permute.xlu1 %3808  ;;  %v7351_v42 = vpop.permute.xlu0 %3812  ;;  %v4334_v21 = vadd.f32 %v4333_v59, %v4332_v20  ;;  %p5174_p2 = scmp.ne.s32.totalorder %s7635_s10, %s5173_s18  ;;  %p5181_p8 = scmp.lt.s32.totalorder %s5179_s28, %s5173_s18 }
 0x50c   : > { %v4089_v23 = vmul.f32 %v7899_v41, %v7349_v48 }
 0x50d   : > { %p5175_p3 = pnand %p5174_p2, %p5317_p5  ;;  %p5182_p9 = por %p5181_p8, %p5180_p7 }
 0x50f   : > { %v7353_v52 = vpop.permute.xlu1 %3682  ;;  %v7355_v39 = vpop.permute.xlu0 %3686  ;;  %p5176_p4 = pneg %p5175_p3 }
 0x510   : > { %v4059_v45 = vmul.f32 %v7890_v1, %v7353_v52  ;;  %v3952_v52 = vunpack.c.l.bf16 %v7516_v38  ;;  %v7900_v1 = vunpack.c.l.bf16 %v7409_v7 }
 0x511   : > { %p5183_p10 = pnand %p5182_p9, %p5176_p4 }
 0x512   : > { %v4300_v8 = vsel %vm7897_vm1, %v4059_v45, 0.0  ;;  %v4060_v4 = vmul.f32 %v7900_v1, %v7355_v39  ;;  %v7917_v1 = vunpack.c.h.bf16 %v7421_v25  ;;  %vm7920_vm1 = vmmov %vm7804_vm0 }
 0x513   : > { %v7360_v40 = vpop.permute.xlu1 %3749  ;;  %v7362_v62 = vpop.permute.xlu0 %3623  ;;  %v4301_v48 = vadd.f32 %v4300_v8, %v4299_v55  ;;  %v7912_v8 = vunpack.c.l.bf16 %v7421_v25  ;;  %v7922_v25 = vunpack.c.l.bf16 %v7450_v34 }
 0x514   : > { %v4045_v60 = vmul.f32 %v7892_v58, %v7362_v62  ;;  %v4074_v62 = vmul.f32 %v7896_v19, %v7347_v50  ;;  %v4368_v50 = vsel %vm7901_vm13, %v4088_v61, 0.0  ;;  %v7903_v58 = vunpack.c.h.bf16 %v7409_v7  ;;  %vm7921_vm13 = vmmov %vm7804_vm0 }
 0x515   : > { %v4369_v9 = vadd.f32 %v4368_v50, %v4367_v10  ;;  %v4075_v39 = vmul.f32 %v7905_v29, %v7360_v40  ;;  %v4302_v10 = vsel %vm7910_vm2, %v4060_v4, 0.0  ;;  %vm7927_vm2 = vmmov %vm7804_vm0 }
 0x516   : > { %v4267_v45 = vsel %vm7902_vm14, %v4045_v60, 0.0  ;;  %v4335_v19 = vsel %vm7906_vm15, %v4074_v62, 0.0  ;;  %v7908_v60 = vunpack.c.l.bf16 %v7439_v26  ;;  %v4303_v41 = vadd.f32 %v4302_v10, %v4301_v48  ;;  %vm7924_vm14 = vmmov %vm7804_vm0 }
 0x517   : > { %v7397_v49 = vpop.permute.xlu1 %3816  ;;  %v7399_v5 = vpop.permute.xlu0 %3690  ;;  %v4268_v63 = vadd.f32 %v4267_v45, %v7300_v2  ;;  %v4336_v55 = vadd.f32 %v4335_v19, %v4334_v21  ;;  %vm7925_vm15 = vmmov %vm7804_vm0 }
 0x51b   : > { %v7424_v31 = vpop.permute.xlu1 %3753  ;;  %v7430_v0 = vpop.permute.xlu0 %3627 }
 0x51c   : > { %v4046_v15 = vmul.f32 %v7898_v33, %v7430_v0  ;;  %v4061_v0 = vmul.f32 %v7903_v58, %v7399_v5  ;;  %v4370_v5 = vsel %vm7804_vm0, %v4089_v23, 0.0 }
 0x51d   : > { %v4371_v50 = vadd.f32 %v4370_v5, %v4369_v9  ;;  %v7923_v9 = vunpack.c.l.bf16 %v7435_v16 }
 0x51e   : > { %v4269_v61 = vsel %vm7907_vm8, %v4046_v15, 0.0  ;;  %v4304_v62 = vsel %vm7911_vm9, %v4061_v0, 0.0  ;;  %v4076_v15 = vmul.f32 %v7912_v8, %v7424_v31  ;;  %vm7926_vm8 = vmmov %vm7804_vm0 }
 0x51f   : > { %v7456_v28 = vpop.permute.xlu1 %3820  ;;  %v7458_v14 = vpop.permute.xlu0 %3694  ;;  %v4270_v23 = vadd.f32 %v4269_v61, %v4268_v63  ;;  %v4305_v45 = vadd.f32 %v4304_v62, %v4303_v41  ;;  %vm7929_vm9 = vmmov %vm7804_vm0 }
 0x520   : > { %v4062_v33 = vmul.f32 %v7908_v60, %v7458_v14 }
 0x522   : > { %v4306_v2 = vsel %vm7916_vm12, %v4062_v33, 0.0  ;;  %vm7932_vm12 = vmmov %vm7804_vm0 }
 0x523   : > { %v7483_v32 = vpop.permute.xlu1 %3757  ;;  %v3632_v18 = vpop.permute.xlu0 %3631 }
 0x524   : > { %v4047_v57 = vmul.f32 %v7904_v53, %v3632_v18  ;;  %v4090_v18 = vmul.f32 %v7909_v11, %v7351_v42  ;;  %v4337_v42 = vsel %vm7915_vm11, %v4075_v39, 0.0  ;;  %v4077_v4 = vmul.f32 %v7917_v1, %v7483_v32  ;;  %vm7931_vm11 = vmmov %vm7804_vm0 }
 0x525   : > { %v7928_v11 = vunpack.c.h.bf16 %v7435_v16 }
 0x526   : > { %v4271_v14 = vsel %vm7913_vm10, %v4047_v57, 0.0  ;;  %v4339_v57 = vsel %vm7920_vm1, %v4076_v15, 0.0  ;;  %v4341_v39 = vsel %vm7924_vm14, %v4077_v4, 0.0  ;;  %vm7930_vm10 = vmmov %vm7804_vm0 }
 0x527   : > { %v7506_v3 = vpop.permute.xlu1 %3824  ;;  %v3699_v54 = vpop.permute.xlu0 %3698  ;;  %v4272_v58 = vadd.f32 %v4271_v14, %v4270_v23  ;;  %vm7934_vm1 = vmmov %vm7804_vm0 }
 0x528   : > { %v4093_v10 = vmul.f32 %v7928_v11, %v7506_v3  ;;  %vm7936_vm14 = vmmov %vm7804_vm0 }
 0x52b   : > { %v3762_v43 = vpop.permute.xlu1 %3761  ;;  %v3636_v30 = vpop.permute.xlu0 %3635 }
 0x52c   : > { %v4048_v7 = vmul.f32 %v3920_v37, %v3636_v30  ;;  %v7914_v37 = vunpack.c.h.bf16 %v7439_v26  ;;  %v7919_v26 = vunpack.c.h.bf16 %v7404_v6  ;;  %v4078_v32 = vmul.f32 %v7922_v25, %v3762_v43 }
 0x52d   : > { %v4092_v6 = vmul.f32 %v7923_v9, %v7456_v28  ;;  %v4372_v43 = vsel %vm7804_vm0, %v4090_v18, 0.0 }
 0x52e   : > { %v4063_v20 = vmul.f32 %v7914_v37, %v3699_v54  ;;  %v4273_v30 = vsel %vm7918_vm3, %v4048_v7, 0.0  ;;  %v4091_v54 = vmul.f32 %v7919_v26, %v7397_v49  ;;  %v4307_v49 = vadd.f32 %v4306_v2, %v4305_v45  ;;  %vm7933_vm3 = vmmov %vm7804_vm0 }
 0x52f   : > { %v3829_v40 = vpop.permute.xlu1 %3828  ;;  %v3703_v59 = vpop.permute.xlu0 %3702  ;;  %v4274_v29 = vadd.f32 %v4273_v30, %v4272_v58  ;;  %v4343_v63 = vsel %vm7929_vm9, %v4078_v32, 0.0  ;;  %v4376_v8 = vsel %vm7930_vm10, %v4092_v6, 0.0 }
 0x530   : > { %v4064_v31 = vmul.f32 %v3936_v27, %v3703_v59  ;;  %v4308_v21 = vsel %vm7921_vm13, %v4063_v20, 0.0  ;;  %v4338_v27 = vadd.f32 %v4337_v42, %v4336_v55  ;;  %v4374_v28 = vsel %vm7927_vm2, %v4091_v54, 0.0  ;;  %vm7935_vm13 = vmmov %vm7804_vm0 }
 0x531   : > { %v4094_v15 = vmul.f32 %v3966_v24, %v3829_v40 }
 0x532   : > { %v4310_v19 = vsel %vm7925_vm15, %v4064_v31, 0.0  ;;  %v4340_v36 = vadd.f32 %v4339_v57, %v4338_v27  ;;  %vm7937_vm15 = vmmov %vm7804_vm0 }
 0x533   : > { %v3766_v0 = vpop.permute.xlu1 %3765  ;;  %v3640_v53 = vpop.permute.xlu0 %3639  ;;  %v4380_v30 = vsel %vm7934_vm1, %v4094_v15, 0.0 }
 0x534   : > { %v4049_v48 = vmul.f32 %v3921_v44, %v3640_v53  ;;  %v4079_v61 = vmul.f32 %v3951_v12, %v3766_v0  ;;  %v4309_v44 = vadd.f32 %v4308_v21, %v4307_v49  ;;  %v4373_v12 = vadd.f32 %v4372_v43, %v4371_v50 }
 0x535   : > { %v4342_v59 = vadd.f32 %v4341_v39, %v4340_v36 }
 0x536   : > { %v4275_v60 = vsel %vm7926_vm8, %v4049_v48, 0.0  ;;  %v4311_v62 = vadd.f32 %v4310_v19, %v4309_v44  ;;  %v4345_v14 = vsel %vm7931_vm11, %v4079_v61, 0.0  ;;  %v4375_v16 = vadd.f32 %v4374_v28, %v4373_v12  ;;  %vm7938_vm8 = vmmov %vm7804_vm0 }
 0x537   : > { %v4276_v33 = vadd.f32 %v4275_v60, %v4274_v29  ;;  %v3833_v7 = vpop.permute.xlu1 %3832  ;;  %v3707_v5 = vpop.permute.xlu0 %3706  ;;  %v4344_v3 = vadd.f32 %v4343_v63, %v4342_v59 }
 0x538   : > { %v4065_v34 = vmul.f32 %v3937_v35, %v3707_v5  ;;  %v4378_v35 = vsel %vm7933_vm3, %v4093_v10, 0.0  ;;  %v4095_v42 = vmul.f32 %v3967_v17, %v3833_v7  ;;  %v4377_v40 = vadd.f32 %v4376_v8, %v4375_v16 }
 0x539   : > { %v4277_v18 = vrot.slane %v4276_v33, 4  ;;  %v4346_v2 = vadd.f32 %v4345_v14, %v4344_v3 }
 0x53a   : > { %v4312_v37 = vsel %vm7932_vm12, %v4065_v34, 0.0  ;;  %v4379_v50 = vadd.f32 %v4378_v35, %v4377_v40  ;;  %v4382_v17 = vsel %vm7936_vm14, %v4095_v42, 0.0 }
 0x53b   : > { %v4278_v20 = vadd.f32 %v4277_v18, %v4276_v33  ;;  %v4313_v55 = vadd.f32 %v4312_v37, %v4311_v62  ;;  %v3770_v41 = vpop.permute.xlu1 %3769  ;;  %v3774_v13 = vpop.permute.xlu0 %3773 }
 0x53c   : > { %v4080_v23 = vmul.f32 %v3952_v52, %v3770_v41  ;;  %v4081_v24 = vmul.f32 %v3953_v47, %v3774_v13  ;;  %v3969_v47 = vunpack.c.h.bf16 %v7523_v22  ;;  %v4381_v58 = vadd.f32 %v4380_v30, %v4379_v50 }
 0x53d   : > { %v4279_v1 = vrot.slane %v4278_v20, 2  ;;  %v4314_v4 = vrot.slane %v4313_v55, 4 }
 0x53e   : > { %v4347_v31 = vsel %vm7935_vm13, %v4080_v23, 0.0  ;;  %v4349_v52 = vsel %vm7937_vm15, %v4081_v24, 0.0  ;;  %v4383_v32 = vadd.f32 %v4382_v17, %v4381_v58 }
 0x53f   : > { %v4280_v26 = vadd.f32 %v4279_v1, %v4278_v20  ;;  %v4315_v54 = vadd.f32 %v4314_v4, %v4313_v55  ;;  %v4348_v45 = vadd.f32 %v4347_v31, %v4346_v2  ;;  %v3837_v56 = vpop.permute.xlu1 %3836 }
 0x540   : > { %v4096_v38 = vmul.f32 %v3968_v51, %v3837_v56 }
 0x541   : > { %v4281_v0 = vrot.slane %v4280_v26, 1  ;;  %v4316_v53 = vrot.slane %v4315_v54, 2  ;;  %v4350_v57 = vadd.f32 %v4349_v52, %v4348_v45 }
 0x542   : > { %v4384_v21 = vsel %vm7938_vm8, %v4096_v38, 0.0 }
 0x543   : > { %v4282_v25 = vadd.f32 %v4281_v0, %v4280_v26  ;;  %v4317_v48 = vadd.f32 %v4316_v53, %v4315_v54  ;;  %v4351_v27 = vrot.slane %v4350_v57, 4  ;;  %v3841_v9 = vpop.permute.xlu1 %3840  ;;  %v4385_v39 = vadd.f32 %v4384_v21, %v4383_v32 }
 0x544   : > { %v4097_v6 = vmul.f32 %v3969_v47, %v3841_v9 }
 0x545   : > { %v4318_v49 = vrot.slane %v4317_v48, 1  ;;  %v4352_v29 = vadd.f32 %v4351_v27, %v4350_v57  ;;  %v4405_v51 = vsel %vm3287_vm4, %v4282_v25, %v7259_v46  ;;  %vm7939_vm4 = vmmov %vm7804_vm0 }
 0x546   : > { %v4386_v22 = vsel %vm7804_vm0, %v4097_v6, 0.0 }
 0x547   : > { %v4319_v19 = vadd.f32 %v4318_v49, %v4317_v48  ;;  %v4353_v61 = vrot.slane %v4352_v29, 2  ;;  %v4387_v60 = vadd.f32 %v4386_v22, %v4385_v39 }
 0x549   : > { %v4354_v43 = vadd.f32 %v4353_v61, %v4352_v29  ;;  %v4388_v36 = vrot.slane %v4387_v60, 4  ;;  %v4406_v44 = vsel %vm3289_vm5, %v4319_v19, %v4405_v51 }
 0x54b   : > { %v4355_v33 = vrot.slane %v4354_v43, 1  ;;  %v4389_v7 = vadd.f32 %v4388_v36, %v4387_v60 }
 0x54d   : > { %v4356_v5 = vadd.f32 %v4355_v33, %v4354_v43  ;;  %v4390_v28 = vrot.slane %v4389_v7, 2 }
 0x54f   : > { %v4391_v11 = vadd.f32 %v4390_v28, %v4389_v7  ;;  %v4407_v10 = vsel %vm3291_vm6, %v4356_v5, %v4406_v44 }
 0x551   : > { %v4392_v46 = vrot.slane %v4391_v11, 1 }
 0x553   : > { %v4393_v63 = vadd.f32 %v4392_v46, %v4391_v11 }
 0x555   : > { %v4408_v34 = vsel %vm3293_vm7, %v4393_v63, %v4407_v10 }
 0x556   : > { %4410 = vst.msk [vmem:[%s264_s17] sm:$0xff] %vm7939_vm4, %v4408_v34 }
 0x557   : > { %5186 = shalt.err (!%p5183_p10)
}
 0x558   : > { %s5187_s19 = scalar_lea.hbm %s7633_s13, 128  ;;  %s5191_s9 = scalar_lea.hbm %s7683_s5, 256 }
 0x559   : > { %p5188_p11 = scmp.ne.s32.totalorder %s7633_s13, %s5187_s19  ;;  %p5192_p0 = scmp.lt.u32.totalorder %s7633_s13, %s7683_s5 }
 0x55a   : > { %p5193_p1 = scmp.lt.u32.totalorder %s5191_s9, %s5187_s19  ;;  %p5195_p3 = scmp.lt.u32.totalorder %s5187_s19, %s7633_s13 }
 0x55b   : > { %p5189_p12 = pnand %p5188_p11, %p5317_p5 }
 0x55c   : > { %p5194_p2 = por %p5193_p1, %p5192_p0 }
 0x55d   : > { %p5190_p13 = pneg %p5189_p12 }
 0x55e   : > { %p5196_p4 = por %p5195_p3, %p5194_p2 }
 0x560   : > { %p5197_p7 = pnand %p5196_p4, %p5190_p13 }
 0x562   : > { %5200 = shalt.err (!%p5197_p7)
}
 0x563   : > { %4898 = dma.vmem_to_hbm [thread:$0]  (%p5317_p5), %s7635_s10, 128, %s7633_s13, %s4413_s16  }
 0x564 PF: > { %p4909_p8 = scmp.ge.s32.totalorder %s5239_s24, 2  ;;  %s4456_s17 = sand.u32 1, %s5227_s21  }
 0x565   : > { %s4457_s11 = scalar_lea.sflag [#allocation3], %s4456_s17 }
 0x566   : > { %p4903_p9 = pnand %p4909_p8, %p5321_p6 }
 0x568   : > { %5218 = dma.done.wait (!%p4903_p9), %s4457_s11, 128  }
 0x569   : > { %5220 = vsyncadd (!%p4903_p9), %s4457_s11, 4294967168  ;;  %s4466_s12 = scalar_lea.sflag [#allocation5], %s4456_s17 }
 0x56a   : > { %5222 = dma.done.wait (!%p4903_p9), %s4466_s12, 128  }
 0x56b   : > { %5224 = vsyncadd (!%p4903_p9), %s4466_s12, 4294967168  ;;  %p20_p5 = scmp.ge.s32.totalorder %s5304_s27, 4   ;;  %s7940_s21 = smov %s5231_s22 }
 0x56c   : > { %s7941_s22 = smov %s5235_s23  ;;  %s7942_s23 = smov %s5315_s30 }
 0x56d   : > { %s7943_s24 = smov %s5304_s27  ;;  %22 = sbr.rel (!%p20_p5) target bundleno = 5 (0x5), region = 95 }
 0x574   :  { %4471 = vsyncpa [#allocation3], 1 }
 0x575   :  { %4473 = vsyncpa [#allocation3 + $0x1], 1 }
 0x576   :  { %4474 = vsyncpa [#allocation5], 1 }
 0x577   :  { %4476 = vsyncpa [#allocation5 + $0x1], 1 }

</bundles_post_ra>
